<compile_context>
chip_gen: v5e
topology: v5e:2x2
jax: 0.10.0
libtpu: 0.0.40
codegen_flags: <defaults>
</compile_context>

<pallas_src>
import jax
import jax.numpy as jnp
from jax.experimental import pallas as pl
from jax.experimental.pallas import tpu as pltpu

VMEM_LIMIT = 32 * 1024 * 1024  # generation-safe scoped-VMEM cap (v7x has 64 MiB physical)

# Geometry constants for the 28x28 model.
_H1, _W1 = 28, 28          # conv1 output spatial
_H2, _W2 = 14, 14          # conv2 input/output spatial (after pool1)
_H3, _W3 = 7, 7            # conv3 input/output spatial (after pool2)
_C1, _C2, _C3 = 32, 64, 128
_WP2 = _W2 + 2             # 16: padded row width of conv2's input
_WP3 = _W3 + 2             # 9 : padded row width of conv3's input
_PAD1_ROWS = 264           # >= (H2+2)*WP2 = 256 and >= last tap read end (258), 8-aligned
_PAD2_ROWS = 88            # >= (H3+2)*WP3 = 81  and >= last tap read end (84),  8-aligned


# ---------------------------------------------------------------------------
# Fused conv trunk: conv1+BN+ReLU+pool, conv2+BN+ReLU+pool, conv3+BN+ReLU.
# One image per grid step.  conv1 consumes im2col patches (Cin=3 -> K=32); conv2/3
# read shifted taps from zero-padded f32 VMEM scratch images written by the previous
# stage's pooling epilogue.  Column-pair pooling uses strided (stride=2) scratch reads.
# ---------------------------------------------------------------------------
def _trunk_kernel(x_ref, w1_ref, s1_ref, b1_ref, w2_ref, s2_ref, b2_ref,
                  w3_ref, s3_ref, b3_ref, o_ref,
                  pad1_ref, pad2_ref, tmp1_ref, tmp2_ref):
    # Zero the padded-image scratches (halo must be zero on every grid step).
    pad1_ref[...] = jnp.zeros_like(pad1_ref)
    pad2_ref[...] = jnp.zeros_like(pad2_ref)

    w1 = w1_ref[...]
    s1, b1 = s1_ref[...], b1_ref[...]

    # ---- Block 1: conv1 (single im2col dot per chunk) + BN + ReLU + 2x2 maxpool.
    # One pooled output row per iteration; result written into pad1's interior.
    for r in range(_H2):
        a = x_ref[0, pl.ds(2 * r * _W1, 2 * _W1), :]                 # (56, 32) image rows 2r,2r+1
        y = jnp.dot(a, w1, preferred_element_type=jnp.float32)       # (56, 32)
        y = jnp.maximum(y * s1 + b1, 0.0)
        m = jnp.maximum(y[0:_W1], y[_W1:2 * _W1])                    # (28, 32) row-pair max
        tmp1_ref[...] = m
        p = jnp.maximum(tmp1_ref[pl.ds(0, _W2, stride=2), :],        # (14, 32) column-pair max
                        tmp1_ref[pl.ds(1, _W2, stride=2), :])
        pad1_ref[pl.ds((r + 1) * _WP2 + 1, _W2), :] = p

    # ---- Block 2: conv2 (9 shifted taps over pad1) + BN + ReLU + 2x2 maxpool.
    s2, b2 = s2_ref[...], b2_ref[...]
    for r in range(_H3):
        acc = jnp.zeros((2 * _WP2, _C2), jnp.float32)                # (32, 64): rows 2r,2r+1 x 16 cols
        for dy in range(3):
            for dx in range(3):
                a = pad1_ref[pl.ds((2 * r + dy) * _WP2 + dx, 2 * _WP2), :].astype(jnp.bfloat16)
                wk = w2_ref[pl.ds((dy * 3 + dx) * _C1, _C1), :]      # (32, 64)
                acc = acc + jnp.dot(a, wk, preferred_element_type=jnp.float32)
        y = jnp.maximum(acc * s2 + b2, 0.0)
        m = jnp.maximum(y[0:_WP2], y[_WP2:2 * _WP2])                 # (16, 64) row-pair max
        tmp2_ref[...] = m
        p = jnp.maximum(tmp2_ref[pl.ds(0, _W3, stride=2), :],        # (7, 64): cols 0..13 only
                        tmp2_ref[pl.ds(1, _W3, stride=2), :])
        pad2_ref[pl.ds((r + 1) * _WP3 + 1, _W3), :] = p

    # ---- Block 3: conv3 (9 shifted taps over pad2) + BN + ReLU -> (7,7,128) features.
    s3, b3 = s3_ref[...], b3_ref[...]
    acc = jnp.zeros((64, _C3), jnp.float32)                          # 63 valid flat rows, padded to 64
    for dy in range(3):
        for dx in range(3):
            a = pad2_ref[pl.ds(dy * _WP3 + dx, 64), :].astype(jnp.bfloat16)   # (64, 64)
            wk = w3_ref[pl.ds((dy * 3 + dx) * _C2, _C2), :]                   # (64, 128)
            acc = acc + jnp.dot(a, wk, preferred_element_type=jnp.float32)
    y = jnp.maximum(acc * s3 + b3, 0.0)
    # AdaptiveAvgPool2d((7,7)) is the identity on a 7x7 map; drop the 2 garbage cols/row.
    for h in range(_H3):
        o_ref[0, pl.ds(h * _W3, _W3), :] = y[h * _WP3:h * _WP3 + _W3]


def conv_trunk(patches, params):
    """patches: (B, 784, 32) bf16 im2col of the 28x28x3 input -> (B, 49, 128) f32 features."""
    B = patches.shape[0]
    return pl.pallas_call(
        _trunk_kernel,
        out_shape=jax.ShapeDtypeStruct((B, _H3 * _W3, _C3), jnp.float32),
        grid_spec=pltpu.PrefetchScalarGridSpec(
            num_scalar_prefetch=0,
            grid=(B,),
            in_specs=[
                pl.BlockSpec((1, _H1 * _W1, 32), lambda b: (b, 0, 0)),   # im2col patches
                pl.BlockSpec((32, _C1), lambda b: (0, 0)),               # conv1 weight (K=32)
                pl.BlockSpec((1, _C1), lambda b: (0, 0)),                # BN1 scale
                pl.BlockSpec((1, _C1), lambda b: (0, 0)),                # BN1 bias
                pl.BlockSpec((9 * _C1, _C2), lambda b: (0, 0)),          # conv2 weight (tap-major)
                pl.BlockSpec((1, _C2), lambda b: (0, 0)),
                pl.BlockSpec((1, _C2), lambda b: (0, 0)),
                pl.BlockSpec((9 * _C2, _C3), lambda b: (0, 0)),          # conv3 weight (tap-major)
                pl.BlockSpec((1, _C3), lambda b: (0, 0)),
                pl.BlockSpec((1, _C3), lambda b: (0, 0)),
            ],
            out_specs=pl.BlockSpec((1, _H3 * _W3, _C3), lambda b: (b, 0, 0)),
            scratch_shapes=[
                pltpu.VMEM((_PAD1_ROWS, _C1), jnp.float32),   # zero-padded pool1 output (16x16 rows)
                pltpu.VMEM((_PAD2_ROWS, _C2), jnp.float32),   # zero-padded pool2 output (9x9 rows)
                pltpu.VMEM((_W1, _C1), jnp.float32),          # (28,32) row-pair-max staging
                pltpu.VMEM((_WP2, _C2), jnp.float32),         # (16,64) row-pair-max staging
            ],
        ),
        compiler_params=pltpu.CompilerParams(
            dimension_semantics=("parallel",),
            vmem_limit_bytes=VMEM_LIMIT,
        ),
    )(patches, params["w1"], params["s1"], params["b1"],
      params["w2"], params["s2"], params["b2"],
      params["w3"], params["s3"], params["b3"])


# ---------------------------------------------------------------------------
# Fused classifier: logits = (relu(x @ W1 + b1)) @ W2 + b2.
# Grid = (M/tm, K/tk) with K last ("arbitrary"); the (tm,512) f32 hidden activation is a
# resident VMEM scratch accumulator and fc2 is applied in the final K step.
# ---------------------------------------------------------------------------
def _fc_kernel(x_ref, w1_ref, b1_ref, w2_ref, b2_ref, o_ref, h_ref):
    k = pl.program_id(1)

    @pl.when(k == 0)
    def _():
        h_ref[...] = jnp.zeros_like(h_ref)

    h_ref[...] += jnp.dot(x_ref[...].astype(jnp.bfloat16), w1_ref[...],
                          preferred_element_type=jnp.float32)

    @pl.when(k == pl.num_programs(1) - 1)
    def _():
        h = jnp.maximum(h_ref[...] + b1_ref[...], 0.0)
        # TODO(synk): Dropout(0.5) only affects training; eval-mode forward is identity.
        logits = jnp.dot(h.astype(w2_ref.dtype), w2_ref[...],
                         preferred_element_type=jnp.float32) + b2_ref[...]
        o_ref[...] = logits


def fc_head(feat, w1t, b1, w2t, b2, *, tk=896):
    M, K = feat.shape
    N1 = w1t.shape[1]                       # 512
    N2 = w2t.shape[1]                       # 128 (7 logits padded lane-dense)
    tm = M if M <= 256 else 256             # cap resident block for v7x's 64 MiB VMEM
    assert M % tm == 0 and K % tk == 0, (M, tm, K, tk)
    return pl.pallas_call(
        _fc_kernel,
        out_shape=jax.ShapeDtypeStruct((M, N2), jnp.float32),
        grid_spec=pltpu.PrefetchScalarGridSpec(
            num_scalar_prefetch=0,
            grid=(M // tm, K // tk),
            in_specs=[
                pl.BlockSpec((tm, tk), lambda i, k: (i, k)),
                pl.BlockSpec((tk, N1), lambda i, k: (k, 0)),
                pl.BlockSpec((1, N1), lambda i, k: (0, 0)),
                pl.BlockSpec((N1, N2), lambda i, k: (0, 0)),
                pl.BlockSpec((1, N2), lambda i, k: (0, 0)),
            ],
            out_specs=pl.BlockSpec((tm, N2), lambda i, k: (i, 0)),
            scratch_shapes=[pltpu.VMEM((tm, N1), jnp.float32)],
        ),
        compiler_params=pltpu.CompilerParams(
            dimension_semantics=("parallel", "arbitrary"),
            vmem_limit_bytes=VMEM_LIMIT,
        ),
    )(feat, w1t, b1, w2t, b2)


# ---------------------------------------------------------------------------
# XLA-side glue (tiny): im2col for conv1 (Cin=3), folded BN, parameter packing.
# ---------------------------------------------------------------------------
def im2col_3x3(x):
    """x: [B,H,W,C] -> patches [B, H*W, 9*C] ordered (kh, kw, cin)."""
    B, H, W, C = x.shape
    xp = jnp.pad(x, ((0, 0), (1, 1), (1, 1), (0, 0)))
    cols = [xp[:, dy:dy + H, dx:dx + W, :] for dy in range(3) for dx in range(3)]
    return jnp.stack(cols, axis=3).reshape(B, H * W, 9 * C)


def bn_affine(gamma, beta, mean, var, eps=1e-5):
    scale = gamma / jnp.sqrt(var + eps)
    return scale, beta - mean * scale


def init_params(key):
    ks = jax.random.split(key, 5)

    def kaiming_out(k, shape):            # kaiming_normal_(mode='fan_out', relu)
        fan_out = shape[0] * shape[2] * shape[3]
        return jax.random.normal(k, shape, jnp.float32) * jnp.sqrt(2.0 / fan_out)

    def linear(k, out_f, in_f):           # PyTorch default Linear init
        k1, k2 = jax.random.split(k)
        bound = 1.0 / (in_f ** 0.5)
        w = jax.random.uniform(k1, (out_f, in_f), jnp.float32, -bound, bound)
        b = jax.random.uniform(k2, (out_f,), jnp.float32, -bound, bound)
        return w, b

    def bn_sb(c):                         # eval-mode BN with default (untrained) stats
        return bn_affine(jnp.ones((c,), jnp.float32), jnp.zeros((c,), jnp.float32),
                         jnp.zeros((c,), jnp.float32), jnp.ones((c,), jnp.float32))

    w1 = kaiming_out(ks[0], (32, 3, 3, 3))
    w2 = kaiming_out(ks[1], (64, 32, 3, 3))
    w3 = kaiming_out(ks[2], (128, 64, 3, 3))
    fc1w, fc1b = linear(ks[3], 512, 128 * 7 * 7)
    fc2w, fc2b = linear(ks[4], 7, 512)

    def conv_mat(w):                      # (cout,cin,3,3) -> [(kh,kw,cin), cout] bf16
        return (jnp.transpose(w, (2, 3, 1, 0))
                .reshape(9 * w.shape[1], w.shape[0]).astype(jnp.bfloat16))

    w1m = jnp.pad(conv_mat(w1), ((0, 5), (0, 0)))                    # im2col K 27 -> 32
    s1, b1 = bn_sb(_C1)
    w2m = conv_mat(w2)                                               # (288, 64)
    s2, b2 = bn_sb(_C2)
    w3m = conv_mat(w3)                                               # (576, 128)
    s3, b3 = bn_sb(_C3)

    # fc1: permute the input dim once from (C,H,W)- to (H,W,C)-flatten order, transpose, bf16.
    fc1w_hwc = fc1w.reshape(512, 128, 7, 7).transpose(0, 2, 3, 1).reshape(512, 128 * 7 * 7)
    fc1w_t = jnp.transpose(fc1w_hwc).astype(jnp.bfloat16)            # (6272, 512)

    # fc2: pad the 7 logits to a lane-dense 128-wide output (sliced back after the kernel).
    fc2w_t = jnp.pad(jnp.transpose(fc2w), ((0, 0), (0, 121))).astype(jnp.bfloat16)  # (512, 128)
    fc2b_p = jnp.pad(fc2b, (0, 121))

    return dict(
        w1=w1m, s1=s1.reshape(1, _C1), b1=b1.reshape(1, _C1),
        w2=w2m, s2=s2.reshape(1, _C2), b2=b2.reshape(1, _C2),
        w3=w3m, s3=s3.reshape(1, _C3), b3=b3.reshape(1, _C3),
        fc1w_t=fc1w_t, fc1b=fc1b.reshape(1, 512),
        fc2w_t=fc2w_t, fc2b=fc2b_p.reshape(1, 128),
    )


# ---------------------------------------------------------------------------
# Forward pass (matches ImprovedHMNIST_28x28.forward in eval mode).
# ---------------------------------------------------------------------------
def _forward(x_nchw, params):
    B = x_nchw.shape[0]
    x = jnp.transpose(x_nchw, (0, 2, 3, 1)).astype(jnp.bfloat16)     # NCHW -> NHWC, bf16
    patches = im2col_3x3(x)                                          # (B, 784, 27)
    patches = jnp.pad(patches, ((0, 0), (0, 0), (0, 5)))             # K 27 -> 32
    feat = conv_trunk(patches, params)                               # (B, 49, 128) f32
    feat = feat.reshape(B, _H3 * _W3 * _C3)                          # metadata-only reshape
    logits = fc_head(feat, params["fc1w_t"], params["fc1b"],
                     params["fc2w_t"], params["fc2b"])               # (B, 128) f32, lane-dense
    return logits[:, :7]


forward = jax.jit(_forward)


if __name__ == "__main__":
    key = jax.random.PRNGKey(0)
    pkey, xkey = jax.random.split(key)
    params = init_params(pkey)
    x = jax.random.normal(xkey, (2, 3, 28, 28), jnp.float32)         # NCHW, like PyTorch

    out = jax.block_until_ready(forward(x, params))
    assert out.shape == (2, 7) and out.dtype == jnp.float32
    assert bool(jnp.all(jnp.isfinite(out)))
    print("KERNEL_OK")
</pallas_src>

<mosaic_0001>
module attributes {stable_mosaic.version = 11 : i64} {
  func.func @_fc_kernel(%arg0: i32, %arg1: i32, %arg2: memref<2x896xf32, #tpu.memory_space<vmem>>, %arg3: memref<896x512xbf16, #tpu.memory_space<vmem>>, %arg4: memref<1x512xf32, #tpu.memory_space<vmem>>, %arg5: memref<512x128xbf16, #tpu.memory_space<vmem>>, %arg6: memref<1x128xf32, #tpu.memory_space<vmem>>, %arg7: memref<2x128xf32, #tpu.memory_space<vmem>>, %arg8: memref<2x512xf32, #tpu.memory_space<vmem>>) attributes {dimension_semantics = [#tpu.dimension_semantics<parallel>, #tpu.dimension_semantics<arbitrary>], iteration_bounds = array<i64: 1, 7>, scalar_prefetch = 0 : i64, scratch_operands = 1 : i64, tpu.core_type = #tpu.core_type<tc>, window_params = [{transform_indices = @transform_0, window_bounds = array<i64: 2, 896>}, {transform_indices = @transform_1, window_bounds = array<i64: 896, 512>}, {pipeline_mode = #tpu.pipeline_mode<synchronous>, transform_indices = @transform_2, window_bounds = array<i64: 1, 512>}, {pipeline_mode = #tpu.pipeline_mode<synchronous>, transform_indices = @transform_3, window_bounds = array<i64: 512, 128>}, {pipeline_mode = #tpu.pipeline_mode<synchronous>, transform_indices = @transform_4, window_bounds = array<i64: 1, 128>}, {transform_indices = @transform_5, window_bounds = array<i64: 2, 128>}]} {
    %c0_i32 = arith.constant 0 : i32
    %0 = arith.cmpi eq, %arg1, %c0_i32 : i32
    %1 = arith.extui %0 : i1 to i32
    %c0_i32_0 = arith.constant 0 : i32
    %2 = arith.cmpi ne, %1, %c0_i32_0 : i32
    scf.if %2 {
      %cst_9 = arith.constant 0.000000e+00 : f32
      %13 = vector.broadcast %cst_9 : f32 to vector<2x512xf32>
      %c0_10 = arith.constant 0 : index
      %c0_11 = arith.constant 0 : index
      %14 = vector.load %arg8[%c0_10, %c0_11] : memref<2x512xf32, #tpu.memory_space<vmem>>, vector<2x512xf32>
      tpu.vector_store %arg8[%c0_10, %c0_11], %13 {strides = array<i32>} : memref<2x512xf32, #tpu.memory_space<vmem>>, vector<2x512xf32>,
    } else {
    }
    %c0 = arith.constant 0 : index
    %c0_1 = arith.constant 0 : index
    %3 = vector.load %arg8[%c0, %c0_1] : memref<2x512xf32, #tpu.memory_space<vmem>>, vector<2x512xf32>
    %c0_2 = arith.constant 0 : index
    %c0_3 = arith.constant 0 : index
    %4 = vector.load %arg2[%c0_2, %c0_3] : memref<2x896xf32, #tpu.memory_space<vmem>>, vector<2x896xf32>
    %5 = arith.truncf %4 : vector<2x896xf32> to vector<2x896xbf16>
    %c0_4 = arith.constant 0 : index
    %c0_5 = arith.constant 0 : index
    %6 = vector.load %arg3[%c0_4, %c0_5] : memref<896x512xbf16, #tpu.memory_space<vmem>>, vector<896x512xbf16>
    %cst = arith.constant dense<0.000000e+00> : vector<2x512xf32>
    %7 = tpu.matmul %5, %6, %cst {dimension_numbers = #tpu.dot_dimension_numbers<[1], [0], [0], [1], [0, 0, 1, 1], [], []>} : vector<2x896xbf16>, vector<896x512xbf16>, vector<2x512xf32> -> vector<2x512xf32>
    %8 = arith.addf %3, %7 : vector<2x512xf32>
    %c0_6 = arith.constant 0 : index
    %c0_7 = arith.constant 0 : index
    %9 = vector.load %arg8[%c0_6, %c0_7] : memref<2x512xf32, #tpu.memory_space<vmem>>, vector<2x512xf32>
    tpu.vector_store %arg8[%c0_6, %c0_7], %8 {strides = array<i32>} : memref<2x512xf32, #tpu.memory_space<vmem>>, vector<2x512xf32>,
    %c6_i32 = arith.constant 6 : i32
    %10 = arith.cmpi eq, %arg1, %c6_i32 : i32
    %11 = arith.extui %10 : i1 to i32
    %c0_i32_8 = arith.constant 0 : i32
    %12 = arith.cmpi ne, %11, %c0_i32_8 : i32
    scf.if %12 {
      %c0_9 = arith.constant 0 : index
      %c0_10 = arith.constant 0 : index
      %13 = vector.load %arg8[%c0_9, %c0_10] : memref<2x512xf32, #tpu.memory_space<vmem>>, vector<2x512xf32>
      %c0_11 = arith.constant 0 : index
      %c0_12 = arith.constant 0 : index
      %14 = vector.load %arg4[%c0_11, %c0_12] : memref<1x512xf32, #tpu.memory_space<vmem>>, vector<1x512xf32>
      %15 = vector.broadcast %14 : vector<1x512xf32> to vector<2x512xf32>
      %16 = arith.addf %13, %15 : vector<2x512xf32>
      %cst_13 = arith.constant 0.000000e+00 : f32
      %17 = vector.broadcast %cst_13 : f32 to vector<2x512xf32>
      %18 = arith.maximumf %16, %17 : vector<2x512xf32>
      %19 = arith.truncf %18 : vector<2x512xf32> to vector<2x512xbf16>
      %c0_14 = arith.constant 0 : index
      %c0_15 = arith.constant 0 : index
      %20 = vector.load %arg5[%c0_14, %c0_15] : memref<512x128xbf16, #tpu.memory_space<vmem>>, vector<512x128xbf16>
      %cst_16 = arith.constant dense<0.000000e+00> : vector<2x128xf32>
      %21 = tpu.matmul %19, %20, %cst_16 {dimension_numbers = #tpu.dot_dimension_numbers<[1], [0], [0], [1], [0, 0, 1, 1], [], []>} : vector<2x512xbf16>, vector<512x128xbf16>, vector<2x128xf32> -> vector<2x128xf32>
      %c0_17 = arith.constant 0 : index
      %c0_18 = arith.constant 0 : index
      %22 = vector.load %arg6[%c0_17, %c0_18] : memref<1x128xf32, #tpu.memory_space<vmem>>, vector<1x128xf32>
      %23 = vector.broadcast %22 : vector<1x128xf32> to vector<2x128xf32>
      %24 = arith.addf %21, %23 : vector<2x128xf32>
      %c0_19 = arith.constant 0 : index
      %c0_20 = arith.constant 0 : index
      %25 = vector.load %arg7[%c0_19, %c0_20] : memref<2x128xf32, #tpu.memory_space<vmem>>, vector<2x128xf32>
      tpu.vector_store %arg7[%c0_19, %c0_20], %24 {strides = array<i32>} : memref<2x128xf32, #tpu.memory_space<vmem>>, vector<2x128xf32>,
    } else {
    }
    return
  }
  func.func @transform_0(%arg0: i32, %arg1: i32) -> (i32, i32) {
    %c0_i32 = arith.constant 0 : i32
    return %arg0, %arg1 : i32, i32
  }
  func.func @transform_1(%arg0: i32, %arg1: i32) -> (i32, i32) {
    %c0_i32 = arith.constant 0 : i32
    %c0_i32_0 = arith.constant 0 : i32
    return %arg1, %c0_i32 : i32, i32
  }
  func.func @transform_2(%arg0: i32, %arg1: i32) -> (i32, i32) {
    %c0_i32 = arith.constant 0 : i32
    %c0_i32_0 = arith.constant 0 : i32
    %c0_i32_1 = arith.constant 0 : i32
    return %c0_i32, %c0_i32_0 : i32, i32
  }
  func.func @transform_3(%arg0: i32, %arg1: i32) -> (i32, i32) {
    %c0_i32 = arith.constant 0 : i32
    %c0_i32_0 = arith.constant 0 : i32
    %c0_i32_1 = arith.constant 0 : i32
    return %c0_i32, %c0_i32_0 : i32, i32
  }
  func.func @transform_4(%arg0: i32, %arg1: i32) -> (i32, i32) {
    %c0_i32 = arith.constant 0 : i32
    %c0_i32_0 = arith.constant 0 : i32
    %c0_i32_1 = arith.constant 0 : i32
    return %c0_i32, %c0_i32_0 : i32, i32
  }
  func.func @transform_5(%arg0: i32, %arg1: i32) -> (i32, i32) {
    %c0_i32 = arith.constant 0 : i32
    %c0_i32_0 = arith.constant 0 : i32
    return %arg0, %c0_i32 : i32, i32
  }
}

module attributes {stable_mosaic.version = 11 : i64} {
  func.func @_trunk_kernel(%arg0: i32, %arg1: memref<1x784x32xbf16, #tpu.memory_space<vmem>>, %arg2: memref<32x32xbf16, #tpu.memory_space<vmem>>, %arg3: memref<1x32xf32, #tpu.memory_space<vmem>>, %arg4: memref<1x32xf32, #tpu.memory_space<vmem>>, %arg5: memref<288x64xbf16, #tpu.memory_space<vmem>>, %arg6: memref<1x64xf32, #tpu.memory_space<vmem>>, %arg7: memref<1x64xf32, #tpu.memory_space<vmem>>, %arg8: memref<576x128xbf16, #tpu.memory_space<vmem>>, %arg9: memref<1x128xf32, #tpu.memory_space<vmem>>, %arg10: memref<1x128xf32, #tpu.memory_space<vmem>>, %arg11: memref<1x49x128xf32, #tpu.memory_space<vmem>>, %arg12: memref<264x32xf32, #tpu.memory_space<vmem>>, %arg13: memref<88x64xf32, #tpu.memory_space<vmem>>, %arg14: memref<28x32xf32, #tpu.memory_space<vmem>>, %arg15: memref<16x64xf32, #tpu.memory_space<vmem>>) attributes {dimension_semantics = [#tpu.dimension_semantics<parallel>], iteration_bounds = array<i64: 2>, scalar_prefetch = 0 : i64, scratch_operands = 4 : i64, tpu.core_type = #tpu.core_type<tc>, window_params = [{transform_indices = @transform_0, window_bounds = array<i64: 1, 784, 32>}, {pipeline_mode = #tpu.pipeline_mode<synchronous>, transform_indices = @transform_1, window_bounds = array<i64: 32, 32>}, {pipeline_mode = #tpu.pipeline_mode<synchronous>, transform_indices = @transform_2, window_bounds = array<i64: 1, 32>}, {pipeline_mode = #tpu.pipeline_mode<synchronous>, transform_indices = @transform_3, window_bounds = array<i64: 1, 32>}, {pipeline_mode = #tpu.pipeline_mode<synchronous>, transform_indices = @transform_4, window_bounds = array<i64: 288, 64>}, {pipeline_mode = #tpu.pipeline_mode<synchronous>, transform_indices = @transform_5, window_bounds = array<i64: 1, 64>}, {pipeline_mode = #tpu.pipeline_mode<synchronous>, transform_indices = @transform_6, window_bounds = array<i64: 1, 64>}, {pipeline_mode = #tpu.pipeline_mode<synchronous>, transform_indices = @transform_7, window_bounds = array<i64: 576, 128>}, {pipeline_mode = #tpu.pipeline_mode<synchronous>, transform_indices = @transform_8, window_bounds = array<i64: 1, 128>}, {pipeline_mode = #tpu.pipeline_mode<synchronous>, transform_indices = @transform_9, window_bounds = array<i64: 1, 128>}, {transform_indices = @transform_10, window_bounds = array<i64: 1, 49, 128>}]} {
    %cst = arith.constant 0.000000e+00 : f32
    %0 = vector.broadcast %cst : f32 to vector<264x32xf32>
    %c0 = arith.constant 0 : index
    %c0_0 = arith.constant 0 : index
    %1 = vector.load %arg12[%c0, %c0_0] : memref<264x32xf32, #tpu.memory_space<vmem>>, vector<264x32xf32>
    tpu.vector_store %arg12[%c0, %c0_0], %0 {strides = array<i32>} : memref<264x32xf32, #tpu.memory_space<vmem>>, vector<264x32xf32>,
    %cst_1 = arith.constant 0.000000e+00 : f32
    %2 = vector.broadcast %cst_1 : f32 to vector<88x64xf32>
    %c0_2 = arith.constant 0 : index
    %c0_3 = arith.constant 0 : index
    %3 = vector.load %arg13[%c0_2, %c0_3] : memref<88x64xf32, #tpu.memory_space<vmem>>, vector<88x64xf32>
    tpu.vector_store %arg13[%c0_2, %c0_3], %2 {strides = array<i32>} : memref<88x64xf32, #tpu.memory_space<vmem>>, vector<88x64xf32>,
    %c0_4 = arith.constant 0 : index
    %c0_5 = arith.constant 0 : index
    %4 = vector.load %arg2[%c0_4, %c0_5] : memref<32x32xbf16, #tpu.memory_space<vmem>>, vector<32x32xbf16>
    %c0_6 = arith.constant 0 : index
    %c0_7 = arith.constant 0 : index
    %5 = vector.load %arg3[%c0_6, %c0_7] : memref<1x32xf32, #tpu.memory_space<vmem>>, vector<1x32xf32>
    %c0_8 = arith.constant 0 : index
    %c0_9 = arith.constant 0 : index
    %6 = vector.load %arg4[%c0_8, %c0_9] : memref<1x32xf32, #tpu.memory_space<vmem>>, vector<1x32xf32>
    %c0_10 = arith.constant 0 : index
    %c0_11 = arith.constant 0 : index
    %c0_12 = arith.constant 0 : index
    %7 = vector.load %arg1[%c0_10, %c0_11, %c0_12] : memref<1x784x32xbf16, #tpu.memory_space<vmem>>, vector<1x56x32xbf16>
    %8 = vector.shape_cast %7 : vector<1x56x32xbf16> to vector<56x32xbf16>
    %cst_13 = arith.constant dense<0.000000e+00> : vector<56x32xf32>
    %9 = tpu.matmul %8, %4, %cst_13 {dimension_numbers = #tpu.dot_dimension_numbers<[1], [0], [0], [1], [0, 0, 1, 1], [], []>} : vector<56x32xbf16>, vector<32x32xbf16>, vector<56x32xf32> -> vector<56x32xf32>
    %10 = vector.broadcast %5 : vector<1x32xf32> to vector<56x32xf32>
    %11 = arith.mulf %9, %10 : vector<56x32xf32>
    %12 = vector.broadcast %6 : vector<1x32xf32> to vector<56x32xf32>
    %13 = arith.addf %11, %12 : vector<56x32xf32>
    %cst_14 = arith.constant 0.000000e+00 : f32
    %14 = vector.broadcast %cst_14 : f32 to vector<56x32xf32>
    %15 = arith.maximumf %13, %14 : vector<56x32xf32>
    %16 = vector.extract_strided_slice %15 {offsets = [0, 0], sizes = [28, 32], strides = [1, 1]} : vector<56x32xf32> to vector<28x32xf32>
    %17 = vector.extract_strided_slice %15 {offsets = [28, 0], sizes = [28, 32], strides = [1, 1]} : vector<56x32xf32> to vector<28x32xf32>
    %18 = arith.maximumf %16, %17 : vector<28x32xf32>
    %c0_15 = arith.constant 0 : index
    %c0_16 = arith.constant 0 : index
    %19 = vector.load %arg14[%c0_15, %c0_16] : memref<28x32xf32, #tpu.memory_space<vmem>>, vector<28x32xf32>
    tpu.vector_store %arg14[%c0_15, %c0_16], %18 {strides = array<i32>} : memref<28x32xf32, #tpu.memory_space<vmem>>, vector<28x32xf32>,
    %c0_17 = arith.constant 0 : index
    %c0_18 = arith.constant 0 : index
    %20 = tpu.strided_load %arg14[%c0_17, %c0_18] {strides = array<i32: 2, 1>} : memref<28x32xf32, #tpu.memory_space<vmem>>, vector<14x32xf32>
    %c1 = arith.constant 1 : index
    %c0_19 = arith.constant 0 : index
    %21 = tpu.strided_load %arg14[%c1, %c0_19] {strides = array<i32: 2, 1>} : memref<28x32xf32, #tpu.memory_space<vmem>>, vector<14x32xf32>
    %22 = arith.maximumf %20, %21 : vector<14x32xf32>
    %c17 = arith.constant 17 : index
    %c0_20 = arith.constant 0 : index
    %23 = vector.load %arg12[%c17, %c0_20] : memref<264x32xf32, #tpu.memory_space<vmem>>, vector<14x32xf32>
    tpu.vector_store %arg12[%c17, %c0_20], %22 {strides = array<i32>} : memref<264x32xf32, #tpu.memory_space<vmem>>, vector<14x32xf32>,
    %c0_21 = arith.constant 0 : index
    %c56 = arith.constant 56 : index
    %c0_22 = arith.constant 0 : index
    %24 = vector.load %arg1[%c0_21, %c56, %c0_22] : memref<1x784x32xbf16, #tpu.memory_space<vmem>>, vector<1x56x32xbf16>
    %25 = vector.shape_cast %24 : vector<1x56x32xbf16> to vector<56x32xbf16>
    %cst_23 = arith.constant dense<0.000000e+00> : vector<56x32xf32>
    %26 = tpu.matmul %25, %4, %cst_23 {dimension_numbers = #tpu.dot_dimension_numbers<[1], [0], [0], [1], [0, 0, 1, 1], [], []>} : vector<56x32xbf16>, vector<32x32xbf16>, vector<56x32xf32> -> vector<56x32xf32>
    %27 = vector.broadcast %5 : vector<1x32xf32> to vector<56x32xf32>
    %28 = arith.mulf %26, %27 : vector<56x32xf32>
    %29 = vector.broadcast %6 : vector<1x32xf32> to vector<56x32xf32>
    %30 = arith.addf %28, %29 : vector<56x32xf32>
    %cst_24 = arith.constant 0.000000e+00 : f32
    %31 = vector.broadcast %cst_24 : f32 to vector<56x32xf32>
    %32 = arith.maximumf %30, %31 : vector<56x32xf32>
    %33 = vector.extract_strided_slice %32 {offsets = [0, 0], sizes = [28, 32], strides = [1, 1]} : vector<56x32xf32> to vector<28x32xf32>
    %34 = vector.extract_strided_slice %32 {offsets = [28, 0], sizes = [28, 32], strides = [1, 1]} : vector<56x32xf32> to vector<28x32xf32>
    %35 = arith.maximumf %33, %34 : vector<28x32xf32>
    %c0_25 = arith.constant 0 : index
    %c0_26 = arith.constant 0 : index
    %36 = vector.load %arg14[%c0_25, %c0_26] : memref<28x32xf32, #tpu.memory_space<vmem>>, vector<28x32xf32>
    tpu.vector_store %arg14[%c0_25, %c0_26], %35 {strides = array<i32>} : memref<28x32xf32, #tpu.memory_space<vmem>>, vector<28x32xf32>,
    %c0_27 = arith.constant 0 : index
    %c0_28 = arith.constant 0 : index
    %37 = tpu.strided_load %arg14[%c0_27, %c0_28] {strides = array<i32: 2, 1>} : memref<28x32xf32, #tpu.memory_space<vmem>>, vector<14x32xf32>
    %c1_29 = arith.constant 1 : index
    %c0_30 = arith.constant 0 : index
    %38 = tpu.strided_load %arg14[%c1_29, %c0_30] {strides = array<i32: 2, 1>} : memref<28x32xf32, #tpu.memory_space<vmem>>, vector<14x32xf32>
    %39 = arith.maximumf %37, %38 : vector<14x32xf32>
    %c33 = arith.constant 33 : index
    %c0_31 = arith.constant 0 : index
    %40 = vector.load %arg12[%c33, %c0_31] : memref<264x32xf32, #tpu.memory_space<vmem>>, vector<14x32xf32>
    tpu.vector_store %arg12[%c33, %c0_31], %39 {strides = array<i32>} : memref<264x32xf32, #tpu.memory_space<vmem>>, vector<14x32xf32>,
    %c0_32 = arith.constant 0 : index
    %c112 = arith.constant 112 : index
    %c0_33 = arith.constant 0 : index
    %41 = vector.load %arg1[%c0_32, %c112, %c0_33] : memref<1x784x32xbf16, #tpu.memory_space<vmem>>, vector<1x56x32xbf16>
    %42 = vector.shape_cast %41 : vector<1x56x32xbf16> to vector<56x32xbf16>
    %cst_34 = arith.constant dense<0.000000e+00> : vector<56x32xf32>
    %43 = tpu.matmul %42, %4, %cst_34 {dimension_numbers = #tpu.dot_dimension_numbers<[1], [0], [0], [1], [0, 0, 1, 1], [], []>} : vector<56x32xbf16>, vector<32x32xbf16>, vector<56x32xf32> -> vector<56x32xf32>
    %44 = vector.broadcast %5 : vector<1x32xf32> to vector<56x32xf32>
    %45 = arith.mulf %43, %44 : vector<56x32xf32>
    %46 = vector.broadcast %6 : vector<1x32xf32> to vector<56x32xf32>
    %47 = arith.addf %45, %46 : vector<56x32xf32>
    %cst_35 = arith.constant 0.000000e+00 : f32
    %48 = vector.broadcast %cst_35 : f32 to vector<56x32xf32>
    %49 = arith.maximumf %47, %48 : vector<56x32xf32>
    %50 = vector.extract_strided_slice %49 {offsets = [0, 0], sizes = [28, 32], strides = [1, 1]} : vector<56x32xf32> to vector<28x32xf32>
    %51 = vector.extract_strided_slice %49 {offsets = [28, 0], sizes = [28, 32], strides = [1, 1]} : vector<56x32xf32> to vector<28x32xf32>
    %52 = arith.maximumf %50, %51 : vector<28x32xf32>
    %c0_36 = arith.constant 0 : index
    %c0_37 = arith.constant 0 : index
    %53 = vector.load %arg14[%c0_36, %c0_37] : memref<28x32xf32, #tpu.memory_space<vmem>>, vector<28x32xf32>
    tpu.vector_store %arg14[%c0_36, %c0_37], %52 {strides = array<i32>} : memref<28x32xf32, #tpu.memory_space<vmem>>, vector<28x32xf32>,
    %c0_38 = arith.constant 0 : index
    %c0_39 = arith.constant 0 : index
    %54 = tpu.strided_load %arg14[%c0_38, %c0_39] {strides = array<i32: 2, 1>} : memref<28x32xf32, #tpu.memory_space<vmem>>, vector<14x32xf32>
    %c1_40 = arith.constant 1 : index
    %c0_41 = arith.constant 0 : index
    %55 = tpu.strided_load %arg14[%c1_40, %c0_41] {strides = array<i32: 2, 1>} : memref<28x32xf32, #tpu.memory_space<vmem>>, vector<14x32xf32>
    %56 = arith.maximumf %54, %55 : vector<14x32xf32>
    %c49 = arith.constant 49 : index
    %c0_42 = arith.constant 0 : index
    %57 = vector.load %arg12[%c49, %c0_42] : memref<264x32xf32, #tpu.memory_space<vmem>>, vector<14x32xf32>
    tpu.vector_store %arg12[%c49, %c0_42], %56 {strides = array<i32>} : memref<264x32xf32, #tpu.memory_space<vmem>>, vector<14x32xf32>,
    %c0_43 = arith.constant 0 : index
    %c168 = arith.constant 168 : index
    %c0_44 = arith.constant 0 : index
    %58 = vector.load %arg1[%c0_43, %c168, %c0_44] : memref<1x784x32xbf16, #tpu.memory_space<vmem>>, vector<1x56x32xbf16>
    %59 = vector.shape_cast %58 : vector<1x56x32xbf16> to vector<56x32xbf16>
    %cst_45 = arith.constant dense<0.000000e+00> : vector<56x32xf32>
    %60 = tpu.matmul %59, %4, %cst_45 {dimension_numbers = #tpu.dot_dimension_numbers<[1], [0], [0], [1], [0, 0, 1, 1], [], []>} : vector<56x32xbf16>, vector<32x32xbf16>, vector<56x32xf32> -> vector<56x32xf32>
    %61 = vector.broadcast %5 : vector<1x32xf32> to vector<56x32xf32>
    %62 = arith.mulf %60, %61 : vector<56x32xf32>
    %63 = vector.broadcast %6 : vector<1x32xf32> to vector<56x32xf32>
    %64 = arith.addf %62, %63 : vector<56x32xf32>
    %cst_46 = arith.constant 0.000000e+00 : f32
    %65 = vector.broadcast %cst_46 : f32 to vector<56x32xf32>
    %66 = arith.maximumf %64, %65 : vector<56x32xf32>
    %67 = vector.extract_strided_slice %66 {offsets = [0, 0], sizes = [28, 32], strides = [1, 1]} : vector<56x32xf32> to vector<28x32xf32>
    %68 = vector.extract_strided_slice %66 {offsets = [28, 0], sizes = [28, 32], strides = [1, 1]} : vector<56x32xf32> to vector<28x32xf32>
    %69 = arith.maximumf %67, %68 : vector<28x32xf32>
    %c0_47 = arith.constant 0 : index
    %c0_48 = arith.constant 0 : index
    %70 = vector.load %arg14[%c0_47, %c0_48] : memref<28x32xf32, #tpu.memory_space<vmem>>, vector<28x32xf32>
    tpu.vector_store %arg14[%c0_47, %c0_48], %69 {strides = array<i32>} : memref<28x32xf32, #tpu.memory_space<vmem>>, vector<28x32xf32>,
    %c0_49 = arith.constant 0 : index
    %c0_50 = arith.constant 0 : index
    %71 = tpu.strided_load %arg14[%c0_49, %c0_50] {strides = array<i32: 2, 1>} : memref<28x32xf32, #tpu.memory_space<vmem>>, vector<14x32xf32>
    %c1_51 = arith.constant 1 : index
    %c0_52 = arith.constant 0 : index
    %72 = tpu.strided_load %arg14[%c1_51, %c0_52] {strides = array<i32: 2, 1>} : memref<28x32xf32, #tpu.memory_space<vmem>>, vector<14x32xf32>
    %73 = arith.maximumf %71, %72 : vector<14x32xf32>
    %c65 = arith.constant 65 : index
    %c0_53 = arith.constant 0 : index
    %74 = vector.load %arg12[%c65, %c0_53] : memref<264x32xf32, #tpu.memory_space<vmem>>, vector<14x32xf32>
    tpu.vector_store %arg12[%c65, %c0_53], %73 {strides = array<i32>} : memref<264x32xf32, #tpu.memory_space<vmem>>, vector<14x32xf32>,
    %c0_54 = arith.constant 0 : index
    %c224 = arith.constant 224 : index
    %c0_55 = arith.constant 0 : index
    %75 = vector.load %arg1[%c0_54, %c224, %c0_55] : memref<1x784x32xbf16, #tpu.memory_space<vmem>>, vector<1x56x32xbf16>
    %76 = vector.shape_cast %75 : vector<1x56x32xbf16> to vector<56x32xbf16>
    %cst_56 = arith.constant dense<0.000000e+00> : vector<56x32xf32>
    %77 = tpu.matmul %76, %4, %cst_56 {dimension_numbers = #tpu.dot_dimension_numbers<[1], [0], [0], [1], [0, 0, 1, 1], [], []>} : vector<56x32xbf16>, vector<32x32xbf16>, vector<56x32xf32> -> vector<56x32xf32>
    %78 = vector.broadcast %5 : vector<1x32xf32> to vector<56x32xf32>
    %79 = arith.mulf %77, %78 : vector<56x32xf32>
    %80 = vector.broadcast %6 : vector<1x32xf32> to vector<56x32xf32>
    %81 = arith.addf %79, %80 : vector<56x32xf32>
    %cst_57 = arith.constant 0.000000e+00 : f32
    %82 = vector.broadcast %cst_57 : f32 to vector<56x32xf32>
    %83 = arith.maximumf %81, %82 : vector<56x32xf32>
    %84 = vector.extract_strided_slice %83 {offsets = [0, 0], sizes = [28, 32], strides = [1, 1]} : vector<56x32xf32> to vector<28x32xf32>
    %85 = vector.extract_strided_slice %83 {offsets = [28, 0], sizes = [28, 32], strides = [1, 1]} : vector<56x32xf32> to vector<28x32xf32>
    %86 = arith.maximumf %84, %85 : vector<28x32xf32>
    %c0_58 = arith.constant 0 : index
    %c0_59 = arith.constant 0 : index
    %87 = vector.load %arg14[%c0_58, %c0_59] : memref<28x32xf32, #tpu.memory_space<vmem>>, vector<28x32xf32>
    tpu.vector_store %arg14[%c0_58, %c0_59], %86 {strides = array<i32>} : memref<28x32xf32, #tpu.memory_space<vmem>>, vector<28x32xf32>,
    %c0_60 = arith.constant 0 : index
    %c0_61 = arith.constant 0 : index
    %88 = tpu.strided_load %arg14[%c0_60, %c0_61] {strides = array<i32: 2, 1>} : memref<28x32xf32, #tpu.memory_space<vmem>>, vector<14x32xf32>
    %c1_62 = arith.constant 1 : index
    %c0_63 = arith.constant 0 : index
    %89 = tpu.strided_load %arg14[%c1_62, %c0_63] {strides = array<i32: 2, 1>} : memref<28x32xf32, #tpu.memory_space<vmem>>, vector<14x32xf32>
    %90 = arith.maximumf %88, %89 : vector<14x32xf32>
    %c81 = arith.constant 81 : index
    %c0_64 = arith.constant 0 : index
    %91 = vector.load %arg12[%c81, %c0_64] : memref<264x32xf32, #tpu.memory_space<vmem>>, vector<14x32xf32>
    tpu.vector_store %arg12[%c81, %c0_64], %90 {strides = array<i32>} : memref<264x32xf32, #tpu.memory_space<vmem>>, vector<14x32xf32>,
    %c0_65 = arith.constant 0 : index
    %c280 = arith.constant 280 : index
    %c0_66 = arith.constant 0 : index
    %92 = vector.load %arg1[%c0_65, %c280, %c0_66] : memref<1x784x32xbf16, #tpu.memory_space<vmem>>, vector<1x56x32xbf16>
    %93 = vector.shape_cast %92 : vector<1x56x32xbf16> to vector<56x32xbf16>
    %cst_67 = arith.constant dense<0.000000e+00> : vector<56x32xf32>
    %94 = tpu.matmul %93, %4, %cst_67 {dimension_numbers = #tpu.dot_dimension_numbers<[1], [0], [0], [1], [0, 0, 1, 1], [], []>} : vector<56x32xbf16>, vector<32x32xbf16>, vector<56x32xf32> -> vector<56x32xf32>
    %95 = vector.broadcast %5 : vector<1x32xf32> to vector<56x32xf32>
    %96 = arith.mulf %94, %95 : vector<56x32xf32>
    %97 = vector.broadcast %6 : vector<1x32xf32> to vector<56x32xf32>
    %98 = arith.addf %96, %97 : vector<56x32xf32>
    %cst_68 = arith.constant 0.000000e+00 : f32
    %99 = vector.broadcast %cst_68 : f32 to vector<56x32xf32>
    %100 = arith.maximumf %98, %99 : vector<56x32xf32>
    %101 = vector.extract_strided_slice %100 {offsets = [0, 0], sizes = [28, 32], strides = [1, 1]} : vector<56x32xf32> to vector<28x32xf32>
    %102 = vector.extract_strided_slice %100 {offsets = [28, 0], sizes = [28, 32], strides = [1, 1]} : vector<56x32xf32> to vector<28x32xf32>
    %103 = arith.maximumf %101, %102 : vector<28x32xf32>
    %c0_69 = arith.constant 0 : index
    %c0_70 = arith.constant 0 : index
    %104 = vector.load %arg14[%c0_69, %c0_70] : memref<28x32xf32, #tpu.memory_space<vmem>>, vector<28x32xf32>
    tpu.vector_store %arg14[%c0_69, %c0_70], %103 {strides = array<i32>} : memref<28x32xf32, #tpu.memory_space<vmem>>, vector<28x32xf32>,
    %c0_71 = arith.constant 0 : index
    %c0_72 = arith.constant 0 : index
    %105 = tpu.strided_load %arg14[%c0_71, %c0_72] {strides = array<i32: 2, 1>} : memref<28x32xf32, #tpu.memory_space<vmem>>, vector<14x32xf32>
    %c1_73 = arith.constant 1 : index
    %c0_74 = arith.constant 0 : index
    %106 = tpu.strided_load %arg14[%c1_73, %c0_74] {strides = array<i32: 2, 1>} : memref<28x32xf32, #tpu.memory_space<vmem>>, vector<14x32xf32>
    %107 = arith.maximumf %105, %106 : vector<14x32xf32>
    %c97 = arith.constant 97 : index
    %c0_75 = arith.constant 0 : index
    %108 = vector.load %arg12[%c97, %c0_75] : memref<264x32xf32, #tpu.memory_space<vmem>>, vector<14x32xf32>
    tpu.vector_store %arg12[%c97, %c0_75], %107 {strides = array<i32>} : memref<264x32xf32, #tpu.memory_space<vmem>>, vector<14x32xf32>,
    %c0_76 = arith.constant 0 : index
    %c336 = arith.constant 336 : index
    %c0_77 = arith.constant 0 : index
    %109 = vector.load %arg1[%c0_76, %c336, %c0_77] : memref<1x784x32xbf16, #tpu.memory_space<vmem>>, vector<1x56x32xbf16>
    %110 = vector.shape_cast %109 : vector<1x56x32xbf16> to vector<56x32xbf16>
    %cst_78 = arith.constant dense<0.000000e+00> : vector<56x32xf32>
    %111 = tpu.matmul %110, %4, %cst_78 {dimension_numbers = #tpu.dot_dimension_numbers<[1], [0], [0], [1], [0, 0, 1, 1], [], []>} : vector<56x32xbf16>, vector<32x32xbf16>, vector<56x32xf32> -> vector<56x32xf32>
    %112 = vector.broadcast %5 : vector<1x32xf32> to vector<56x32xf32>
    %113 = arith.mulf %111, %112 : vector<56x32xf32>
    %114 = vector.broadcast %6 : vector<1x32xf32> to vector<56x32xf32>
    %115 = arith.addf %113, %114 : vector<56x32xf32>
    %cst_79 = arith.constant 0.000000e+00 : f32
    %116 = vector.broadcast %cst_79 : f32 to vector<56x32xf32>
    %117 = arith.maximumf %115, %116 : vector<56x32xf32>
    %118 = vector.extract_strided_slice %117 {offsets = [0, 0], sizes = [28, 32], strides = [1, 1]} : vector<56x32xf32> to vector<28x32xf32>
    %119 = vector.extract_strided_slice %117 {offsets = [28, 0], sizes = [28, 32], strides = [1, 1]} : vector<56x32xf32> to vector<28x32xf32>
    %120 = arith.maximumf %118, %119 : vector<28x32xf32>
    %c0_80 = arith.constant 0 : index
    %c0_81 = arith.constant 0 : index
    %121 = vector.load %arg14[%c0_80, %c0_81] : memref<28x32xf32, #tpu.memory_space<vmem>>, vector<28x32xf32>
    tpu.vector_store %arg14[%c0_80, %c0_81], %120 {strides = array<i32>} : memref<28x32xf32, #tpu.memory_space<vmem>>, vector<28x32xf32>,
    %c0_82 = arith.constant 0 : index
    %c0_83 = arith.constant 0 : index
    %122 = tpu.strided_load %arg14[%c0_82, %c0_83] {strides = array<i32: 2, 1>} : memref<28x32xf32, #tpu.memory_space<vmem>>, vector<14x32xf32>
    %c1_84 = arith.constant 1 : index
    %c0_85 = arith.constant 0 : index
    %123 = tpu.strided_load %arg14[%c1_84, %c0_85] {strides = array<i32: 2, 1>} : memref<28x32xf32, #tpu.memory_space<vmem>>, vector<14x32xf32>
    %124 = arith.maximumf %122, %123 : vector<14x32xf32>
    %c113 = arith.constant 113 : index
    %c0_86 = arith.constant 0 : index
    %125 = vector.load %arg12[%c113, %c0_86] : memref<264x32xf32, #tpu.memory_space<vmem>>, vector<14x32xf32>
    tpu.vector_store %arg12[%c113, %c0_86], %124 {strides = array<i32>} : memref<264x32xf32, #tpu.memory_space<vmem>>, vector<14x32xf32>,
    %c0_87 = arith.constant 0 : index
    %c392 = arith.constant 392 : index
    %c0_88 = arith.constant 0 : index
    %126 = vector.load %arg1[%c0_87, %c392, %c0_88] : memref<1x784x32xbf16, #tpu.memory_space<vmem>>, vector<1x56x32xbf16>
    %127 = vector.shape_cast %126 : vector<1x56x32xbf16> to vector<56x32xbf16>
    %cst_89 = arith.constant dense<0.000000e+00> : vector<56x32xf32>
    %128 = tpu.matmul %127, %4, %cst_89 {dimension_numbers = #tpu.dot_dimension_numbers<[1], [0], [0], [1], [0, 0, 1, 1], [], []>} : vector<56x32xbf16>, vector<32x32xbf16>, vector<56x32xf32> -> vector<56x32xf32>
    %129 = vector.broadcast %5 : vector<1x32xf32> to vector<56x32xf32>
    %130 = arith.mulf %128, %129 : vector<56x32xf32>
    %131 = vector.broadcast %6 : vector<1x32xf32> to vector<56x32xf32>
    %132 = arith.addf %130, %131 : vector<56x32xf32>
    %cst_90 = arith.constant 0.000000e+00 : f32
    %133 = vector.broadcast %cst_90 : f32 to vector<56x32xf32>
    %134 = arith.maximumf %132, %133 : vector<56x32xf32>
    %135 = vector.extract_strided_slice %134 {offsets = [0, 0], sizes = [28, 32], strides = [1, 1]} : vector<56x32xf32> to vector<28x32xf32>
    %136 = vector.extract_strided_slice %134 {offsets = [28, 0], sizes = [28, 32], strides = [1, 1]} : vector<56x32xf32> to vector<28x32xf32>
    %137 = arith.maximumf %135, %136 : vector<28x32xf32>
    %c0_91 = arith.constant 0 : index
    %c0_92 = arith.constant 0 : index
    %138 = vector.load %arg14[%c0_91, %c0_92] : memref<28x32xf32, #tpu.memory_space<vmem>>, vector<28x32xf32>
    tpu.vector_store %arg14[%c0_91, %c0_92], %137 {strides = array<i32>} : memref<28x32xf32, #tpu.memory_space<vmem>>, vector<28x32xf32>,
    %c0_93 = arith.constant 0 : index
    %c0_94 = arith.constant 0 : index
    %139 = tpu.strided_load %arg14[%c0_93, %c0_94] {strides = array<i32: 2, 1>} : memref<28x32xf32, #tpu.memory_space<vmem>>, vector<14x32xf32>
    %c1_95 = arith.constant 1 : index
    %c0_96 = arith.constant 0 : index
    %140 = tpu.strided_load %arg14[%c1_95, %c0_96] {strides = array<i32: 2, 1>} : memref<28x32xf32, #tpu.memory_space<vmem>>, vector<14x32xf32>
    %141 = arith.maximumf %139, %140 : vector<14x32xf32>
    %c129 = arith.constant 129 : index
    %c0_97 = arith.constant 0 : index
    %142 = vector.load %arg12[%c129, %c0_97] : memref<264x32xf32, #tpu.memory_space<vmem>>, vector<14x32xf32>
    tpu.vector_store %arg12[%c129, %c0_97], %141 {strides = array<i32>} : memref<264x32xf32, #tpu.memory_space<vmem>>, vector<14x32xf32>,
    %c0_98 = arith.constant 0 : index
    %c448 = arith.constant 448 : index
    %c0_99 = arith.constant 0 : index
    %143 = vector.load %arg1[%c0_98, %c448, %c0_99] : memref<1x784x32xbf16, #tpu.memory_space<vmem>>, vector<1x56x32xbf16>
    %144 = vector.shape_cast %143 : vector<1x56x32xbf16> to vector<56x32xbf16>
    %cst_100 = arith.constant dense<0.000000e+00> : vector<56x32xf32>
    %145 = tpu.matmul %144, %4, %cst_100 {dimension_numbers = #tpu.dot_dimension_numbers<[1], [0], [0], [1], [0, 0, 1, 1], [], []>} : vector<56x32xbf16>, vector<32x32xbf16>, vector<56x32xf32> -> vector<56x32xf32>
    %146 = vector.broadcast %5 : vector<1x32xf32> to vector<56x32xf32>
    %147 = arith.mulf %145, %146 : vector<56x32xf32>
    %148 = vector.broadcast %6 : vector<1x32xf32> to vector<56x32xf32>
    %149 = arith.addf %147, %148 : vector<56x32xf32>
    %cst_101 = arith.constant 0.000000e+00 : f32
    %150 = vector.broadcast %cst_101 : f32 to vector<56x32xf32>
    %151 = arith.maximumf %149, %150 : vector<56x32xf32>
    %152 = vector.extract_strided_slice %151 {offsets = [0, 0], sizes = [28, 32], strides = [1, 1]} : vector<56x32xf32> to vector<28x32xf32>
    %153 = vector.extract_strided_slice %151 {offsets = [28, 0], sizes = [28, 32], strides = [1, 1]} : vector<56x32xf32> to vector<28x32xf32>
    %154 = arith.maximumf %152, %153 : vector<28x32xf32>
    %c0_102 = arith.constant 0 : index
    %c0_103 = arith.constant 0 : index
    %155 = vector.load %arg14[%c0_102, %c0_103] : memref<28x32xf32, #tpu.memory_space<vmem>>, vector<28x32xf32>
    tpu.vector_store %arg14[%c0_102, %c0_103], %154 {strides = array<i32>} : memref<28x32xf32, #tpu.memory_space<vmem>>, vector<28x32xf32>,
    %c0_104 = arith.constant 0 : index
    %c0_105 = arith.constant 0 : index
    %156 = tpu.strided_load %arg14[%c0_104, %c0_105] {strides = array<i32: 2, 1>} : memref<28x32xf32, #tpu.memory_space<vmem>>, vector<14x32xf32>
    %c1_106 = arith.constant 1 : index
    %c0_107 = arith.constant 0 : index
    %157 = tpu.strided_load %arg14[%c1_106, %c0_107] {strides = array<i32: 2, 1>} : memref<28x32xf32, #tpu.memory_space<vmem>>, vector<14x32xf32>
    %158 = arith.maximumf %156, %157 : vector<14x32xf32>
    %c145 = arith.constant 145 : index
    %c0_108 = arith.constant 0 : index
    %159 = vector.load %arg12[%c145, %c0_108] : memref<264x32xf32, #tpu.memory_space<vmem>>, vector<14x32xf32>
    tpu.vector_store %arg12[%c145, %c0_108], %158 {strides = array<i32>} : memref<264x32xf32, #tpu.memory_space<vmem>>, vector<14x32xf32>,
    %c0_109 = arith.constant 0 : index
    %c504 = arith.constant 504 : index
    %c0_110 = arith.constant 0 : index
    %160 = vector.load %arg1[%c0_109, %c504, %c0_110] : memref<1x784x32xbf16, #tpu.memory_space<vmem>>, vector<1x56x32xbf16>
    %161 = vector.shape_cast %160 : vector<1x56x32xbf16> to vector<56x32xbf16>
    %cst_111 = arith.constant dense<0.000000e+00> : vector<56x32xf32>
    %162 = tpu.matmul %161, %4, %cst_111 {dimension_numbers = #tpu.dot_dimension_numbers<[1], [0], [0], [1], [0, 0, 1, 1], [], []>} : vector<56x32xbf16>, vector<32x32xbf16>, vector<56x32xf32> -> vector<56x32xf32>
    %163 = vector.broadcast %5 : vector<1x32xf32> to vector<56x32xf32>
    %164 = arith.mulf %162, %163 : vector<56x32xf32>
    %165 = vector.broadcast %6 : vector<1x32xf32> to vector<56x32xf32>
    %166 = arith.addf %164, %165 : vector<56x32xf32>
    %cst_112 = arith.constant 0.000000e+00 : f32
    %167 = vector.broadcast %cst_112 : f32 to vector<56x32xf32>
    %168 = arith.maximumf %166, %167 : vector<56x32xf32>
    %169 = vector.extract_strided_slice %168 {offsets = [0, 0], sizes = [28, 32], strides = [1, 1]} : vector<56x32xf32> to vector<28x32xf32>
    %170 = vector.extract_strided_slice %168 {offsets = [28, 0], sizes = [28, 32], strides = [1, 1]} : vector<56x32xf32> to vector<28x32xf32>
    %171 = arith.maximumf %169, %170 : vector<28x32xf32>
    %c0_113 = arith.constant 0 : index
    %c0_114 = arith.constant 0 : index
    %172 = vector.load %arg14[%c0_113, %c0_114] : memref<28x32xf32, #tpu.memory_space<vmem>>, vector<28x32xf32>
    tpu.vector_store %arg14[%c0_113, %c0_114], %171 {strides = array<i32>} : memref<28x32xf32, #tpu.memory_space<vmem>>, vector<28x32xf32>,
    %c0_115 = arith.constant 0 : index
    %c0_116 = arith.constant 0 : index
    %173 = tpu.strided_load %arg14[%c0_115, %c0_116] {strides = array<i32: 2, 1>} : memref<28x32xf32, #tpu.memory_space<vmem>>, vector<14x32xf32>
    %c1_117 = arith.constant 1 : index
    %c0_118 = arith.constant 0 : index
    %174 = tpu.strided_load %arg14[%c1_117, %c0_118] {strides = array<i32: 2, 1>} : memref<28x32xf32, #tpu.memory_space<vmem>>, vector<14x32xf32>
    %175 = arith.maximumf %173, %174 : vector<14x32xf32>
    %c161 = arith.constant 161 : index
    %c0_119 = arith.constant 0 : index
    %176 = vector.load %arg12[%c161, %c0_119] : memref<264x32xf32, #tpu.memory_space<vmem>>, vector<14x32xf32>
    tpu.vector_store %arg12[%c161, %c0_119], %175 {strides = array<i32>} : memref<264x32xf32, #tpu.memory_space<vmem>>, vector<14x32xf32>,
    %c0_120 = arith.constant 0 : index
    %c560 = arith.constant 560 : index
    %c0_121 = arith.constant 0 : index
    %177 = vector.load %arg1[%c0_120, %c560, %c0_121] : memref<1x784x32xbf16, #tpu.memory_space<vmem>>, vector<1x56x32xbf16>
    %178 = vector.shape_cast %177 : vector<1x56x32xbf16> to vector<56x32xbf16>
    %cst_122 = arith.constant dense<0.000000e+00> : vector<56x32xf32>
    %179 = tpu.matmul %178, %4, %cst_122 {dimension_numbers = #tpu.dot_dimension_numbers<[1], [0], [0], [1], [0, 0, 1, 1], [], []>} : vector<56x32xbf16>, vector<32x32xbf16>, vector<56x32xf32> -> vector<56x32xf32>
    %180 = vector.broadcast %5 : vector<1x32xf32> to vector<56x32xf32>
    %181 = arith.mulf %179, %180 : vector<56x32xf32>
    %182 = vector.broadcast %6 : vector<1x32xf32> to vector<56x32xf32>
    %183 = arith.addf %181, %182 : vector<56x32xf32>
    %cst_123 = arith.constant 0.000000e+00 : f32
    %184 = vector.broadcast %cst_123 : f32 to vector<56x32xf32>
    %185 = arith.maximumf %183, %184 : vector<56x32xf32>
    %186 = vector.extract_strided_slice %185 {offsets = [0, 0], sizes = [28, 32], strides = [1, 1]} : vector<56x32xf32> to vector<28x32xf32>
    %187 = vector.extract_strided_slice %185 {offsets = [28, 0], sizes = [28, 32], strides = [1, 1]} : vector<56x32xf32> to vector<28x32xf32>
    %188 = arith.maximumf %186, %187 : vector<28x32xf32>
    %c0_124 = arith.constant 0 : index
    %c0_125 = arith.constant 0 : index
    %189 = vector.load %arg14[%c0_124, %c0_125] : memref<28x32xf32, #tpu.memory_space<vmem>>, vector<28x32xf32>
    tpu.vector_store %arg14[%c0_124, %c0_125], %188 {strides = array<i32>} : memref<28x32xf32, #tpu.memory_space<vmem>>, vector<28x32xf32>,
    %c0_126 = arith.constant 0 : index
    %c0_127 = arith.constant 0 : index
    %190 = tpu.strided_load %arg14[%c0_126, %c0_127] {strides = array<i32: 2, 1>} : memref<28x32xf32, #tpu.memory_space<vmem>>, vector<14x32xf32>
    %c1_128 = arith.constant 1 : index
    %c0_129 = arith.constant 0 : index
    %191 = tpu.strided_load %arg14[%c1_128, %c0_129] {strides = array<i32: 2, 1>} : memref<28x32xf32, #tpu.memory_space<vmem>>, vector<14x32xf32>
    %192 = arith.maximumf %190, %191 : vector<14x32xf32>
    %c177 = arith.constant 177 : index
    %c0_130 = arith.constant 0 : index
    %193 = vector.load %arg12[%c177, %c0_130] : memref<264x32xf32, #tpu.memory_space<vmem>>, vector<14x32xf32>
    tpu.vector_store %arg12[%c177, %c0_130], %192 {strides = array<i32>} : memref<264x32xf32, #tpu.memory_space<vmem>>, vector<14x32xf32>,
    %c0_131 = arith.constant 0 : index
    %c616 = arith.constant 616 : index
    %c0_132 = arith.constant 0 : index
    %194 = vector.load %arg1[%c0_131, %c616, %c0_132] : memref<1x784x32xbf16, #tpu.memory_space<vmem>>, vector<1x56x32xbf16>
    %195 = vector.shape_cast %194 : vector<1x56x32xbf16> to vector<56x32xbf16>
    %cst_133 = arith.constant dense<0.000000e+00> : vector<56x32xf32>
    %196 = tpu.matmul %195, %4, %cst_133 {dimension_numbers = #tpu.dot_dimension_numbers<[1], [0], [0], [1], [0, 0, 1, 1], [], []>} : vector<56x32xbf16>, vector<32x32xbf16>, vector<56x32xf32> -> vector<56x32xf32>
    %197 = vector.broadcast %5 : vector<1x32xf32> to vector<56x32xf32>
    %198 = arith.mulf %196, %197 : vector<56x32xf32>
    %199 = vector.broadcast %6 : vector<1x32xf32> to vector<56x32xf32>
    %200 = arith.addf %198, %199 : vector<56x32xf32>
    %cst_134 = arith.constant 0.000000e+00 : f32
    %201 = vector.broadcast %cst_134 : f32 to vector<56x32xf32>
    %202 = arith.maximumf %200, %201 : vector<56x32xf32>
    %203 = vector.extract_strided_slice %202 {offsets = [0, 0], sizes = [28, 32], strides = [1, 1]} : vector<56x32xf32> to vector<28x32xf32>
    %204 = vector.extract_strided_slice %202 {offsets = [28, 0], sizes = [28, 32], strides = [1, 1]} : vector<56x32xf32> to vector<28x32xf32>
    %205 = arith.maximumf %203, %204 : vector<28x32xf32>
    %c0_135 = arith.constant 0 : index
    %c0_136 = arith.constant 0 : index
    %206 = vector.load %arg14[%c0_135, %c0_136] : memref<28x32xf32, #tpu.memory_space<vmem>>, vector<28x32xf32>
    tpu.vector_store %arg14[%c0_135, %c0_136], %205 {strides = array<i32>} : memref<28x32xf32, #tpu.memory_space<vmem>>, vector<28x32xf32>,
    %c0_137 = arith.constant 0 : index
    %c0_138 = arith.constant 0 : index
    %207 = tpu.strided_load %arg14[%c0_137, %c0_138] {strides = array<i32: 2, 1>} : memref<28x32xf32, #tpu.memory_space<vmem>>, vector<14x32xf32>
    %c1_139 = arith.constant 1 : index
    %c0_140 = arith.constant 0 : index
    %208 = tpu.strided_load %arg14[%c1_139, %c0_140] {strides = array<i32: 2, 1>} : memref<28x32xf32, #tpu.memory_space<vmem>>, vector<14x32xf32>
    %209 = arith.maximumf %207, %208 : vector<14x32xf32>
    %c193 = arith.constant 193 : index
    %c0_141 = arith.constant 0 : index
    %210 = vector.load %arg12[%c193, %c0_141] : memref<264x32xf32, #tpu.memory_space<vmem>>, vector<14x32xf32>
    tpu.vector_store %arg12[%c193, %c0_141], %209 {strides = array<i32>} : memref<264x32xf32, #tpu.memory_space<vmem>>, vector<14x32xf32>,
    %c0_142 = arith.constant 0 : index
    %c672 = arith.constant 672 : index
    %c0_143 = arith.constant 0 : index
    %211 = vector.load %arg1[%c0_142, %c672, %c0_143] : memref<1x784x32xbf16, #tpu.memory_space<vmem>>, vector<1x56x32xbf16>
    %212 = vector.shape_cast %211 : vector<1x56x32xbf16> to vector<56x32xbf16>
    %cst_144 = arith.constant dense<0.000000e+00> : vector<56x32xf32>
    %213 = tpu.matmul %212, %4, %cst_144 {dimension_numbers = #tpu.dot_dimension_numbers<[1], [0], [0], [1], [0, 0, 1, 1], [], []>} : vector<56x32xbf16>, vector<32x32xbf16>, vector<56x32xf32> -> vector<56x32xf32>
    %214 = vector.broadcast %5 : vector<1x32xf32> to vector<56x32xf32>
    %215 = arith.mulf %213, %214 : vector<56x32xf32>
    %216 = vector.broadcast %6 : vector<1x32xf32> to vector<56x32xf32>
    %217 = arith.addf %215, %216 : vector<56x32xf32>
    %cst_145 = arith.constant 0.000000e+00 : f32
    %218 = vector.broadcast %cst_145 : f32 to vector<56x32xf32>
    %219 = arith.maximumf %217, %218 : vector<56x32xf32>
    %220 = vector.extract_strided_slice %219 {offsets = [0, 0], sizes = [28, 32], strides = [1, 1]} : vector<56x32xf32> to vector<28x32xf32>
    %221 = vector.extract_strided_slice %219 {offsets = [28, 0], sizes = [28, 32], strides = [1, 1]} : vector<56x32xf32> to vector<28x32xf32>
    %222 = arith.maximumf %220, %221 : vector<28x32xf32>
    %c0_146 = arith.constant 0 : index
    %c0_147 = arith.constant 0 : index
    %223 = vector.load %arg14[%c0_146, %c0_147] : memref<28x32xf32, #tpu.memory_space<vmem>>, vector<28x32xf32>
    tpu.vector_store %arg14[%c0_146, %c0_147], %222 {strides = array<i32>} : memref<28x32xf32, #tpu.memory_space<vmem>>, vector<28x32xf32>,
    %c0_148 = arith.constant 0 : index
    %c0_149 = arith.constant 0 : index
    %224 = tpu.strided_load %arg14[%c0_148, %c0_149] {strides = array<i32: 2, 1>} : memref<28x32xf32, #tpu.memory_space<vmem>>, vector<14x32xf32>
    %c1_150 = arith.constant 1 : index
    %c0_151 = arith.constant 0 : index
    %225 = tpu.strided_load %arg14[%c1_150, %c0_151] {strides = array<i32: 2, 1>} : memref<28x32xf32, #tpu.memory_space<vmem>>, vector<14x32xf32>
    %226 = arith.maximumf %224, %225 : vector<14x32xf32>
    %c209 = arith.constant 209 : index
    %c0_152 = arith.constant 0 : index
    %227 = vector.load %arg12[%c209, %c0_152] : memref<264x32xf32, #tpu.memory_space<vmem>>, vector<14x32xf32>
    tpu.vector_store %arg12[%c209, %c0_152], %226 {strides = array<i32>} : memref<264x32xf32, #tpu.memory_space<vmem>>, vector<14x32xf32>,
    %c0_153 = arith.constant 0 : index
    %c728 = arith.constant 728 : index
    %c0_154 = arith.constant 0 : index
    %228 = vector.load %arg1[%c0_153, %c728, %c0_154] : memref<1x784x32xbf16, #tpu.memory_space<vmem>>, vector<1x56x32xbf16>
    %229 = vector.shape_cast %228 : vector<1x56x32xbf16> to vector<56x32xbf16>
    %cst_155 = arith.constant dense<0.000000e+00> : vector<56x32xf32>
    %230 = tpu.matmul %229, %4, %cst_155 {dimension_numbers = #tpu.dot_dimension_numbers<[1], [0], [0], [1], [0, 0, 1, 1], [], []>} : vector<56x32xbf16>, vector<32x32xbf16>, vector<56x32xf32> -> vector<56x32xf32>
    %231 = vector.broadcast %5 : vector<1x32xf32> to vector<56x32xf32>
    %232 = arith.mulf %230, %231 : vector<56x32xf32>
    %233 = vector.broadcast %6 : vector<1x32xf32> to vector<56x32xf32>
    %234 = arith.addf %232, %233 : vector<56x32xf32>
    %cst_156 = arith.constant 0.000000e+00 : f32
    %235 = vector.broadcast %cst_156 : f32 to vector<56x32xf32>
    %236 = arith.maximumf %234, %235 : vector<56x32xf32>
    %237 = vector.extract_strided_slice %236 {offsets = [0, 0], sizes = [28, 32], strides = [1, 1]} : vector<56x32xf32> to vector<28x32xf32>
    %238 = vector.extract_strided_slice %236 {offsets = [28, 0], sizes = [28, 32], strides = [1, 1]} : vector<56x32xf32> to vector<28x32xf32>
    %239 = arith.maximumf %237, %238 : vector<28x32xf32>
    %c0_157 = arith.constant 0 : index
    %c0_158 = arith.constant 0 : index
    %240 = vector.load %arg14[%c0_157, %c0_158] : memref<28x32xf32, #tpu.memory_space<vmem>>, vector<28x32xf32>
    tpu.vector_store %arg14[%c0_157, %c0_158], %239 {strides = array<i32>} : memref<28x32xf32, #tpu.memory_space<vmem>>, vector<28x32xf32>,
    %c0_159 = arith.constant 0 : index
    %c0_160 = arith.constant 0 : index
    %241 = tpu.strided_load %arg14[%c0_159, %c0_160] {strides = array<i32: 2, 1>} : memref<28x32xf32, #tpu.memory_space<vmem>>, vector<14x32xf32>
    %c1_161 = arith.constant 1 : index
    %c0_162 = arith.constant 0 : index
    %242 = tpu.strided_load %arg14[%c1_161, %c0_162] {strides = array<i32: 2, 1>} : memref<28x32xf32, #tpu.memory_space<vmem>>, vector<14x32xf32>
    %243 = arith.maximumf %241, %242 : vector<14x32xf32>
    %c225 = arith.constant 225 : index
    %c0_163 = arith.constant 0 : index
    %244 = vector.load %arg12[%c225, %c0_163] : memref<264x32xf32, #tpu.memory_space<vmem>>, vector<14x32xf32>
    tpu.vector_store %arg12[%c225, %c0_163], %243 {strides = array<i32>} : memref<264x32xf32, #tpu.memory_space<vmem>>, vector<14x32xf32>,
    %c0_164 = arith.constant 0 : index
    %c0_165 = arith.constant 0 : index
    %245 = vector.load %arg6[%c0_164, %c0_165] : memref<1x64xf32, #tpu.memory_space<vmem>>, vector<1x64xf32>
    %c0_166 = arith.constant 0 : index
    %c0_167 = arith.constant 0 : index
    %246 = vector.load %arg7[%c0_166, %c0_167] : memref<1x64xf32, #tpu.memory_space<vmem>>, vector<1x64xf32>
    %cst_168 = arith.constant 0.000000e+00 : f32
    %247 = vector.broadcast %cst_168 : f32 to vector<32x64xf32>
    %c0_169 = arith.constant 0 : index
    %c0_170 = arith.constant 0 : index
    %248 = vector.load %arg12[%c0_169, %c0_170] : memref<264x32xf32, #tpu.memory_space<vmem>>, vector<32x32xf32>
    %249 = arith.truncf %248 : vector<32x32xf32> to vector<32x32xbf16>
    %c0_171 = arith.constant 0 : index
    %c0_172 = arith.constant 0 : index
    %250 = vector.load %arg5[%c0_171, %c0_172] : memref<288x64xbf16, #tpu.memory_space<vmem>>, vector<32x64xbf16>
    %cst_173 = arith.constant dense<0.000000e+00> : vector<32x64xf32>
    %251 = tpu.matmul %249, %250, %cst_173 {dimension_numbers = #tpu.dot_dimension_numbers<[1], [0], [0], [1], [0, 0, 1, 1], [], []>} : vector<32x32xbf16>, vector<32x64xbf16>, vector<32x64xf32> -> vector<32x64xf32>
    %252 = arith.addf %247, %251 : vector<32x64xf32>
    %c1_174 = arith.constant 1 : index
    %c0_175 = arith.constant 0 : index
    %253 = vector.load %arg12[%c1_174, %c0_175] : memref<264x32xf32, #tpu.memory_space<vmem>>, vector<32x32xf32>
    %254 = arith.truncf %253 : vector<32x32xf32> to vector<32x32xbf16>
    %c32 = arith.constant 32 : index
    %c0_176 = arith.constant 0 : index
    %255 = vector.load %arg5[%c32, %c0_176] : memref<288x64xbf16, #tpu.memory_space<vmem>>, vector<32x64xbf16>
    %cst_177 = arith.constant dense<0.000000e+00> : vector<32x64xf32>
    %256 = tpu.matmul %254, %255, %cst_177 {dimension_numbers = #tpu.dot_dimension_numbers<[1], [0], [0], [1], [0, 0, 1, 1], [], []>} : vector<32x32xbf16>, vector<32x64xbf16>, vector<32x64xf32> -> vector<32x64xf32>
    %257 = arith.addf %252, %256 : vector<32x64xf32>
    %c2 = arith.constant 2 : index
    %c0_178 = arith.constant 0 : index
    %258 = vector.load %arg12[%c2, %c0_178] : memref<264x32xf32, #tpu.memory_space<vmem>>, vector<32x32xf32>
    %259 = arith.truncf %258 : vector<32x32xf32> to vector<32x32xbf16>
    %c64 = arith.constant 64 : index
    %c0_179 = arith.constant 0 : index
    %260 = vector.load %arg5[%c64, %c0_179] : memref<288x64xbf16, #tpu.memory_space<vmem>>, vector<32x64xbf16>
    %cst_180 = arith.constant dense<0.000000e+00> : vector<32x64xf32>
    %261 = tpu.matmul %259, %260, %cst_180 {dimension_numbers = #tpu.dot_dimension_numbers<[1], [0], [0], [1], [0, 0, 1, 1], [], []>} : vector<32x32xbf16>, vector<32x64xbf16>, vector<32x64xf32> -> vector<32x64xf32>
    %262 = arith.addf %257, %261 : vector<32x64xf32>
    %c16 = arith.constant 16 : index
    %c0_181 = arith.constant 0 : index
    %263 = vector.load %arg12[%c16, %c0_181] : memref<264x32xf32, #tpu.memory_space<vmem>>, vector<32x32xf32>
    %264 = arith.truncf %263 : vector<32x32xf32> to vector<32x32xbf16>
    %c96 = arith.constant 96 : index
    %c0_182 = arith.constant 0 : index
    %265 = vector.load %arg5[%c96, %c0_182] : memref<288x64xbf16, #tpu.memory_space<vmem>>, vector<32x64xbf16>
    %cst_183 = arith.constant dense<0.000000e+00> : vector<32x64xf32>
    %266 = tpu.matmul %264, %265, %cst_183 {dimension_numbers = #tpu.dot_dimension_numbers<[1], [0], [0], [1], [0, 0, 1, 1], [], []>} : vector<32x32xbf16>, vector<32x64xbf16>, vector<32x64xf32> -> vector<32x64xf32>
    %267 = arith.addf %262, %266 : vector<32x64xf32>
    %c17_184 = arith.constant 17 : index
    %c0_185 = arith.constant 0 : index
    %268 = vector.load %arg12[%c17_184, %c0_185] : memref<264x32xf32, #tpu.memory_space<vmem>>, vector<32x32xf32>
    %269 = arith.truncf %268 : vector<32x32xf32> to vector<32x32xbf16>
    %c128 = arith.constant 128 : index
    %c0_186 = arith.constant 0 : index
    %270 = vector.load %arg5[%c128, %c0_186] : memref<288x64xbf16, #tpu.memory_space<vmem>>, vector<32x64xbf16>
    %cst_187 = arith.constant dense<0.000000e+00> : vector<32x64xf32>
    %271 = tpu.matmul %269, %270, %cst_187 {dimension_numbers = #tpu.dot_dimension_numbers<[1], [0], [0], [1], [0, 0, 1, 1], [], []>} : vector<32x32xbf16>, vector<32x64xbf16>, vector<32x64xf32> -> vector<32x64xf32>
    %272 = arith.addf %267, %271 : vector<32x64xf32>
    %c18 = arith.constant 18 : index
    %c0_188 = arith.constant 0 : index
    %273 = vector.load %arg12[%c18, %c0_188] : memref<264x32xf32, #tpu.memory_space<vmem>>, vector<32x32xf32>
    %274 = arith.truncf %273 : vector<32x32xf32> to vector<32x32xbf16>
    %c160 = arith.constant 160 : index
    %c0_189 = arith.constant 0 : index
    %275 = vector.load %arg5[%c160, %c0_189] : memref<288x64xbf16, #tpu.memory_space<vmem>>, vector<32x64xbf16>
    %cst_190 = arith.constant dense<0.000000e+00> : vector<32x64xf32>
    %276 = tpu.matmul %274, %275, %cst_190 {dimension_numbers = #tpu.dot_dimension_numbers<[1], [0], [0], [1], [0, 0, 1, 1], [], []>} : vector<32x32xbf16>, vector<32x64xbf16>, vector<32x64xf32> -> vector<32x64xf32>
    %277 = arith.addf %272, %276 : vector<32x64xf32>
    %c32_191 = arith.constant 32 : index
    %c0_192 = arith.constant 0 : index
    %278 = vector.load %arg12[%c32_191, %c0_192] : memref<264x32xf32, #tpu.memory_space<vmem>>, vector<32x32xf32>
    %279 = arith.truncf %278 : vector<32x32xf32> to vector<32x32xbf16>
    %c192 = arith.constant 192 : index
    %c0_193 = arith.constant 0 : index
    %280 = vector.load %arg5[%c192, %c0_193] : memref<288x64xbf16, #tpu.memory_space<vmem>>, vector<32x64xbf16>
    %cst_194 = arith.constant dense<0.000000e+00> : vector<32x64xf32>
    %281 = tpu.matmul %279, %280, %cst_194 {dimension_numbers = #tpu.dot_dimension_numbers<[1], [0], [0], [1], [0, 0, 1, 1], [], []>} : vector<32x32xbf16>, vector<32x64xbf16>, vector<32x64xf32> -> vector<32x64xf32>
    %282 = arith.addf %277, %281 : vector<32x64xf32>
    %c33_195 = arith.constant 33 : index
    %c0_196 = arith.constant 0 : index
    %283 = vector.load %arg12[%c33_195, %c0_196] : memref<264x32xf32, #tpu.memory_space<vmem>>, vector<32x32xf32>
    %284 = arith.truncf %283 : vector<32x32xf32> to vector<32x32xbf16>
    %c224_197 = arith.constant 224 : index
    %c0_198 = arith.constant 0 : index
    %285 = vector.load %arg5[%c224_197, %c0_198] : memref<288x64xbf16, #tpu.memory_space<vmem>>, vector<32x64xbf16>
    %cst_199 = arith.constant dense<0.000000e+00> : vector<32x64xf32>
    %286 = tpu.matmul %284, %285, %cst_199 {dimension_numbers = #tpu.dot_dimension_numbers<[1], [0], [0], [1], [0, 0, 1, 1], [], []>} : vector<32x32xbf16>, vector<32x64xbf16>, vector<32x64xf32> -> vector<32x64xf32>
    %287 = arith.addf %282, %286 : vector<32x64xf32>
    %c34 = arith.constant 34 : index
    %c0_200 = arith.constant 0 : index
    %288 = vector.load %arg12[%c34, %c0_200] : memref<264x32xf32, #tpu.memory_space<vmem>>, vector<32x32xf32>
    %289 = arith.truncf %288 : vector<32x32xf32> to vector<32x32xbf16>
    %c256 = arith.constant 256 : index
    %c0_201 = arith.constant 0 : index
    %290 = vector.load %arg5[%c256, %c0_201] : memref<288x64xbf16, #tpu.memory_space<vmem>>, vector<32x64xbf16>
    %cst_202 = arith.constant dense<0.000000e+00> : vector<32x64xf32>
    %291 = tpu.matmul %289, %290, %cst_202 {dimension_numbers = #tpu.dot_dimension_numbers<[1], [0], [0], [1], [0, 0, 1, 1], [], []>} : vector<32x32xbf16>, vector<32x64xbf16>, vector<32x64xf32> -> vector<32x64xf32>
    %292 = arith.addf %287, %291 : vector<32x64xf32>
    %293 = vector.broadcast %245 : vector<1x64xf32> to vector<32x64xf32>
    %294 = arith.mulf %292, %293 : vector<32x64xf32>
    %295 = vector.broadcast %246 : vector<1x64xf32> to vector<32x64xf32>
    %296 = arith.addf %294, %295 : vector<32x64xf32>
    %cst_203 = arith.constant 0.000000e+00 : f32
    %297 = vector.broadcast %cst_203 : f32 to vector<32x64xf32>
    %298 = arith.maximumf %296, %297 : vector<32x64xf32>
    %299 = vector.extract_strided_slice %298 {offsets = [0, 0], sizes = [16, 64], strides = [1, 1]} : vector<32x64xf32> to vector<16x64xf32>
    %300 = vector.extract_strided_slice %298 {offsets = [16, 0], sizes = [16, 64], strides = [1, 1]} : vector<32x64xf32> to vector<16x64xf32>
    %301 = arith.maximumf %299, %300 : vector<16x64xf32>
    %c0_204 = arith.constant 0 : index
    %c0_205 = arith.constant 0 : index
    %302 = vector.load %arg15[%c0_204, %c0_205] : memref<16x64xf32, #tpu.memory_space<vmem>>, vector<16x64xf32>
    tpu.vector_store %arg15[%c0_204, %c0_205], %301 {strides = array<i32>} : memref<16x64xf32, #tpu.memory_space<vmem>>, vector<16x64xf32>,
    %c0_206 = arith.constant 0 : index
    %c0_207 = arith.constant 0 : index
    %303 = tpu.strided_load %arg15[%c0_206, %c0_207] {strides = array<i32: 2, 1>} : memref<16x64xf32, #tpu.memory_space<vmem>>, vector<7x64xf32>
    %c1_208 = arith.constant 1 : index
    %c0_209 = arith.constant 0 : index
    %304 = tpu.strided_load %arg15[%c1_208, %c0_209] {strides = array<i32: 2, 1>} : memref<16x64xf32, #tpu.memory_space<vmem>>, vector<7x64xf32>
    %305 = arith.maximumf %303, %304 : vector<7x64xf32>
    %c10 = arith.constant 10 : index
    %c0_210 = arith.constant 0 : index
    %306 = vector.load %arg13[%c10, %c0_210] : memref<88x64xf32, #tpu.memory_space<vmem>>, vector<7x64xf32>
    tpu.vector_store %arg13[%c10, %c0_210], %305 {strides = array<i32>} : memref<88x64xf32, #tpu.memory_space<vmem>>, vector<7x64xf32>,
    %cst_211 = arith.constant 0.000000e+00 : f32
    %307 = vector.broadcast %cst_211 : f32 to vector<32x64xf32>
    %c32_212 = arith.constant 32 : index
    %c0_213 = arith.constant 0 : index
    %308 = vector.load %arg12[%c32_212, %c0_213] : memref<264x32xf32, #tpu.memory_space<vmem>>, vector<32x32xf32>
    %309 = arith.truncf %308 : vector<32x32xf32> to vector<32x32xbf16>
    %c0_214 = arith.constant 0 : index
    %c0_215 = arith.constant 0 : index
    %310 = vector.load %arg5[%c0_214, %c0_215] : memref<288x64xbf16, #tpu.memory_space<vmem>>, vector<32x64xbf16>
    %cst_216 = arith.constant dense<0.000000e+00> : vector<32x64xf32>
    %311 = tpu.matmul %309, %310, %cst_216 {dimension_numbers = #tpu.dot_dimension_numbers<[1], [0], [0], [1], [0, 0, 1, 1], [], []>} : vector<32x32xbf16>, vector<32x64xbf16>, vector<32x64xf32> -> vector<32x64xf32>
    %312 = arith.addf %307, %311 : vector<32x64xf32>
    %c33_217 = arith.constant 33 : index
    %c0_218 = arith.constant 0 : index
    %313 = vector.load %arg12[%c33_217, %c0_218] : memref<264x32xf32, #tpu.memory_space<vmem>>, vector<32x32xf32>
    %314 = arith.truncf %313 : vector<32x32xf32> to vector<32x32xbf16>
    %c32_219 = arith.constant 32 : index
    %c0_220 = arith.constant 0 : index
    %315 = vector.load %arg5[%c32_219, %c0_220] : memref<288x64xbf16, #tpu.memory_space<vmem>>, vector<32x64xbf16>
    %cst_221 = arith.constant dense<0.000000e+00> : vector<32x64xf32>
    %316 = tpu.matmul %314, %315, %cst_221 {dimension_numbers = #tpu.dot_dimension_numbers<[1], [0], [0], [1], [0, 0, 1, 1], [], []>} : vector<32x32xbf16>, vector<32x64xbf16>, vector<32x64xf32> -> vector<32x64xf32>
    %317 = arith.addf %312, %316 : vector<32x64xf32>
    %c34_222 = arith.constant 34 : index
    %c0_223 = arith.constant 0 : index
    %318 = vector.load %arg12[%c34_222, %c0_223] : memref<264x32xf32, #tpu.memory_space<vmem>>, vector<32x32xf32>
    %319 = arith.truncf %318 : vector<32x32xf32> to vector<32x32xbf16>
    %c64_224 = arith.constant 64 : index
    %c0_225 = arith.constant 0 : index
    %320 = vector.load %arg5[%c64_224, %c0_225] : memref<288x64xbf16, #tpu.memory_space<vmem>>, vector<32x64xbf16>
    %cst_226 = arith.constant dense<0.000000e+00> : vector<32x64xf32>
    %321 = tpu.matmul %319, %320, %cst_226 {dimension_numbers = #tpu.dot_dimension_numbers<[1], [0], [0], [1], [0, 0, 1, 1], [], []>} : vector<32x32xbf16>, vector<32x64xbf16>, vector<32x64xf32> -> vector<32x64xf32>
    %322 = arith.addf %317, %321 : vector<32x64xf32>
    %c48 = arith.constant 48 : index
    %c0_227 = arith.constant 0 : index
    %323 = vector.load %arg12[%c48, %c0_227] : memref<264x32xf32, #tpu.memory_space<vmem>>, vector<32x32xf32>
    %324 = arith.truncf %323 : vector<32x32xf32> to vector<32x32xbf16>
    %c96_228 = arith.constant 96 : index
    %c0_229 = arith.constant 0 : index
    %325 = vector.load %arg5[%c96_228, %c0_229] : memref<288x64xbf16, #tpu.memory_space<vmem>>, vector<32x64xbf16>
    %cst_230 = arith.constant dense<0.000000e+00> : vector<32x64xf32>
    %326 = tpu.matmul %324, %325, %cst_230 {dimension_numbers = #tpu.dot_dimension_numbers<[1], [0], [0], [1], [0, 0, 1, 1], [], []>} : vector<32x32xbf16>, vector<32x64xbf16>, vector<32x64xf32> -> vector<32x64xf32>
    %327 = arith.addf %322, %326 : vector<32x64xf32>
    %c49_231 = arith.constant 49 : index
    %c0_232 = arith.constant 0 : index
    %328 = vector.load %arg12[%c49_231, %c0_232] : memref<264x32xf32, #tpu.memory_space<vmem>>, vector<32x32xf32>
    %329 = arith.truncf %328 : vector<32x32xf32> to vector<32x32xbf16>
    %c128_233 = arith.constant 128 : index
    %c0_234 = arith.constant 0 : index
    %330 = vector.load %arg5[%c128_233, %c0_234] : memref<288x64xbf16, #tpu.memory_space<vmem>>, vector<32x64xbf16>
    %cst_235 = arith.constant dense<0.000000e+00> : vector<32x64xf32>
    %331 = tpu.matmul %329, %330, %cst_235 {dimension_numbers = #tpu.dot_dimension_numbers<[1], [0], [0], [1], [0, 0, 1, 1], [], []>} : vector<32x32xbf16>, vector<32x64xbf16>, vector<32x64xf32> -> vector<32x64xf32>
    %332 = arith.addf %327, %331 : vector<32x64xf32>
    %c50 = arith.constant 50 : index
    %c0_236 = arith.constant 0 : index
    %333 = vector.load %arg12[%c50, %c0_236] : memref<264x32xf32, #tpu.memory_space<vmem>>, vector<32x32xf32>
    %334 = arith.truncf %333 : vector<32x32xf32> to vector<32x32xbf16>
    %c160_237 = arith.constant 160 : index
    %c0_238 = arith.constant 0 : index
    %335 = vector.load %arg5[%c160_237, %c0_238] : memref<288x64xbf16, #tpu.memory_space<vmem>>, vector<32x64xbf16>
    %cst_239 = arith.constant dense<0.000000e+00> : vector<32x64xf32>
    %336 = tpu.matmul %334, %335, %cst_239 {dimension_numbers = #tpu.dot_dimension_numbers<[1], [0], [0], [1], [0, 0, 1, 1], [], []>} : vector<32x32xbf16>, vector<32x64xbf16>, vector<32x64xf32> -> vector<32x64xf32>
    %337 = arith.addf %332, %336 : vector<32x64xf32>
    %c64_240 = arith.constant 64 : index
    %c0_241 = arith.constant 0 : index
    %338 = vector.load %arg12[%c64_240, %c0_241] : memref<264x32xf32, #tpu.memory_space<vmem>>, vector<32x32xf32>
    %339 = arith.truncf %338 : vector<32x32xf32> to vector<32x32xbf16>
    %c192_242 = arith.constant 192 : index
    %c0_243 = arith.constant 0 : index
    %340 = vector.load %arg5[%c192_242, %c0_243] : memref<288x64xbf16, #tpu.memory_space<vmem>>, vector<32x64xbf16>
    %cst_244 = arith.constant dense<0.000000e+00> : vector<32x64xf32>
    %341 = tpu.matmul %339, %340, %cst_244 {dimension_numbers = #tpu.dot_dimension_numbers<[1], [0], [0], [1], [0, 0, 1, 1], [], []>} : vector<32x32xbf16>, vector<32x64xbf16>, vector<32x64xf32> -> vector<32x64xf32>
    %342 = arith.addf %337, %341 : vector<32x64xf32>
    %c65_245 = arith.constant 65 : index
    %c0_246 = arith.constant 0 : index
    %343 = vector.load %arg12[%c65_245, %c0_246] : memref<264x32xf32, #tpu.memory_space<vmem>>, vector<32x32xf32>
    %344 = arith.truncf %343 : vector<32x32xf32> to vector<32x32xbf16>
    %c224_247 = arith.constant 224 : index
    %c0_248 = arith.constant 0 : index
    %345 = vector.load %arg5[%c224_247, %c0_248] : memref<288x64xbf16, #tpu.memory_space<vmem>>, vector<32x64xbf16>
    %cst_249 = arith.constant dense<0.000000e+00> : vector<32x64xf32>
    %346 = tpu.matmul %344, %345, %cst_249 {dimension_numbers = #tpu.dot_dimension_numbers<[1], [0], [0], [1], [0, 0, 1, 1], [], []>} : vector<32x32xbf16>, vector<32x64xbf16>, vector<32x64xf32> -> vector<32x64xf32>
    %347 = arith.addf %342, %346 : vector<32x64xf32>
    %c66 = arith.constant 66 : index
    %c0_250 = arith.constant 0 : index
    %348 = vector.load %arg12[%c66, %c0_250] : memref<264x32xf32, #tpu.memory_space<vmem>>, vector<32x32xf32>
    %349 = arith.truncf %348 : vector<32x32xf32> to vector<32x32xbf16>
    %c256_251 = arith.constant 256 : index
    %c0_252 = arith.constant 0 : index
    %350 = vector.load %arg5[%c256_251, %c0_252] : memref<288x64xbf16, #tpu.memory_space<vmem>>, vector<32x64xbf16>
    %cst_253 = arith.constant dense<0.000000e+00> : vector<32x64xf32>
    %351 = tpu.matmul %349, %350, %cst_253 {dimension_numbers = #tpu.dot_dimension_numbers<[1], [0], [0], [1], [0, 0, 1, 1], [], []>} : vector<32x32xbf16>, vector<32x64xbf16>, vector<32x64xf32> -> vector<32x64xf32>
    %352 = arith.addf %347, %351 : vector<32x64xf32>
    %353 = vector.broadcast %245 : vector<1x64xf32> to vector<32x64xf32>
    %354 = arith.mulf %352, %353 : vector<32x64xf32>
    %355 = vector.broadcast %246 : vector<1x64xf32> to vector<32x64xf32>
    %356 = arith.addf %354, %355 : vector<32x64xf32>
    %cst_254 = arith.constant 0.000000e+00 : f32
    %357 = vector.broadcast %cst_254 : f32 to vector<32x64xf32>
    %358 = arith.maximumf %356, %357 : vector<32x64xf32>
    %359 = vector.extract_strided_slice %358 {offsets = [0, 0], sizes = [16, 64], strides = [1, 1]} : vector<32x64xf32> to vector<16x64xf32>
    %360 = vector.extract_strided_slice %358 {offsets = [16, 0], sizes = [16, 64], strides = [1, 1]} : vector<32x64xf32> to vector<16x64xf32>
    %361 = arith.maximumf %359, %360 : vector<16x64xf32>
    %c0_255 = arith.constant 0 : index
    %c0_256 = arith.constant 0 : index
    %362 = vector.load %arg15[%c0_255, %c0_256] : memref<16x64xf32, #tpu.memory_space<vmem>>, vector<16x64xf32>
    tpu.vector_store %arg15[%c0_255, %c0_256], %361 {strides = array<i32>} : memref<16x64xf32, #tpu.memory_space<vmem>>, vector<16x64xf32>,
    %c0_257 = arith.constant 0 : index
    %c0_258 = arith.constant 0 : index
    %363 = tpu.strided_load %arg15[%c0_257, %c0_258] {strides = array<i32: 2, 1>} : memref<16x64xf32, #tpu.memory_space<vmem>>, vector<7x64xf32>
    %c1_259 = arith.constant 1 : index
    %c0_260 = arith.constant 0 : index
    %364 = tpu.strided_load %arg15[%c1_259, %c0_260] {strides = array<i32: 2, 1>} : memref<16x64xf32, #tpu.memory_space<vmem>>, vector<7x64xf32>
    %365 = arith.maximumf %363, %364 : vector<7x64xf32>
    %c19 = arith.constant 19 : index
    %c0_261 = arith.constant 0 : index
    %366 = vector.load %arg13[%c19, %c0_261] : memref<88x64xf32, #tpu.memory_space<vmem>>, vector<7x64xf32>
    tpu.vector_store %arg13[%c19, %c0_261], %365 {strides = array<i32>} : memref<88x64xf32, #tpu.memory_space<vmem>>, vector<7x64xf32>,
    %cst_262 = arith.constant 0.000000e+00 : f32
    %367 = vector.broadcast %cst_262 : f32 to vector<32x64xf32>
    %c64_263 = arith.constant 64 : index
    %c0_264 = arith.constant 0 : index
    %368 = vector.load %arg12[%c64_263, %c0_264] : memref<264x32xf32, #tpu.memory_space<vmem>>, vector<32x32xf32>
    %369 = arith.truncf %368 : vector<32x32xf32> to vector<32x32xbf16>
    %c0_265 = arith.constant 0 : index
    %c0_266 = arith.constant 0 : index
    %370 = vector.load %arg5[%c0_265, %c0_266] : memref<288x64xbf16, #tpu.memory_space<vmem>>, vector<32x64xbf16>
    %cst_267 = arith.constant dense<0.000000e+00> : vector<32x64xf32>
    %371 = tpu.matmul %369, %370, %cst_267 {dimension_numbers = #tpu.dot_dimension_numbers<[1], [0], [0], [1], [0, 0, 1, 1], [], []>} : vector<32x32xbf16>, vector<32x64xbf16>, vector<32x64xf32> -> vector<32x64xf32>
    %372 = arith.addf %367, %371 : vector<32x64xf32>
    %c65_268 = arith.constant 65 : index
    %c0_269 = arith.constant 0 : index
    %373 = vector.load %arg12[%c65_268, %c0_269] : memref<264x32xf32, #tpu.memory_space<vmem>>, vector<32x32xf32>
    %374 = arith.truncf %373 : vector<32x32xf32> to vector<32x32xbf16>
    %c32_270 = arith.constant 32 : index
    %c0_271 = arith.constant 0 : index
    %375 = vector.load %arg5[%c32_270, %c0_271] : memref<288x64xbf16, #tpu.memory_space<vmem>>, vector<32x64xbf16>
    %cst_272 = arith.constant dense<0.000000e+00> : vector<32x64xf32>
    %376 = tpu.matmul %374, %375, %cst_272 {dimension_numbers = #tpu.dot_dimension_numbers<[1], [0], [0], [1], [0, 0, 1, 1], [], []>} : vector<32x32xbf16>, vector<32x64xbf16>, vector<32x64xf32> -> vector<32x64xf32>
    %377 = arith.addf %372, %376 : vector<32x64xf32>
    %c66_273 = arith.constant 66 : index
    %c0_274 = arith.constant 0 : index
    %378 = vector.load %arg12[%c66_273, %c0_274] : memref<264x32xf32, #tpu.memory_space<vmem>>, vector<32x32xf32>
    %379 = arith.truncf %378 : vector<32x32xf32> to vector<32x32xbf16>
    %c64_275 = arith.constant 64 : index
    %c0_276 = arith.constant 0 : index
    %380 = vector.load %arg5[%c64_275, %c0_276] : memref<288x64xbf16, #tpu.memory_space<vmem>>, vector<32x64xbf16>
    %cst_277 = arith.constant dense<0.000000e+00> : vector<32x64xf32>
    %381 = tpu.matmul %379, %380, %cst_277 {dimension_numbers = #tpu.dot_dimension_numbers<[1], [0], [0], [1], [0, 0, 1, 1], [], []>} : vector<32x32xbf16>, vector<32x64xbf16>, vector<32x64xf32> -> vector<32x64xf32>
    %382 = arith.addf %377, %381 : vector<32x64xf32>
    %c80 = arith.constant 80 : index
    %c0_278 = arith.constant 0 : index
    %383 = vector.load %arg12[%c80, %c0_278] : memref<264x32xf32, #tpu.memory_space<vmem>>, vector<32x32xf32>
    %384 = arith.truncf %383 : vector<32x32xf32> to vector<32x32xbf16>
    %c96_279 = arith.constant 96 : index
    %c0_280 = arith.constant 0 : index
    %385 = vector.load %arg5[%c96_279, %c0_280] : memref<288x64xbf16, #tpu.memory_space<vmem>>, vector<32x64xbf16>
    %cst_281 = arith.constant dense<0.000000e+00> : vector<32x64xf32>
    %386 = tpu.matmul %384, %385, %cst_281 {dimension_numbers = #tpu.dot_dimension_numbers<[1], [0], [0], [1], [0, 0, 1, 1], [], []>} : vector<32x32xbf16>, vector<32x64xbf16>, vector<32x64xf32> -> vector<32x64xf32>
    %387 = arith.addf %382, %386 : vector<32x64xf32>
    %c81_282 = arith.constant 81 : index
    %c0_283 = arith.constant 0 : index
    %388 = vector.load %arg12[%c81_282, %c0_283] : memref<264x32xf32, #tpu.memory_space<vmem>>, vector<32x32xf32>
    %389 = arith.truncf %388 : vector<32x32xf32> to vector<32x32xbf16>
    %c128_284 = arith.constant 128 : index
    %c0_285 = arith.constant 0 : index
    %390 = vector.load %arg5[%c128_284, %c0_285] : memref<288x64xbf16, #tpu.memory_space<vmem>>, vector<32x64xbf16>
    %cst_286 = arith.constant dense<0.000000e+00> : vector<32x64xf32>
    %391 = tpu.matmul %389, %390, %cst_286 {dimension_numbers = #tpu.dot_dimension_numbers<[1], [0], [0], [1], [0, 0, 1, 1], [], []>} : vector<32x32xbf16>, vector<32x64xbf16>, vector<32x64xf32> -> vector<32x64xf32>
    %392 = arith.addf %387, %391 : vector<32x64xf32>
    %c82 = arith.constant 82 : index
    %c0_287 = arith.constant 0 : index
    %393 = vector.load %arg12[%c82, %c0_287] : memref<264x32xf32, #tpu.memory_space<vmem>>, vector<32x32xf32>
    %394 = arith.truncf %393 : vector<32x32xf32> to vector<32x32xbf16>
    %c160_288 = arith.constant 160 : index
    %c0_289 = arith.constant 0 : index
    %395 = vector.load %arg5[%c160_288, %c0_289] : memref<288x64xbf16, #tpu.memory_space<vmem>>, vector<32x64xbf16>
    %cst_290 = arith.constant dense<0.000000e+00> : vector<32x64xf32>
    %396 = tpu.matmul %394, %395, %cst_290 {dimension_numbers = #tpu.dot_dimension_numbers<[1], [0], [0], [1], [0, 0, 1, 1], [], []>} : vector<32x32xbf16>, vector<32x64xbf16>, vector<32x64xf32> -> vector<32x64xf32>
    %397 = arith.addf %392, %396 : vector<32x64xf32>
    %c96_291 = arith.constant 96 : index
    %c0_292 = arith.constant 0 : index
    %398 = vector.load %arg12[%c96_291, %c0_292] : memref<264x32xf32, #tpu.memory_space<vmem>>, vector<32x32xf32>
    %399 = arith.truncf %398 : vector<32x32xf32> to vector<32x32xbf16>
    %c192_293 = arith.constant 192 : index
    %c0_294 = arith.constant 0 : index
    %400 = vector.load %arg5[%c192_293, %c0_294] : memref<288x64xbf16, #tpu.memory_space<vmem>>, vector<32x64xbf16>
    %cst_295 = arith.constant dense<0.000000e+00> : vector<32x64xf32>
    %401 = tpu.matmul %399, %400, %cst_295 {dimension_numbers = #tpu.dot_dimension_numbers<[1], [0], [0], [1], [0, 0, 1, 1], [], []>} : vector<32x32xbf16>, vector<32x64xbf16>, vector<32x64xf32> -> vector<32x64xf32>
    %402 = arith.addf %397, %401 : vector<32x64xf32>
    %c97_296 = arith.constant 97 : index
    %c0_297 = arith.constant 0 : index
    %403 = vector.load %arg12[%c97_296, %c0_297] : memref<264x32xf32, #tpu.memory_space<vmem>>, vector<32x32xf32>
    %404 = arith.truncf %403 : vector<32x32xf32> to vector<32x32xbf16>
    %c224_298 = arith.constant 224 : index
    %c0_299 = arith.constant 0 : index
    %405 = vector.load %arg5[%c224_298, %c0_299] : memref<288x64xbf16, #tpu.memory_space<vmem>>, vector<32x64xbf16>
    %cst_300 = arith.constant dense<0.000000e+00> : vector<32x64xf32>
    %406 = tpu.matmul %404, %405, %cst_300 {dimension_numbers = #tpu.dot_dimension_numbers<[1], [0], [0], [1], [0, 0, 1, 1], [], []>} : vector<32x32xbf16>, vector<32x64xbf16>, vector<32x64xf32> -> vector<32x64xf32>
    %407 = arith.addf %402, %406 : vector<32x64xf32>
    %c98 = arith.constant 98 : index
    %c0_301 = arith.constant 0 : index
    %408 = vector.load %arg12[%c98, %c0_301] : memref<264x32xf32, #tpu.memory_space<vmem>>, vector<32x32xf32>
    %409 = arith.truncf %408 : vector<32x32xf32> to vector<32x32xbf16>
    %c256_302 = arith.constant 256 : index
    %c0_303 = arith.constant 0 : index
    %410 = vector.load %arg5[%c256_302, %c0_303] : memref<288x64xbf16, #tpu.memory_space<vmem>>, vector<32x64xbf16>
    %cst_304 = arith.constant dense<0.000000e+00> : vector<32x64xf32>
    %411 = tpu.matmul %409, %410, %cst_304 {dimension_numbers = #tpu.dot_dimension_numbers<[1], [0], [0], [1], [0, 0, 1, 1], [], []>} : vector<32x32xbf16>, vector<32x64xbf16>, vector<32x64xf32> -> vector<32x64xf32>
    %412 = arith.addf %407, %411 : vector<32x64xf32>
    %413 = vector.broadcast %245 : vector<1x64xf32> to vector<32x64xf32>
    %414 = arith.mulf %412, %413 : vector<32x64xf32>
    %415 = vector.broadcast %246 : vector<1x64xf32> to vector<32x64xf32>
    %416 = arith.addf %414, %415 : vector<32x64xf32>
    %cst_305 = arith.constant 0.000000e+00 : f32
    %417 = vector.broadcast %cst_305 : f32 to vector<32x64xf32>
    %418 = arith.maximumf %416, %417 : vector<32x64xf32>
    %419 = vector.extract_strided_slice %418 {offsets = [0, 0], sizes = [16, 64], strides = [1, 1]} : vector<32x64xf32> to vector<16x64xf32>
    %420 = vector.extract_strided_slice %418 {offsets = [16, 0], sizes = [16, 64], strides = [1, 1]} : vector<32x64xf32> to vector<16x64xf32>
    %421 = arith.maximumf %419, %420 : vector<16x64xf32>
    %c0_306 = arith.constant 0 : index
    %c0_307 = arith.constant 0 : index
    %422 = vector.load %arg15[%c0_306, %c0_307] : memref<16x64xf32, #tpu.memory_space<vmem>>, vector<16x64xf32>
    tpu.vector_store %arg15[%c0_306, %c0_307], %421 {strides = array<i32>} : memref<16x64xf32, #tpu.memory_space<vmem>>, vector<16x64xf32>,
    %c0_308 = arith.constant 0 : index
    %c0_309 = arith.constant 0 : index
    %423 = tpu.strided_load %arg15[%c0_308, %c0_309] {strides = array<i32: 2, 1>} : memref<16x64xf32, #tpu.memory_space<vmem>>, vector<7x64xf32>
    %c1_310 = arith.constant 1 : index
    %c0_311 = arith.constant 0 : index
    %424 = tpu.strided_load %arg15[%c1_310, %c0_311] {strides = array<i32: 2, 1>} : memref<16x64xf32, #tpu.memory_space<vmem>>, vector<7x64xf32>
    %425 = arith.maximumf %423, %424 : vector<7x64xf32>
    %c28 = arith.constant 28 : index
    %c0_312 = arith.constant 0 : index
    %426 = vector.load %arg13[%c28, %c0_312] : memref<88x64xf32, #tpu.memory_space<vmem>>, vector<7x64xf32>
    tpu.vector_store %arg13[%c28, %c0_312], %425 {strides = array<i32>} : memref<88x64xf32, #tpu.memory_space<vmem>>, vector<7x64xf32>,
    %cst_313 = arith.constant 0.000000e+00 : f32
    %427 = vector.broadcast %cst_313 : f32 to vector<32x64xf32>
    %c96_314 = arith.constant 96 : index
    %c0_315 = arith.constant 0 : index
    %428 = vector.load %arg12[%c96_314, %c0_315] : memref<264x32xf32, #tpu.memory_space<vmem>>, vector<32x32xf32>
    %429 = arith.truncf %428 : vector<32x32xf32> to vector<32x32xbf16>
    %c0_316 = arith.constant 0 : index
    %c0_317 = arith.constant 0 : index
    %430 = vector.load %arg5[%c0_316, %c0_317] : memref<288x64xbf16, #tpu.memory_space<vmem>>, vector<32x64xbf16>
    %cst_318 = arith.constant dense<0.000000e+00> : vector<32x64xf32>
    %431 = tpu.matmul %429, %430, %cst_318 {dimension_numbers = #tpu.dot_dimension_numbers<[1], [0], [0], [1], [0, 0, 1, 1], [], []>} : vector<32x32xbf16>, vector<32x64xbf16>, vector<32x64xf32> -> vector<32x64xf32>
    %432 = arith.addf %427, %431 : vector<32x64xf32>
    %c97_319 = arith.constant 97 : index
    %c0_320 = arith.constant 0 : index
    %433 = vector.load %arg12[%c97_319, %c0_320] : memref<264x32xf32, #tpu.memory_space<vmem>>, vector<32x32xf32>
    %434 = arith.truncf %433 : vector<32x32xf32> to vector<32x32xbf16>
    %c32_321 = arith.constant 32 : index
    %c0_322 = arith.constant 0 : index
    %435 = vector.load %arg5[%c32_321, %c0_322] : memref<288x64xbf16, #tpu.memory_space<vmem>>, vector<32x64xbf16>
    %cst_323 = arith.constant dense<0.000000e+00> : vector<32x64xf32>
    %436 = tpu.matmul %434, %435, %cst_323 {dimension_numbers = #tpu.dot_dimension_numbers<[1], [0], [0], [1], [0, 0, 1, 1], [], []>} : vector<32x32xbf16>, vector<32x64xbf16>, vector<32x64xf32> -> vector<32x64xf32>
    %437 = arith.addf %432, %436 : vector<32x64xf32>
    %c98_324 = arith.constant 98 : index
    %c0_325 = arith.constant 0 : index
    %438 = vector.load %arg12[%c98_324, %c0_325] : memref<264x32xf32, #tpu.memory_space<vmem>>, vector<32x32xf32>
    %439 = arith.truncf %438 : vector<32x32xf32> to vector<32x32xbf16>
    %c64_326 = arith.constant 64 : index
    %c0_327 = arith.constant 0 : index
    %440 = vector.load %arg5[%c64_326, %c0_327] : memref<288x64xbf16, #tpu.memory_space<vmem>>, vector<32x64xbf16>
    %cst_328 = arith.constant dense<0.000000e+00> : vector<32x64xf32>
    %441 = tpu.matmul %439, %440, %cst_328 {dimension_numbers = #tpu.dot_dimension_numbers<[1], [0], [0], [1], [0, 0, 1, 1], [], []>} : vector<32x32xbf16>, vector<32x64xbf16>, vector<32x64xf32> -> vector<32x64xf32>
    %442 = arith.addf %437, %441 : vector<32x64xf32>
    %c112_329 = arith.constant 112 : index
    %c0_330 = arith.constant 0 : index
    %443 = vector.load %arg12[%c112_329, %c0_330] : memref<264x32xf32, #tpu.memory_space<vmem>>, vector<32x32xf32>
    %444 = arith.truncf %443 : vector<32x32xf32> to vector<32x32xbf16>
    %c96_331 = arith.constant 96 : index
    %c0_332 = arith.constant 0 : index
    %445 = vector.load %arg5[%c96_331, %c0_332] : memref<288x64xbf16, #tpu.memory_space<vmem>>, vector<32x64xbf16>
    %cst_333 = arith.constant dense<0.000000e+00> : vector<32x64xf32>
    %446 = tpu.matmul %444, %445, %cst_333 {dimension_numbers = #tpu.dot_dimension_numbers<[1], [0], [0], [1], [0, 0, 1, 1], [], []>} : vector<32x32xbf16>, vector<32x64xbf16>, vector<32x64xf32> -> vector<32x64xf32>
    %447 = arith.addf %442, %446 : vector<32x64xf32>
    %c113_334 = arith.constant 113 : index
    %c0_335 = arith.constant 0 : index
    %448 = vector.load %arg12[%c113_334, %c0_335] : memref<264x32xf32, #tpu.memory_space<vmem>>, vector<32x32xf32>
    %449 = arith.truncf %448 : vector<32x32xf32> to vector<32x32xbf16>
    %c128_336 = arith.constant 128 : index
    %c0_337 = arith.constant 0 : index
    %450 = vector.load %arg5[%c128_336, %c0_337] : memref<288x64xbf16, #tpu.memory_space<vmem>>, vector<32x64xbf16>
    %cst_338 = arith.constant dense<0.000000e+00> : vector<32x64xf32>
    %451 = tpu.matmul %449, %450, %cst_338 {dimension_numbers = #tpu.dot_dimension_numbers<[1], [0], [0], [1], [0, 0, 1, 1], [], []>} : vector<32x32xbf16>, vector<32x64xbf16>, vector<32x64xf32> -> vector<32x64xf32>
    %452 = arith.addf %447, %451 : vector<32x64xf32>
    %c114 = arith.constant 114 : index
    %c0_339 = arith.constant 0 : index
    %453 = vector.load %arg12[%c114, %c0_339] : memref<264x32xf32, #tpu.memory_space<vmem>>, vector<32x32xf32>
    %454 = arith.truncf %453 : vector<32x32xf32> to vector<32x32xbf16>
    %c160_340 = arith.constant 160 : index
    %c0_341 = arith.constant 0 : index
    %455 = vector.load %arg5[%c160_340, %c0_341] : memref<288x64xbf16, #tpu.memory_space<vmem>>, vector<32x64xbf16>
    %cst_342 = arith.constant dense<0.000000e+00> : vector<32x64xf32>
    %456 = tpu.matmul %454, %455, %cst_342 {dimension_numbers = #tpu.dot_dimension_numbers<[1], [0], [0], [1], [0, 0, 1, 1], [], []>} : vector<32x32xbf16>, vector<32x64xbf16>, vector<32x64xf32> -> vector<32x64xf32>
    %457 = arith.addf %452, %456 : vector<32x64xf32>
    %c128_343 = arith.constant 128 : index
    %c0_344 = arith.constant 0 : index
    %458 = vector.load %arg12[%c128_343, %c0_344] : memref<264x32xf32, #tpu.memory_space<vmem>>, vector<32x32xf32>
    %459 = arith.truncf %458 : vector<32x32xf32> to vector<32x32xbf16>
    %c192_345 = arith.constant 192 : index
    %c0_346 = arith.constant 0 : index
    %460 = vector.load %arg5[%c192_345, %c0_346] : memref<288x64xbf16, #tpu.memory_space<vmem>>, vector<32x64xbf16>
    %cst_347 = arith.constant dense<0.000000e+00> : vector<32x64xf32>
    %461 = tpu.matmul %459, %460, %cst_347 {dimension_numbers = #tpu.dot_dimension_numbers<[1], [0], [0], [1], [0, 0, 1, 1], [], []>} : vector<32x32xbf16>, vector<32x64xbf16>, vector<32x64xf32> -> vector<32x64xf32>
    %462 = arith.addf %457, %461 : vector<32x64xf32>
    %c129_348 = arith.constant 129 : index
    %c0_349 = arith.constant 0 : index
    %463 = vector.load %arg12[%c129_348, %c0_349] : memref<264x32xf32, #tpu.memory_space<vmem>>, vector<32x32xf32>
    %464 = arith.truncf %463 : vector<32x32xf32> to vector<32x32xbf16>
    %c224_350 = arith.constant 224 : index
    %c0_351 = arith.constant 0 : index
    %465 = vector.load %arg5[%c224_350, %c0_351] : memref<288x64xbf16, #tpu.memory_space<vmem>>, vector<32x64xbf16>
    %cst_352 = arith.constant dense<0.000000e+00> : vector<32x64xf32>
    %466 = tpu.matmul %464, %465, %cst_352 {dimension_numbers = #tpu.dot_dimension_numbers<[1], [0], [0], [1], [0, 0, 1, 1], [], []>} : vector<32x32xbf16>, vector<32x64xbf16>, vector<32x64xf32> -> vector<32x64xf32>
    %467 = arith.addf %462, %466 : vector<32x64xf32>
    %c130 = arith.constant 130 : index
    %c0_353 = arith.constant 0 : index
    %468 = vector.load %arg12[%c130, %c0_353] : memref<264x32xf32, #tpu.memory_space<vmem>>, vector<32x32xf32>
    %469 = arith.truncf %468 : vector<32x32xf32> to vector<32x32xbf16>
    %c256_354 = arith.constant 256 : index
    %c0_355 = arith.constant 0 : index
    %470 = vector.load %arg5[%c256_354, %c0_355] : memref<288x64xbf16, #tpu.memory_space<vmem>>, vector<32x64xbf16>
    %cst_356 = arith.constant dense<0.000000e+00> : vector<32x64xf32>
    %471 = tpu.matmul %469, %470, %cst_356 {dimension_numbers = #tpu.dot_dimension_numbers<[1], [0], [0], [1], [0, 0, 1, 1], [], []>} : vector<32x32xbf16>, vector<32x64xbf16>, vector<32x64xf32> -> vector<32x64xf32>
    %472 = arith.addf %467, %471 : vector<32x64xf32>
    %473 = vector.broadcast %245 : vector<1x64xf32> to vector<32x64xf32>
    %474 = arith.mulf %472, %473 : vector<32x64xf32>
    %475 = vector.broadcast %246 : vector<1x64xf32> to vector<32x64xf32>
    %476 = arith.addf %474, %475 : vector<32x64xf32>
    %cst_357 = arith.constant 0.000000e+00 : f32
    %477 = vector.broadcast %cst_357 : f32 to vector<32x64xf32>
    %478 = arith.maximumf %476, %477 : vector<32x64xf32>
    %479 = vector.extract_strided_slice %478 {offsets = [0, 0], sizes = [16, 64], strides = [1, 1]} : vector<32x64xf32> to vector<16x64xf32>
    %480 = vector.extract_strided_slice %478 {offsets = [16, 0], sizes = [16, 64], strides = [1, 1]} : vector<32x64xf32> to vector<16x64xf32>
    %481 = arith.maximumf %479, %480 : vector<16x64xf32>
    %c0_358 = arith.constant 0 : index
    %c0_359 = arith.constant 0 : index
    %482 = vector.load %arg15[%c0_358, %c0_359] : memref<16x64xf32, #tpu.memory_space<vmem>>, vector<16x64xf32>
    tpu.vector_store %arg15[%c0_358, %c0_359], %481 {strides = array<i32>} : memref<16x64xf32, #tpu.memory_space<vmem>>, vector<16x64xf32>,
    %c0_360 = arith.constant 0 : index
    %c0_361 = arith.constant 0 : index
    %483 = tpu.strided_load %arg15[%c0_360, %c0_361] {strides = array<i32: 2, 1>} : memref<16x64xf32, #tpu.memory_space<vmem>>, vector<7x64xf32>
    %c1_362 = arith.constant 1 : index
    %c0_363 = arith.constant 0 : index
    %484 = tpu.strided_load %arg15[%c1_362, %c0_363] {strides = array<i32: 2, 1>} : memref<16x64xf32, #tpu.memory_space<vmem>>, vector<7x64xf32>
    %485 = arith.maximumf %483, %484 : vector<7x64xf32>
    %c37 = arith.constant 37 : index
    %c0_364 = arith.constant 0 : index
    %486 = vector.load %arg13[%c37, %c0_364] : memref<88x64xf32, #tpu.memory_space<vmem>>, vector<7x64xf32>
    tpu.vector_store %arg13[%c37, %c0_364], %485 {strides = array<i32>} : memref<88x64xf32, #tpu.memory_space<vmem>>, vector<7x64xf32>,
    %cst_365 = arith.constant 0.000000e+00 : f32
    %487 = vector.broadcast %cst_365 : f32 to vector<32x64xf32>
    %c128_366 = arith.constant 128 : index
    %c0_367 = arith.constant 0 : index
    %488 = vector.load %arg12[%c128_366, %c0_367] : memref<264x32xf32, #tpu.memory_space<vmem>>, vector<32x32xf32>
    %489 = arith.truncf %488 : vector<32x32xf32> to vector<32x32xbf16>
    %c0_368 = arith.constant 0 : index
    %c0_369 = arith.constant 0 : index
    %490 = vector.load %arg5[%c0_368, %c0_369] : memref<288x64xbf16, #tpu.memory_space<vmem>>, vector<32x64xbf16>
    %cst_370 = arith.constant dense<0.000000e+00> : vector<32x64xf32>
    %491 = tpu.matmul %489, %490, %cst_370 {dimension_numbers = #tpu.dot_dimension_numbers<[1], [0], [0], [1], [0, 0, 1, 1], [], []>} : vector<32x32xbf16>, vector<32x64xbf16>, vector<32x64xf32> -> vector<32x64xf32>
    %492 = arith.addf %487, %491 : vector<32x64xf32>
    %c129_371 = arith.constant 129 : index
    %c0_372 = arith.constant 0 : index
    %493 = vector.load %arg12[%c129_371, %c0_372] : memref<264x32xf32, #tpu.memory_space<vmem>>, vector<32x32xf32>
    %494 = arith.truncf %493 : vector<32x32xf32> to vector<32x32xbf16>
    %c32_373 = arith.constant 32 : index
    %c0_374 = arith.constant 0 : index
    %495 = vector.load %arg5[%c32_373, %c0_374] : memref<288x64xbf16, #tpu.memory_space<vmem>>, vector<32x64xbf16>
    %cst_375 = arith.constant dense<0.000000e+00> : vector<32x64xf32>
    %496 = tpu.matmul %494, %495, %cst_375 {dimension_numbers = #tpu.dot_dimension_numbers<[1], [0], [0], [1], [0, 0, 1, 1], [], []>} : vector<32x32xbf16>, vector<32x64xbf16>, vector<32x64xf32> -> vector<32x64xf32>
    %497 = arith.addf %492, %496 : vector<32x64xf32>
    %c130_376 = arith.constant 130 : index
    %c0_377 = arith.constant 0 : index
    %498 = vector.load %arg12[%c130_376, %c0_377] : memref<264x32xf32, #tpu.memory_space<vmem>>, vector<32x32xf32>
    %499 = arith.truncf %498 : vector<32x32xf32> to vector<32x32xbf16>
    %c64_378 = arith.constant 64 : index
    %c0_379 = arith.constant 0 : index
    %500 = vector.load %arg5[%c64_378, %c0_379] : memref<288x64xbf16, #tpu.memory_space<vmem>>, vector<32x64xbf16>
    %cst_380 = arith.constant dense<0.000000e+00> : vector<32x64xf32>
    %501 = tpu.matmul %499, %500, %cst_380 {dimension_numbers = #tpu.dot_dimension_numbers<[1], [0], [0], [1], [0, 0, 1, 1], [], []>} : vector<32x32xbf16>, vector<32x64xbf16>, vector<32x64xf32> -> vector<32x64xf32>
    %502 = arith.addf %497, %501 : vector<32x64xf32>
    %c144 = arith.constant 144 : index
    %c0_381 = arith.constant 0 : index
    %503 = vector.load %arg12[%c144, %c0_381] : memref<264x32xf32, #tpu.memory_space<vmem>>, vector<32x32xf32>
    %504 = arith.truncf %503 : vector<32x32xf32> to vector<32x32xbf16>
    %c96_382 = arith.constant 96 : index
    %c0_383 = arith.constant 0 : index
    %505 = vector.load %arg5[%c96_382, %c0_383] : memref<288x64xbf16, #tpu.memory_space<vmem>>, vector<32x64xbf16>
    %cst_384 = arith.constant dense<0.000000e+00> : vector<32x64xf32>
    %506 = tpu.matmul %504, %505, %cst_384 {dimension_numbers = #tpu.dot_dimension_numbers<[1], [0], [0], [1], [0, 0, 1, 1], [], []>} : vector<32x32xbf16>, vector<32x64xbf16>, vector<32x64xf32> -> vector<32x64xf32>
    %507 = arith.addf %502, %506 : vector<32x64xf32>
    %c145_385 = arith.constant 145 : index
    %c0_386 = arith.constant 0 : index
    %508 = vector.load %arg12[%c145_385, %c0_386] : memref<264x32xf32, #tpu.memory_space<vmem>>, vector<32x32xf32>
    %509 = arith.truncf %508 : vector<32x32xf32> to vector<32x32xbf16>
    %c128_387 = arith.constant 128 : index
    %c0_388 = arith.constant 0 : index
    %510 = vector.load %arg5[%c128_387, %c0_388] : memref<288x64xbf16, #tpu.memory_space<vmem>>, vector<32x64xbf16>
    %cst_389 = arith.constant dense<0.000000e+00> : vector<32x64xf32>
    %511 = tpu.matmul %509, %510, %cst_389 {dimension_numbers = #tpu.dot_dimension_numbers<[1], [0], [0], [1], [0, 0, 1, 1], [], []>} : vector<32x32xbf16>, vector<32x64xbf16>, vector<32x64xf32> -> vector<32x64xf32>
    %512 = arith.addf %507, %511 : vector<32x64xf32>
    %c146 = arith.constant 146 : index
    %c0_390 = arith.constant 0 : index
    %513 = vector.load %arg12[%c146, %c0_390] : memref<264x32xf32, #tpu.memory_space<vmem>>, vector<32x32xf32>
    %514 = arith.truncf %513 : vector<32x32xf32> to vector<32x32xbf16>
    %c160_391 = arith.constant 160 : index
    %c0_392 = arith.constant 0 : index
    %515 = vector.load %arg5[%c160_391, %c0_392] : memref<288x64xbf16, #tpu.memory_space<vmem>>, vector<32x64xbf16>
    %cst_393 = arith.constant dense<0.000000e+00> : vector<32x64xf32>
    %516 = tpu.matmul %514, %515, %cst_393 {dimension_numbers = #tpu.dot_dimension_numbers<[1], [0], [0], [1], [0, 0, 1, 1], [], []>} : vector<32x32xbf16>, vector<32x64xbf16>, vector<32x64xf32> -> vector<32x64xf32>
    %517 = arith.addf %512, %516 : vector<32x64xf32>
    %c160_394 = arith.constant 160 : index
    %c0_395 = arith.constant 0 : index
    %518 = vector.load %arg12[%c160_394, %c0_395] : memref<264x32xf32, #tpu.memory_space<vmem>>, vector<32x32xf32>
    %519 = arith.truncf %518 : vector<32x32xf32> to vector<32x32xbf16>
    %c192_396 = arith.constant 192 : index
    %c0_397 = arith.constant 0 : index
    %520 = vector.load %arg5[%c192_396, %c0_397] : memref<288x64xbf16, #tpu.memory_space<vmem>>, vector<32x64xbf16>
    %cst_398 = arith.constant dense<0.000000e+00> : vector<32x64xf32>
    %521 = tpu.matmul %519, %520, %cst_398 {dimension_numbers = #tpu.dot_dimension_numbers<[1], [0], [0], [1], [0, 0, 1, 1], [], []>} : vector<32x32xbf16>, vector<32x64xbf16>, vector<32x64xf32> -> vector<32x64xf32>
    %522 = arith.addf %517, %521 : vector<32x64xf32>
    %c161_399 = arith.constant 161 : index
    %c0_400 = arith.constant 0 : index
    %523 = vector.load %arg12[%c161_399, %c0_400] : memref<264x32xf32, #tpu.memory_space<vmem>>, vector<32x32xf32>
    %524 = arith.truncf %523 : vector<32x32xf32> to vector<32x32xbf16>
    %c224_401 = arith.constant 224 : index
    %c0_402 = arith.constant 0 : index
    %525 = vector.load %arg5[%c224_401, %c0_402] : memref<288x64xbf16, #tpu.memory_space<vmem>>, vector<32x64xbf16>
    %cst_403 = arith.constant dense<0.000000e+00> : vector<32x64xf32>
    %526 = tpu.matmul %524, %525, %cst_403 {dimension_numbers = #tpu.dot_dimension_numbers<[1], [0], [0], [1], [0, 0, 1, 1], [], []>} : vector<32x32xbf16>, vector<32x64xbf16>, vector<32x64xf32> -> vector<32x64xf32>
    %527 = arith.addf %522, %526 : vector<32x64xf32>
    %c162 = arith.constant 162 : index
    %c0_404 = arith.constant 0 : index
    %528 = vector.load %arg12[%c162, %c0_404] : memref<264x32xf32, #tpu.memory_space<vmem>>, vector<32x32xf32>
    %529 = arith.truncf %528 : vector<32x32xf32> to vector<32x32xbf16>
    %c256_405 = arith.constant 256 : index
    %c0_406 = arith.constant 0 : index
    %530 = vector.load %arg5[%c256_405, %c0_406] : memref<288x64xbf16, #tpu.memory_space<vmem>>, vector<32x64xbf16>
    %cst_407 = arith.constant dense<0.000000e+00> : vector<32x64xf32>
    %531 = tpu.matmul %529, %530, %cst_407 {dimension_numbers = #tpu.dot_dimension_numbers<[1], [0], [0], [1], [0, 0, 1, 1], [], []>} : vector<32x32xbf16>, vector<32x64xbf16>, vector<32x64xf32> -> vector<32x64xf32>
    %532 = arith.addf %527, %531 : vector<32x64xf32>
    %533 = vector.broadcast %245 : vector<1x64xf32> to vector<32x64xf32>
    %534 = arith.mulf %532, %533 : vector<32x64xf32>
    %535 = vector.broadcast %246 : vector<1x64xf32> to vector<32x64xf32>
    %536 = arith.addf %534, %535 : vector<32x64xf32>
    %cst_408 = arith.constant 0.000000e+00 : f32
    %537 = vector.broadcast %cst_408 : f32 to vector<32x64xf32>
    %538 = arith.maximumf %536, %537 : vector<32x64xf32>
    %539 = vector.extract_strided_slice %538 {offsets = [0, 0], sizes = [16, 64], strides = [1, 1]} : vector<32x64xf32> to vector<16x64xf32>
    %540 = vector.extract_strided_slice %538 {offsets = [16, 0], sizes = [16, 64], strides = [1, 1]} : vector<32x64xf32> to vector<16x64xf32>
    %541 = arith.maximumf %539, %540 : vector<16x64xf32>
    %c0_409 = arith.constant 0 : index
    %c0_410 = arith.constant 0 : index
    %542 = vector.load %arg15[%c0_409, %c0_410] : memref<16x64xf32, #tpu.memory_space<vmem>>, vector<16x64xf32>
    tpu.vector_store %arg15[%c0_409, %c0_410], %541 {strides = array<i32>} : memref<16x64xf32, #tpu.memory_space<vmem>>, vector<16x64xf32>,
    %c0_411 = arith.constant 0 : index
    %c0_412 = arith.constant 0 : index
    %543 = tpu.strided_load %arg15[%c0_411, %c0_412] {strides = array<i32: 2, 1>} : memref<16x64xf32, #tpu.memory_space<vmem>>, vector<7x64xf32>
    %c1_413 = arith.constant 1 : index
    %c0_414 = arith.constant 0 : index
    %544 = tpu.strided_load %arg15[%c1_413, %c0_414] {strides = array<i32: 2, 1>} : memref<16x64xf32, #tpu.memory_space<vmem>>, vector<7x64xf32>
    %545 = arith.maximumf %543, %544 : vector<7x64xf32>
    %c46 = arith.constant 46 : index
    %c0_415 = arith.constant 0 : index
    %546 = vector.load %arg13[%c46, %c0_415] : memref<88x64xf32, #tpu.memory_space<vmem>>, vector<7x64xf32>
    tpu.vector_store %arg13[%c46, %c0_415], %545 {strides = array<i32>} : memref<88x64xf32, #tpu.memory_space<vmem>>, vector<7x64xf32>,
    %cst_416 = arith.constant 0.000000e+00 : f32
    %547 = vector.broadcast %cst_416 : f32 to vector<32x64xf32>
    %c160_417 = arith.constant 160 : index
    %c0_418 = arith.constant 0 : index
    %548 = vector.load %arg12[%c160_417, %c0_418] : memref<264x32xf32, #tpu.memory_space<vmem>>, vector<32x32xf32>
    %549 = arith.truncf %548 : vector<32x32xf32> to vector<32x32xbf16>
    %c0_419 = arith.constant 0 : index
    %c0_420 = arith.constant 0 : index
    %550 = vector.load %arg5[%c0_419, %c0_420] : memref<288x64xbf16, #tpu.memory_space<vmem>>, vector<32x64xbf16>
    %cst_421 = arith.constant dense<0.000000e+00> : vector<32x64xf32>
    %551 = tpu.matmul %549, %550, %cst_421 {dimension_numbers = #tpu.dot_dimension_numbers<[1], [0], [0], [1], [0, 0, 1, 1], [], []>} : vector<32x32xbf16>, vector<32x64xbf16>, vector<32x64xf32> -> vector<32x64xf32>
    %552 = arith.addf %547, %551 : vector<32x64xf32>
    %c161_422 = arith.constant 161 : index
    %c0_423 = arith.constant 0 : index
    %553 = vector.load %arg12[%c161_422, %c0_423] : memref<264x32xf32, #tpu.memory_space<vmem>>, vector<32x32xf32>
    %554 = arith.truncf %553 : vector<32x32xf32> to vector<32x32xbf16>
    %c32_424 = arith.constant 32 : index
    %c0_425 = arith.constant 0 : index
    %555 = vector.load %arg5[%c32_424, %c0_425] : memref<288x64xbf16, #tpu.memory_space<vmem>>, vector<32x64xbf16>
    %cst_426 = arith.constant dense<0.000000e+00> : vector<32x64xf32>
    %556 = tpu.matmul %554, %555, %cst_426 {dimension_numbers = #tpu.dot_dimension_numbers<[1], [0], [0], [1], [0, 0, 1, 1], [], []>} : vector<32x32xbf16>, vector<32x64xbf16>, vector<32x64xf32> -> vector<32x64xf32>
    %557 = arith.addf %552, %556 : vector<32x64xf32>
    %c162_427 = arith.constant 162 : index
    %c0_428 = arith.constant 0 : index
    %558 = vector.load %arg12[%c162_427, %c0_428] : memref<264x32xf32, #tpu.memory_space<vmem>>, vector<32x32xf32>
    %559 = arith.truncf %558 : vector<32x32xf32> to vector<32x32xbf16>
    %c64_429 = arith.constant 64 : index
    %c0_430 = arith.constant 0 : index
    %560 = vector.load %arg5[%c64_429, %c0_430] : memref<288x64xbf16, #tpu.memory_space<vmem>>, vector<32x64xbf16>
    %cst_431 = arith.constant dense<0.000000e+00> : vector<32x64xf32>
    %561 = tpu.matmul %559, %560, %cst_431 {dimension_numbers = #tpu.dot_dimension_numbers<[1], [0], [0], [1], [0, 0, 1, 1], [], []>} : vector<32x32xbf16>, vector<32x64xbf16>, vector<32x64xf32> -> vector<32x64xf32>
    %562 = arith.addf %557, %561 : vector<32x64xf32>
    %c176 = arith.constant 176 : index
    %c0_432 = arith.constant 0 : index
    %563 = vector.load %arg12[%c176, %c0_432] : memref<264x32xf32, #tpu.memory_space<vmem>>, vector<32x32xf32>
    %564 = arith.truncf %563 : vector<32x32xf32> to vector<32x32xbf16>
    %c96_433 = arith.constant 96 : index
    %c0_434 = arith.constant 0 : index
    %565 = vector.load %arg5[%c96_433, %c0_434] : memref<288x64xbf16, #tpu.memory_space<vmem>>, vector<32x64xbf16>
    %cst_435 = arith.constant dense<0.000000e+00> : vector<32x64xf32>
    %566 = tpu.matmul %564, %565, %cst_435 {dimension_numbers = #tpu.dot_dimension_numbers<[1], [0], [0], [1], [0, 0, 1, 1], [], []>} : vector<32x32xbf16>, vector<32x64xbf16>, vector<32x64xf32> -> vector<32x64xf32>
    %567 = arith.addf %562, %566 : vector<32x64xf32>
    %c177_436 = arith.constant 177 : index
    %c0_437 = arith.constant 0 : index
    %568 = vector.load %arg12[%c177_436, %c0_437] : memref<264x32xf32, #tpu.memory_space<vmem>>, vector<32x32xf32>
    %569 = arith.truncf %568 : vector<32x32xf32> to vector<32x32xbf16>
    %c128_438 = arith.constant 128 : index
    %c0_439 = arith.constant 0 : index
    %570 = vector.load %arg5[%c128_438, %c0_439] : memref<288x64xbf16, #tpu.memory_space<vmem>>, vector<32x64xbf16>
    %cst_440 = arith.constant dense<0.000000e+00> : vector<32x64xf32>
    %571 = tpu.matmul %569, %570, %cst_440 {dimension_numbers = #tpu.dot_dimension_numbers<[1], [0], [0], [1], [0, 0, 1, 1], [], []>} : vector<32x32xbf16>, vector<32x64xbf16>, vector<32x64xf32> -> vector<32x64xf32>
    %572 = arith.addf %567, %571 : vector<32x64xf32>
    %c178 = arith.constant 178 : index
    %c0_441 = arith.constant 0 : index
    %573 = vector.load %arg12[%c178, %c0_441] : memref<264x32xf32, #tpu.memory_space<vmem>>, vector<32x32xf32>
    %574 = arith.truncf %573 : vector<32x32xf32> to vector<32x32xbf16>
    %c160_442 = arith.constant 160 : index
    %c0_443 = arith.constant 0 : index
    %575 = vector.load %arg5[%c160_442, %c0_443] : memref<288x64xbf16, #tpu.memory_space<vmem>>, vector<32x64xbf16>
    %cst_444 = arith.constant dense<0.000000e+00> : vector<32x64xf32>
    %576 = tpu.matmul %574, %575, %cst_444 {dimension_numbers = #tpu.dot_dimension_numbers<[1], [0], [0], [1], [0, 0, 1, 1], [], []>} : vector<32x32xbf16>, vector<32x64xbf16>, vector<32x64xf32> -> vector<32x64xf32>
    %577 = arith.addf %572, %576 : vector<32x64xf32>
    %c192_445 = arith.constant 192 : index
    %c0_446 = arith.constant 0 : index
    %578 = vector.load %arg12[%c192_445, %c0_446] : memref<264x32xf32, #tpu.memory_space<vmem>>, vector<32x32xf32>
    %579 = arith.truncf %578 : vector<32x32xf32> to vector<32x32xbf16>
    %c192_447 = arith.constant 192 : index
    %c0_448 = arith.constant 0 : index
    %580 = vector.load %arg5[%c192_447, %c0_448] : memref<288x64xbf16, #tpu.memory_space<vmem>>, vector<32x64xbf16>
    %cst_449 = arith.constant dense<0.000000e+00> : vector<32x64xf32>
    %581 = tpu.matmul %579, %580, %cst_449 {dimension_numbers = #tpu.dot_dimension_numbers<[1], [0], [0], [1], [0, 0, 1, 1], [], []>} : vector<32x32xbf16>, vector<32x64xbf16>, vector<32x64xf32> -> vector<32x64xf32>
    %582 = arith.addf %577, %581 : vector<32x64xf32>
    %c193_450 = arith.constant 193 : index
    %c0_451 = arith.constant 0 : index
    %583 = vector.load %arg12[%c193_450, %c0_451] : memref<264x32xf32, #tpu.memory_space<vmem>>, vector<32x32xf32>
    %584 = arith.truncf %583 : vector<32x32xf32> to vector<32x32xbf16>
    %c224_452 = arith.constant 224 : index
    %c0_453 = arith.constant 0 : index
    %585 = vector.load %arg5[%c224_452, %c0_453] : memref<288x64xbf16, #tpu.memory_space<vmem>>, vector<32x64xbf16>
    %cst_454 = arith.constant dense<0.000000e+00> : vector<32x64xf32>
    %586 = tpu.matmul %584, %585, %cst_454 {dimension_numbers = #tpu.dot_dimension_numbers<[1], [0], [0], [1], [0, 0, 1, 1], [], []>} : vector<32x32xbf16>, vector<32x64xbf16>, vector<32x64xf32> -> vector<32x64xf32>
    %587 = arith.addf %582, %586 : vector<32x64xf32>
    %c194 = arith.constant 194 : index
    %c0_455 = arith.constant 0 : index
    %588 = vector.load %arg12[%c194, %c0_455] : memref<264x32xf32, #tpu.memory_space<vmem>>, vector<32x32xf32>
    %589 = arith.truncf %588 : vector<32x32xf32> to vector<32x32xbf16>
    %c256_456 = arith.constant 256 : index
    %c0_457 = arith.constant 0 : index
    %590 = vector.load %arg5[%c256_456, %c0_457] : memref<288x64xbf16, #tpu.memory_space<vmem>>, vector<32x64xbf16>
    %cst_458 = arith.constant dense<0.000000e+00> : vector<32x64xf32>
    %591 = tpu.matmul %589, %590, %cst_458 {dimension_numbers = #tpu.dot_dimension_numbers<[1], [0], [0], [1], [0, 0, 1, 1], [], []>} : vector<32x32xbf16>, vector<32x64xbf16>, vector<32x64xf32> -> vector<32x64xf32>
    %592 = arith.addf %587, %591 : vector<32x64xf32>
    %593 = vector.broadcast %245 : vector<1x64xf32> to vector<32x64xf32>
    %594 = arith.mulf %592, %593 : vector<32x64xf32>
    %595 = vector.broadcast %246 : vector<1x64xf32> to vector<32x64xf32>
    %596 = arith.addf %594, %595 : vector<32x64xf32>
    %cst_459 = arith.constant 0.000000e+00 : f32
    %597 = vector.broadcast %cst_459 : f32 to vector<32x64xf32>
    %598 = arith.maximumf %596, %597 : vector<32x64xf32>
    %599 = vector.extract_strided_slice %598 {offsets = [0, 0], sizes = [16, 64], strides = [1, 1]} : vector<32x64xf32> to vector<16x64xf32>
    %600 = vector.extract_strided_slice %598 {offsets = [16, 0], sizes = [16, 64], strides = [1, 1]} : vector<32x64xf32> to vector<16x64xf32>
    %601 = arith.maximumf %599, %600 : vector<16x64xf32>
    %c0_460 = arith.constant 0 : index
    %c0_461 = arith.constant 0 : index
    %602 = vector.load %arg15[%c0_460, %c0_461] : memref<16x64xf32, #tpu.memory_space<vmem>>, vector<16x64xf32>
    tpu.vector_store %arg15[%c0_460, %c0_461], %601 {strides = array<i32>} : memref<16x64xf32, #tpu.memory_space<vmem>>, vector<16x64xf32>,
    %c0_462 = arith.constant 0 : index
    %c0_463 = arith.constant 0 : index
    %603 = tpu.strided_load %arg15[%c0_462, %c0_463] {strides = array<i32: 2, 1>} : memref<16x64xf32, #tpu.memory_space<vmem>>, vector<7x64xf32>
    %c1_464 = arith.constant 1 : index
    %c0_465 = arith.constant 0 : index
    %604 = tpu.strided_load %arg15[%c1_464, %c0_465] {strides = array<i32: 2, 1>} : memref<16x64xf32, #tpu.memory_space<vmem>>, vector<7x64xf32>
    %605 = arith.maximumf %603, %604 : vector<7x64xf32>
    %c55 = arith.constant 55 : index
    %c0_466 = arith.constant 0 : index
    %606 = vector.load %arg13[%c55, %c0_466] : memref<88x64xf32, #tpu.memory_space<vmem>>, vector<7x64xf32>
    tpu.vector_store %arg13[%c55, %c0_466], %605 {strides = array<i32>} : memref<88x64xf32, #tpu.memory_space<vmem>>, vector<7x64xf32>,
    %cst_467 = arith.constant 0.000000e+00 : f32
    %607 = vector.broadcast %cst_467 : f32 to vector<32x64xf32>
    %c192_468 = arith.constant 192 : index
    %c0_469 = arith.constant 0 : index
    %608 = vector.load %arg12[%c192_468, %c0_469] : memref<264x32xf32, #tpu.memory_space<vmem>>, vector<32x32xf32>
    %609 = arith.truncf %608 : vector<32x32xf32> to vector<32x32xbf16>
    %c0_470 = arith.constant 0 : index
    %c0_471 = arith.constant 0 : index
    %610 = vector.load %arg5[%c0_470, %c0_471] : memref<288x64xbf16, #tpu.memory_space<vmem>>, vector<32x64xbf16>
    %cst_472 = arith.constant dense<0.000000e+00> : vector<32x64xf32>
    %611 = tpu.matmul %609, %610, %cst_472 {dimension_numbers = #tpu.dot_dimension_numbers<[1], [0], [0], [1], [0, 0, 1, 1], [], []>} : vector<32x32xbf16>, vector<32x64xbf16>, vector<32x64xf32> -> vector<32x64xf32>
    %612 = arith.addf %607, %611 : vector<32x64xf32>
    %c193_473 = arith.constant 193 : index
    %c0_474 = arith.constant 0 : index
    %613 = vector.load %arg12[%c193_473, %c0_474] : memref<264x32xf32, #tpu.memory_space<vmem>>, vector<32x32xf32>
    %614 = arith.truncf %613 : vector<32x32xf32> to vector<32x32xbf16>
    %c32_475 = arith.constant 32 : index
    %c0_476 = arith.constant 0 : index
    %615 = vector.load %arg5[%c32_475, %c0_476] : memref<288x64xbf16, #tpu.memory_space<vmem>>, vector<32x64xbf16>
    %cst_477 = arith.constant dense<0.000000e+00> : vector<32x64xf32>
    %616 = tpu.matmul %614, %615, %cst_477 {dimension_numbers = #tpu.dot_dimension_numbers<[1], [0], [0], [1], [0, 0, 1, 1], [], []>} : vector<32x32xbf16>, vector<32x64xbf16>, vector<32x64xf32> -> vector<32x64xf32>
    %617 = arith.addf %612, %616 : vector<32x64xf32>
    %c194_478 = arith.constant 194 : index
    %c0_479 = arith.constant 0 : index
    %618 = vector.load %arg12[%c194_478, %c0_479] : memref<264x32xf32, #tpu.memory_space<vmem>>, vector<32x32xf32>
    %619 = arith.truncf %618 : vector<32x32xf32> to vector<32x32xbf16>
    %c64_480 = arith.constant 64 : index
    %c0_481 = arith.constant 0 : index
    %620 = vector.load %arg5[%c64_480, %c0_481] : memref<288x64xbf16, #tpu.memory_space<vmem>>, vector<32x64xbf16>
    %cst_482 = arith.constant dense<0.000000e+00> : vector<32x64xf32>
    %621 = tpu.matmul %619, %620, %cst_482 {dimension_numbers = #tpu.dot_dimension_numbers<[1], [0], [0], [1], [0, 0, 1, 1], [], []>} : vector<32x32xbf16>, vector<32x64xbf16>, vector<32x64xf32> -> vector<32x64xf32>
    %622 = arith.addf %617, %621 : vector<32x64xf32>
    %c208 = arith.constant 208 : index
    %c0_483 = arith.constant 0 : index
    %623 = vector.load %arg12[%c208, %c0_483] : memref<264x32xf32, #tpu.memory_space<vmem>>, vector<32x32xf32>
    %624 = arith.truncf %623 : vector<32x32xf32> to vector<32x32xbf16>
    %c96_484 = arith.constant 96 : index
    %c0_485 = arith.constant 0 : index
    %625 = vector.load %arg5[%c96_484, %c0_485] : memref<288x64xbf16, #tpu.memory_space<vmem>>, vector<32x64xbf16>
    %cst_486 = arith.constant dense<0.000000e+00> : vector<32x64xf32>
    %626 = tpu.matmul %624, %625, %cst_486 {dimension_numbers = #tpu.dot_dimension_numbers<[1], [0], [0], [1], [0, 0, 1, 1], [], []>} : vector<32x32xbf16>, vector<32x64xbf16>, vector<32x64xf32> -> vector<32x64xf32>
    %627 = arith.addf %622, %626 : vector<32x64xf32>
    %c209_487 = arith.constant 209 : index
    %c0_488 = arith.constant 0 : index
    %628 = vector.load %arg12[%c209_487, %c0_488] : memref<264x32xf32, #tpu.memory_space<vmem>>, vector<32x32xf32>
    %629 = arith.truncf %628 : vector<32x32xf32> to vector<32x32xbf16>
    %c128_489 = arith.constant 128 : index
    %c0_490 = arith.constant 0 : index
    %630 = vector.load %arg5[%c128_489, %c0_490] : memref<288x64xbf16, #tpu.memory_space<vmem>>, vector<32x64xbf16>
    %cst_491 = arith.constant dense<0.000000e+00> : vector<32x64xf32>
    %631 = tpu.matmul %629, %630, %cst_491 {dimension_numbers = #tpu.dot_dimension_numbers<[1], [0], [0], [1], [0, 0, 1, 1], [], []>} : vector<32x32xbf16>, vector<32x64xbf16>, vector<32x64xf32> -> vector<32x64xf32>
    %632 = arith.addf %627, %631 : vector<32x64xf32>
    %c210 = arith.constant 210 : index
    %c0_492 = arith.constant 0 : index
    %633 = vector.load %arg12[%c210, %c0_492] : memref<264x32xf32, #tpu.memory_space<vmem>>, vector<32x32xf32>
    %634 = arith.truncf %633 : vector<32x32xf32> to vector<32x32xbf16>
    %c160_493 = arith.constant 160 : index
    %c0_494 = arith.constant 0 : index
    %635 = vector.load %arg5[%c160_493, %c0_494] : memref<288x64xbf16, #tpu.memory_space<vmem>>, vector<32x64xbf16>
    %cst_495 = arith.constant dense<0.000000e+00> : vector<32x64xf32>
    %636 = tpu.matmul %634, %635, %cst_495 {dimension_numbers = #tpu.dot_dimension_numbers<[1], [0], [0], [1], [0, 0, 1, 1], [], []>} : vector<32x32xbf16>, vector<32x64xbf16>, vector<32x64xf32> -> vector<32x64xf32>
    %637 = arith.addf %632, %636 : vector<32x64xf32>
    %c224_496 = arith.constant 224 : index
    %c0_497 = arith.constant 0 : index
    %638 = vector.load %arg12[%c224_496, %c0_497] : memref<264x32xf32, #tpu.memory_space<vmem>>, vector<32x32xf32>
    %639 = arith.truncf %638 : vector<32x32xf32> to vector<32x32xbf16>
    %c192_498 = arith.constant 192 : index
    %c0_499 = arith.constant 0 : index
    %640 = vector.load %arg5[%c192_498, %c0_499] : memref<288x64xbf16, #tpu.memory_space<vmem>>, vector<32x64xbf16>
    %cst_500 = arith.constant dense<0.000000e+00> : vector<32x64xf32>
    %641 = tpu.matmul %639, %640, %cst_500 {dimension_numbers = #tpu.dot_dimension_numbers<[1], [0], [0], [1], [0, 0, 1, 1], [], []>} : vector<32x32xbf16>, vector<32x64xbf16>, vector<32x64xf32> -> vector<32x64xf32>
    %642 = arith.addf %637, %641 : vector<32x64xf32>
    %c225_501 = arith.constant 225 : index
    %c0_502 = arith.constant 0 : index
    %643 = vector.load %arg12[%c225_501, %c0_502] : memref<264x32xf32, #tpu.memory_space<vmem>>, vector<32x32xf32>
    %644 = arith.truncf %643 : vector<32x32xf32> to vector<32x32xbf16>
    %c224_503 = arith.constant 224 : index
    %c0_504 = arith.constant 0 : index
    %645 = vector.load %arg5[%c224_503, %c0_504] : memref<288x64xbf16, #tpu.memory_space<vmem>>, vector<32x64xbf16>
    %cst_505 = arith.constant dense<0.000000e+00> : vector<32x64xf32>
    %646 = tpu.matmul %644, %645, %cst_505 {dimension_numbers = #tpu.dot_dimension_numbers<[1], [0], [0], [1], [0, 0, 1, 1], [], []>} : vector<32x32xbf16>, vector<32x64xbf16>, vector<32x64xf32> -> vector<32x64xf32>
    %647 = arith.addf %642, %646 : vector<32x64xf32>
    %c226 = arith.constant 226 : index
    %c0_506 = arith.constant 0 : index
    %648 = vector.load %arg12[%c226, %c0_506] : memref<264x32xf32, #tpu.memory_space<vmem>>, vector<32x32xf32>
    %649 = arith.truncf %648 : vector<32x32xf32> to vector<32x32xbf16>
    %c256_507 = arith.constant 256 : index
    %c0_508 = arith.constant 0 : index
    %650 = vector.load %arg5[%c256_507, %c0_508] : memref<288x64xbf16, #tpu.memory_space<vmem>>, vector<32x64xbf16>
    %cst_509 = arith.constant dense<0.000000e+00> : vector<32x64xf32>
    %651 = tpu.matmul %649, %650, %cst_509 {dimension_numbers = #tpu.dot_dimension_numbers<[1], [0], [0], [1], [0, 0, 1, 1], [], []>} : vector<32x32xbf16>, vector<32x64xbf16>, vector<32x64xf32> -> vector<32x64xf32>
    %652 = arith.addf %647, %651 : vector<32x64xf32>
    %653 = vector.broadcast %245 : vector<1x64xf32> to vector<32x64xf32>
    %654 = arith.mulf %652, %653 : vector<32x64xf32>
    %655 = vector.broadcast %246 : vector<1x64xf32> to vector<32x64xf32>
    %656 = arith.addf %654, %655 : vector<32x64xf32>
    %cst_510 = arith.constant 0.000000e+00 : f32
    %657 = vector.broadcast %cst_510 : f32 to vector<32x64xf32>
    %658 = arith.maximumf %656, %657 : vector<32x64xf32>
    %659 = vector.extract_strided_slice %658 {offsets = [0, 0], sizes = [16, 64], strides = [1, 1]} : vector<32x64xf32> to vector<16x64xf32>
    %660 = vector.extract_strided_slice %658 {offsets = [16, 0], sizes = [16, 64], strides = [1, 1]} : vector<32x64xf32> to vector<16x64xf32>
    %661 = arith.maximumf %659, %660 : vector<16x64xf32>
    %c0_511 = arith.constant 0 : index
    %c0_512 = arith.constant 0 : index
    %662 = vector.load %arg15[%c0_511, %c0_512] : memref<16x64xf32, #tpu.memory_space<vmem>>, vector<16x64xf32>
    tpu.vector_store %arg15[%c0_511, %c0_512], %661 {strides = array<i32>} : memref<16x64xf32, #tpu.memory_space<vmem>>, vector<16x64xf32>,
    %c0_513 = arith.constant 0 : index
    %c0_514 = arith.constant 0 : index
    %663 = tpu.strided_load %arg15[%c0_513, %c0_514] {strides = array<i32: 2, 1>} : memref<16x64xf32, #tpu.memory_space<vmem>>, vector<7x64xf32>
    %c1_515 = arith.constant 1 : index
    %c0_516 = arith.constant 0 : index
    %664 = tpu.strided_load %arg15[%c1_515, %c0_516] {strides = array<i32: 2, 1>} : memref<16x64xf32, #tpu.memory_space<vmem>>, vector<7x64xf32>
    %665 = arith.maximumf %663, %664 : vector<7x64xf32>
    %c64_517 = arith.constant 64 : index
    %c0_518 = arith.constant 0 : index
    %666 = vector.load %arg13[%c64_517, %c0_518] : memref<88x64xf32, #tpu.memory_space<vmem>>, vector<7x64xf32>
    tpu.vector_store %arg13[%c64_517, %c0_518], %665 {strides = array<i32>} : memref<88x64xf32, #tpu.memory_space<vmem>>, vector<7x64xf32>,
    %c0_519 = arith.constant 0 : index
    %c0_520 = arith.constant 0 : index
    %667 = vector.load %arg9[%c0_519, %c0_520] : memref<1x128xf32, #tpu.memory_space<vmem>>, vector<1x128xf32>
    %c0_521 = arith.constant 0 : index
    %c0_522 = arith.constant 0 : index
    %668 = vector.load %arg10[%c0_521, %c0_522] : memref<1x128xf32, #tpu.memory_space<vmem>>, vector<1x128xf32>
    %cst_523 = arith.constant 0.000000e+00 : f32
    %669 = vector.broadcast %cst_523 : f32 to vector<64x128xf32>
    %c0_524 = arith.constant 0 : index
    %c0_525 = arith.constant 0 : index
    %670 = vector.load %arg13[%c0_524, %c0_525] : memref<88x64xf32, #tpu.memory_space<vmem>>, vector<64x64xf32>
    %671 = arith.truncf %670 : vector<64x64xf32> to vector<64x64xbf16>
    %c0_526 = arith.constant 0 : index
    %c0_527 = arith.constant 0 : index
    %672 = vector.load %arg8[%c0_526, %c0_527] : memref<576x128xbf16, #tpu.memory_space<vmem>>, vector<64x128xbf16>
    %cst_528 = arith.constant dense<0.000000e+00> : vector<64x128xf32>
    %673 = tpu.matmul %671, %672, %cst_528 {dimension_numbers = #tpu.dot_dimension_numbers<[1], [0], [0], [1], [0, 0, 1, 1], [], []>} : vector<64x64xbf16>, vector<64x128xbf16>, vector<64x128xf32> -> vector<64x128xf32>
    %674 = arith.addf %669, %673 : vector<64x128xf32>
    %c1_529 = arith.constant 1 : index
    %c0_530 = arith.constant 0 : index
    %675 = vector.load %arg13[%c1_529, %c0_530] : memref<88x64xf32, #tpu.memory_space<vmem>>, vector<64x64xf32>
    %676 = arith.truncf %675 : vector<64x64xf32> to vector<64x64xbf16>
    %c64_531 = arith.constant 64 : index
    %c0_532 = arith.constant 0 : index
    %677 = vector.load %arg8[%c64_531, %c0_532] : memref<576x128xbf16, #tpu.memory_space<vmem>>, vector<64x128xbf16>
    %cst_533 = arith.constant dense<0.000000e+00> : vector<64x128xf32>
    %678 = tpu.matmul %676, %677, %cst_533 {dimension_numbers = #tpu.dot_dimension_numbers<[1], [0], [0], [1], [0, 0, 1, 1], [], []>} : vector<64x64xbf16>, vector<64x128xbf16>, vector<64x128xf32> -> vector<64x128xf32>
    %679 = arith.addf %674, %678 : vector<64x128xf32>
    %c2_534 = arith.constant 2 : index
    %c0_535 = arith.constant 0 : index
    %680 = vector.load %arg13[%c2_534, %c0_535] : memref<88x64xf32, #tpu.memory_space<vmem>>, vector<64x64xf32>
    %681 = arith.truncf %680 : vector<64x64xf32> to vector<64x64xbf16>
    %c128_536 = arith.constant 128 : index
    %c0_537 = arith.constant 0 : index
    %682 = vector.load %arg8[%c128_536, %c0_537] : memref<576x128xbf16, #tpu.memory_space<vmem>>, vector<64x128xbf16>
    %cst_538 = arith.constant dense<0.000000e+00> : vector<64x128xf32>
    %683 = tpu.matmul %681, %682, %cst_538 {dimension_numbers = #tpu.dot_dimension_numbers<[1], [0], [0], [1], [0, 0, 1, 1], [], []>} : vector<64x64xbf16>, vector<64x128xbf16>, vector<64x128xf32> -> vector<64x128xf32>
    %684 = arith.addf %679, %683 : vector<64x128xf32>
    %c9 = arith.constant 9 : index
    %c0_539 = arith.constant 0 : index
    %685 = vector.load %arg13[%c9, %c0_539] : memref<88x64xf32, #tpu.memory_space<vmem>>, vector<64x64xf32>
    %686 = arith.truncf %685 : vector<64x64xf32> to vector<64x64xbf16>
    %c192_540 = arith.constant 192 : index
    %c0_541 = arith.constant 0 : index
    %687 = vector.load %arg8[%c192_540, %c0_541] : memref<576x128xbf16, #tpu.memory_space<vmem>>, vector<64x128xbf16>
    %cst_542 = arith.constant dense<0.000000e+00> : vector<64x128xf32>
    %688 = tpu.matmul %686, %687, %cst_542 {dimension_numbers = #tpu.dot_dimension_numbers<[1], [0], [0], [1], [0, 0, 1, 1], [], []>} : vector<64x64xbf16>, vector<64x128xbf16>, vector<64x128xf32> -> vector<64x128xf32>
    %689 = arith.addf %684, %688 : vector<64x128xf32>
    %c10_543 = arith.constant 10 : index
    %c0_544 = arith.constant 0 : index
    %690 = vector.load %arg13[%c10_543, %c0_544] : memref<88x64xf32, #tpu.memory_space<vmem>>, vector<64x64xf32>
    %691 = arith.truncf %690 : vector<64x64xf32> to vector<64x64xbf16>
    %c256_545 = arith.constant 256 : index
    %c0_546 = arith.constant 0 : index
    %692 = vector.load %arg8[%c256_545, %c0_546] : memref<576x128xbf16, #tpu.memory_space<vmem>>, vector<64x128xbf16>
    %cst_547 = arith.constant dense<0.000000e+00> : vector<64x128xf32>
    %693 = tpu.matmul %691, %692, %cst_547 {dimension_numbers = #tpu.dot_dimension_numbers<[1], [0], [0], [1], [0, 0, 1, 1], [], []>} : vector<64x64xbf16>, vector<64x128xbf16>, vector<64x128xf32> -> vector<64x128xf32>
    %694 = arith.addf %689, %693 : vector<64x128xf32>
    %c11 = arith.constant 11 : index
    %c0_548 = arith.constant 0 : index
    %695 = vector.load %arg13[%c11, %c0_548] : memref<88x64xf32, #tpu.memory_space<vmem>>, vector<64x64xf32>
    %696 = arith.truncf %695 : vector<64x64xf32> to vector<64x64xbf16>
    %c320 = arith.constant 320 : index
    %c0_549 = arith.constant 0 : index
    %697 = vector.load %arg8[%c320, %c0_549] : memref<576x128xbf16, #tpu.memory_space<vmem>>, vector<64x128xbf16>
    %cst_550 = arith.constant dense<0.000000e+00> : vector<64x128xf32>
    %698 = tpu.matmul %696, %697, %cst_550 {dimension_numbers = #tpu.dot_dimension_numbers<[1], [0], [0], [1], [0, 0, 1, 1], [], []>} : vector<64x64xbf16>, vector<64x128xbf16>, vector<64x128xf32> -> vector<64x128xf32>
    %699 = arith.addf %694, %698 : vector<64x128xf32>
    %c18_551 = arith.constant 18 : index
    %c0_552 = arith.constant 0 : index
    %700 = vector.load %arg13[%c18_551, %c0_552] : memref<88x64xf32, #tpu.memory_space<vmem>>, vector<64x64xf32>
    %701 = arith.truncf %700 : vector<64x64xf32> to vector<64x64xbf16>
    %c384 = arith.constant 384 : index
    %c0_553 = arith.constant 0 : index
    %702 = vector.load %arg8[%c384, %c0_553] : memref<576x128xbf16, #tpu.memory_space<vmem>>, vector<64x128xbf16>
    %cst_554 = arith.constant dense<0.000000e+00> : vector<64x128xf32>
    %703 = tpu.matmul %701, %702, %cst_554 {dimension_numbers = #tpu.dot_dimension_numbers<[1], [0], [0], [1], [0, 0, 1, 1], [], []>} : vector<64x64xbf16>, vector<64x128xbf16>, vector<64x128xf32> -> vector<64x128xf32>
    %704 = arith.addf %699, %703 : vector<64x128xf32>
    %c19_555 = arith.constant 19 : index
    %c0_556 = arith.constant 0 : index
    %705 = vector.load %arg13[%c19_555, %c0_556] : memref<88x64xf32, #tpu.memory_space<vmem>>, vector<64x64xf32>
    %706 = arith.truncf %705 : vector<64x64xf32> to vector<64x64xbf16>
    %c448_557 = arith.constant 448 : index
    %c0_558 = arith.constant 0 : index
    %707 = vector.load %arg8[%c448_557, %c0_558] : memref<576x128xbf16, #tpu.memory_space<vmem>>, vector<64x128xbf16>
    %cst_559 = arith.constant dense<0.000000e+00> : vector<64x128xf32>
    %708 = tpu.matmul %706, %707, %cst_559 {dimension_numbers = #tpu.dot_dimension_numbers<[1], [0], [0], [1], [0, 0, 1, 1], [], []>} : vector<64x64xbf16>, vector<64x128xbf16>, vector<64x128xf32> -> vector<64x128xf32>
    %709 = arith.addf %704, %708 : vector<64x128xf32>
    %c20 = arith.constant 20 : index
    %c0_560 = arith.constant 0 : index
    %710 = vector.load %arg13[%c20, %c0_560] : memref<88x64xf32, #tpu.memory_space<vmem>>, vector<64x64xf32>
    %711 = arith.truncf %710 : vector<64x64xf32> to vector<64x64xbf16>
    %c512 = arith.constant 512 : index
    %c0_561 = arith.constant 0 : index
    %712 = vector.load %arg8[%c512, %c0_561] : memref<576x128xbf16, #tpu.memory_space<vmem>>, vector<64x128xbf16>
    %cst_562 = arith.constant dense<0.000000e+00> : vector<64x128xf32>
    %713 = tpu.matmul %711, %712, %cst_562 {dimension_numbers = #tpu.dot_dimension_numbers<[1], [0], [0], [1], [0, 0, 1, 1], [], []>} : vector<64x64xbf16>, vector<64x128xbf16>, vector<64x128xf32> -> vector<64x128xf32>
    %714 = arith.addf %709, %713 : vector<64x128xf32>
    %715 = vector.broadcast %667 : vector<1x128xf32> to vector<64x128xf32>
    %716 = arith.mulf %714, %715 : vector<64x128xf32>
    %717 = vector.broadcast %668 : vector<1x128xf32> to vector<64x128xf32>
    %718 = arith.addf %716, %717 : vector<64x128xf32>
    %cst_563 = arith.constant 0.000000e+00 : f32
    %719 = vector.broadcast %cst_563 : f32 to vector<64x128xf32>
    %720 = arith.maximumf %718, %719 : vector<64x128xf32>
    %721 = vector.extract_strided_slice %720 {offsets = [0, 0], sizes = [7, 128], strides = [1, 1]} : vector<64x128xf32> to vector<7x128xf32>
    %c0_564 = arith.constant 0 : index
    %c0_565 = arith.constant 0 : index
    %c0_566 = arith.constant 0 : index
    %722 = vector.load %arg11[%c0_564, %c0_565, %c0_566] : memref<1x49x128xf32, #tpu.memory_space<vmem>>, vector<1x7x128xf32>
    %723 = vector.shape_cast %722 : vector<1x7x128xf32> to vector<7x128xf32>
    %724 = vector.shape_cast %721 : vector<7x128xf32> to vector<1x7x128xf32>
    tpu.vector_store %arg11[%c0_564, %c0_565, %c0_566], %724 {strides = array<i32>} : memref<1x49x128xf32, #tpu.memory_space<vmem>>, vector<1x7x128xf32>,
    %725 = vector.extract_strided_slice %720 {offsets = [9, 0], sizes = [7, 128], strides = [1, 1]} : vector<64x128xf32> to vector<7x128xf32>
    %c0_567 = arith.constant 0 : index
    %c7 = arith.constant 7 : index
    %c0_568 = arith.constant 0 : index
    %726 = vector.load %arg11[%c0_567, %c7, %c0_568] : memref<1x49x128xf32, #tpu.memory_space<vmem>>, vector<1x7x128xf32>
    %727 = vector.shape_cast %726 : vector<1x7x128xf32> to vector<7x128xf32>
    %728 = vector.shape_cast %725 : vector<7x128xf32> to vector<1x7x128xf32>
    tpu.vector_store %arg11[%c0_567, %c7, %c0_568], %728 {strides = array<i32>} : memref<1x49x128xf32, #tpu.memory_space<vmem>>, vector<1x7x128xf32>,
    %729 = vector.extract_strided_slice %720 {offsets = [18, 0], sizes = [7, 128], strides = [1, 1]} : vector<64x128xf32> to vector<7x128xf32>
    %c0_569 = arith.constant 0 : index
    %c14 = arith.constant 14 : index
    %c0_570 = arith.constant 0 : index
    %730 = vector.load %arg11[%c0_569, %c14, %c0_570] : memref<1x49x128xf32, #tpu.memory_space<vmem>>, vector<1x7x128xf32>
    %731 = vector.shape_cast %730 : vector<1x7x128xf32> to vector<7x128xf32>
    %732 = vector.shape_cast %729 : vector<7x128xf32> to vector<1x7x128xf32>
    tpu.vector_store %arg11[%c0_569, %c14, %c0_570], %732 {strides = array<i32>} : memref<1x49x128xf32, #tpu.memory_space<vmem>>, vector<1x7x128xf32>,
    %733 = vector.extract_strided_slice %720 {offsets = [27, 0], sizes = [7, 128], strides = [1, 1]} : vector<64x128xf32> to vector<7x128xf32>
    %c0_571 = arith.constant 0 : index
    %c21 = arith.constant 21 : index
    %c0_572 = arith.constant 0 : index
    %734 = vector.load %arg11[%c0_571, %c21, %c0_572] : memref<1x49x128xf32, #tpu.memory_space<vmem>>, vector<1x7x128xf32>
    %735 = vector.shape_cast %734 : vector<1x7x128xf32> to vector<7x128xf32>
    %736 = vector.shape_cast %733 : vector<7x128xf32> to vector<1x7x128xf32>
    tpu.vector_store %arg11[%c0_571, %c21, %c0_572], %736 {strides = array<i32>} : memref<1x49x128xf32, #tpu.memory_space<vmem>>, vector<1x7x128xf32>,
    %737 = vector.extract_strided_slice %720 {offsets = [36, 0], sizes = [7, 128], strides = [1, 1]} : vector<64x128xf32> to vector<7x128xf32>
    %c0_573 = arith.constant 0 : index
    %c28_574 = arith.constant 28 : index
    %c0_575 = arith.constant 0 : index
    %738 = vector.load %arg11[%c0_573, %c28_574, %c0_575] : memref<1x49x128xf32, #tpu.memory_space<vmem>>, vector<1x7x128xf32>
    %739 = vector.shape_cast %738 : vector<1x7x128xf32> to vector<7x128xf32>
    %740 = vector.shape_cast %737 : vector<7x128xf32> to vector<1x7x128xf32>
    tpu.vector_store %arg11[%c0_573, %c28_574, %c0_575], %740 {strides = array<i32>} : memref<1x49x128xf32, #tpu.memory_space<vmem>>, vector<1x7x128xf32>,
    %741 = vector.extract_strided_slice %720 {offsets = [45, 0], sizes = [7, 128], strides = [1, 1]} : vector<64x128xf32> to vector<7x128xf32>
    %c0_576 = arith.constant 0 : index
    %c35 = arith.constant 35 : index
    %c0_577 = arith.constant 0 : index
    %742 = vector.load %arg11[%c0_576, %c35, %c0_577] : memref<1x49x128xf32, #tpu.memory_space<vmem>>, vector<1x7x128xf32>
    %743 = vector.shape_cast %742 : vector<1x7x128xf32> to vector<7x128xf32>
    %744 = vector.shape_cast %741 : vector<7x128xf32> to vector<1x7x128xf32>
    tpu.vector_store %arg11[%c0_576, %c35, %c0_577], %744 {strides = array<i32>} : memref<1x49x128xf32, #tpu.memory_space<vmem>>, vector<1x7x128xf32>,
    %745 = vector.extract_strided_slice %720 {offsets = [54, 0], sizes = [7, 128], strides = [1, 1]} : vector<64x128xf32> to vector<7x128xf32>
    %c0_578 = arith.constant 0 : index
    %c42 = arith.constant 42 : index
    %c0_579 = arith.constant 0 : index
    %746 = vector.load %arg11[%c0_578, %c42, %c0_579] : memref<1x49x128xf32, #tpu.memory_space<vmem>>, vector<1x7x128xf32>
    %747 = vector.shape_cast %746 : vector<1x7x128xf32> to vector<7x128xf32>
    %748 = vector.shape_cast %745 : vector<7x128xf32> to vector<1x7x128xf32>
    tpu.vector_store %arg11[%c0_578, %c42, %c0_579], %748 {strides = array<i32>} : memref<1x49x128xf32, #tpu.memory_space<vmem>>, vector<1x7x128xf32>,
    return
  }
  func.func @transform_0(%arg0: i32) -> (i32, i32, i32) {
    %c0_i32 = arith.constant 0 : i32
    %c0_i32_0 = arith.constant 0 : i32
    %c0_i32_1 = arith.constant 0 : i32
    return %arg0, %c0_i32, %c0_i32_0 : i32, i32, i32
  }
  func.func @transform_1(%arg0: i32) -> (i32, i32) {
    %c0_i32 = arith.constant 0 : i32
    %c0_i32_0 = arith.constant 0 : i32
    %c0_i32_1 = arith.constant 0 : i32
    return %c0_i32, %c0_i32_0 : i32, i32
  }
  func.func @transform_2(%arg0: i32) -> (i32, i32) {
    %c0_i32 = arith.constant 0 : i32
    %c0_i32_0 = arith.constant 0 : i32
    %c0_i32_1 = arith.constant 0 : i32
    return %c0_i32, %c0_i32_0 : i32, i32
  }
  func.func @transform_3(%arg0: i32) -> (i32, i32) {
    %c0_i32 = arith.constant 0 : i32
    %c0_i32_0 = arith.constant 0 : i32
    %c0_i32_1 = arith.constant 0 : i32
    return %c0_i32, %c0_i32_0 : i32, i32
  }
  func.func @transform_4(%arg0: i32) -> (i32, i32) {
    %c0_i32 = arith.constant 0 : i32
    %c0_i32_0 = arith.constant 0 : i32
    %c0_i32_1 = arith.constant 0 : i32
    return %c0_i32, %c0_i32_0 : i32, i32
  }
  func.func @transform_5(%arg0: i32) -> (i32, i32) {
    %c0_i32 = arith.constant 0 : i32
    %c0_i32_0 = arith.constant 0 : i32
    %c0_i32_1 = arith.constant 0 : i32
    return %c0_i32, %c0_i32_0 : i32, i32
  }
  func.func @transform_6(%arg0: i32) -> (i32, i32) {
    %c0_i32 = arith.constant 0 : i32
    %c0_i32_0 = arith.constant 0 : i32
    %c0_i32_1 = arith.constant 0 : i32
    return %c0_i32, %c0_i32_0 : i32, i32
  }
  func.func @transform_7(%arg0: i32) -> (i32, i32) {
    %c0_i32 = arith.constant 0 : i32
    %c0_i32_0 = arith.constant 0 : i32
    %c0_i32_1 = arith.constant 0 : i32
    return %c0_i32, %c0_i32_0 : i32, i32
  }
  func.func @transform_8(%arg0: i32) -> (i32, i32) {
    %c0_i32 = arith.constant 0 : i32
    %c0_i32_0 = arith.constant 0 : i32
    %c0_i32_1 = arith.constant 0 : i32
    return %c0_i32, %c0_i32_0 : i32, i32
  }
  func.func @transform_9(%arg0: i32) -> (i32, i32) {
    %c0_i32 = arith.constant 0 : i32
    %c0_i32_0 = arith.constant 0 : i32
    %c0_i32_1 = arith.constant 0 : i32
    return %c0_i32, %c0_i32_0 : i32, i32
  }
  func.func @transform_10(%arg0: i32) -> (i32, i32, i32) {
    %c0_i32 = arith.constant 0 : i32
    %c0_i32_0 = arith.constant 0 : i32
    %c0_i32_1 = arith.constant 0 : i32
    return %arg0, %c0_i32, %c0_i32_0 : i32, i32, i32
  }
}

</mosaic_0001>

<bundles_post_ra>
// kernel: _forward.3
= control target key start
LH: loop header
LB: loop body
LE: loop exit
PB: predicated region body
PF: predicated region fallthrough
CT: control target
= control target key end

     0   :  { %s4850_s0 = inlined_call_operand.vmem [shape: f32[2,6272], index: 0, kind: input, shape index: {}]   ;;  %s4851_s1 = inlined_call_operand.hbm [shape: bf16[6272,512], index: 1, kind: input, shape index: {}]   ;;  %s4852_s2 = inlined_call_operand.hbm [shape: f32[1,512], index: 2, kind: input, shape index: {}]   ;;  %s4853_s3 = inlined_call_operand.hbm [shape: bf16[512,128], index: 3, kind: input, shape index: {}]   ;;  %s4854_s4 = inlined_call_operand.hbm [shape: f32[1,128], index: 4, kind: input, shape index: {}]   ;;  %s4855_s5 = inlined_call_operand.hbm [shape: f32[2,128], index: 5, kind: output, shape index: {}]  }
   0x1   :  { %4857 = sst [smem:[#allocation16_spill]] %s4852_s2 }
   0x2   :  { %10 = vsyncpa [#allocation4], 0 }
   0x3   :  { %12 = vsyncpa [#allocation4 + $0x1], 0 }
   0x4   :  { %13 = vsyncpa [#allocation7], 0 }
   0x5   :  { %14 = vsyncpa [#allocation10], 0 }
   0x6   :  { %15 = vsyncpa [#allocation5], 0  ;;  %s4212_s18 = smov 0   ;;  %s4214_s19 = smov 0  }
   0x7   :  { %s4216_s20 = smov 0   ;;  %s4218_s21 = smov 0  }
   0x8   :  { %s4220_s22 = smov 0   ;;  %s4222_s23 = smov 0  }
   0x9 LB: > { %s4856_s24 = sadd.s32 4294967295, %s4171_s23   ;;  %p81_p0 = scmp.ne.s32.totalorder %s4155_s19, %s4151_s18  ;;  %s4171_s23 = sphi %s4222_s23, %s21_s23   ;;  %s4167_s22 = sphi %s4220_s22, %s4868_s22   ;;  %s4163_s21 = sphi %s4218_s21, %s4867_s21   ;;  %s4159_s20 = sphi %s4216_s20, %s4866_s20   ;;  %s4155_s19 = sphi %s4214_s19, %s4865_s19   ;;  %s4151_s18 = sphi %s4212_s18, %s4864_s18  }
   0xa   : > { %p4244_p1 = scmp.eq.s32.totalorder %s4856_s24, 0  ;;  %p2559_p2 = scmp.ge.s32.totalorder %s4171_s23, 1 }
   0xb   : > { %p181_p3 = scmp.lt.s32.totalorder %s4171_s23, 8  ;;  %s4860_s2 = sld [smem:[#allocation16_spill]] }
   0xc   : > { %p4252_p4 = por %p4244_p1, %p81_p0  ;;  %s4173_s6 = smov [#allocation6]  }
   0xd   : > { %p4259_p5 = pnand %p2559_p2, %p181_p3  ;;  %s195_s7 = sshll.u32 %s4173_s6, 4  ;;  %s196_s7 = int_to_ptr.vmem [resolvable:$true] %s195_s7 }
   0xe   : > { %s204_s10 = sshll.u32 %s4853_s3, 4  ;;  %s4174_s12 = smov [#allocation8]   ;;  %s205_s10 = int_to_ptr.hbm [resolvable:$true] %s204_s10 }
   0xf   : > { %p3880_p6 = pneg %p4259_p5  ;;  %s206_s13 = sshll.u32 %s4174_s12, 4  ;;  %s207_s13 = int_to_ptr.vmem [resolvable:$true] %s206_s13 }
  0x10   : > { %s4175_s14 = smov 64   ;;  %s4176_s15 = smov 4  }
  0x11   : > { %s193_s29 = sshll.u32 %s4860_s2, 4  ;;  %p4270_p7 = pnand %p3880_p6, %p4244_p1  ;;  %s194_s29 = int_to_ptr.hbm [resolvable:$true] %s193_s29 }
  0x12   : > { %s219_s18 = sshll.u32 %s4854_s4, 4  ;;  %s4177_s27 = smov [#allocation9]   ;;  %s220_s18 = int_to_ptr.hbm [resolvable:$true] %s219_s18 }
  0x13   : > { %3883 = dma.hbm_to_vmem [thread:$0]  (!%p4270_p7), %s194_s29, 64, %s196_s7, [#allocation7]  }
  0x14   : > { %3886 = dma.hbm_to_vmem [thread:$0]  (!%p4270_p7), %s205_s10, 4096, %s207_s13, [#allocation7], %s4175_s14, %s4175_s14, %s4176_s15  }
  0x15   : > { %s221_s28 = sshll.u32 %s4177_s27, 4  ;;  %s68_s29 = sadd.s32 1, %s4159_s20  ;;  %s222_s28 = int_to_ptr.vmem [resolvable:$true] %s221_s28 }
  0x16   : > { %3889 = dma.hbm_to_vmem [thread:$0]  (!%p4270_p7), %s220_s18, 16, %s222_s28, [#allocation10]  }
  0x17   : > { %s30_s6 = sadd.s32 1, %s4167_s22  ;;  %p75_p8 = scmp.ne.s32.totalorder %s4159_s20, %s4155_s19 }
  0x18   : > { %p31_p9 = scmp.ge.s32.totalorder %s30_s6, 7  ;;  %p76_p10 = scmp.eq.s32.totalorder %s4171_s23, 0 }
  0x19   : > { %p3897_p11 = scmp.lt.s32.totalorder %s4171_s23, 7  ;;  %s245_s7 = sand.u32 1, %s4159_s20  }
  0x1a   : > { %s4870_s6 = smov (%p31_p9, %s30_s6), 0  ;;  %p77_p12 = por %p76_p10, %p75_p8 }
  0x1b   : > { %s65_s8 = ssub.s32 %s4167_s22, %s4870_s6  ;;  %s3860_s9 = smul.u32 1792, %s245_s7 }
  0x1c   : > { %p66_p13 = scmp.eq.s32.totalorder %s65_s8, 0  ;;  %s3859_s10 = smul.u32 1792, %s4167_s22 }
  0x1d   : > { %p3891_p0 = pnand %p3897_p11, %p77_p12  ;;  %s249_s15 = scalar_lea.vmem [#allocation3], %s3860_s9 }
  0x1e   : > { %s4296_s12 = scalar_select %p66_p13, %s4159_s20, %s68_s29  }
  0x1f   : > { %s255_s14 = scalar_lea.hbm %s4851_s1, %s3859_s10  ;;  %s258_s16 = sshll.u32 %s249_s15, 4  ;;  %s259_s16 = int_to_ptr.vmem [resolvable:$true] %s258_s16 }
  0x20   : > { %s256_s17 = sshll.u32 %s255_s14, 4  ;;  %s246_s18 = scalar_lea.sflag [#allocation4], %s245_s7  ;;  %s257_s17 = int_to_ptr.hbm [resolvable:$true] %s256_s17 }
  0x21   : > { %s4178_s27 = smov 256   ;;  %s4179_s28 = smov 16  }
  0x22   : > { %3893 = dma.hbm_to_vmem [thread:$0]  (!%p3891_p0), %s257_s17, 28672, %s259_s16, %s246_s18, %s4178_s27, %s4178_s27, %s4179_s28  }
  0x23   : > { %270 = sbr.rel (%p4259_p5) target bundleno = 607 (0x25f), region = 40  ;;  %s272_s29 = sand.u32 (!%p4259_p5), 1, %s4155_s19  }
  0x24   : > { %s3861_s8 = smul.u32 (!%p4259_p5), 1792, %s272_s29  ;;  %s273_s24 = scalar_lea.sflag (!%p4259_p5), [#allocation4], %s272_s29 }
  0x26   : > { %s4304_s2 = scalar_lea.vmem (!%p4259_p5), [#allocation3], %s3861_s8 }
  0x28   : > { %4134 = dma.done.wait (%p4252_p4), %s273_s24, 28672  }
  0x29   : > { %4136 = vsyncadd (%p4252_p4), %s273_s24, 4294938624 }
  0x2a   : > { %4138 = dma.done.wait (%p4244_p1), [#allocation7], 4160  }
  0x2b   : > { %4140 = vsyncadd (%p4244_p1), [#allocation7], 4294963136 }
  0x2c   : > { %4142 = dma.done.wait (%p4244_p1), [#allocation10], 16  }
  0x2d   : > { %4144 = vsyncadd (%p4244_p1), [#allocation10], 4294967280  ;;  %s323_s30 = smul.u32 7, %s4163_s21  ;;  %p2571_p3 = scmp.ne.s32.totalorder %s4163_s21, 0 }
  0x2f   : > { %p326_p2 = scmp.lt.s32.totalorder %s323_s30, 48  ;;  %337 = sbr.rel (%p2571_p3) target bundleno = 54 (0x36), region = 60 }
  0x31   : > { %s4872_s30 = smov (!%p326_p2, %s323_s30), 48 }
  0x32   : > { %s2570_s7 = sshll.u32 %s4872_s30, 1 }
  0x33   : > { %s4322_s24 = scalar_lea.vmem %s4850_s0, %s2570_s7 }
  0x34   : > { %v4180_v0 = vmov 0.0  }
  0x35   : > { %338 = vst [vmem:[#allocation2] sm:$0xff] %v4180_v0 }
  0x36 PF: > { %v2686_v1 = vld [vmem:[%s4304_s2 + $0xe0] sm:$0xf]  ;;  %v3633_v2 = vld [vmem:[%s4304_s2 + $0xec] sm:$0xf0]  ;;  %vm2083_vm0 = vcmask 1041408   ;;  %vm2085_vm1 = vcmask 1045508  }
  0x37   : > { %v2814_v3 = vld [vmem:[%s4304_s2 + $0x1e0] sm:$0xf]  ;;  %v2687_v4 = vor.u32 %v3633_v2, %v2686_v1  ;;  %v3665_v5 = vld [vmem:[%s4304_s2 + $0x1ec] sm:$0xf0]  ;;  %vm2087_vm2 = vcmask 1043456   ;;  %p3468_p1 = scmp.ne.s32.totalorder %s4163_s21, 6 }
  0x38   : > { %v2942_v6 = vld [vmem:[%s4304_s2 + $0x2e0] sm:$0xf]  ;;  %v3697_v7 = vld [vmem:[%s4304_s2 + $0x2ec] sm:$0xf0]  ;;  %v2815_v8 = vor.u32 %v3665_v5, %v2814_v3 }
  0x39   : > { %v2943_v9 = vor.u32 %v3697_v7, %v2942_v6  ;;  %v3070_v10 = vld [vmem:[%s4304_s2 + $0x3e0] sm:$0xf]  ;;  %v3729_v11 = vld [vmem:[%s4304_s2 + $0x3ec] sm:$0xf0]  ;;  %1712 = vmatpush.bf16.msra.mxu0 %v2687_v4 }
  0x3a   : > { %v2670_v12 = vld [vmem:[%s4304_s2 + $0xc0] sm:$0xf]  ;;  %v3071_v13 = vor.u32 %v3729_v11, %v3070_v10  ;;  %v3629_v14 = vld [vmem:[%s4304_s2 + $0xcc] sm:$0xf0]  ;;  %1725 = vmatpush.bf16.msra.mxu1 %v2815_v8 }
  0x3b   : > { %v2798_v15 = vld [vmem:[%s4304_s2 + $0x1c0] sm:$0xf]  ;;  %v3661_v16 = vld [vmem:[%s4304_s2 + $0x1cc] sm:$0xf0]  ;;  %1738 = vmatpush.bf16.msra.mxu2 %v2943_v9  ;;  %v2671_v17 = vor.u32 %v3629_v14, %v2670_v12 }
  0x3c   : > { %v2799_v18 = vor.u32 %v3661_v16, %v2798_v15  ;;  %v2926_v19 = vld [vmem:[%s4304_s2 + $0x2c0] sm:$0xf]  ;;  %v3693_v20 = vld [vmem:[%s4304_s2 + $0x2cc] sm:$0xf0]  ;;  %1751 = vmatpush.bf16.msra.mxu3 %v3071_v13 }
  0x3d   : > { %v3054_v21 = vld [vmem:[%s4304_s2 + $0x3c0] sm:$0xf]  ;;  %v2927_v22 = vor.u32 %v3693_v20, %v2926_v19  ;;  %v3725_v23 = vld [vmem:[%s4304_s2 + $0x3cc] sm:$0xf0]  ;;  %1713 = vmatpush.bf16.msra.mxu0 %v2671_v17 }
  0x3e   : > { %v2654_v24 = vld [vmem:[%s4304_s2 + $0xa0] sm:$0xf]  ;;  %v3625_v25 = vld [vmem:[%s4304_s2 + $0xac] sm:$0xf0]  ;;  %v3055_v26 = vor.u32 %v3725_v23, %v3054_v21  ;;  %1726 = vmatpush.bf16.msra.mxu1 %v2799_v18 }
  0x3f   : > { %v2782_v27 = vld [vmem:[%s4304_s2 + $0x1a0] sm:$0xf]  ;;  %v3657_v28 = vld [vmem:[%s4304_s2 + $0x1ac] sm:$0xf0]  ;;  %v2655_v30 = vor.u32 %v3625_v25, %v2654_v24  ;;  %1739 = vmatpush.bf16.msra.mxu2 %v2927_v22 }
  0x40   : > { %v2910_v29 = vld [vmem:[%s4304_s2 + $0x2a0] sm:$0xf]  ;;  %v3689_v31 = vld [vmem:[%s4304_s2 + $0x2ac] sm:$0xf0]  ;;  %v2783_v34 = vor.u32 %v3657_v28, %v2782_v27  ;;  %1752 = vmatpush.bf16.msra.mxu3 %v3055_v26 }
  0x41   : > { %v3038_v32 = vld [vmem:[%s4304_s2 + $0x3a0] sm:$0xf]  ;;  %v3721_v33 = vld [vmem:[%s4304_s2 + $0x3ac] sm:$0xf0]  ;;  %v2911_v35 = vor.u32 %v3689_v31, %v2910_v29  ;;  %1714 = vmatpush.bf16.msra.mxu0 %v2655_v30 }
  0x42   : > { %v2638_v36 = vld [vmem:[%s4304_s2 + $0x80] sm:$0xf]  ;;  %v3621_v37 = vld [vmem:[%s4304_s2 + $0x8c] sm:$0xf0]  ;;  %v3039_v39 = vor.u32 %v3721_v33, %v3038_v32  ;;  %1727 = vmatpush.bf16.msra.mxu1 %v2783_v34 }
  0x43   : > { %v2766_v38 = vld [vmem:[%s4304_s2 + $0x180] sm:$0xf]  ;;  %v3653_v40 = vld [vmem:[%s4304_s2 + $0x18c] sm:$0xf0]  ;;  %v2639_v45 = vor.u32 %v3621_v37, %v2638_v36  ;;  %1740 = vmatpush.bf16.msra.mxu2 %v2911_v35 }
  0x44   : > { %v2894_v41 = vld [vmem:[%s4304_s2 + $0x280] sm:$0xf]  ;;  %v3685_v42 = vld [vmem:[%s4304_s2 + $0x28c] sm:$0xf0]  ;;  %v2767_v46 = vor.u32 %v3653_v40, %v2766_v38  ;;  %1753 = vmatpush.bf16.msra.mxu3 %v3039_v39  ;;  %v3631_v38 = vld [vmem:[%s4304_s2 + $0xe4] sm:$0xf] }
  0x45   : > { %v3022_v43 = vld [vmem:[%s4304_s2 + $0x380] sm:$0xf]  ;;  %v3717_v44 = vld [vmem:[%s4304_s2 + $0x38c] sm:$0xf0]  ;;  %v2895_v47 = vor.u32 %v3685_v42, %v2894_v41  ;;  %1715 = vmatpush.bf16.msra.mxu0 %v2639_v45  ;;  %v2688_v39 = vld [vmem:[%s4304_s2 + $0xf0] sm:$0xf0] }
  0x46   : > { %v2622_v48 = vld [vmem:[%s4304_s2 + $0x60] sm:$0xf]  ;;  %v3617_v49 = vld [vmem:[%s4304_s2 + $0x6c] sm:$0xf0]  ;;  %v3023_v51 = vor.u32 %v3717_v44, %v3022_v43  ;;  %1728 = vmatpush.bf16.msra.mxu1 %v2767_v46 }
  0x47   : > { %v2750_v50 = vld [vmem:[%s4304_s2 + $0x160] sm:$0xf]  ;;  %v3649_v52 = vld [vmem:[%s4304_s2 + $0x16c] sm:$0xf0]  ;;  %v2623_v57 = vor.u32 %v3617_v49, %v2622_v48  ;;  %1741 = vmatpush.bf16.msra.mxu2 %v2895_v47  ;;  %v2691_v47 = vor.u32 %v3631_v38, %v2688_v39 }
  0x48   : > { %v2878_v53 = vld [vmem:[%s4304_s2 + $0x260] sm:$0xf]  ;;  %v3681_v54 = vld [vmem:[%s4304_s2 + $0x26c] sm:$0xf0]  ;;  %v2751_v58 = vor.u32 %v3649_v52, %v2750_v50  ;;  %1754 = vmatpush.bf16.msra.mxu3 %v3023_v51  ;;  %v3627_v51 = vld [vmem:[%s4304_s2 + $0xc4] sm:$0xf] }
  0x49   : > { %v3006_v55 = vld [vmem:[%s4304_s2 + $0x360] sm:$0xf]  ;;  %v3713_v56 = vld [vmem:[%s4304_s2 + $0x36c] sm:$0xf0]  ;;  %v2879_v59 = vor.u32 %v3681_v54, %v2878_v53  ;;  %1716 = vmatpush.bf16.msra.mxu0 %v2623_v57  ;;  %v2672_v52 = vld [vmem:[%s4304_s2 + $0xd0] sm:$0xf0] }
  0x4a   : > { %v2606_v60 = vld [vmem:[%s4304_s2 + $0x40] sm:$0xf]  ;;  %v3613_v61 = vld [vmem:[%s4304_s2 + $0x4c] sm:$0xf0]  ;;  %v3007_v63 = vor.u32 %v3713_v56, %v3006_v55  ;;  %1729 = vmatpush.bf16.msra.mxu1 %v2751_v58 }
  0x4b   : > { %v2734_v62 = vld [vmem:[%s4304_s2 + $0x140] sm:$0xf]  ;;  %v3645_v0 = vld [vmem:[%s4304_s2 + $0x14c] sm:$0xf0]  ;;  %v2607_v5 = vor.u32 %v3613_v61, %v2606_v60  ;;  %1742 = vmatpush.bf16.msra.mxu2 %v2879_v59  ;;  %v2675_v61 = vor.u32 %v3627_v51, %v2672_v52 }
  0x4c   : > { %v2862_v1 = vld [vmem:[%s4304_s2 + $0x240] sm:$0xf]  ;;  %v3677_v2 = vld [vmem:[%s4304_s2 + $0x24c] sm:$0xf0]  ;;  %v2735_v6 = vor.u32 %v3645_v0, %v2734_v62  ;;  %1755 = vmatpush.bf16.msra.mxu3 %v3007_v63  ;;  %v3623_v0 = vld [vmem:[%s4304_s2 + $0xa4] sm:$0xf] }
  0x4d   : > { %v2990_v3 = vld [vmem:[%s4304_s2 + $0x340] sm:$0xf]  ;;  %v3709_v4 = vld [vmem:[%s4304_s2 + $0x34c] sm:$0xf0]  ;;  %v2863_v7 = vor.u32 %v3677_v2, %v2862_v1  ;;  %1717 = vmatpush.bf16.msra.mxu0 %v2607_v5  ;;  %v2656_v1 = vld [vmem:[%s4304_s2 + $0xb0] sm:$0xf0] }
  0x4e   : > { %v2590_v8 = vld [vmem:[%s4304_s2 + $0x20] sm:$0xf]  ;;  %v3609_v9 = vld [vmem:[%s4304_s2 + $0x2c] sm:$0xf0]  ;;  %v2991_v11 = vor.u32 %v3709_v4, %v2990_v3  ;;  %1730 = vmatpush.bf16.msra.mxu1 %v2735_v6 }
  0x4f   : > { %v2718_v10 = vld [vmem:[%s4304_s2 + $0x120] sm:$0xf]  ;;  %v3641_v12 = vld [vmem:[%s4304_s2 + $0x12c] sm:$0xf0]  ;;  %v2591_v17 = vor.u32 %v3609_v9, %v2590_v8  ;;  %1743 = vmatpush.bf16.msra.mxu2 %v2863_v7  ;;  %v2659_v9 = vor.u32 %v3623_v0, %v2656_v1 }
  0x50   : > { %v2846_v13 = vld [vmem:[%s4304_s2 + $0x220] sm:$0xf]  ;;  %v3673_v14 = vld [vmem:[%s4304_s2 + $0x22c] sm:$0xf0]  ;;  %v2719_v20 = vor.u32 %v3641_v12, %v2718_v10  ;;  %1756 = vmatpush.bf16.msra.mxu3 %v2991_v11  ;;  %v3619_v12 = vld [vmem:[%s4304_s2 + $0x84] sm:$0xf] }
  0x51   : > { %v2974_v15 = vld [vmem:[%s4304_s2 + $0x320] sm:$0xf]  ;;  %v3705_v16 = vld [vmem:[%s4304_s2 + $0x32c] sm:$0xf0]  ;;  %v2847_v21 = vor.u32 %v3673_v14, %v2846_v13  ;;  %1718 = vmatpush.bf16.msra.mxu0 %v2591_v17  ;;  %v2640_v13 = vld [vmem:[%s4304_s2 + $0x90] sm:$0xf0] }
  0x52   : > { %v2574_v18 = vld [vmem:[%s4304_s2] sm:$0xf]  ;;  %v3605_v19 = vld [vmem:[%s4304_s2 + $0xc] sm:$0xf0]  ;;  %v2975_v25 = vor.u32 %v3705_v16, %v2974_v15  ;;  %1731 = vmatpush.bf16.msra.mxu1 %v2719_v20 }
  0x53   : > { %v2702_v22 = vld [vmem:[%s4304_s2 + $0x100] sm:$0xf]  ;;  %v3637_v23 = vld [vmem:[%s4304_s2 + $0x10c] sm:$0xf0]  ;;  %v2575_v32 = vor.u32 %v3605_v19, %v2574_v18  ;;  %1744 = vmatpush.bf16.msra.mxu2 %v2847_v21 }
  0x54   : > { %v2830_v24 = vld [vmem:[%s4304_s2 + $0x200] sm:$0xf]  ;;  %v3669_v26 = vld [vmem:[%s4304_s2 + $0x20c] sm:$0xf0]  ;;  %v2703_v36 = vor.u32 %v3637_v23, %v2702_v22  ;;  %1757 = vmatpush.bf16.msra.mxu3 %v2975_v25  ;;  %v2643_v25 = vor.u32 %v3619_v12, %v2640_v13  ;;  %v3727_v12 = vld [vmem:[%s4304_s2 + $0x3e4] sm:$0xf] }
  0x55   : > { %v2958_v27 = vld [vmem:[%s4304_s2 + $0x300] sm:$0xf]  ;;  %v3701_v28 = vld [vmem:[%s4304_s2 + $0x30c] sm:$0xf0]  ;;  %v2831_v37 = vor.u32 %v3669_v26, %v2830_v24  ;;  %1719 = vmatpush.bf16.msra.mxu0 %v2575_v32  ;;  %v3072_v13 = vld [vmem:[%s4304_s2 + $0x3f0] sm:$0xf0] }
  0x56   : > { %v3198_v29 = vld [vmem:[%s4304_s2 + $0x4e0] sm:$0xf]  ;;  %v3761_v30 = vld [vmem:[%s4304_s2 + $0x4ec] sm:$0xf0]  ;;  %v2959_v40 = vor.u32 %v3701_v28, %v2958_v27  ;;  %1732 = vmatpush.bf16.msra.mxu1 %v2703_v36 }
  0x57   : > { %v3326_v31 = vld [vmem:[%s4304_s2 + $0x5e0] sm:$0xf]  ;;  %v3793_v33 = vld [vmem:[%s4304_s2 + $0x5ec] sm:$0xf0]  ;;  %v3199_v41 = vor.u32 %v3761_v30, %v3198_v29  ;;  %1745 = vmatpush.bf16.msra.mxu2 %v2831_v37  ;;  %v3615_v30 = vld [vmem:[%s4304_s2 + $0x64] sm:$0xf] }
  0x58   : > { %v3454_v34 = vld [vmem:[%s4304_s2 + $0x6e0] sm:$0xf]  ;;  %v3825_v35 = vld [vmem:[%s4304_s2 + $0x6ec] sm:$0xf0]  ;;  %v3327_v42 = vor.u32 %v3793_v33, %v3326_v31  ;;  %1758 = vmatpush.bf16.msra.mxu3 %v2959_v40  ;;  %v2624_v31 = vld [vmem:[%s4304_s2 + $0x70] sm:$0xf0] }
  0x59   : > { %v3455_v43 = vor.u32 %v3825_v35, %v3454_v34  ;;  %v3182_v44 = vld [vmem:[%s4304_s2 + $0x4c0] sm:$0xf]  ;;  %v3757_v45 = vld [vmem:[%s4304_s2 + $0x4cc] sm:$0xf0]  ;;  %1764 = vmatpush.bf16.msrb.mxu0 %v3199_v41  ;;  %v2627_v40 = vor.u32 %v3615_v30, %v2624_v31  ;;  %v2928_v31 = vld [vmem:[%s4304_s2 + $0x2d0] sm:$0xf0] }
  0x5a   : > { %v3310_v46 = vld [vmem:[%s4304_s2 + $0x5c0] sm:$0xf]  ;;  %v3789_v48 = vld [vmem:[%s4304_s2 + $0x5cc] sm:$0xf0]  ;;  %v3183_v53 = vor.u32 %v3757_v45, %v3182_v44  ;;  %1777 = vmatpush.bf16.msrb.mxu1 %v3327_v42  ;;  %v3611_v44 = vld [vmem:[%s4304_s2 + $0x44] sm:$0xf] }
  0x5b   : > { %v3438_v49 = vld [vmem:[%s4304_s2 + $0x6c0] sm:$0xf]  ;;  %v3821_v50 = vld [vmem:[%s4304_s2 + $0x6cc] sm:$0xf0]  ;;  %1790 = vmatpush.bf16.msrb.mxu2 %v3455_v43  ;;  %v3311_v56 = vor.u32 %v3789_v48, %v3310_v46  ;;  %v2608_v45 = vld [vmem:[%s4304_s2 + $0x50] sm:$0xf0] }
  0x5c   : > { %v3166_v54 = vld [vmem:[%s4304_s2 + $0x4a0] sm:$0xf]  ;;  %v3753_v55 = vld [vmem:[%s4304_s2 + $0x4ac] sm:$0xf0]  ;;  %v3439_v57 = vor.u32 %v3821_v50, %v3438_v49  ;;  %1803 = vmatpush.bf16.msrb.mxu3 %v2691_v47 }
  0x5d   : > { %v3294_v58 = vld [vmem:[%s4304_s2 + $0x5a0] sm:$0xf]  ;;  %v3785_v59 = vld [vmem:[%s4304_s2 + $0x5ac] sm:$0xf0]  ;;  %1765 = vmatpush.bf16.msrb.mxu0 %v3183_v53  ;;  %v3167_v2 = vor.u32 %v3753_v55, %v3166_v54  ;;  %v341_v53 = vld [vmem:[%s4322_s24 + $0x8] sm:$0x3f]  ;;  %v2611_v54 = vor.u32 %v3611_v44, %v2608_v45 }
  0x5e   : > { %v340_v60 = vld [vmem:[%s4322_s24] sm:$0xff]  ;;  %v3422_v62 = vld [vmem:[%s4304_s2 + $0x6a0] sm:$0xf]  ;;  %1778 = vmatpush.bf16.msrb.mxu1 %v3311_v56  ;;  %v3295_v4 = vor.u32 %v3785_v59, %v3294_v58  ;;  %346 = vst [vmem:[#allocation1 + $0x20] ss:$4 sm:$0xff] %v341_v53 }
  0x5f   : > { %v3817_v63 = vld [vmem:[%s4304_s2 + $0x6ac] sm:$0xf0]  ;;  %344 = vst [vmem:[#allocation1] ss:$4 sm:$0xff] %v340_v60  ;;  %v3150_v3 = vld [vmem:[%s4304_s2 + $0x480] sm:$0xf]  ;;  %1791 = vmatpush.bf16.msrb.mxu2 %v3439_v57 }
  0x60   : > { %v3423_v5 = vor.u32 %v3817_v63, %v3422_v62  ;;  %v3749_v6 = vld [vmem:[%s4304_s2 + $0x48c] sm:$0xf0]  ;;  %v3278_v7 = vld [vmem:[%s4304_s2 + $0x580] sm:$0xf]  ;;  %1804 = vmatpush.bf16.msrb.mxu3 %v2675_v61  ;;  %v3607_v57 = vld [vmem:[%s4304_s2 + $0x24] sm:$0xf] }
  0x61   : > { %v3781_v8 = vld [vmem:[%s4304_s2 + $0x58c] sm:$0xf0]  ;;  %v3406_v10 = vld [vmem:[%s4304_s2 + $0x680] sm:$0xf]  ;;  %1766 = vmatpush.bf16.msrb.mxu0 %v3167_v2  ;;  %v3151_v16 = vor.u32 %v3749_v6, %v3150_v3  ;;  %v2592_v58 = vld [vmem:[%s4304_s2 + $0x30] sm:$0xf0] }
  0x62   : > { %v3813_v11 = vld [vmem:[%s4304_s2 + $0x68c] sm:$0xf0]  ;;  %v3134_v14 = vld [vmem:[%s4304_s2 + $0x460] sm:$0xf]  ;;  %1779 = vmatpush.bf16.msrb.mxu1 %v3295_v4  ;;  %v3279_v21 = vor.u32 %v3781_v8, %v3278_v7  ;;  %v2595_v4 = vor.u32 %v3607_v57, %v2592_v58  ;;  %v2576_v6 = vld [vmem:[%s4304_s2 + $0x10] sm:$0xf0] }
  0x63   : > { %v3745_v15 = vld [vmem:[%s4304_s2 + $0x46c] sm:$0xf0]  ;;  %v3262_v17 = vld [vmem:[%s4304_s2 + $0x560] sm:$0xf]  ;;  %1792 = vmatpush.bf16.msrb.mxu2 %v3423_v5  ;;  %v3407_v22 = vor.u32 %v3813_v11, %v3406_v10  ;;  %v3603_v5 = vld [vmem:[%s4304_s2 + $0x4] sm:$0xf] }
  0x64   : > { %v3777_v18 = vld [vmem:[%s4304_s2 + $0x56c] sm:$0xf0]  ;;  %v3390_v19 = vld [vmem:[%s4304_s2 + $0x660] sm:$0xf]  ;;  %1805 = vmatpush.bf16.msrb.mxu3 %v2659_v9  ;;  %v3135_v34 = vor.u32 %v3745_v15, %v3134_v14  ;;  %v3663_v7 = vld [vmem:[%s4304_s2 + $0x1e4] sm:$0xf] }
  0x65   : > { %v3809_v20 = vld [vmem:[%s4304_s2 + $0x66c] sm:$0xf0]  ;;  %1767 = vmatpush.bf16.msrb.mxu0 %v3151_v16  ;;  %v3263_v35 = vor.u32 %v3777_v18, %v3262_v17  ;;  %v3118_v37 = vld [vmem:[%s4304_s2 + $0x440] sm:$0xf]  ;;  %v2816_v8 = vld [vmem:[%s4304_s2 + $0x1f0] sm:$0xf0] }
  0x66   : > { %v349_v23 = vld.sshfl [vmem:[#allocation1 + $0x10] sm:$0xff pattern:$0x73625140]  ;;  %v347_v24 = vld.sshfl [vmem:[#allocation1] sm:$0xff pattern:$0x73625140]  ;;  %1780 = vmatpush.bf16.msrb.mxu1 %v3279_v21  ;;  %v3391_v36 = vor.u32 %v3809_v20, %v3390_v19  ;;  %v2579_v19 = vor.u32 %v3603_v5, %v2576_v6  ;;  %v2819_v20 = vor.u32 %v3663_v7, %v2816_v8 }
  0x67   : > { %v4428_v26 = vpack.c.bf16 %v349_v23, %v349_v23  ;;  %v4430_v27 = vpack.c.bf16 %v347_v24, %v347_v24  ;;  %v348_v28 = vld.sshfl [vmem:[#allocation1 + $0x8] sm:$0xff pattern:$0x73625140]  ;;  %v350_v29 = vld.sshfl [vmem:[#allocation1 + $0x18] sm:$0xff pattern:$0x73625140]  ;;  %1793 = vmatpush.bf16.msrb.mxu2 %v3407_v22  ;;  %v3075_v24 = vor.u32 %v3727_v12, %v3072_v13 }
  0x68   : > { %v4434_v32 = vpack.c.bf16 %v348_v28, %v348_v28  ;;  %v4436_v33 = vpack.c.bf16 %v350_v29, %v350_v29  ;;  %v3741_v38 = vld [vmem:[%s4304_s2 + $0x44c] sm:$0xf0]  ;;  %v3246_v39 = vld [vmem:[%s4304_s2 + $0x540] sm:$0xf]  ;;  %1806 = vmatpush.bf16.msrb.mxu3 %v2643_v25  ;;  %v3695_v9 = vld [vmem:[%s4304_s2 + $0x2e4] sm:$0xf] }
  0x69   : > { %1746 = vmatmul.bf16.vlgmr.msra.gmra.mxu2 %v4428_v26  ;;  %v3773_v41 = vld [vmem:[%s4304_s2 + $0x54c] sm:$0xf0]  ;;  %v3374_v42 = vld [vmem:[%s4304_s2 + $0x640] sm:$0xf]  ;;  %1720 = vmatmul.bf16.vlgmr.msra.gmra.mxu0 %v4430_v27  ;;  %v3119_v46 = vor.u32 %v3741_v38, %v3118_v37  ;;  %v2944_v10 = vld [vmem:[%s4304_s2 + $0x2f0] sm:$0xf0] }
  0x6a   : > { %v3805_v43 = vld [vmem:[%s4304_s2 + $0x64c] sm:$0xf0]  ;;  %1733 = vmatmul.bf16.vlgmr.msra.gmra.mxu1 %v4434_v32  ;;  %1759 = vmatmul.bf16.vlgmr.msra.gmra.mxu3 %v4436_v33  ;;  %v3102_v47 = vld [vmem:[%s4304_s2 + $0x420] sm:$0xf]  ;;  %v3247_v49 = vor.u32 %v3773_v41, %v3246_v39  ;;  %v3759_v14 = vld [vmem:[%s4304_s2 + $0x4e4] sm:$0xf]  ;;  %v2947_v23 = vor.u32 %v3695_v9, %v2944_v10 }
  0x6b   : > { %1768 = vmatpush.bf16.msrb.mxu0 %v3135_v34  ;;  %v3737_v48 = vld [vmem:[%s4304_s2 + $0x42c] sm:$0xf0]  ;;  %1781 = vmatpush.bf16.msrb.mxu1 %v3263_v35  ;;  %v3375_v50 = vor.u32 %v3805_v43, %v3374_v42  ;;  %v3230_v51 = vld [vmem:[%s4304_s2 + $0x520] sm:$0xf]  ;;  %v3200_v17 = vld [vmem:[%s4304_s2 + $0x4f0] sm:$0xf0] }
  0x6c   : > { %1794 = vmatpush.bf16.msrb.mxu2 %v3391_v36  ;;  %v3769_v52 = vld [vmem:[%s4304_s2 + $0x52c] sm:$0xf0]  ;;  %1807 = vmatpush.bf16.msrb.mxu3 %v2627_v40  ;;  %v3358_v55 = vld [vmem:[%s4304_s2 + $0x620] sm:$0xf]  ;;  %v3103_v59 = vor.u32 %v3737_v48, %v3102_v47  ;;  %v3659_v25 = vld [vmem:[%s4304_s2 + $0x1c4] sm:$0xf]  ;;  %v3203_v30 = vor.u32 %v3759_v14, %v3200_v17 }
  0x6d   : > { %v3801_v56 = vld [vmem:[%s4304_s2 + $0x62c] sm:$0xf0]  ;;  %v3086_v60 = vld [vmem:[%s4304_s2 + $0x400] sm:$0xf]  ;;  %v3231_v63 = vor.u32 %v3769_v52, %v3230_v51  ;;  %v2800_v28 = vld [vmem:[%s4304_s2 + $0x1d0] sm:$0xf0] }
  0x6e   : > { %v3733_v61 = vld [vmem:[%s4304_s2 + $0x40c] sm:$0xf0]  ;;  %v3214_v62 = vld [vmem:[%s4304_s2 + $0x500] sm:$0xf]  ;;  %v3359_v0 = vor.u32 %v3801_v56, %v3358_v55  ;;  %v3691_v29 = vld [vmem:[%s4304_s2 + $0x2c4] sm:$0xf]  ;;  %v2803_v41 = vor.u32 %v3659_v25, %v2800_v28 }
  0x6f   : > { %1769 = vmatpush.bf16.msrb.mxu0 %v3119_v46  ;;  %1782 = vmatpush.bf16.msrb.mxu1 %v3247_v49  ;;  %v3765_v1 = vld [vmem:[%s4304_s2 + $0x50c] sm:$0xf0]  ;;  %v3342_v2 = vld [vmem:[%s4304_s2 + $0x600] sm:$0xf]  ;;  %v3087_v11 = vor.u32 %v3733_v61, %v3086_v60  ;;  %v3723_v34 = vld [vmem:[%s4304_s2 + $0x3c4] sm:$0xf]  ;;  %v2931_v42 = vor.u32 %v3691_v29, %v2928_v31 }
  0x70   : > { %1795 = vmatpush.bf16.msrb.mxu2 %v3375_v50  ;;  %v3797_v3 = vld [vmem:[%s4304_s2 + $0x60c] sm:$0xf0]  ;;  %1808 = vmatpush.bf16.msrb.mxu3 %v2611_v54  ;;  %v3215_v15 = vor.u32 %v3765_v1, %v3214_v62  ;;  %v353_v18 = vld.sshfl [vmem:[#allocation1 + $0x30] sm:$0xff pattern:$0x73625140] }
  0x71   : > { %v3343_v16 = vor.u32 %v3797_v3, %v3342_v2  ;;  %v351_v21 = vld.sshfl [vmem:[#allocation1 + $0x20] sm:$0xff pattern:$0x73625140]  ;;  %v352_v22 = vld.sshfl [vmem:[#allocation1 + $0x28] sm:$0xff pattern:$0x73625140]  ;;  %v4481_v36 = vpack.c.bf16 %v353_v18, %v353_v18 }
  0x72   : > { %v3056_v35 = vld [vmem:[%s4304_s2 + $0x3d0] sm:$0xf0]  ;;  %v3755_v37 = vld [vmem:[%s4304_s2 + $0x4c4] sm:$0xf]  ;;  %v4485_v39 = vpack.c.bf16 %v351_v21, %v351_v21  ;;  %v4487_v40 = vpack.c.bf16 %v352_v22, %v352_v22 }
  0x73   : > { %1770 = vmatpush.bf16.msrb.mxu0 %v3103_v59  ;;  %1783 = vmatpush.bf16.msrb.mxu1 %v3231_v63  ;;  %v3184_v38 = vld [vmem:[%s4304_s2 + $0x4d0] sm:$0xf0]  ;;  %v3059_v43 = vor.u32 %v3723_v34, %v3056_v35  ;;  %v3655_v44 = vld [vmem:[%s4304_s2 + $0x1a4] sm:$0xf] }
  0x74   : > { %1796 = vmatpush.bf16.msrb.mxu2 %v3359_v0  ;;  %1809 = vmatpush.bf16.msrb.mxu3 %v2595_v4  ;;  %v2784_v45 = vld [vmem:[%s4304_s2 + $0x1b0] sm:$0xf0]  ;;  %v3687_v46 = vld [vmem:[%s4304_s2 + $0x2a4] sm:$0xf]  ;;  %v3187_v47 = vor.u32 %v3755_v37, %v3184_v38 }
  0x75   : > { %v2912_v48 = vld [vmem:[%s4304_s2 + $0x2b0] sm:$0xf0]  ;;  %v3719_v49 = vld [vmem:[%s4304_s2 + $0x3a4] sm:$0xf]  ;;  %v2787_v53 = vor.u32 %v3655_v44, %v2784_v45 }
  0x76   : > { %v3040_v50 = vld [vmem:[%s4304_s2 + $0x3b0] sm:$0xf0]  ;;  %v3751_v51 = vld [vmem:[%s4304_s2 + $0x4a4] sm:$0xf]  ;;  %v2915_v54 = vor.u32 %v3687_v46, %v2912_v48 }
  0x77   : > { %1771 = vmatpush.bf16.msrb.mxu0 %v3087_v11  ;;  %1784 = vmatpush.bf16.msrb.mxu1 %v3215_v15  ;;  %v3168_v52 = vld [vmem:[%s4304_s2 + $0x4b0] sm:$0xf0]  ;;  %v3043_v55 = vor.u32 %v3719_v49, %v3040_v50  ;;  %v3651_v56 = vld [vmem:[%s4304_s2 + $0x184] sm:$0xf] }
  0x78   : > { %1797 = vmatpush.bf16.msrb.mxu2 %v3343_v16  ;;  %1810 = vmatpush.bf16.msrb.mxu3 %v2579_v19  ;;  %v2768_v57 = vld [vmem:[%s4304_s2 + $0x190] sm:$0xf0]  ;;  %v3683_v58 = vld [vmem:[%s4304_s2 + $0x284] sm:$0xf]  ;;  %v3171_v59 = vor.u32 %v3751_v51, %v3168_v52 }
  0x79   : > { %v2896_v60 = vld [vmem:[%s4304_s2 + $0x290] sm:$0xf0]  ;;  %v3715_v61 = vld [vmem:[%s4304_s2 + $0x384] sm:$0xf]  ;;  %v2771_v1 = vor.u32 %v3651_v56, %v2768_v57 }
  0x7a   : > { %1772 = vmatmul.bf16.vlgmr.msrb.gmra.mxu0 %v4485_v39  ;;  %1785 = vmatmul.bf16.vlgmr.msrb.gmra.mxu1 %v4487_v40  ;;  %v3024_v62 = vld [vmem:[%s4304_s2 + $0x390] sm:$0xf0]  ;;  %v3747_v63 = vld [vmem:[%s4304_s2 + $0x484] sm:$0xf]  ;;  %v2899_v2 = vor.u32 %v3683_v58, %v2896_v60 }
  0x7b   : > { %1816 = vmatpush.bf16.msra.mxu0 %v2819_v20  ;;  %1829 = vmatpush.bf16.msra.mxu1 %v2947_v23  ;;  %v3152_v0 = vld [vmem:[%s4304_s2 + $0x490] sm:$0xf0]  ;;  %v3027_v3 = vor.u32 %v3715_v61, %v3024_v62  ;;  %v3647_v4 = vld [vmem:[%s4304_s2 + $0x164] sm:$0xf]  ;;  %v2694_v61 = vld [vmem:[%s4304_s2 + $0xe8] sm:$0xf] }
  0x7c   : > { %1842 = vmatpush.bf16.msra.mxu2 %v3075_v24  ;;  %1855 = vmatpush.bf16.msra.mxu3 %v3203_v30  ;;  %v2752_v5 = vld [vmem:[%s4304_s2 + $0x170] sm:$0xf0]  ;;  %v3679_v6 = vld [vmem:[%s4304_s2 + $0x264] sm:$0xf]  ;;  %v3155_v7 = vor.u32 %v3747_v63, %v3152_v0  ;;  %v3634_v62 = vld [vmem:[%s4304_s2 + $0xf4] sm:$0xf0] }
  0x7d   : > { %1798 = vmatmul.bf16.vlgmr.msrb.gmra.mxu2 %v4481_v36  ;;  %1811 = vmatmul.bf16.vlgmr.msrb.gmra.mxu3 %v4430_v27  ;;  %v2880_v8 = vld [vmem:[%s4304_s2 + $0x270] sm:$0xf0]  ;;  %v3711_v9 = vld [vmem:[%s4304_s2 + $0x364] sm:$0xf]  ;;  %v2755_v13 = vor.u32 %v3647_v4, %v2752_v5 }
  0x7e   : > { %v3008_v10 = vld [vmem:[%s4304_s2 + $0x370] sm:$0xf0]  ;;  %v3743_v11 = vld [vmem:[%s4304_s2 + $0x464] sm:$0xf]  ;;  %v2883_v14 = vor.u32 %v3679_v6, %v2880_v8  ;;  %v2695_v6 = vor.u32 %v3634_v62, %v2694_v61 }
  0x7f   : > { %1817 = vmatpush.bf16.msra.mxu0 %v2803_v41  ;;  %1830 = vmatpush.bf16.msra.mxu1 %v2931_v42  ;;  %v3136_v12 = vld [vmem:[%s4304_s2 + $0x470] sm:$0xf0]  ;;  %v3011_v15 = vor.u32 %v3711_v9, %v3008_v10  ;;  %v3643_v16 = vld [vmem:[%s4304_s2 + $0x144] sm:$0xf] }
  0x80   : > { %1843 = vmatpush.bf16.msra.mxu2 %v3059_v43  ;;  %1856 = vmatpush.bf16.msra.mxu3 %v3187_v47  ;;  %v2736_v17 = vld [vmem:[%s4304_s2 + $0x150] sm:$0xf0]  ;;  %v3675_v18 = vld [vmem:[%s4304_s2 + $0x244] sm:$0xf]  ;;  %v3139_v19 = vor.u32 %v3743_v11, %v3136_v12  ;;  %v2678_v12 = vld [vmem:[%s4304_s2 + $0xc8] sm:$0xf] }
  0x81   : > { %v2864_v20 = vld [vmem:[%s4304_s2 + $0x250] sm:$0xf0]  ;;  %v3707_v21 = vld [vmem:[%s4304_s2 + $0x344] sm:$0xf]  ;;  %v2739_v25 = vor.u32 %v3643_v16, %v2736_v17 }
  0x82   : > { %v2992_v22 = vld [vmem:[%s4304_s2 + $0x350] sm:$0xf0]  ;;  %v3739_v23 = vld [vmem:[%s4304_s2 + $0x444] sm:$0xf]  ;;  %v2867_v28 = vor.u32 %v3675_v18, %v2864_v20 }
  0x83   : > { %1818 = vmatpush.bf16.msra.mxu0 %v2787_v53  ;;  %1831 = vmatpush.bf16.msra.mxu1 %v2915_v54  ;;  %v3120_v24 = vld [vmem:[%s4304_s2 + $0x450] sm:$0xf0]  ;;  %v2995_v29 = vor.u32 %v3707_v21, %v2992_v22  ;;  %v3639_v30 = vld [vmem:[%s4304_s2 + $0x124] sm:$0xf] }
  0x84   : > { %1844 = vmatpush.bf16.msra.mxu2 %v3043_v55  ;;  %1857 = vmatpush.bf16.msra.mxu3 %v3171_v59  ;;  %v2720_v31 = vld [vmem:[%s4304_s2 + $0x130] sm:$0xf0]  ;;  %v3671_v34 = vld [vmem:[%s4304_s2 + $0x224] sm:$0xf]  ;;  %v3123_v35 = vor.u32 %v3739_v23, %v3120_v24  ;;  %v2662_v24 = vld [vmem:[%s4304_s2 + $0xa8] sm:$0xf] }
  0x85   : > { %v2848_v37 = vld [vmem:[%s4304_s2 + $0x230] sm:$0xf0]  ;;  %v3703_v38 = vld [vmem:[%s4304_s2 + $0x324] sm:$0xf]  ;;  %v2723_v44 = vor.u32 %v3639_v30, %v2720_v31 }
  0x86   : > { %v2976_v41 = vld [vmem:[%s4304_s2 + $0x330] sm:$0xf0]  ;;  %v3735_v42 = vld [vmem:[%s4304_s2 + $0x424] sm:$0xf]  ;;  %v2851_v47 = vor.u32 %v3671_v34, %v2848_v37 }
  0x87   : > { %1819 = vmatpush.bf16.msra.mxu0 %v2771_v1  ;;  %1832 = vmatpush.bf16.msra.mxu1 %v2899_v2  ;;  %v3104_v43 = vld [vmem:[%s4304_s2 + $0x430] sm:$0xf0]  ;;  %v3635_v45 = vld [vmem:[%s4304_s2 + $0x104] sm:$0xf]  ;;  %v2979_v48 = vor.u32 %v3703_v38, %v2976_v41  ;;  %v2822_v1 = vld [vmem:[%s4304_s2 + $0x1e8] sm:$0xf] }
  0x88   : > { %1845 = vmatpush.bf16.msra.mxu2 %v3027_v3  ;;  %1858 = vmatpush.bf16.msra.mxu3 %v3155_v7  ;;  %v2704_v46 = vld [vmem:[%s4304_s2 + $0x110] sm:$0xf0]  ;;  %v3667_v49 = vld [vmem:[%s4304_s2 + $0x204] sm:$0xf]  ;;  %v3107_v52 = vor.u32 %v3735_v42, %v3104_v43  ;;  %v3666_v2 = vld [vmem:[%s4304_s2 + $0x1f4] sm:$0xf0] }
  0x89   : > { %v2832_v50 = vld [vmem:[%s4304_s2 + $0x210] sm:$0xf0]  ;;  %v3699_v51 = vld [vmem:[%s4304_s2 + $0x304] sm:$0xf]  ;;  %v2707_v59 = vor.u32 %v3635_v45, %v2704_v46  ;;  %v2823_v10 = vor.u32 %v3666_v2, %v2822_v1  ;;  %v2646_v43 = vld [vmem:[%s4304_s2 + $0x88] sm:$0xf] }
  0x8a   : > { %v2960_v53 = vld [vmem:[%s4304_s2 + $0x310] sm:$0xf0]  ;;  %v3731_v54 = vld [vmem:[%s4304_s2 + $0x404] sm:$0xf]  ;;  %v2835_v63 = vor.u32 %v3667_v49, %v2832_v50  ;;  %v2774_v45 = vld [vmem:[%s4304_s2 + $0x188] sm:$0xf] }
  0x8b   : > { %1820 = vmatpush.bf16.msra.mxu0 %v2755_v13  ;;  %1833 = vmatpush.bf16.msra.mxu1 %v2883_v14  ;;  %v3088_v55 = vld [vmem:[%s4304_s2 + $0x410] sm:$0xf0]  ;;  %v3791_v56 = vld [vmem:[%s4304_s2 + $0x5e4] sm:$0xf]  ;;  %v2963_v0 = vor.u32 %v3699_v51, %v2960_v53  ;;  %v3630_v13 = vld [vmem:[%s4304_s2 + $0xd4] sm:$0xf0] }
  0x8c   : > { %1846 = vmatpush.bf16.msra.mxu2 %v3011_v15  ;;  %1859 = vmatpush.bf16.msra.mxu3 %v3139_v19  ;;  %v3328_v57 = vld [vmem:[%s4304_s2 + $0x5f0] sm:$0xf0]  ;;  %v3823_v58 = vld [vmem:[%s4304_s2 + $0x6e4] sm:$0xf]  ;;  %v3091_v3 = vor.u32 %v3731_v54, %v3088_v55  ;;  %v2806_v14 = vld [vmem:[%s4304_s2 + $0x1c8] sm:$0xf]  ;;  %v2679_v18 = vor.u32 %v3630_v13, %v2678_v12 }
  0x8d   : > { %v3456_v60 = vld [vmem:[%s4304_s2 + $0x6f0] sm:$0xf0]  ;;  %v3331_v4 = vor.u32 %v3791_v56, %v3328_v57  ;;  %v3787_v7 = vld [vmem:[%s4304_s2 + $0x5c4] sm:$0xf]  ;;  %v3662_v15 = vld [vmem:[%s4304_s2 + $0x1d4] sm:$0xf0] }
  0x8e   : > { %v3459_v5 = vor.u32 %v3823_v58, %v3456_v60  ;;  %v3312_v8 = vld [vmem:[%s4304_s2 + $0x5d0] sm:$0xf0]  ;;  %v3819_v9 = vld [vmem:[%s4304_s2 + $0x6c4] sm:$0xf]  ;;  %v2807_v22 = vor.u32 %v3662_v15, %v2806_v14  ;;  %v3654_v46 = vld [vmem:[%s4304_s2 + $0x194] sm:$0xf0] }
  0x8f   : > { %1821 = vmatpush.bf16.msra.mxu0 %v2739_v25  ;;  %1834 = vmatpush.bf16.msra.mxu1 %v2867_v28  ;;  %v3440_v11 = vld [vmem:[%s4304_s2 + $0x6d0] sm:$0xf0]  ;;  %v3315_v16 = vor.u32 %v3787_v7, %v3312_v8  ;;  %v3783_v19 = vld [vmem:[%s4304_s2 + $0x5a4] sm:$0xf]  ;;  %v3626_v25 = vld [vmem:[%s4304_s2 + $0xb4] sm:$0xf0]  ;;  %v2775_v53 = vor.u32 %v3654_v46, %v2774_v45 }
  0x90   : > { %1847 = vmatpush.bf16.msra.mxu2 %v2995_v29  ;;  %1860 = vmatpush.bf16.msra.mxu3 %v3123_v35  ;;  %v3443_v17 = vor.u32 %v3819_v9, %v3440_v11  ;;  %v3296_v20 = vld [vmem:[%s4304_s2 + $0x5b0] sm:$0xf0]  ;;  %v3815_v21 = vld [vmem:[%s4304_s2 + $0x6a4] sm:$0xf]  ;;  %v2790_v28 = vld [vmem:[%s4304_s2 + $0x1a8] sm:$0xf]  ;;  %v2663_v34 = vor.u32 %v3626_v25, %v2662_v24 }
  0x91   : > { %v3424_v23 = vld [vmem:[%s4304_s2 + $0x6b0] sm:$0xf0]  ;;  %v3658_v29 = vld [vmem:[%s4304_s2 + $0x1b4] sm:$0xf0]  ;;  %v3299_v30 = vor.u32 %v3783_v19, %v3296_v20  ;;  %v3779_v35 = vld [vmem:[%s4304_s2 + $0x584] sm:$0xf] }
  0x92   : > { %v3427_v31 = vor.u32 %v3815_v21, %v3424_v23  ;;  %v3280_v37 = vld [vmem:[%s4304_s2 + $0x590] sm:$0xf0]  ;;  %v3811_v38 = vld [vmem:[%s4304_s2 + $0x684] sm:$0xf]  ;;  %v2791_v41 = vor.u32 %v3658_v29, %v2790_v28  ;;  %v2630_v55 = vld [vmem:[%s4304_s2 + $0x68] sm:$0xf] }
  0x93   : > { %1822 = vmatpush.bf16.msra.mxu0 %v2723_v44  ;;  %1835 = vmatpush.bf16.msra.mxu1 %v2851_v47  ;;  %v3408_v42 = vld [vmem:[%s4304_s2 + $0x690] sm:$0xf0]  ;;  %v3622_v44 = vld [vmem:[%s4304_s2 + $0x94] sm:$0xf0]  ;;  %v3283_v47 = vor.u32 %v3779_v35, %v3280_v37  ;;  %v3775_v50 = vld [vmem:[%s4304_s2 + $0x564] sm:$0xf] }
  0x94   : > { %1848 = vmatpush.bf16.msra.mxu2 %v2979_v48  ;;  %1861 = vmatpush.bf16.msra.mxu3 %v3107_v52  ;;  %v3411_v48 = vor.u32 %v3811_v38, %v3408_v42  ;;  %v2647_v49 = vor.u32 %v3622_v44, %v2646_v43  ;;  %v3264_v51 = vld [vmem:[%s4304_s2 + $0x570] sm:$0xf0]  ;;  %v3807_v52 = vld [vmem:[%s4304_s2 + $0x664] sm:$0xf]  ;;  %v3618_v56 = vld [vmem:[%s4304_s2 + $0x74] sm:$0xf0] }
  0x95   : > { %v3392_v54 = vld [vmem:[%s4304_s2 + $0x670] sm:$0xf0]  ;;  %v2758_v57 = vld [vmem:[%s4304_s2 + $0x168] sm:$0xf]  ;;  %v3650_v58 = vld [vmem:[%s4304_s2 + $0x174] sm:$0xf0]  ;;  %v2631_v61 = vor.u32 %v3618_v56, %v2630_v55 }
  0x96   : > { %v3395_v60 = vor.u32 %v3807_v52, %v3392_v54  ;;  %v3771_v62 = vld [vmem:[%s4304_s2 + $0x544] sm:$0xf]  ;;  %v2759_v1 = vor.u32 %v3650_v58, %v2758_v57  ;;  %v3376_v2 = vld [vmem:[%s4304_s2 + $0x650] sm:$0xf0]  ;;  %v2598_v15 = vld [vmem:[%s4304_s2 + $0x28] sm:$0xf] }
  0x97   : > { %1823 = vmatpush.bf16.msra.mxu0 %v2707_v59  ;;  %1836 = vmatpush.bf16.msra.mxu1 %v2835_v63  ;;  %v3267_v59 = vor.u32 %v3775_v50, %v3264_v51  ;;  %v3248_v63 = vld [vmem:[%s4304_s2 + $0x550] sm:$0xf0]  ;;  %v3799_v12 = vld [vmem:[%s4304_s2 + $0x624] sm:$0xf]  ;;  %v2582_v28 = vld [vmem:[%s4304_s2 + $0x8] sm:$0xf] }
  0x98   : > { %1849 = vmatpush.bf16.msra.mxu2 %v2963_v0  ;;  %1862 = vmatpush.bf16.msra.mxu3 %v3091_v3  ;;  %v3803_v0 = vld [vmem:[%s4304_s2 + $0x644] sm:$0xf]  ;;  %v2614_v3 = vld [vmem:[%s4304_s2 + $0x48] sm:$0xf]  ;;  %v3251_v7 = vor.u32 %v3771_v62, %v3248_v63  ;;  %v3232_v11 = vld [vmem:[%s4304_s2 + $0x530] sm:$0xf0] }
  0x99   : > { %v3379_v8 = vor.u32 %v3803_v0, %v3376_v2  ;;  %v3360_v14 = vld [vmem:[%s4304_s2 + $0x630] sm:$0xf0]  ;;  %v3763_v20 = vld [vmem:[%s4304_s2 + $0x504] sm:$0xf]  ;;  %v2950_v35 = vld [vmem:[%s4304_s2 + $0x2e8] sm:$0xf] }
  0x9a   : > { %1824 = vmatmul.bf16.vlgmr.msra.gmra.mxu0 %v4434_v32  ;;  %1837 = vmatmul.bf16.vlgmr.msra.gmra.mxu1 %v4428_v26  ;;  %v3216_v21 = vld [vmem:[%s4304_s2 + $0x510] sm:$0xf0]  ;;  %v3795_v24 = vld [vmem:[%s4304_s2 + $0x604] sm:$0xf]  ;;  %v3698_v37 = vld [vmem:[%s4304_s2 + $0x2f4] sm:$0xf0] }
  0x9b   : > { %1868 = vmatpush.bf16.msrb.mxu0 %v3331_v4  ;;  %1881 = vmatpush.bf16.msrb.mxu1 %v3459_v5  ;;  %v3614_v4 = vld [vmem:[%s4304_s2 + $0x54] sm:$0xf0]  ;;  %v2742_v5 = vld [vmem:[%s4304_s2 + $0x148] sm:$0xf]  ;;  %v3344_v25 = vld [vmem:[%s4304_s2 + $0x610] sm:$0xf0]  ;;  %v2951_v50 = vor.u32 %v3698_v37, %v2950_v35 }
  0x9c   : > { %1894 = vmatpush.bf16.msrb.mxu2 %v2695_v6  ;;  %1907 = vmatpush.bf16.msrb.mxu3 %v2823_v10  ;;  %v3646_v6 = vld [vmem:[%s4304_s2 + $0x154] sm:$0xf0]  ;;  %v2615_v9 = vor.u32 %v3614_v4, %v2614_v3  ;;  %v3767_v10 = vld [vmem:[%s4304_s2 + $0x524] sm:$0xf]  ;;  %v3078_v38 = vld [vmem:[%s4304_s2 + $0x3e8] sm:$0xf]  ;;  %v3347_v45 = vor.u32 %v3795_v24, %v3344_v25 }
  0x9d   : > { %1850 = vmatmul.bf16.vlgmr.msra.gmra.mxu2 %v4436_v33  ;;  %1863 = vmatmul.bf16.vlgmr.msra.gmra.mxu3 %v4485_v39  ;;  %v2743_v13 = vor.u32 %v3646_v6, %v2742_v5  ;;  %v3235_v19 = vor.u32 %v3767_v10, %v3232_v11  ;;  %v3730_v42 = vld [vmem:[%s4304_s2 + $0x3f4] sm:$0xf0]  ;;  %v3206_v43 = vld [vmem:[%s4304_s2 + $0x4e8] sm:$0xf] }
  0x9e   : > { %v3762_v44 = vld [vmem:[%s4304_s2 + $0x4f4] sm:$0xf0]  ;;  %v3079_v51 = vor.u32 %v3730_v42, %v3078_v38  ;;  %v3062_v55 = vld [vmem:[%s4304_s2 + $0x3c8] sm:$0xf] }
  0x9f   : > { %1869 = vmatpush.bf16.msrb.mxu0 %v3315_v16  ;;  %1882 = vmatpush.bf16.msrb.mxu1 %v3443_v17  ;;  %v3610_v16 = vld [vmem:[%s4304_s2 + $0x34] sm:$0xf0]  ;;  %v2726_v17 = vld [vmem:[%s4304_s2 + $0x128] sm:$0xf]  ;;  %v3207_v52 = vor.u32 %v3762_v44, %v3206_v43 }
  0xa0   : > { %1895 = vmatpush.bf16.msrb.mxu2 %v2679_v18  ;;  %1908 = vmatpush.bf16.msrb.mxu3 %v2807_v22  ;;  %v3642_v18 = vld [vmem:[%s4304_s2 + $0x134] sm:$0xf0]  ;;  %v3363_v22 = vor.u32 %v3799_v12, %v3360_v14  ;;  %v2599_v23 = vor.u32 %v3610_v16, %v2598_v15  ;;  %v3190_v58 = vld [vmem:[%s4304_s2 + $0x4c8] sm:$0xf] }
  0xa1   : > { %v2727_v29 = vor.u32 %v3642_v18, %v2726_v17  ;;  %v3694_v54 = vld [vmem:[%s4304_s2 + $0x2d4] sm:$0xf0]  ;;  %v3046_v3 = vld [vmem:[%s4304_s2 + $0x3a8] sm:$0xf] }
  0xa2   : > { %v3726_v57 = vld [vmem:[%s4304_s2 + $0x3d4] sm:$0xf0]  ;;  %v3174_v6 = vld [vmem:[%s4304_s2 + $0x4a8] sm:$0xf] }
  0xa3   : > { %1870 = vmatpush.bf16.msrb.mxu0 %v3299_v30  ;;  %1883 = vmatpush.bf16.msrb.mxu1 %v3427_v31  ;;  %v3606_v30 = vld [vmem:[%s4304_s2 + $0x14] sm:$0xf0]  ;;  %v2710_v31 = vld [vmem:[%s4304_s2 + $0x108] sm:$0xf]  ;;  %v3063_v63 = vor.u32 %v3726_v57, %v3062_v55 }
  0xa4   : > { %1896 = vmatpush.bf16.msrb.mxu2 %v2663_v34  ;;  %1909 = vmatpush.bf16.msrb.mxu3 %v2791_v41  ;;  %v3638_v34 = vld [vmem:[%s4304_s2 + $0x114] sm:$0xf0]  ;;  %v3219_v41 = vor.u32 %v3763_v20, %v3216_v21  ;;  %v2583_v46 = vor.u32 %v3606_v30, %v2582_v28  ;;  %v3030_v15 = vld [vmem:[%s4304_s2 + $0x388] sm:$0xf] }
  0xa5   : > { %v3690_v2 = vld [vmem:[%s4304_s2 + $0x2b4] sm:$0xf0]  ;;  %v3158_v18 = vld [vmem:[%s4304_s2 + $0x488] sm:$0xf] }
  0xa6   : > { %v3722_v5 = vld [vmem:[%s4304_s2 + $0x3b4] sm:$0xf0]  ;;  %v3286_v20 = vld [vmem:[%s4304_s2 + $0x588] sm:$0xf] }
  0xa7   : > { %1871 = vmatpush.bf16.msrb.mxu0 %v3283_v47  ;;  %1884 = vmatpush.bf16.msrb.mxu1 %v3411_v48  ;;  %v3334_v47 = vld [vmem:[%s4304_s2 + $0x5e8] sm:$0xf]  ;;  %v3794_v48 = vld [vmem:[%s4304_s2 + $0x5f4] sm:$0xf0]  ;;  %v3047_v11 = vor.u32 %v3722_v5, %v3046_v3 }
  0xa8   : > { %1897 = vmatpush.bf16.msrb.mxu2 %v2647_v49  ;;  %1910 = vmatpush.bf16.msrb.mxu3 %v2775_v53  ;;  %v2711_v49 = vor.u32 %v3638_v34, %v2710_v31  ;;  %v2934_v53 = vld [vmem:[%s4304_s2 + $0x2c8] sm:$0xf]  ;;  %v3335_v56 = vor.u32 %v3794_v48, %v3334_v47  ;;  %v3686_v14 = vld [vmem:[%s4304_s2 + $0x294] sm:$0xf0] }
  0xa9   : > { %v2935_v62 = vor.u32 %v3694_v54, %v2934_v53  ;;  %v3718_v17 = vld [vmem:[%s4304_s2 + $0x394] sm:$0xf0]  ;;  %v2886_v25 = vld [vmem:[%s4304_s2 + $0x268] sm:$0xf] }
  0xaa   : > { %v3782_v21 = vld [vmem:[%s4304_s2 + $0x594] sm:$0xf0]  ;;  %v3142_v34 = vld [vmem:[%s4304_s2 + $0x468] sm:$0xf] }
  0xab   : > { %1872 = vmatpush.bf16.msrb.mxu0 %v3267_v59  ;;  %1885 = vmatpush.bf16.msrb.mxu1 %v3395_v60  ;;  %v3758_v59 = vld [vmem:[%s4304_s2 + $0x4d4] sm:$0xf0]  ;;  %v3318_v60 = vld [vmem:[%s4304_s2 + $0x5c8] sm:$0xf]  ;;  %v3287_v30 = vor.u32 %v3782_v21, %v3286_v20 }
  0xac   : > { %1898 = vmatpush.bf16.msrb.mxu2 %v2631_v61  ;;  %1911 = vmatpush.bf16.msrb.mxu3 %v2759_v1  ;;  %v3790_v61 = vld [vmem:[%s4304_s2 + $0x5d4] sm:$0xf0]  ;;  %v3191_v0 = vor.u32 %v3758_v59, %v3190_v58  ;;  %v2918_v1 = vld [vmem:[%s4304_s2 + $0x2a8] sm:$0xf] }
  0xad   : > { %v3319_v4 = vor.u32 %v3790_v61, %v3318_v60  ;;  %v2919_v10 = vor.u32 %v3690_v2, %v2918_v1  ;;  %v3682_v28 = vld [vmem:[%s4304_s2 + $0x274] sm:$0xf0]  ;;  %v3270_v37 = vld [vmem:[%s4304_s2 + $0x568] sm:$0xf] }
  0xae   : > { %v3714_v31 = vld [vmem:[%s4304_s2 + $0x374] sm:$0xf0]  ;;  %v2870_v44 = vld [vmem:[%s4304_s2 + $0x248] sm:$0xf] }
  0xaf   : > { %1873 = vmatpush.bf16.msrb.mxu0 %v3251_v7  ;;  %1886 = vmatpush.bf16.msrb.mxu1 %v3379_v8  ;;  %v3754_v7 = vld [vmem:[%s4304_s2 + $0x4b4] sm:$0xf0]  ;;  %v3302_v8 = vld [vmem:[%s4304_s2 + $0x5a8] sm:$0xf] }
  0xb0   : > { %1899 = vmatpush.bf16.msrb.mxu2 %v2615_v9  ;;  %1912 = vmatpush.bf16.msrb.mxu3 %v2743_v13  ;;  %v3786_v9 = vld [vmem:[%s4304_s2 + $0x5b4] sm:$0xf0]  ;;  %v3175_v12 = vor.u32 %v3754_v7, %v3174_v6  ;;  %v2902_v13 = vld [vmem:[%s4304_s2 + $0x288] sm:$0xf] }
  0xb1   : > { %v3303_v16 = vor.u32 %v3786_v9, %v3302_v8  ;;  %v3746_v35 = vld [vmem:[%s4304_s2 + $0x474] sm:$0xf0]  ;;  %v2982_v58 = vld [vmem:[%s4304_s2 + $0x328] sm:$0xf] }
  0xb2   : > { %v3778_v38 = vld [vmem:[%s4304_s2 + $0x574] sm:$0xf0]  ;;  %v3143_v43 = vor.u32 %v3746_v35, %v3142_v34  ;;  %v3110_v61 = vld [vmem:[%s4304_s2 + $0x428] sm:$0xf]  ;;  %v3628_v34 = vld [vmem:[%s4304_s2 + $0xcc] sm:$0xf] }
  0xb3   : > { %1874 = vmatpush.bf16.msrb.mxu0 %v3235_v19  ;;  %1887 = vmatpush.bf16.msrb.mxu1 %v3363_v22  ;;  %v3750_v19 = vld [vmem:[%s4304_s2 + $0x494] sm:$0xf0]  ;;  %v2903_v22 = vor.u32 %v3686_v14, %v2902_v13  ;;  %v3271_v47 = vor.u32 %v3778_v38, %v3270_v37  ;;  %v2838_v2 = vld [vmem:[%s4304_s2 + $0x208] sm:$0xf]  ;;  %v2680_v37 = vld [vmem:[%s4304_s2 + $0xd8] sm:$0xf0] }
  0xb4   : > { %1900 = vmatpush.bf16.msrb.mxu2 %v2599_v23  ;;  %1913 = vmatpush.bf16.msrb.mxu3 %v2727_v29  ;;  %v3031_v23 = vor.u32 %v3718_v17, %v3030_v15  ;;  %v3159_v24 = vor.u32 %v3750_v19, %v3158_v18  ;;  %v3014_v29 = vld [vmem:[%s4304_s2 + $0x368] sm:$0xf]  ;;  %v3710_v48 = vld [vmem:[%s4304_s2 + $0x354] sm:$0xf0]  ;;  %v3632_v15 = vld [vmem:[%s4304_s2 + $0xec] sm:$0xf] }
  0xb5   : > { %v3015_v42 = vor.u32 %v3714_v31, %v3014_v29  ;;  %v3674_v57 = vld [vmem:[%s4304_s2 + $0x234] sm:$0xf0]  ;;  %v2966_v6 = vld [vmem:[%s4304_s2 + $0x308] sm:$0xf]  ;;  %v2696_v17 = vld [vmem:[%s4304_s2 + $0xf8] sm:$0xf0] }
  0xb6   : > { %v3706_v60 = vld [vmem:[%s4304_s2 + $0x334] sm:$0xf0]  ;;  %v3094_v8 = vld [vmem:[%s4304_s2 + $0x408] sm:$0xf]  ;;  %v3664_v18 = vld [vmem:[%s4304_s2 + $0x1ec] sm:$0xf] }
  0xb7   : > { %1875 = vmatpush.bf16.msrb.mxu0 %v3219_v41  ;;  %1888 = vmatpush.bf16.msrb.mxu1 %v3347_v45  ;;  %v2887_v41 = vor.u32 %v3682_v28, %v2886_v25  ;;  %v3678_v45 = vld [vmem:[%s4304_s2 + $0x254] sm:$0xf0]  ;;  %v3462_v13 = vld [vmem:[%s4304_s2 + $0x6e8] sm:$0xf]  ;;  %v2824_v19 = vld [vmem:[%s4304_s2 + $0x1f8] sm:$0xf0]  ;;  %v2699_v28 = vor.u32 %v3632_v15, %v2696_v17 }
  0xb8   : > { %1901 = vmatpush.bf16.msrb.mxu2 %v2583_v46  ;;  %1914 = vmatpush.bf16.msrb.mxu3 %v2711_v49  ;;  %v2998_v46 = vld [vmem:[%s4304_s2 + $0x348] sm:$0xf]  ;;  %v2871_v53 = vor.u32 %v3678_v45, %v2870_v44  ;;  %v3670_v3 = vld [vmem:[%s4304_s2 + $0x214] sm:$0xf0]  ;;  %v2827_v29 = vor.u32 %v3664_v18, %v2824_v19  ;;  %v3660_v38 = vld [vmem:[%s4304_s2 + $0x1cc] sm:$0xf]  ;;  %v2683_v45 = vor.u32 %v3628_v34, %v2680_v37 }
  0xb9   : > { %v3126_v49 = vld [vmem:[%s4304_s2 + $0x448] sm:$0xf]  ;;  %v2999_v54 = vor.u32 %v3710_v48, %v2998_v46  ;;  %v3702_v7 = vld [vmem:[%s4304_s2 + $0x314] sm:$0xf0]  ;;  %v2888_v15 = vld [vmem:[%s4304_s2 + $0x278] sm:$0xf0] }
  0xba   : > { %1876 = vmatmul.bf16.vlgmr.msrb.gmra.mxu0 %v4487_v40  ;;  %1889 = vmatmul.bf16.vlgmr.msrb.gmra.mxu1 %v4481_v36  ;;  %v3826_v14 = vld [vmem:[%s4304_s2 + $0x6f4] sm:$0xf0]  ;;  %v2967_v20 = vor.u32 %v3702_v7, %v2966_v6  ;;  %v3398_v7 = vld [vmem:[%s4304_s2 + $0x668] sm:$0xf] }
  0xbb   : > { %1920 = vmatpush.bf16.msra.mxu0 %v2951_v50  ;;  %1933 = vmatpush.bf16.msra.mxu1 %v3079_v51  ;;  %v3742_v50 = vld [vmem:[%s4304_s2 + $0x454] sm:$0xf0]  ;;  %v3254_v51 = vld [vmem:[%s4304_s2 + $0x548] sm:$0xf]  ;;  %v3463_v25 = vor.u32 %v3826_v14, %v3462_v13  ;;  %v2760_v13 = vld [vmem:[%s4304_s2 + $0x178] sm:$0xf0] }
  0xbc   : > { %1946 = vmatpush.bf16.msra.mxu2 %v3207_v52  ;;  %1959 = vmatpush.bf16.msra.mxu3 %v3335_v56  ;;  %v3774_v52 = vld [vmem:[%s4304_s2 + $0x554] sm:$0xf0]  ;;  %v3127_v55 = vor.u32 %v3742_v50, %v3126_v49  ;;  %v2854_v56 = vld [vmem:[%s4304_s2 + $0x228] sm:$0xf]  ;;  %v3624_v49 = vld [vmem:[%s4304_s2 + $0xac] sm:$0xf] }
  0xbd   : > { %1902 = vmatmul.bf16.vlgmr.msrb.gmra.mxu2 %v4430_v27  ;;  %1915 = vmatmul.bf16.vlgmr.msrb.gmra.mxu3 %v4434_v32  ;;  %v3255_v59 = vor.u32 %v3774_v52, %v3254_v51  ;;  %v2855_v1 = vor.u32 %v3674_v57, %v2854_v56  ;;  %v3822_v31 = vld [vmem:[%s4304_s2 + $0x6d4] sm:$0xf0]  ;;  %v2664_v51 = vld [vmem:[%s4304_s2 + $0xb8] sm:$0xf0]  ;;  %v3656_v52 = vld [vmem:[%s4304_s2 + $0x1ac] sm:$0xf] }
  0xbe   : > { %v3818_v48 = vld [vmem:[%s4304_s2 + $0x6b4] sm:$0xf0]  ;;  %v2667_v57 = vor.u32 %v3624_v49, %v2664_v51  ;;  %v3680_v14 = vld [vmem:[%s4304_s2 + $0x26c] sm:$0xf]  ;;  %v3382_v19 = vld [vmem:[%s4304_s2 + $0x648] sm:$0xf] }
  0xbf   : > { %1921 = vmatpush.bf16.msra.mxu0 %v2935_v62  ;;  %1934 = vmatpush.bf16.msra.mxu1 %v3063_v63  ;;  %v3738_v62 = vld [vmem:[%s4304_s2 + $0x434] sm:$0xf0]  ;;  %v3238_v63 = vld [vmem:[%s4304_s2 + $0x528] sm:$0xf] }
  0xc0   : > { %1947 = vmatpush.bf16.msra.mxu2 %v3191_v0  ;;  %1960 = vmatpush.bf16.msra.mxu3 %v3319_v4  ;;  %v3770_v0 = vld [vmem:[%s4304_s2 + $0x534] sm:$0xf0]  ;;  %v2983_v4 = vor.u32 %v3706_v60, %v2982_v58  ;;  %v3111_v5 = vor.u32 %v3738_v62, %v3110_v61  ;;  %v3620_v61 = vld [vmem:[%s4304_s2 + $0x8c] sm:$0xf]  ;;  %v3350_v49 = vld [vmem:[%s4304_s2 + $0x608] sm:$0xf] }
  0xc1   : > { %v3239_v9 = vor.u32 %v3770_v0, %v3238_v63  ;;  %v3814_v60 = vld [vmem:[%s4304_s2 + $0x694] sm:$0xf0]  ;;  %v2648_v63 = vld [vmem:[%s4304_s2 + $0x98] sm:$0xf0]  ;;  %v3652_v0 = vld [vmem:[%s4304_s2 + $0x18c] sm:$0xf] }
  0xc2   : > { %v3802_v37 = vld [vmem:[%s4304_s2 + $0x634] sm:$0xf0] }
  0xc3   : > { %1922 = vmatpush.bf16.msra.mxu0 %v2919_v10  ;;  %1935 = vmatpush.bf16.msra.mxu1 %v3047_v11  ;;  %v3734_v10 = vld [vmem:[%s4304_s2 + $0x414] sm:$0xf0]  ;;  %v3222_v11 = vld [vmem:[%s4304_s2 + $0x508] sm:$0xf] }
  0xc4   : > { %1948 = vmatpush.bf16.msra.mxu2 %v3175_v12  ;;  %1961 = vmatpush.bf16.msra.mxu3 %v3303_v16  ;;  %v3766_v12 = vld [vmem:[%s4304_s2 + $0x514] sm:$0xf0]  ;;  %v2839_v16 = vor.u32 %v3670_v3, %v2838_v2  ;;  %v3095_v21 = vor.u32 %v3734_v10, %v3094_v8  ;;  %v3684_v2 = vld [vmem:[%s4304_s2 + $0x28c] sm:$0xf]  ;;  %v2904_v3 = vld [vmem:[%s4304_s2 + $0x298] sm:$0xf0] }
  0xc5   : > { %v3810_v8 = vld [vmem:[%s4304_s2 + $0x674] sm:$0xf0]  ;;  %v2907_v10 = vor.u32 %v3684_v2, %v2904_v3  ;;  %v3208_v3 = vld [vmem:[%s4304_s2 + $0x4f8] sm:$0xf0] }
  0xc7   : > { %1923 = vmatpush.bf16.msra.mxu0 %v2903_v22  ;;  %1936 = vmatpush.bf16.msra.mxu1 %v3031_v23  ;;  %v3696_v22 = vld [vmem:[%s4304_s2 + $0x2ec] sm:$0xf]  ;;  %v2952_v23 = vld [vmem:[%s4304_s2 + $0x2f8] sm:$0xf0] }
  0xc8   : > { %1949 = vmatpush.bf16.msra.mxu2 %v3159_v24  ;;  %1962 = vmatpush.bf16.msra.mxu3 %v3287_v30  ;;  %v3223_v24 = vor.u32 %v3766_v12, %v3222_v11  ;;  %v3446_v30 = vld [vmem:[%s4304_s2 + $0x6c8] sm:$0xf]  ;;  %v2955_v35 = vor.u32 %v3696_v22, %v2952_v23  ;;  %v2632_v11 = vld [vmem:[%s4304_s2 + $0x78] sm:$0xf0]  ;;  %v3648_v12 = vld [vmem:[%s4304_s2 + $0x16c] sm:$0xf]  ;;  %v2891_v22 = vor.u32 %v3680_v14, %v2888_v15 }
  0xc9   : > { %v3447_v44 = vor.u32 %v3822_v31, %v3446_v30  ;;  %v2763_v18 = vor.u32 %v3648_v12, %v2760_v13  ;;  %v2616_v23 = vld [vmem:[%s4304_s2 + $0x58] sm:$0xf0] }
  0xcb   : > { %1924 = vmatpush.bf16.msra.mxu0 %v2887_v41  ;;  %1937 = vmatpush.bf16.msra.mxu1 %v3015_v42  ;;  %v2808_v41 = vld [vmem:[%s4304_s2 + $0x1d8] sm:$0xf0]  ;;  %v3692_v42 = vld [vmem:[%s4304_s2 + $0x2cc] sm:$0xf] }
  0xcc   : > { %1950 = vmatpush.bf16.msra.mxu2 %v3143_v43  ;;  %1963 = vmatpush.bf16.msra.mxu3 %v3271_v47  ;;  %v2936_v43 = vld [vmem:[%s4304_s2 + $0x2d8] sm:$0xf0]  ;;  %v2811_v46 = vor.u32 %v3660_v38, %v2808_v41  ;;  %v3430_v47 = vld [vmem:[%s4304_s2 + $0x6a8] sm:$0xf]  ;;  %v3608_v38 = vld [vmem:[%s4304_s2 + $0x2c] sm:$0xf] }
  0xcd   : > { %v2939_v50 = vor.u32 %v3692_v42, %v2936_v43  ;;  %v3431_v56 = vor.u32 %v3818_v48, %v3430_v47  ;;  %v2600_v42 = vld [vmem:[%s4304_s2 + $0x38] sm:$0xf0]  ;;  %v3640_v43 = vld [vmem:[%s4304_s2 + $0x12c] sm:$0xf] }
  0xcf   : > { %1925 = vmatpush.bf16.msra.mxu0 %v2871_v53  ;;  %1938 = vmatpush.bf16.msra.mxu1 %v2999_v54  ;;  %v2792_v53 = vld [vmem:[%s4304_s2 + $0x1b8] sm:$0xf0]  ;;  %v3688_v54 = vld [vmem:[%s4304_s2 + $0x2ac] sm:$0xf] }
  0xd0   : > { %1951 = vmatpush.bf16.msra.mxu2 %v3127_v55  ;;  %1964 = vmatpush.bf16.msra.mxu3 %v3255_v59  ;;  %v2920_v55 = vld [vmem:[%s4304_s2 + $0x2b8] sm:$0xf0]  ;;  %v2795_v58 = vor.u32 %v3656_v52, %v2792_v53  ;;  %v3414_v59 = vld [vmem:[%s4304_s2 + $0x688] sm:$0xf]  ;;  %v2603_v52 = vor.u32 %v3608_v38, %v2600_v42  ;;  %v3752_v38 = vld [vmem:[%s4304_s2 + $0x4ac] sm:$0xf] }
  0xd1   : > { %v2923_v62 = vor.u32 %v3688_v54, %v2920_v55  ;;  %v3604_v54 = vld [vmem:[%s4304_s2 + $0xc] sm:$0xf]  ;;  %v2584_v55 = vld [vmem:[%s4304_s2 + $0x18] sm:$0xf0] }
  0xd3   : > { %1926 = vmatpush.bf16.msra.mxu0 %v2855_v1  ;;  %1939 = vmatpush.bf16.msra.mxu1 %v2983_v4  ;;  %v2776_v1 = vld [vmem:[%s4304_s2 + $0x198] sm:$0xf0]  ;;  %v3415_v4 = vor.u32 %v3814_v60, %v3414_v59  ;;  %v3668_v60 = vld [vmem:[%s4304_s2 + $0x20c] sm:$0xf] }
  0xd4   : > { %1952 = vmatpush.bf16.msra.mxu2 %v3111_v5  ;;  %1965 = vmatpush.bf16.msra.mxu3 %v3239_v9  ;;  %v2651_v5 = vor.u32 %v3620_v61, %v2648_v63  ;;  %v2779_v6 = vor.u32 %v3652_v0, %v2776_v1  ;;  %v3616_v9 = vld [vmem:[%s4304_s2 + $0x6c] sm:$0xf]  ;;  %v2712_v59 = vld [vmem:[%s4304_s2 + $0x118] sm:$0xf0] }
  0xd5   : > { %v2635_v17 = vor.u32 %v3616_v9, %v2632_v11  ;;  %v2840_v61 = vld [vmem:[%s4304_s2 + $0x218] sm:$0xf0]  ;;  %v3760_v0 = vld [vmem:[%s4304_s2 + $0x4ec] sm:$0xf] }
  0xd6   : > { %v3080_v63 = vld [vmem:[%s4304_s2 + $0x3f8] sm:$0xf0]  ;;  %v3824_v9 = vld [vmem:[%s4304_s2 + $0x6ec] sm:$0xf]  ;;  %v2843_v11 = vor.u32 %v3668_v60, %v2840_v61  ;;  %v3211_v14 = vor.u32 %v3760_v0, %v3208_v3 }
  0xd7   : > { %1927 = vmatpush.bf16.msra.mxu0 %v2839_v16  ;;  %1940 = vmatpush.bf16.msra.mxu1 %v2967_v20  ;;  %v3399_v16 = vor.u32 %v3810_v8, %v3398_v7  ;;  %v3806_v20 = vld [vmem:[%s4304_s2 + $0x654] sm:$0xf0]  ;;  %v2587_v7 = vor.u32 %v3604_v54, %v2584_v55  ;;  %v3780_v55 = vld [vmem:[%s4304_s2 + $0x58c] sm:$0xf]  ;;  %v3016_v0 = vld [vmem:[%s4304_s2 + $0x378] sm:$0xf0] }
  0xd8   : > { %1953 = vmatpush.bf16.msra.mxu2 %v3095_v21  ;;  %1966 = vmatpush.bf16.msra.mxu3 %v3223_v24  ;;  %v3612_v21 = vld [vmem:[%s4304_s2 + $0x4c] sm:$0xf]  ;;  %v3383_v30 = vor.u32 %v3806_v20, %v3382_v19 }
  0xd9   : > { %v3644_v24 = vld [vmem:[%s4304_s2 + $0x14c] sm:$0xf]  ;;  %v2619_v31 = vor.u32 %v3612_v21, %v2616_v23 }
  0xda   : > { %1928 = vmatmul.bf16.vlgmr.msra.gmra.mxu0 %v4428_v26  ;;  %1941 = vmatmul.bf16.vlgmr.msra.gmra.mxu1 %v4436_v33  ;;  %v3788_v23 = vld [vmem:[%s4304_s2 + $0x5cc] sm:$0xf] }
  0xdb   : > { %1972 = vmatpush.bf16.msrb.mxu0 %v3463_v25  ;;  %1985 = vmatpush.bf16.msrb.mxu1 %v2699_v28  ;;  %v2744_v25 = vld [vmem:[%s4304_s2 + $0x158] sm:$0xf0]  ;;  %v3676_v28 = vld [vmem:[%s4304_s2 + $0x24c] sm:$0xf] }
  0xdc   : > { %1998 = vmatpush.bf16.msrb.mxu2 %v2827_v29  ;;  %2011 = vmatpush.bf16.msrb.mxu3 %v2955_v35  ;;  %v2872_v29 = vld [vmem:[%s4304_s2 + $0x258] sm:$0xf0]  ;;  %v2747_v34 = vor.u32 %v3644_v24, %v2744_v25  ;;  %v3366_v35 = vld [vmem:[%s4304_s2 + $0x628] sm:$0xf] }
  0xdd   : > { %1954 = vmatmul.bf16.vlgmr.msra.gmra.mxu2 %v4485_v39  ;;  %1967 = vmatmul.bf16.vlgmr.msra.gmra.mxu3 %v4487_v40  ;;  %v2875_v41 = vor.u32 %v3676_v28, %v2872_v29  ;;  %v3367_v48 = vor.u32 %v3802_v37, %v3366_v35  ;;  %v3320_v24 = vld [vmem:[%s4304_s2 + $0x5d8] sm:$0xf0]  ;;  %v3820_v28 = vld [vmem:[%s4304_s2 + $0x6cc] sm:$0xf] }
  0xde   : > { %v3448_v29 = vld [vmem:[%s4304_s2 + $0x6d8] sm:$0xf0]  ;;  %v3720_v35 = vld [vmem:[%s4304_s2 + $0x3ac] sm:$0xf] }
  0xdf   : > { %1973 = vmatpush.bf16.msrb.mxu0 %v3447_v44  ;;  %1986 = vmatpush.bf16.msrb.mxu1 %v2683_v45  ;;  %v2728_v44 = vld [vmem:[%s4304_s2 + $0x138] sm:$0xf0]  ;;  %v3672_v45 = vld [vmem:[%s4304_s2 + $0x22c] sm:$0xf]  ;;  %v3451_v42 = vor.u32 %v3820_v28, %v3448_v29 }
  0xe0   : > { %1999 = vmatpush.bf16.msrb.mxu2 %v2811_v46  ;;  %2012 = vmatpush.bf16.msrb.mxu3 %v2939_v50  ;;  %v2856_v46 = vld [vmem:[%s4304_s2 + $0x238] sm:$0xf0]  ;;  %v3798_v50 = vld [vmem:[%s4304_s2 + $0x614] sm:$0xf0]  ;;  %v2731_v53 = vor.u32 %v3640_v43, %v2728_v44  ;;  %v3784_v44 = vld [vmem:[%s4304_s2 + $0x5ac] sm:$0xf] }
  0xe1   : > { %v3351_v2 = vor.u32 %v3798_v50, %v3350_v49  ;;  %v3048_v37 = vld [vmem:[%s4304_s2 + $0x3b8] sm:$0xf0] }
  0xe2   : > { %v3176_v43 = vld [vmem:[%s4304_s2 + $0x4b8] sm:$0xf0] }
  0xe3   : > { %1974 = vmatpush.bf16.msrb.mxu0 %v3431_v56  ;;  %1987 = vmatpush.bf16.msrb.mxu1 %v2667_v57  ;;  %v3636_v56 = vld [vmem:[%s4304_s2 + $0x10c] sm:$0xf]  ;;  %v3179_v50 = vor.u32 %v3752_v38, %v3176_v43  ;;  %v3240_v43 = vld [vmem:[%s4304_s2 + $0x538] sm:$0xf0] }
  0xe4   : > { %2000 = vmatpush.bf16.msrb.mxu2 %v2795_v58  ;;  %2013 = vmatpush.bf16.msrb.mxu3 %v2923_v62  ;;  %v2859_v58 = vor.u32 %v3672_v45, %v2856_v46  ;;  %v3728_v62 = vld [vmem:[%s4304_s2 + $0x3ec] sm:$0xf]  ;;  %v2715_v8 = vor.u32 %v3636_v56, %v2712_v59  ;;  %v3304_v45 = vld [vmem:[%s4304_s2 + $0x5b8] sm:$0xf0] }
  0xe5   : > { %v3083_v12 = vor.u32 %v3728_v62, %v3080_v63  ;;  %v3816_v46 = vld [vmem:[%s4304_s2 + $0x6ac] sm:$0xf]  ;;  %v3288_v56 = vld [vmem:[%s4304_s2 + $0x598] sm:$0xf0] }
  0xe6   : > { %v1721_v47 = vpop.f32.mrf.mxu0  ;;  %v3291_v62 = vor.u32 %v3780_v55, %v3288_v56  ;;  %v3712_v63 = vld [vmem:[%s4304_s2 + $0x36c] sm:$0xf]  ;;  %v3352_v56 = vld [vmem:[%s4304_s2 + $0x618] sm:$0xf0] }
  0xe7   : > { %1975 = vmatpush.bf16.msrb.mxu0 %v3415_v4  ;;  %1988 = vmatpush.bf16.msrb.mxu1 %v2651_v5  ;;  %v1734_v51 = vpop.f32.mrf.mxu1  ;;  %v3792_v4 = vld [vmem:[%s4304_s2 + $0x5ec] sm:$0xf]  ;;  %v3336_v5 = vld [vmem:[%s4304_s2 + $0x5f8] sm:$0xf0] }
  0xe8   : > { %2001 = vmatpush.bf16.msrb.mxu2 %v2779_v6  ;;  %2014 = vmatpush.bf16.msrb.mxu3 %v2907_v10  ;;  %v1735_v57 = vadd.f32 %v1734_v51, %v1721_v47  ;;  %v3464_v10 = vld [vmem:[%s4304_s2 + $0x6f8] sm:$0xf0]  ;;  %v3339_v15 = vor.u32 %v3792_v4, %v3336_v5  ;;  %v3307_v51 = vor.u32 %v3784_v44, %v3304_v45  ;;  %v3776_v5 = vld [vmem:[%s4304_s2 + $0x56c] sm:$0xf] }
  0xe9   : > { %v3467_v21 = vor.u32 %v3824_v9, %v3464_v10  ;;  %v3432_v47 = vld [vmem:[%s4304_s2 + $0x6b8] sm:$0xf0]  ;;  %v3019_v10 = vor.u32 %v3712_v63, %v3016_v0  ;;  %v3800_v44 = vld [vmem:[%s4304_s2 + $0x62c] sm:$0xf] }
  0xea   : > { %v3435_v54 = vor.u32 %v3816_v46, %v3432_v47  ;;  %v3144_v4 = vld [vmem:[%s4304_s2 + $0x478] sm:$0xf0]  ;;  %v3796_v55 = vld [vmem:[%s4304_s2 + $0x60c] sm:$0xf] }
  0xeb   : > { %1976 = vmatpush.bf16.msrb.mxu0 %v3399_v16  ;;  %1989 = vmatpush.bf16.msrb.mxu1 %v2635_v17  ;;  %v3724_v16 = vld [vmem:[%s4304_s2 + $0x3cc] sm:$0xf]  ;;  %v3064_v17 = vld [vmem:[%s4304_s2 + $0x3d8] sm:$0xf0] }
  0xec   : > { %2002 = vmatpush.bf16.msrb.mxu2 %v2763_v18  ;;  %2015 = vmatpush.bf16.msrb.mxu3 %v2891_v22  ;;  %v1747_v1 = vpop.f32.mrf.mxu2  ;;  %v3756_v18 = vld [vmem:[%s4304_s2 + $0x4cc] sm:$0xf]  ;;  %v3192_v22 = vld [vmem:[%s4304_s2 + $0x4d8] sm:$0xf0] }
  0xed   : > { %v1748_v6 = vadd.f32 %v1747_v1, %v1735_v57  ;;  %v1760_v13 = vpop.f32.mrf.mxu3  ;;  %v3812_v57 = vld [vmem:[%s4304_s2 + $0x68c] sm:$0xf]  ;;  %v3368_v45 = vld [vmem:[%s4304_s2 + $0x638] sm:$0xf0] }
  0xee   : > { %v1723_v19 = vpop.f32.mrf.mxu0  ;;  %v3744_v1 = vld [vmem:[%s4304_s2 + $0x46c] sm:$0xf] }
  0xef   : > { %1977 = vmatpush.bf16.msrb.mxu0 %v3383_v30  ;;  %1990 = vmatpush.bf16.msrb.mxu1 %v2619_v31  ;;  %v1761_v20 = vadd.f32 %v1760_v13, %v1748_v6  ;;  %v1736_v25 = vpop.f32.mrf.mxu1  ;;  %v3067_v30 = vor.u32 %v3724_v16, %v3064_v17  ;;  %v3195_v31 = vor.u32 %v3756_v18, %v3192_v22  ;;  %v3272_v6 = vld [vmem:[%s4304_s2 + $0x578] sm:$0xf0]  ;;  %v3708_v13 = vld [vmem:[%s4304_s2 + $0x34c] sm:$0xf] }
  0xf0   : > { %2003 = vmatpush.bf16.msrb.mxu2 %v2747_v34  ;;  %2016 = vmatpush.bf16.msrb.mxu3 %v2875_v41  ;;  %v3323_v34 = vor.u32 %v3788_v23, %v3320_v24  ;;  %v3128_v18 = vld [vmem:[%s4304_s2 + $0x458] sm:$0xf0]  ;;  %v3772_v19 = vld [vmem:[%s4304_s2 + $0x54c] sm:$0xf] }
  0xf1   : > { %v3804_v22 = vld [vmem:[%s4304_s2 + $0x64c] sm:$0xf]  ;;  %v3384_v23 = vld [vmem:[%s4304_s2 + $0x658] sm:$0xf0] }
  0xf2   : > { %v3387_v38 = vor.u32 %v3804_v22, %v3384_v23 }
  0xf3   : > { %1978 = vmatpush.bf16.msrb.mxu0 %v3367_v48  ;;  %1991 = vmatpush.bf16.msrb.mxu1 %v2603_v52  ;;  %v3051_v48 = vor.u32 %v3720_v35, %v3048_v37  ;;  %v3716_v52 = vld [vmem:[%s4304_s2 + $0x38c] sm:$0xf]  ;;  %v2984_v35 = vld [vmem:[%s4304_s2 + $0x338] sm:$0xf0] }
  0xf4   : > { %2004 = vmatpush.bf16.msrb.mxu2 %v2731_v53  ;;  %2017 = vmatpush.bf16.msrb.mxu3 %v2859_v58  ;;  %v1749_v41 = vpop.f32.mrf.mxu2  ;;  %v3748_v53 = vld [vmem:[%s4304_s2 + $0x48c] sm:$0xf]  ;;  %v3416_v58 = vld [vmem:[%s4304_s2 + $0x698] sm:$0xf0] }
  0xf5   : > { %v1762_v49 = vpop.f32.mrf.mxu3  ;;  %v3419_v3 = vor.u32 %v3812_v57, %v3416_v58  ;;  %v3736_v37 = vld [vmem:[%s4304_s2 + $0x42c] sm:$0xf]  ;;  %v3112_v41 = vld [vmem:[%s4304_s2 + $0x438] sm:$0xf0] }
  0xf6   : > { %v3115_v47 = vor.u32 %v3736_v37, %v3112_v41  ;;  %v3700_v49 = vld [vmem:[%s4304_s2 + $0x30c] sm:$0xf] }
  0xf7   : > { %1979 = vmatpush.bf16.msrb.mxu0 %v3351_v2  ;;  %1992 = vmatpush.bf16.msrb.mxu1 %v2587_v7  ;;  %v1773_v59 = vpop.f32.mrf.mxu0  ;;  %v1786_v60 = vpop.f32.mrf.mxu1  ;;  %v3808_v7 = vld [vmem:[%s4304_s2 + $0x66c] sm:$0xf] }
  0xf8   : > { %2005 = vmatpush.bf16.msrb.mxu2 %v2715_v8  ;;  %2018 = vmatpush.bf16.msrb.mxu3 %v2843_v11  ;;  %v1774_v2 = vadd.f32 %v1773_v59, %v1761_v20  ;;  %v3400_v8 = vld [vmem:[%s4304_s2 + $0x678] sm:$0xf0]  ;;  %v3147_v11 = vor.u32 %v3744_v1, %v3144_v4 }
  0xf9   : > { %v3403_v17 = vor.u32 %v3808_v7, %v3400_v8  ;;  %v3256_v20 = vld [vmem:[%s4304_s2 + $0x558] sm:$0xf0] }
  0xfa   : > { %1980 = vmatmul.bf16.vlgmr.msrb.gmra.mxu0 %v4481_v36  ;;  %1993 = vmatmul.bf16.vlgmr.msrb.gmra.mxu1 %v4430_v27  ;;  %v1787_v9 = vadd.f32 %v1786_v60, %v1774_v2  ;;  %v3355_v60 = vor.u32 %v3796_v55, %v3352_v56 }
  0xfb   : > { %2024 = vmatpush.bf16.msra.mxu0 %v3083_v12  ;;  %2037 = vmatpush.bf16.msra.mxu1 %v3211_v14  ;;  %v3275_v12 = vor.u32 %v3776_v5, %v3272_v6  ;;  %v3000_v14 = vld [vmem:[%s4304_s2 + $0x358] sm:$0xf0] }
  0xfc   : > { %2050 = vmatpush.bf16.msra.mxu2 %v3339_v15  ;;  %2063 = vmatpush.bf16.msra.mxu3 %v3467_v21  ;;  %v3740_v15 = vld [vmem:[%s4304_s2 + $0x44c] sm:$0xf]  ;;  %v3003_v25 = vor.u32 %v3708_v13, %v3000_v14 }
  0xfd   : > { %2006 = vmatmul.bf16.vlgmr.msrb.gmra.mxu2 %v4434_v32  ;;  %2019 = vmatmul.bf16.vlgmr.msrb.gmra.mxu3 %v4428_v26  ;;  %v3032_v32 = vld [vmem:[%s4304_s2 + $0x398] sm:$0xf0] }
  0xfe   : > { %v3160_v26 = vld [vmem:[%s4304_s2 + $0x498] sm:$0xf0]  ;;  %v3035_v27 = vor.u32 %v3716_v52, %v3032_v32  ;;  %v3371_v32 = vor.u32 %v3800_v44, %v3368_v45 }
  0xff   : > { %2025 = vmatpush.bf16.msra.mxu0 %v3067_v30  ;;  %2038 = vmatpush.bf16.msra.mxu1 %v3195_v31  ;;  %v3163_v61 = vor.u32 %v3748_v53, %v3160_v26  ;;  %v1775_v28 = vpop.f32.mrf.mxu0  ;;  %v1788_v29 = vpop.f32.mrf.mxu1  ;;  %v3131_v30 = vor.u32 %v3740_v15, %v3128_v18  ;;  %v3259_v31 = vor.u32 %v3772_v19, %v3256_v20  ;;  %v3096_v53 = vld [vmem:[%s4304_s2 + $0x418] sm:$0xf0] }
 0x100   : > { %2051 = vmatpush.bf16.msra.mxu2 %v3323_v34  ;;  %2064 = vmatpush.bf16.msra.mxu3 %v3451_v42  ;;  %v1799_v16 = vpop.f32.mrf.mxu2  ;;  %v1812_v24 = vpop.f32.mrf.mxu3  ;;  %v3704_v34 = vld [vmem:[%s4304_s2 + $0x32c] sm:$0xf]  ;;  %v3224_v26 = vld [vmem:[%s4304_s2 + $0x518] sm:$0xf0] }
 0x101   : > { %v4795_v21 = vadd.f32 %v1799_v16, %v1787_v9  ;;  %v3768_v42 = vld [vmem:[%s4304_s2 + $0x52c] sm:$0xf]  ;;  %v2987_v46 = vor.u32 %v3704_v34, %v2984_v35 }
 0x103   : > { %2026 = vmatpush.bf16.msra.mxu0 %v3051_v48  ;;  %2039 = vmatpush.bf16.msra.mxu1 %v3179_v50  ;;  %v3243_v48 = vor.u32 %v3768_v42, %v3240_v43  ;;  %v2968_v50 = vld [vmem:[%s4304_s2 + $0x318] sm:$0xf0] }
 0x104   : > { %2052 = vmatpush.bf16.msra.mxu2 %v3307_v51  ;;  %2065 = vmatpush.bf16.msra.mxu3 %v3435_v54  ;;  %v3732_v51 = vld [vmem:[%s4304_s2 + $0x40c] sm:$0xf]  ;;  %v2971_v58 = vor.u32 %v3700_v49, %v2968_v50 }
 0x105   : > { %v3764_v54 = vld [vmem:[%s4304_s2 + $0x50c] sm:$0xf] }
 0x106   : > { %v3227_v59 = vor.u32 %v3764_v54, %v3224_v26 }
 0x107   : > { %2027 = vmatpush.bf16.msra.mxu0 %v3035_v27  ;;  %2040 = vmatpush.bf16.msra.mxu1 %v3163_v61  ;;  %v3099_v27 = vor.u32 %v3732_v51, %v3096_v53 }
 0x108   : > { %2053 = vmatpush.bf16.msra.mxu2 %v3291_v62  ;;  %2066 = vmatpush.bf16.msra.mxu3 %v3419_v3  ;;  %v1801_v52 = vpop.f32.mrf.mxu2  ;;  %v1814_v57 = vpop.f32.mrf.mxu3 }
 0x10b   : > { %2028 = vmatpush.bf16.msra.mxu0 %v3019_v10  ;;  %2041 = vmatpush.bf16.msra.mxu1 %v3147_v11 }
 0x10c   : > { %2054 = vmatpush.bf16.msra.mxu2 %v3275_v12  ;;  %2067 = vmatpush.bf16.msra.mxu3 %v3403_v17 }
 0x10f   : > { %2029 = vmatpush.bf16.msra.mxu0 %v3003_v25  ;;  %2042 = vmatpush.bf16.msra.mxu1 %v3131_v30 }
 0x110   : > { %2055 = vmatpush.bf16.msra.mxu2 %v3259_v31  ;;  %2068 = vmatpush.bf16.msra.mxu3 %v3387_v38 }
 0x113   : > { %2030 = vmatpush.bf16.msra.mxu0 %v2987_v46  ;;  %2043 = vmatpush.bf16.msra.mxu1 %v3115_v47 }
 0x114   : > { %2056 = vmatpush.bf16.msra.mxu2 %v3243_v48  ;;  %2069 = vmatpush.bf16.msra.mxu3 %v3371_v32 }
 0x117   : > { %2031 = vmatpush.bf16.msra.mxu0 %v2971_v58  ;;  %2044 = vmatpush.bf16.msra.mxu1 %v3099_v27  ;;  %v1825_v61 = vpop.f32.mrf.mxu0  ;;  %v1838_v63 = vpop.f32.mrf.mxu1  ;;  %v339_v58 = vld [vmem:[#allocation2] sm:$0xff] }
 0x118   : > { %2057 = vmatpush.bf16.msra.mxu2 %v3227_v59  ;;  %2070 = vmatpush.bf16.msra.mxu3 %v3355_v60  ;;  %v1826_v62 = vadd.f32 %v1825_v61, %v1812_v24 }
 0x11a   : > { %2032 = vmatmul.bf16.vlgmr.msra.gmra.mxu0 %v4436_v33  ;;  %2045 = vmatmul.bf16.vlgmr.msra.gmra.mxu1 %v4485_v39  ;;  %v1839_v0 = vadd.f32 %v1838_v63, %v1826_v62 }
 0x11b   : > { %2058 = vmatmul.bf16.vlgmr.msra.gmra.mxu2 %v4487_v40  ;;  %2071 = vmatmul.bf16.vlgmr.msra.gmra.mxu3 %v4481_v36 }
 0x11f   : > { %v1827_v5 = vpop.f32.mrf.mxu0  ;;  %v1840_v6 = vpop.f32.mrf.mxu1 }
 0x120   : > { %v1851_v1 = vpop.f32.mrf.mxu2  ;;  %v1864_v3 = vpop.f32.mrf.mxu3 }
 0x121   : > { %v1852_v2 = vadd.f32 %v1851_v1, %v1839_v0 }
 0x123   : > { %v1865_v4 = vadd.f32 %v1864_v3, %v1852_v2 }
 0x128   : > { %v1853_v7 = vpop.f32.mrf.mxu2  ;;  %v1866_v8 = vpop.f32.mrf.mxu3 }
 0x137   : > { %v1877_v9 = vpop.f32.mrf.mxu0  ;;  %v1890_v10 = vpop.f32.mrf.mxu1 }
 0x138   : > { %v1878_v33 = vadd.f32 %v1877_v9, %v1865_v4 }
 0x13a   : > { %v1891_v39 = vadd.f32 %v1890_v10, %v1878_v33 }
 0x13c   : > { %v2080_v40 = vrot.slane %v1891_v39, 6 }
 0x13e   : > { %v2084_v36 = vsel %vm2083_vm0, %v4795_v21, %v2080_v40 }
 0x13f   : > { %v1879_v13 = vpop.f32.mrf.mxu0  ;;  %v1892_v15 = vpop.f32.mrf.mxu1 }
 0x140   : > { %v1903_v11 = vpop.f32.mrf.mxu2  ;;  %v1916_v12 = vpop.f32.mrf.mxu3 }
 0x141   : > { %v1917_v14 = vadd.f32 %v1916_v12, %v1903_v11 }
 0x148   : > { %v1905_v16 = vpop.f32.mrf.mxu2  ;;  %v1918_v17 = vpop.f32.mrf.mxu3 }
 0x157   : > { %v1929_v18 = vpop.f32.mrf.mxu0  ;;  %v1942_v19 = vpop.f32.mrf.mxu1 }
 0x158   : > { %v1930_v41 = vadd.f32 %v1929_v18, %v1917_v14 }
 0x15a   : > { %v1943_v43 = vadd.f32 %v1942_v19, %v1930_v41 }
 0x15f   : > { %v1931_v23 = vpop.f32.mrf.mxu0  ;;  %v1944_v24 = vpop.f32.mrf.mxu1 }
 0x160   : > { %v1955_v20 = vpop.f32.mrf.mxu2  ;;  %v1968_v22 = vpop.f32.mrf.mxu3 }
 0x161   : > { %v1956_v47 = vadd.f32 %v1955_v20, %v1943_v43 }
 0x163   : > { %v1969_v49 = vadd.f32 %v1968_v22, %v1956_v47 }
 0x168   : > { %v1957_v25 = vpop.f32.mrf.mxu2  ;;  %v1970_v28 = vpop.f32.mrf.mxu3 }
 0x177   : > { %v1981_v29 = vpop.f32.mrf.mxu0  ;;  %v1994_v30 = vpop.f32.mrf.mxu1 }
 0x178   : > { %v1982_v52 = vadd.f32 %v1981_v29, %v1969_v49 }
 0x17a   : > { %v2081_v56 = vrot.slane %v1982_v52, 4 }
 0x17f   : > { %v1983_v21 = vpop.f32.mrf.mxu0  ;;  %v1996_v35 = vpop.f32.mrf.mxu1 }
 0x180   : > { %v2007_v31 = vpop.f32.mrf.mxu2  ;;  %v2020_v34 = vpop.f32.mrf.mxu3 }
 0x181   : > { %v2008_v42 = vadd.f32 %v2007_v31, %v1994_v30 }
 0x183   : > { %v2021_v44 = vadd.f32 %v2020_v34, %v2008_v42 }
 0x188   : > { %v2009_v37 = vpop.f32.mrf.mxu2  ;;  %v2022_v38 = vpop.f32.mrf.mxu3 }
 0x197   : > { %v2033_v45 = vpop.f32.mrf.mxu0  ;;  %v2046_v46 = vpop.f32.mrf.mxu1 }
 0x198   : > { %v2034_v48 = vadd.f32 %v2033_v45, %v2021_v44 }
 0x19a   : > { %v2047_v50 = vadd.f32 %v2046_v46, %v2034_v48 }
 0x19e   : > { %v2059_v51 = vpop.f32.mrf.mxu2  ;;  %v2072_v53 = vpop.f32.mrf.mxu3 }
 0x19f   : > { %v2060_v32 = vadd.f32 %v2059_v51, %v2047_v50  ;;  %v2035_v54 = vpop.f32.mrf.mxu0  ;;  %v2048_v26 = vpop.f32.mrf.mxu1 }
 0x1a1   : > { %v2073_v55 = vadd.f32 %v2072_v53, %v2060_v32 }
 0x1a3   : > { %v2082_v57 = vrot.slane %v2073_v55, 2 }
 0x1a5   : > { %v2086_v27 = vsel %vm2085_vm1, %v2081_v56, %v2082_v57  ;;  %2095 = sbr.rel (%p3468_p1) target bundleno = 601 (0x259), region = 64 }
 0x1a6   : > { %v2088_v59 = vsel %vm2087_vm2, %v2084_v36, %v2086_v27  ;;  %v2061_v60 = vpop.f32.mrf.mxu2  ;;  %v2074_v62 = vpop.f32.mrf.mxu3 }
 0x1a7   : > { %v2090_v61 = vadd.f32 %v2088_v59, %v339_v58 }
 0x1a9   : > { %2091 = vst [vmem:[#allocation2] sm:$0xff] %v2090_v61 }
 0x1aa   : > { %v3834_v63 = vld [vmem:[#allocation8 + $0x38] sm:$0xff]  ;;  %v3833_v3 = vld [vmem:[#allocation8 + $0x30] sm:$0xff]  ;;  %v3832_v7 = vld [vmem:[#allocation8 + $0x28] sm:$0xff] }
 0x1ab   : > { %v3842_v0 = vld [vmem:[#allocation8 + $0x78] sm:$0xff]  ;;  %2386 = vmatpush.bf16.msra.mxu0 %v3834_v63  ;;  %v3841_v4 = vld [vmem:[#allocation8 + $0x70] sm:$0xff]  ;;  %v3840_v8 = vld [vmem:[#allocation8 + $0x68] sm:$0xff] }
 0x1ac   : > { %v3850_v1 = vld [vmem:[#allocation8 + $0xb8] sm:$0xff]  ;;  %2399 = vmatpush.bf16.msra.mxu1 %v3842_v0  ;;  %v3849_v5 = vld [vmem:[#allocation8 + $0xb0] sm:$0xff]  ;;  %v3848_v9 = vld [vmem:[#allocation8 + $0xa8] sm:$0xff] }
 0x1ad   : > { %v3858_v2 = vld [vmem:[#allocation8 + $0xf8] sm:$0xff]  ;;  %2412 = vmatpush.bf16.msra.mxu2 %v3850_v1  ;;  %v3857_v6 = vld [vmem:[#allocation8 + $0xf0] sm:$0xff]  ;;  %v3856_v33 = vld [vmem:[#allocation8 + $0xe8] sm:$0xff] }
 0x1ae   : > { %2425 = vmatpush.bf16.msra.mxu3 %v3858_v2  ;;  %v3831_v10 = vld [vmem:[#allocation8 + $0x20] sm:$0xff]  ;;  %v2097_v11 = vld [vmem:[#allocation6] sm:$0xf]  ;;  %v3829_v30 = vld [vmem:[#allocation8 + $0x10] sm:$0xff] }
 0x1af   : > { %2387 = vmatpush.bf16.msra.mxu0 %v3833_v3  ;;  %v3839_v39 = vld [vmem:[#allocation8 + $0x60] sm:$0xff]  ;;  %v2099_v12 = vperm.slane %v2097_v11, 0  ;;  %v2100_v13 = vperm.slane %v2097_v11, 1  ;;  %v2101_v14 = vperm.slane %v2097_v11, 2  ;;  %v2102_v15 = vperm.slane %v2097_v11, 3  ;;  %v3830_v16 = vld [vmem:[#allocation8 + $0x18] sm:$0xff] }
 0x1b0   : > { %2400 = vmatpush.bf16.msra.mxu1 %v3841_v4  ;;  %v3847_v40 = vld [vmem:[#allocation8 + $0xa0] sm:$0xff]  ;;  %v3838_v17 = vld [vmem:[#allocation8 + $0x58] sm:$0xff]  ;;  %v3837_v31 = vld [vmem:[#allocation8 + $0x50] sm:$0xff] }
 0x1b1   : > { %2413 = vmatpush.bf16.msra.mxu2 %v3849_v5  ;;  %v3855_v36 = vld [vmem:[#allocation8 + $0xe0] sm:$0xff]  ;;  %v2103_v18 = vrot.slane %v2100_v13, 6  ;;  %v2104_v19 = vrot.slane %v2101_v14, 4  ;;  %v2105_v20 = vrot.slane %v2102_v15, 2  ;;  %v3846_v22 = vld [vmem:[#allocation8 + $0x98] sm:$0xff]  ;;  %v3845_v21 = vld [vmem:[#allocation8 + $0x90] sm:$0xff] }
 0x1b2   : > { %2426 = vmatpush.bf16.msra.mxu3 %v3857_v6  ;;  %v3854_v23 = vld [vmem:[#allocation8 + $0xd8] sm:$0xff]  ;;  %v3853_v35 = vld [vmem:[#allocation8 + $0xd0] sm:$0xff]  ;;  %v3828_v38 = vld [vmem:[#allocation8 + $0x8] sm:$0xff] }
 0x1b3   : > { %2388 = vmatpush.bf16.msra.mxu0 %v3832_v7  ;;  %v2096_v24 = vld [vmem:[#allocation2] sm:$0xff]  ;;  %v2106_v25 = vsel %vm2083_vm0, %v2099_v12, %v2103_v18  ;;  %v2107_v28 = vsel %vm2085_vm1, %v2104_v19, %v2105_v20  ;;  %v3836_v41 = vld [vmem:[#allocation8 + $0x48] sm:$0xff]  ;;  %v3827_v44 = vld [vmem:[#allocation8] sm:$0xff] }
 0x1b4   : > { %2401 = vmatpush.bf16.msra.mxu1 %v3840_v8  ;;  %v2108_v29 = vsel %vm2087_vm2, %v2106_v25, %v2107_v28  ;;  %v3844_v42 = vld [vmem:[#allocation8 + $0x88] sm:$0xff]  ;;  %v3835_v45 = vld [vmem:[#allocation8 + $0x40] sm:$0xff] }
 0x1b5   : > { %2414 = vmatpush.bf16.msra.mxu2 %v3848_v9  ;;  %v2110_v34 = vadd.f32 %v2108_v29, %v2096_v24  ;;  %v3852_v43 = vld [vmem:[#allocation8 + $0xc8] sm:$0xff]  ;;  %v3843_v46 = vld [vmem:[#allocation8 + $0x80] sm:$0xff] }
 0x1b6   : > { %2427 = vmatpush.bf16.msra.mxu3 %v3856_v33  ;;  %v3851_v47 = vld [vmem:[#allocation8 + $0xc0] sm:$0xff] }
 0x1b7   : > { %2389 = vmatpush.bf16.msra.mxu0 %v3831_v10  ;;  %v2111_v37 = vmax.f32 %v2110_v34, 0.0  ;;  %v3960_v26 = vld [vmem:[#allocation9] ss:$0 sm:$0xff] }
 0x1b8   : > { %2402 = vmatpush.bf16.msra.mxu1 %v3839_v39 }
 0x1b9   : > { %2415 = vmatpush.bf16.msra.mxu2 %v3847_v40  ;;  %2113 = vst [vmem:[#allocation1] ss:$4 sm:$0xff] %v2111_v37 }
 0x1ba   : > { %2428 = vmatpush.bf16.msra.mxu3 %v3855_v36 }
 0x1bb   : > { %2390 = vmatpush.bf16.msra.mxu0 %v3830_v16 }
 0x1bc   : > { %2403 = vmatpush.bf16.msra.mxu1 %v3838_v17 }
 0x1bd   : > { %2416 = vmatpush.bf16.msra.mxu2 %v3846_v22 }
 0x1be   : > { %2429 = vmatpush.bf16.msra.mxu3 %v3854_v23 }
 0x1bf   : > { %2391 = vmatpush.bf16.msra.mxu0 %v3829_v30 }
 0x1c0   : > { %2404 = vmatpush.bf16.msra.mxu1 %v3837_v31  ;;  %v2114_v48 = vld.sshfl [vmem:[#allocation1] sm:$0xff pattern:$0x73625140]  ;;  %v2115_v49 = vld.sshfl [vmem:[#allocation1 + $0x8] sm:$0xff pattern:$0x73625140] }
 0x1c1   : > { %2417 = vmatpush.bf16.msra.mxu2 %v3845_v21  ;;  %v2122_v50 = vpack.c.bf16 %v2114_v48, %v2114_v48  ;;  %v2123_v51 = vpack.c.bf16 %v2115_v49, %v2115_v49  ;;  %v2116_v52 = vld.sshfl [vmem:[#allocation1 + $0x10] sm:$0xff pattern:$0x73625140]  ;;  %v2117_v32 = vld.sshfl [vmem:[#allocation1 + $0x18] sm:$0xff pattern:$0x73625140] }
 0x1c2   : > { %2430 = vmatpush.bf16.msra.mxu3 %v3853_v35  ;;  %v2124_v53 = vpack.c.bf16 %v2116_v52, %v2116_v52  ;;  %v2125_v54 = vpack.c.bf16 %v2117_v32, %v2117_v32 }
 0x1c3   : > { %2392 = vmatpush.bf16.msra.mxu0 %v3828_v38 }
 0x1c4   : > { %2405 = vmatpush.bf16.msra.mxu1 %v3836_v41 }
 0x1c5   : > { %2418 = vmatpush.bf16.msra.mxu2 %v3844_v42 }
 0x1c6   : > { %2431 = vmatpush.bf16.msra.mxu3 %v3852_v43 }
 0x1c7   : > { %2393 = vmatpush.bf16.msra.mxu0 %v3827_v44 }
 0x1c8   : > { %2406 = vmatpush.bf16.msra.mxu1 %v3835_v45 }
 0x1c9   : > { %2419 = vmatpush.bf16.msra.mxu2 %v3843_v46 }
 0x1ca   : > { %2432 = vmatpush.bf16.msra.mxu3 %v3851_v47  ;;  %2394 = vmatmul.bf16.vlgmr.msra.gmra.mxu0 %v2122_v50 }
 0x1cb   : > { %2407 = vmatmul.bf16.vlgmr.msra.gmra.mxu1 %v2123_v51 }
 0x1cc   : > { %2420 = vmatmul.bf16.vlgmr.msra.gmra.mxu2 %v2124_v53 }
 0x1cd   : > { %2433 = vmatmul.bf16.vlgmr.msra.gmra.mxu3 %v2125_v54 }
 0x247   : > { %v2395_v55 = vpop.f32.mrf.mxu0 }
 0x248   : > { %v2408_v56 = vpop.f32.mrf.mxu1  ;;  %v2396_v57 = vadd.f32 %v3960_v26, %v2395_v55 }
 0x24a   : > { %v2409_v58 = vadd.f32 %v2408_v56, %v2396_v57 }
 0x24f   : > { %v2421_v27 = vpop.f32.mrf.mxu2  ;;  %v2397_v61 = vpop.f32.mrf.mxu0 }
 0x250   : > { %v2434_v59 = vpop.f32.mrf.mxu3  ;;  %v2422_v60 = vadd.f32 %v2421_v27, %v2409_v58  ;;  %v2410_v62 = vpop.f32.mrf.mxu1 }
 0x252   : > { %v2435_v63 = vadd.f32 %v2434_v59, %v2422_v60 }
 0x254   : > { %2438 = vst [vmem:[#allocation11] sm:$0x3] %v2435_v63 }
 0x257   : > { %v2423_v0 = vpop.f32.mrf.mxu2 }
 0x258   : > { %v2436_v1 = vpop.f32.mrf.mxu3 }
 0x259 PF: > { %s4863_s2 = sadd.s32 4294967295, %s4171_s23   ;;  %s2449_s10 = sshll.u32 %s4855_s5, 4  ;;  %s2450_s10 = int_to_ptr.hbm [resolvable:$true] %s2449_s10 }
 0x25a   : > { %p3901_p4 = scmp.eq.s32.totalorder %s4863_s2, 6  ;;  %s4181_s11 = smov [#allocation11]  }
 0x25b   : > { %s2447_s13 = sshll.u32 %s4181_s11, 4  ;;  %s2448_s13 = int_to_ptr.vmem [resolvable:$true] %s2447_s13 }
 0x25c   : > { %3877 = dma.vmem_to_hbm [thread:$0]  (%p3901_p4), %s2448_s13, 32, %s2450_s10, [#allocation5]  }
 0x25d   : > { %4146 = dma.done.wait (%p3901_p4), [#allocation5], 32  }
 0x25e   : > { %4148 = vsyncadd (%p3901_p4), [#allocation5], 4294967264 }
 0x25f PF: > { %s21_s23 = sadd.s32 1, %s4171_s23   ;;  %s4864_s18 = smov %s4155_s19 }
 0x260   : > { %p18_p5 = scmp.ge.s32.totalorder %s21_s23, 9   ;;  %s4865_s19 = smov %s4159_s20 }
 0x261   : > { %s4866_s20 = smov %s4296_s12  ;;  %s4867_s21 = smov %s4167_s22 }
 0x262   : > { %s4868_s22 = smov %s4870_s6  ;;  %20 = sbr.rel (!%p18_p5) target bundleno = 9 (0x9), region = 102 }
 0x267   :  { %2463 = vsyncpa [#allocation4], 1 }
 0x268   :  { %2465 = vsyncpa [#allocation4 + $0x1], 1 }
 0x269   :  { %2466 = vsyncpa [#allocation7], 1 }
 0x26a   :  { %2467 = vsyncpa [#allocation10], 1 }
 0x26b   :  { %2468 = vsyncpa [#allocation5], 1 }
 0x26c   :  { %2470 = vsyncpa [#allocation5 + $0x1], 1 }

// kernel: _forward.2
= control target key start
LH: loop header
LB: loop body
LE: loop exit
PB: predicated region body
PF: predicated region fallthrough
CT: control target
= control target key end

     0   :  { %15 = vsyncpa [#allocation7], 0  ;;  %s10512_s0 = inlined_call_operand.vmem [shape: bf16[2,784,32], index: 0, kind: input, shape index: {}]   ;;  %s10513_s1 = inlined_call_operand.hbm [shape: bf16[32,32], index: 1, kind: input, shape index: {}]   ;;  %s10514_s2 = inlined_call_operand.hbm [shape: f32[1,32], index: 2, kind: input, shape index: {}]   ;;  %s10515_s3 = inlined_call_operand.hbm [shape: f32[1,32], index: 3, kind: input, shape index: {}]   ;;  %s10516_s4 = inlined_call_operand.vmem [shape: bf16[288,64], index: 4, kind: input, shape index: {}]   ;;  %s10517_s5 = inlined_call_operand.hbm [shape: f32[1,64], index: 5, kind: input, shape index: {}]   ;;  %s10518_s6 = inlined_call_operand.hbm [shape: f32[1,64], index: 6, kind: input, shape index: {}]   ;;  %s10519_s7 = inlined_call_operand.hbm [shape: bf16[576,128], index: 7, kind: input, shape index: {}]   ;;  %s10520_s8 = inlined_call_operand.hbm [shape: f32[1,128], index: 8, kind: input, shape index: {}]   ;;  %s10521_s9 = inlined_call_operand.hbm [shape: f32[1,128], index: 9, kind: input, shape index: {}]   ;;  %s10522_s10 = inlined_call_operand.vmem [shape: f32[2,49,128], index: 10, kind: output, shape index: {}]  }
   0x1   :  { %16 = vsyncpa [#allocation9], 0 }
   0x2   :  { %17 = vsyncpa [#allocation12], 0 }
   0x3   :  { %18 = vsyncpa [#allocation15], 0 }
   0x4   :  { %19 = vsyncpa [#allocation18], 0  ;;  %s8215_s13 = smov 0  }
   0x5 LB: > { %s297_s16 = sshll.u32 %s10514_s2, 4  ;;  %s8224_s17 = sadd.s32 4294967295, %s8147_s13   ;;  %s8147_s13 = sphi %s8215_s13, %s25_s13   ;;  %s298_s16 = int_to_ptr.hbm [resolvable:$true] %s297_s16 }
   0x6   : > { %p6504_p0 = scmp.ge.s32.totalorder %s8147_s13, 1  ;;  %p271_p1 = scmp.lt.s32.totalorder %s8147_s13, 3 }
   0x7   : > { %p7836_p2 = scmp.eq.s32.totalorder %s8224_s17, 0  ;;  %s8149_s19 = smov [#allocation8]  }
   0x8   : > { %p8229_p3 = pnand %p6504_p0, %p271_p1  ;;  %s299_s20 = sshll.u32 %s8149_s19, 4  ;;  %s300_s20 = int_to_ptr.vmem [resolvable:$true] %s299_s20 }
   0x9   : > { %s324_s23 = sshll.u32 %s10517_s5, 4  ;;  %s8150_s25 = smov [#allocation11]   ;;  %s325_s23 = int_to_ptr.hbm [resolvable:$true] %s324_s23 }
   0xa   : > { %p7811_p4 = pneg %p8229_p3  ;;  %s326_s26 = sshll.u32 %s8150_s25, 4  ;;  %s327_s26 = int_to_ptr.vmem [resolvable:$true] %s326_s26 }
   0xb   : > { %s347_s29 = sshll.u32 %s10519_s7, 4  ;;  %s8151_s30 = smov [#allocation14]   ;;  %s348_s29 = int_to_ptr.hbm [resolvable:$true] %s347_s29 }
   0xc   : > { %p8240_p5 = pnand %p7836_p2, %p7811_p4  ;;  %s349_s11 = sshll.u32 %s8151_s30, 4  ;;  %s350_s11 = int_to_ptr.vmem [resolvable:$true] %s349_s11 }
   0xd   : > { %s282_s15 = sshll.u32 %s10513_s1, 4  ;;  %s8152_s19 = smov 64   ;;  %s283_s15 = int_to_ptr.hbm [resolvable:$true] %s282_s15 }
   0xe   : > { %7817 = dma.hbm_to_vmem [thread:$0]  (!%p8240_p5), %s298_s16, 16, %s300_s20, [#allocation9]  }
   0xf   : > { %7823 = dma.hbm_to_vmem [thread:$0]  (!%p8240_p5), %s325_s23, 16, %s327_s26, [#allocation12]  }
  0x10   : > { %s8153_s21 = smov 4   ;;  %s309_s16 = sshll.u32 %s10515_s3, 4  ;;  %s310_s16 = int_to_ptr.hbm [resolvable:$true] %s309_s16 }
  0x11   : > { %7829 = dma.hbm_to_vmem [thread:$0]  (!%p8240_p5), %s348_s29, 4608, %s350_s11, [#allocation15], %s8152_s19, %s8152_s19, %s8153_s21  }
  0x12   : > { %s8154_s20 = smov [#allocation6]   ;;  %s8155_s26 = smov [#allocation10]  }
  0x13   : > { %s284_s23 = sshll.u32 %s8154_s20, 4  ;;  %s311_s27 = sshll.u32 %s8155_s26, 4  ;;  %s285_s23 = int_to_ptr.vmem [resolvable:$true] %s284_s23  ;;  %s312_s27 = int_to_ptr.vmem [resolvable:$true] %s311_s27 }
  0x14   : > { %7814 = dma.hbm_to_vmem [thread:$0]  (!%p8240_p5), %s283_s15, 256, %s285_s23, [#allocation7], %s8152_s19, %s8152_s19, %s8153_s21  }
  0x15   : > { %s336_s12 = sshll.u32 %s10518_s6, 4  ;;  %s362_s14 = sshll.u32 %s10520_s8, 4  ;;  %s337_s12 = int_to_ptr.hbm [resolvable:$true] %s336_s12  ;;  %s363_s14 = int_to_ptr.hbm [resolvable:$true] %s362_s14 }
  0x16   : > { %7820 = dma.hbm_to_vmem [thread:$0]  (!%p8240_p5), %s310_s16, 16, %s312_s27, [#allocation9]  }
  0x17   : > { %s8156_s22 = smov [#allocation13]   ;;  %s8157_s15 = smov [#allocation16]  }
  0x18   : > { %s338_s25 = sshll.u32 %s8156_s22, 4  ;;  %s364_s19 = sshll.u32 %s8157_s15, 4  ;;  %s339_s25 = int_to_ptr.vmem [resolvable:$true] %s338_s25  ;;  %s365_s19 = int_to_ptr.vmem [resolvable:$true] %s364_s19 }
  0x19   : > { %7826 = dma.hbm_to_vmem [thread:$0]  (!%p8240_p5), %s337_s12, 16, %s339_s25, [#allocation12]  }
  0x1a   : > { %s374_s23 = sshll.u32 %s10521_s9, 4  ;;  %s8158_s16 = smov [#allocation17]   ;;  %s375_s23 = int_to_ptr.hbm [resolvable:$true] %s374_s23 }
  0x1b   : > { %7832 = dma.hbm_to_vmem [thread:$0]  (!%p8240_p5), %s363_s14, 16, %s365_s19, [#allocation15]  }
  0x1c   : > { %s376_s26 = sshll.u32 %s8158_s16, 4  ;;  %397 = sbr.rel (%p8229_p3) target bundleno = 1231 (0x4cf), region = 60  ;;  %s377_s26 = int_to_ptr.vmem [resolvable:$true] %s376_s26 }
  0x1d   : > { %7835 = dma.hbm_to_vmem [thread:$0]  (!%p8240_p5), %s375_s23, 16, %s377_s26, [#allocation18]  }
  0x21   : > { %8126 = dma.done.wait (%p7836_p2), [#allocation7], 256  }
  0x22   : > { %8128 = vsyncadd (%p7836_p2), [#allocation7], 4294967040 }
  0x23   : > { %8130 = dma.done.wait (%p7836_p2), [#allocation9], 32  }
  0x24   : > { %8132 = vsyncadd (%p7836_p2), [#allocation9], 4294967264 }
  0x25   : > { %8134 = dma.done.wait (%p7836_p2), [#allocation12], 32  }
  0x26   : > { %8136 = vsyncadd (%p7836_p2), [#allocation12], 4294967264 }
  0x27   : > { %8138 = dma.done.wait (%p7836_p2), [#allocation15], 4624  }
  0x28   : > { %8140 = vsyncadd (%p7836_p2), [#allocation15], 4294962672 }
  0x29   : > { %8142 = dma.done.wait (%p7836_p2), [#allocation18], 16  }
  0x2a   : > { %8144 = vsyncadd (%p7836_p2), [#allocation18], 4294967280  ;;  %p471_p6 = scmp.lt.s32.totalorder %s8224_s17, 1  ;;  %v8305_v0 = vld [vmem:[#allocation6 + $0x8] sm:$0xff]  ;;  %v8314_v1 = vld [vmem:[#allocation6] sm:$0xff]  ;;  %vm482_vm0 = vcmask 261120  }
  0x2b   : > { %589 = vmatpush.bf16.msra.mxu0 %v8305_v0  ;;  %718 = vmatpush.bf16.msra.mxu1 %v8305_v0  ;;  %v7616_v48 = vld [vmem:[%s10516_s4 + $0x18] sm:$0xff]  ;;  %vm642_vm1 = vcmask 1043456   ;;  %vm661_vm2 = vcmask 257024   ;;  %vm673_vm3 = vcmask 259072   ;;  %vm516_vm4 = vcmask 523264  }
  0x2c   : > { %s10526_s17 = smov (!%p471_p6, %s8224_s17), 1  ;;  %835 = vmatpush.bf16.msra.mxu2 %v8305_v0  ;;  %7775 = vmatpush.bf16.msra.mxu3 %v8305_v0  ;;  %vm2675_vm5 = vcmask 522240  }
  0x2d   : > { %s7777_s18 = smul.u32 392, %s10526_s17 }
  0x2e   : > { %s7778_s29 = smul.u32 56, %s10526_s17 }
  0x2f   : > { %s8310_s28 = scalar_lea.vmem %s10512_s0, %s7777_s18  ;;  %590 = vmatpush.bf16.msra.mxu0 %v8314_v1  ;;  %719 = vmatpush.bf16.msra.mxu1 %v8314_v1 }
  0x30   : > { %v7571_v2 = vld [vmem:[%s8310_s28] sm:$0xff]  ;;  %v7577_v4 = vld [vmem:[%s8310_s28 + $0x38] sm:$0xff]  ;;  %836 = vmatpush.bf16.msra.mxu2 %v8314_v1  ;;  %7776 = vmatpush.bf16.msra.mxu3 %v8314_v1  ;;  %v7572_v6 = vld [vmem:[%s8310_s28 + $0x8] sm:$0xff]  ;;  %s10461_s14 = scalar_lea.vmem %s10522_s10, %s7778_s29 }
  0x31   : > { %v7574_v3 = vld [vmem:[%s8310_s28 + $0x1c] sm:$0xff]  ;;  %v7575_v7 = vld [vmem:[%s8310_s28 + $0x24] sm:$0xff]  ;;  %v915_v10 = vld [vmem:[%s8310_s28 + $0x6c] sm:$0xf] }
  0x32   : > { %v7581_v5 = vld [vmem:[%s8310_s28 + $0x5c] sm:$0xff]  ;;  %6545 = vmatmul.msk.bf16.vlgmr.msra.gmra.mxu0 %vm482_vm0, %v7571_v2  ;;  %6561 = vmatmul.msk.bf16.vlgmr.msra.gmra.mxu1 %vm482_vm0, %v7574_v3  ;;  %v7582_v9 = vld [vmem:[%s8310_s28 + $0x64] sm:$0xff]  ;;  %v929_v11 = vunpack.c.l.b16 %v915_v10  ;;  %v7573_v12 = vld [vmem:[%s8310_s28 + $0x10] sm:$0xff] }
  0x33   : > { %952 = vmatpush.bf16.msrb.mxu0 %v8305_v0  ;;  %6577 = vmatmul.msk.bf16.vlgmr.msra.gmra.mxu2 %vm482_vm0, %v7577_v4  ;;  %v7578_v8 = vld [vmem:[%s8310_s28 + $0x40] sm:$0xff]  ;;  %v7576_v13 = vld [vmem:[%s8310_s28 + $0x2c] sm:$0xff]  ;;  %v540_v16 = vld [vmem:[%s8310_s28 + $0x18] sm:$0xf] }
  0x34   : > { %1303 = vmatpush.bf16.msrb.mxu2 %v8305_v0  ;;  %1186 = vmatpush.bf16.msrb.mxu1 %v8305_v0  ;;  %v7579_v14 = vld [vmem:[%s8310_s28 + $0x48] sm:$0xff]  ;;  %v933_v15 = vpack.c.b16 %v929_v11, %v929_v11  ;;  %v681_v17 = vld [vmem:[%s8310_s28 + $0x34] sm:$0xf]  ;;  %v798_v18 = vld [vmem:[%s8310_s28 + $0x50] sm:$0xf]  ;;  %v554_v19 = vunpack.c.l.b16 %v540_v16 }
  0x35   : > { %6594 = vmatmul.msk.bf16.vlgmr.msra.gmra.mxu3 %vm482_vm0, %v7581_v5  ;;  %v695_v20 = vunpack.c.l.b16 %v681_v17  ;;  %v812_v21 = vunpack.c.l.b16 %v798_v18  ;;  %v7592_v25 = vld [vmem:[%s8310_s28 + $0xc4] sm:$0xff]  ;;  %v7580_v26 = vld [vmem:[%s8310_s28 + $0x54] sm:$0xff]  ;;  %v7586_v27 = vld [vmem:[%s8310_s28 + $0x8c] sm:$0xff] }
  0x36   : > { %1420 = vmatpush.bf16.msrb.mxu3 %v8305_v0  ;;  %v558_v22 = vpack.c.b16 %v554_v19, %v554_v19  ;;  %v7589_v28 = vld [vmem:[%s8310_s28 + $0xa8] sm:$0xff]  ;;  %v7583_v30 = vld [vmem:[%s8310_s28 + $0x70] sm:$0xff]  ;;  %v1383_v34 = vld [vmem:[%s8310_s28 + $0xdc] sm:$0xf] }
  0x37   : > { %953 = vmatpush.bf16.msrb.mxu0 %v8314_v1  ;;  %v699_v23 = vpack.c.b16 %v695_v20, %v695_v20  ;;  %v816_v24 = vpack.c.b16 %v812_v21, %v812_v21  ;;  %v7593_v29 = vld [vmem:[%s8310_s28 + $0xcc] sm:$0xff]  ;;  %v7587_v31 = vld [vmem:[%s8310_s28 + $0x94] sm:$0xff]  ;;  %v1397_v35 = vunpack.c.l.b16 %v1383_v34  ;;  %v7588_v37 = vld [vmem:[%s8310_s28 + $0x9c] sm:$0xff] }
  0x38   : > { %1304 = vmatpush.bf16.msrb.mxu2 %v8314_v1  ;;  %1187 = vmatpush.bf16.msrb.mxu1 %v8314_v1  ;;  %v7590_v32 = vld [vmem:[%s8310_s28 + $0xb0] sm:$0xff]  ;;  %v7584_v36 = vld [vmem:[%s8310_s28 + $0x78] sm:$0xff]  ;;  %v1149_v40 = vld [vmem:[%s8310_s28 + $0xa4] sm:$0xf] }
  0x39   : > { %v7594_v33 = vld [vmem:[%s8310_s28 + $0xd4] sm:$0xff]  ;;  %v1401_v39 = vpack.c.b16 %v1397_v35, %v1397_v35  ;;  %v1266_v41 = vld [vmem:[%s8310_s28 + $0xc0] sm:$0xf]  ;;  %v1163_v42 = vunpack.c.l.b16 %v1149_v40  ;;  %v1032_v49 = vld [vmem:[%s8310_s28 + $0x88] sm:$0xf] }
  0x3a   : > { %1421 = vmatpush.bf16.msrb.mxu3 %v8314_v1  ;;  %v7591_v38 = vld [vmem:[%s8310_s28 + $0xb8] sm:$0xff]  ;;  %v1280_v43 = vunpack.c.l.b16 %v1266_v41  ;;  %v7585_v44 = vld [vmem:[%s8310_s28 + $0x80] sm:$0xff]  ;;  %v1046_v50 = vunpack.c.l.b16 %v1032_v49  ;;  %v1851_v11 = vld [vmem:[%s8310_s28 + $0x14c] sm:$0xf] }
  0x3b   : > { %1069 = vmatpush.bf16.msra.mxu0 %v8305_v0  ;;  %v1167_v45 = vpack.c.b16 %v1163_v42, %v1163_v42  ;;  %v7604_v47 = vld [vmem:[%s8310_s28 + $0x134] sm:$0xff]  ;;  %v7598_v52 = vld [vmem:[%s8310_s28 + $0xfc] sm:$0xff]  ;;  %v7599_v63 = vld [vmem:[%s8310_s28 + $0x104] sm:$0xff] }
  0x3c   : > { %1771 = vmatpush.bf16.msra.mxu2 %v8305_v0  ;;  %1654 = vmatpush.bf16.msra.mxu1 %v8305_v0  ;;  %v1284_v46 = vpack.c.b16 %v1280_v43, %v1280_v43  ;;  %v1050_v51 = vpack.c.b16 %v1046_v50, %v1046_v50  ;;  %v7601_v55 = vld [vmem:[%s8310_s28 + $0x118] sm:$0xff]  ;;  %v7595_v62 = vld [vmem:[%s8310_s28 + $0xe0] sm:$0xff]  ;;  %v7596_v18 = vld [vmem:[%s8310_s28 + $0xe8] sm:$0xff] }
  0x3d   : > { %v7605_v56 = vld [vmem:[%s8310_s28 + $0x13c] sm:$0xff]  ;;  %v7606_v4 = vld [vmem:[%s8310_s28 + $0x144] sm:$0xff]  ;;  %v7600_v19 = vld [vmem:[%s8310_s28 + $0x10c] sm:$0xff] }
  0x3e   : > { %1888 = vmatpush.bf16.msra.mxu3 %v8305_v0  ;;  %v7602_v2 = vld [vmem:[%s8310_s28 + $0x120] sm:$0xff]  ;;  %v1617_v42 = vld [vmem:[%s8310_s28 + $0x114] sm:$0xf] }
  0x3f   : > { %1070 = vmatpush.bf16.msra.mxu0 %v8314_v1 }
  0x40   : > { %1772 = vmatpush.bf16.msra.mxu2 %v8314_v1  ;;  %1655 = vmatpush.bf16.msra.mxu1 %v8314_v1 }
  0x42   : > { %1889 = vmatpush.bf16.msra.mxu3 %v8314_v1  ;;  %6546 = vmatmul.msk.bf16.gmra.mxu0 %vm482_vm0, %v7572_v6 }
  0x43   : > { %6562 = vmatmul.msk.bf16.gmra.mxu1 %vm482_vm0, %v7575_v7  ;;  %6578 = vmatmul.msk.bf16.gmra.mxu2 %vm482_vm0, %v7578_v8  ;;  %v7614_v8 = vld [vmem:[%s10516_s4 + $0x8] sm:$0xff] }
  0x45   : > { %6595 = vmatmul.msk.bf16.gmra.mxu3 %vm482_vm0, %v7582_v9  ;;  %v8448_v9 = vld [vmem:[#allocation8] ss:$0 sm:$0xff] }
  0x52   : > { %6547 = vmatmul.msk.bf16.gmra.mxu0 %vm482_vm0, %v7573_v12 }
  0x53   : > { %6563 = vmatmul.msk.bf16.gmra.mxu1 %vm482_vm0, %v7576_v13  ;;  %6579 = vmatmul.msk.bf16.gmra.mxu2 %vm482_vm0, %v7579_v14  ;;  %v8159_v13 = vmov 0.0   ;;  %v8456_v14 = vld [vmem:[#allocation10] ss:$0 sm:$0xff] }
  0x54   : > { %483 = vst.msk [vmem:[#allocation2] sm:$0xff] %vm482_vm0, %v8159_v13 }
  0x55   : > { %6596 = vmatmul.msk.bf16.gmra.mxu3 %vm482_vm0, %v933_v15  ;;  %v1865_v15 = vunpack.c.l.b16 %v1851_v11  ;;  %484 = vst.msk [vmem:[#allocation2 + $0x8] sm:$0xff] %vm482_vm0, %v8159_v13 }
  0x56   : > { %485 = vst.msk [vmem:[#allocation2 + $0x10] sm:$0xff] %vm482_vm0, %v8159_v13 }
  0x57   : > { %486 = vst.msk [vmem:[#allocation2 + $0x18] sm:$0xff] %vm482_vm0, %v8159_v13 }
  0x58   : > { %487 = vst.msk [vmem:[#allocation2 + $0x20] sm:$0xff] %vm482_vm0, %v8159_v13 }
  0x59   : > { %488 = vst.msk [vmem:[#allocation2 + $0x28] sm:$0xff] %vm482_vm0, %v8159_v13 }
  0x5a   : > { %489 = vst.msk [vmem:[#allocation2 + $0x30] sm:$0xff] %vm482_vm0, %v8159_v13 }
  0x5b   : > { %490 = vst.msk [vmem:[#allocation2 + $0x38] sm:$0xff] %vm482_vm0, %v8159_v13 }
  0x5c   : > { %491 = vst.msk [vmem:[#allocation2 + $0x40] sm:$0xff] %vm482_vm0, %v8159_v13 }
  0x5d   : > { %492 = vst.msk [vmem:[#allocation2 + $0x48] sm:$0xff] %vm482_vm0, %v8159_v13 }
  0x5e   : > { %493 = vst.msk [vmem:[#allocation2 + $0x50] sm:$0xff] %vm482_vm0, %v8159_v13 }
  0x5f   : > { %494 = vst.msk [vmem:[#allocation2 + $0x58] sm:$0xff] %vm482_vm0, %v8159_v13 }
  0x60   : > { %495 = vst.msk [vmem:[#allocation2 + $0x60] sm:$0xff] %vm482_vm0, %v8159_v13 }
  0x61   : > { %496 = vst.msk [vmem:[#allocation2 + $0x68] sm:$0xff] %vm482_vm0, %v8159_v13 }
  0x62   : > { %6548 = vmatmul.msk.bf16.gmra.mxu0 %vm482_vm0, %v558_v22  ;;  %497 = vst.msk [vmem:[#allocation2 + $0x70] sm:$0xff] %vm482_vm0, %v8159_v13 }
  0x63   : > { %6564 = vmatmul.msk.bf16.gmra.mxu1 %vm482_vm0, %v699_v23  ;;  %6580 = vmatmul.msk.bf16.gmra.mxu2 %vm482_vm0, %v816_v24  ;;  %v7603_v23 = vld [vmem:[%s8310_s28 + $0x128] sm:$0xff]  ;;  %498 = vst.msk [vmem:[#allocation2 + $0x78] sm:$0xff] %vm482_vm0, %v8159_v13 }
  0x64   : > { %499 = vst.msk [vmem:[#allocation2 + $0x80] sm:$0xff] %vm482_vm0, %v8159_v13 }
  0x65   : > { %6657 = vmatmul.msk.bf16.vlgmr.msrb.gmra.mxu3 %vm482_vm0, %v7592_v25  ;;  %500 = vst.msk [vmem:[#allocation2 + $0x88] sm:$0xff] %vm482_vm0, %v8159_v13 }
  0x66   : > { %2279 = vmatpush.bf16.msrb.mxu3 %v7614_v8  ;;  %501 = vst.msk [vmem:[#allocation2 + $0x90] sm:$0xff] %vm482_vm0, %v8159_v13 }
  0x67   : > { %502 = vst.msk [vmem:[#allocation2 + $0x98] sm:$0xff] %vm482_vm0, %v8159_v13 }
  0x68   : > { %503 = vst.msk [vmem:[#allocation2 + $0xa0] sm:$0xff] %vm482_vm0, %v8159_v13 }
  0x69   : > { %504 = vst.msk [vmem:[#allocation2 + $0xa8] sm:$0xff] %vm482_vm0, %v8159_v13 }
  0x6a   : > { %505 = vst.msk [vmem:[#allocation2 + $0xb0] sm:$0xff] %vm482_vm0, %v8159_v13 }
  0x6b   : > { %506 = vst.msk [vmem:[#allocation2 + $0xb8] sm:$0xff] %vm482_vm0, %v8159_v13 }
  0x6c   : > { %507 = vst.msk [vmem:[#allocation2 + $0xc0] sm:$0xff] %vm482_vm0, %v8159_v13 }
  0x6d   : > { %508 = vst.msk [vmem:[#allocation2 + $0xc8] sm:$0xff] %vm482_vm0, %v8159_v13 }
  0x6e   : > { %509 = vst.msk [vmem:[#allocation2 + $0xd0] sm:$0xff] %vm482_vm0, %v8159_v13 }
  0x6f   : > { %510 = vst.msk [vmem:[#allocation2 + $0xd8] sm:$0xff] %vm482_vm0, %v8159_v13 }
  0x70   : > { %511 = vst.msk [vmem:[#allocation2 + $0xe0] sm:$0xff] %vm482_vm0, %v8159_v13 }
  0x71   : > { %512 = vst.msk [vmem:[#allocation2 + $0xe8] sm:$0xff] %vm482_vm0, %v8159_v13 }
  0x72   : > { %6593 = vmatmul.msk.bf16.vlgmr.msrb.gmra.mxu0 %vm482_vm0, %v7580_v26  ;;  %v1869_v26 = vpack.c.b16 %v1865_v15, %v1865_v15  ;;  %v7597_v15 = vld [vmem:[%s8310_s28 + $0xf0] sm:$0xff]  ;;  %513 = vst.msk [vmem:[#allocation2 + $0xf0] sm:$0xff] %vm482_vm0, %v8159_v13 }
  0x73   : > { %6625 = vmatmul.msk.bf16.vlgmr.msrb.gmra.mxu1 %vm482_vm0, %v7586_v27  ;;  %6641 = vmatmul.msk.bf16.vlgmr.msrb.gmra.mxu2 %vm482_vm0, %v7589_v28  ;;  %v7613_v27 = vld [vmem:[%s10516_s4] sm:$0xff]  ;;  %v7615_v28 = vld [vmem:[%s10516_s4 + $0x10] sm:$0xff]  ;;  %514 = vst.msk [vmem:[#allocation2 + $0xf8] sm:$0xff] %vm482_vm0, %v8159_v13 }
  0x74   : > { %1537 = vmatpush.bf16.msrb.mxu0 %v8305_v0  ;;  %2122 = vmatpush.bf16.msrb.mxu1 %v8305_v0  ;;  %515 = vst.msk [vmem:[#allocation2 + $0x100] sm:$0xff] %vm482_vm0, %v8159_v13 }
  0x75   : > { %6658 = vmatmul.msk.bf16.gmra.mxu3 %vm482_vm0, %v7593_v29  ;;  %2242 = vmatpush.bf16.msrb.mxu2 %v7616_v48  ;;  %517 = vst.msk [vmem:[#allocation3] sm:$0xff] %vm516_vm4, %v8159_v13 }
  0x76   : > { %2280 = vmatpush.bf16.msrb.mxu3 %v7613_v27  ;;  %518 = vst.msk [vmem:[#allocation3 + $0x8] sm:$0xff] %vm516_vm4, %v8159_v13 }
  0x77   : > { %519 = vst.msk [vmem:[#allocation3 + $0x10] sm:$0xff] %vm516_vm4, %v8159_v13 }
  0x78   : > { %1538 = vmatpush.bf16.msrb.mxu0 %v8314_v1  ;;  %2123 = vmatpush.bf16.msrb.mxu1 %v8314_v1  ;;  %520 = vst.msk [vmem:[#allocation3 + $0x18] sm:$0xff] %vm516_vm4, %v8159_v13 }
  0x79   : > { %2243 = vmatpush.bf16.msrb.mxu2 %v7615_v28  ;;  %521 = vst.msk [vmem:[#allocation3 + $0x20] sm:$0xff] %vm516_vm4, %v8159_v13 }
  0x7a   : > { %522 = vst.msk [vmem:[#allocation3 + $0x28] sm:$0xff] %vm516_vm4, %v8159_v13 }
  0x7b   : > { %523 = vst.msk [vmem:[#allocation3 + $0x30] sm:$0xff] %vm516_vm4, %v8159_v13 }
  0x7c   : > { %524 = vst.msk [vmem:[#allocation3 + $0x38] sm:$0xff] %vm516_vm4, %v8159_v13 }
  0x7d   : > { %525 = vst.msk [vmem:[#allocation3 + $0x40] sm:$0xff] %vm516_vm4, %v8159_v13 }
  0x7e   : > { %526 = vst.msk [vmem:[#allocation3 + $0x48] sm:$0xff] %vm516_vm4, %v8159_v13 }
  0x7f   : > { %527 = vst.msk [vmem:[#allocation3 + $0x50] sm:$0xff] %vm516_vm4, %v8159_v13 }
  0x82   : > { %6609 = vmatmul.msk.bf16.vlgmr.msra.gmra.mxu0 %vm482_vm0, %v7583_v30 }
  0x83   : > { %6626 = vmatmul.msk.bf16.gmra.mxu1 %vm482_vm0, %v7587_v31  ;;  %6642 = vmatmul.msk.bf16.gmra.mxu2 %vm482_vm0, %v7590_v32 }
  0x84   : > { %2005 = vmatpush.bf16.msra.mxu0 %v8305_v0 }
  0x85   : > { %6659 = vmatmul.msk.bf16.gmra.mxu3 %vm482_vm0, %v7594_v33 }
  0x88   : > { %2006 = vmatpush.bf16.msra.mxu0 %v8314_v1 }
  0x92   : > { %6610 = vmatmul.msk.bf16.gmra.mxu0 %vm482_vm0, %v7584_v36 }
  0x93   : > { %6627 = vmatmul.msk.bf16.gmra.mxu1 %vm482_vm0, %v7588_v37  ;;  %6643 = vmatmul.msk.bf16.gmra.mxu2 %vm482_vm0, %v7591_v38 }
  0x95   : > { %6660 = vmatmul.msk.bf16.gmra.mxu3 %vm482_vm0, %v1401_v39 }
  0xa2   : > { %6611 = vmatmul.msk.bf16.gmra.mxu0 %vm482_vm0, %v7585_v44 }
  0xa3   : > { %6628 = vmatmul.msk.bf16.gmra.mxu1 %vm482_vm0, %v1167_v45  ;;  %6644 = vmatmul.msk.bf16.gmra.mxu2 %vm482_vm0, %v1284_v46 }
  0xa5   : > { %6721 = vmatmul.msk.bf16.vlgmr.msra.gmra.mxu3 %vm482_vm0, %v7604_v47  ;;  %v1734_v47 = vld [vmem:[%s8310_s28 + $0x130] sm:$0xf] }
  0xaf   : > { %v592_v53 = vpop.f32.mrf.mxu0  ;;  %v8413_v54 = vpop.f32.mrf.mxu1 }
  0xb0   : > { %v614_v20 = vmul.f32 %v8448_v9, %v592_v53  ;;  %v740_v48 = vmul.f32 %v8448_v9, %v8413_v54 }
  0xb2   : > { %6612 = vmatmul.msk.bf16.gmra.mxu0 %vm482_vm0, %v1050_v51  ;;  %v624_v31 = vadd.f32 %v8456_v14, %v614_v20 }
  0xb3   : > { %6689 = vmatmul.msk.bf16.vlgmr.msra.gmra.mxu1 %vm482_vm0, %v7598_v52  ;;  %6705 = vmatmul.msk.bf16.vlgmr.msra.gmra.mxu2 %vm482_vm0, %v7601_v55  ;;  %v1631_v55 = vunpack.c.l.b16 %v1617_v42 }
  0xb4   : > { %v631_v39 = vmax.f32 %v624_v31, 0.0 }
  0xb5   : > { %6722 = vmatmul.msk.bf16.gmra.mxu3 %vm482_vm0, %v7605_v56  ;;  %v1748_v56 = vunpack.c.l.b16 %v1734_v47 }
  0xb6   : > { %v8421_v57 = vpop.f32.mrf.mxu2 }
  0xb7   : > { %v594_v58 = vpop.f32.mrf.mxu0  ;;  %v8423_v59 = vpop.f32.mrf.mxu1 }
  0xb8   : > { %v8425_v60 = vpop.f32.mrf.mxu3  ;;  %v615_v33 = vmul.f32 %v8448_v9, %v594_v58 }
  0xba   : > { %v625_v49 = vadd.f32 %v8456_v14, %v615_v33 }
  0xbe   : > { %v8427_v61 = vpop.f32.mrf.mxu2 }
  0xbf   : > { %v8431_v0 = vpop.f32.mrf.mxu0 }
  0xc0   : > { %v8433_v1 = vpop.f32.mrf.mxu1  ;;  %v8436_v3 = vpop.f32.mrf.mxu3 }
  0xc2   : > { %6673 = vmatmul.msk.bf16.vlgmr.msrb.gmra.mxu0 %vm482_vm0, %v7595_v62  ;;  %v8538_v62 = vadd.f32 %v8456_v14, %v740_v48  ;;  %v977_v48 = vmul.f32 %v8448_v9, %v8436_v3 }
  0xc3   : > { %6690 = vmatmul.msk.bf16.gmra.mxu1 %vm482_vm0, %v7599_v63  ;;  %6706 = vmatmul.msk.bf16.gmra.mxu2 %vm482_vm0, %v7602_v2  ;;  %v632_v63 = vmax.f32 %v625_v49, 0.0  ;;  %v741_v2 = vmul.f32 %v8448_v9, %v8423_v59 }
  0xc5   : > { %6723 = vmatmul.msk.bf16.gmra.mxu3 %vm482_vm0, %v7606_v4  ;;  %v2198_v4 = vld [vmem:[#allocation2] sm:$0xff] }
  0xc6   : > { %v8443_v5 = vpop.f32.mrf.mxu2 }
  0xc7   : > { %v599_v6 = vpop.f32.mrf.mxu0 }
  0xc8   : > { %v728_v7 = vpop.f32.mrf.mxu1  ;;  %v8450_v10 = vpop.f32.mrf.mxu3  ;;  %v617_v12 = vmul.f32 %v8448_v9, %v599_v6  ;;  %v2199_v6 = vld [vmem:[#allocation2 + $0x8] sm:$0xff] }
  0xc9   : > { %v743_v35 = vmul.f32 %v8448_v9, %v728_v7  ;;  %v978_v3 = vmul.f32 %v8448_v9, %v8450_v10 }
  0xca   : > { %v8463_v16 = vadd.f32 %v8456_v14, %v617_v12 }
  0xcb   : > { %v8527_v51 = vadd.f32 %v8456_v14, %v743_v35 }
  0xcc   : > { %v634_v29 = vmax.f32 %v8463_v16, 0.0 }
  0xcd   : > { %v757_v7 = vmax.f32 %v8527_v51, 0.0 }
  0xce   : > { %v8465_v17 = vpop.f32.mrf.mxu2  ;;  %v643_v34 = vrot.slane %v634_v29, 4 }
  0xcf   : > { %v602_v21 = vpop.f32.mrf.mxu0  ;;  %v860_v31 = vmul.f32 %v8448_v9, %v8465_v17 }
  0xd0   : > { %v731_v22 = vpop.f32.mrf.mxu1  ;;  %v618_v24 = vmul.f32 %v8448_v9, %v602_v21  ;;  %v8476_v25 = vpop.f32.mrf.mxu3 }
  0xd1   : > { %v744_v37 = vmul.f32 %v8448_v9, %v731_v22 }
  0xd2   : > { %v628_v30 = vadd.f32 %v8456_v14, %v618_v24  ;;  %6674 = vmatmul.msk.bf16.gmra.mxu0 %vm482_vm0, %v7596_v18  ;;  %v1635_v18 = vpack.c.b16 %v1631_v55, %v1631_v55 }
  0xd3   : > { %6691 = vmatmul.msk.bf16.gmra.mxu1 %vm482_vm0, %v7600_v19  ;;  %6707 = vmatmul.msk.bf16.gmra.mxu2 %vm482_vm0, %v7603_v23  ;;  %v751_v52 = vadd.f32 %v8456_v14, %v744_v37  ;;  %v616_v19 = vmul.f32 %v8448_v9, %v8431_v0  ;;  %v1752_v23 = vpack.c.b16 %v1748_v56, %v1748_v56 }
  0xd4   : > { %v635_v32 = vmax.f32 %v628_v30, 0.0  ;;  %v2202_v30 = vpack.c.bf16 %v2199_v6, %v2198_v4  ;;  %v748_v0 = vadd.f32 %v8456_v14, %v741_v2 }
  0xd5   : > { %6724 = vmatmul.msk.bf16.gmra.mxu3 %vm482_vm0, %v1869_v26  ;;  %v758_v8 = vmax.f32 %v751_v52, 0.0  ;;  %v626_v17 = vadd.f32 %v8456_v14, %v616_v19 }
  0xd6   : > { %v644_v36 = vrot.slane %v635_v32, 4  ;;  %v848_v38 = vpop.f32.mrf.mxu2 }
  0xd7   : > { %v604_v40 = vpop.f32.mrf.mxu0  ;;  %v861_v59 = vmul.f32 %v8448_v9, %v848_v38  ;;  %v766_v35 = vrot.slane %v758_v8, 4 }
  0xd8   : > { %v733_v41 = vpop.f32.mrf.mxu1  ;;  %v645_v43 = vsel %vm642_vm1, %v643_v34, %v644_v36  ;;  %v619_v44 = vmul.f32 %v8448_v9, %v604_v40  ;;  %v8516_v46 = vpop.f32.mrf.mxu3  ;;  %v765_v34 = vrot.slane %v757_v7, 4  ;;  %v857_v40 = vmul.f32 %v8448_v9, %v8421_v57 }
  0xd9   : > { %v745_v45 = vmul.f32 %v8448_v9, %v733_v41  ;;  %v654_v50 = vmax.f32 %v631_v39, %v645_v43  ;;  %v868_v37 = vadd.f32 %v8456_v14, %v861_v59  ;;  %v754_v39 = vmax.f32 %v8538_v62, 0.0 }
  0xda   : > { %v629_v53 = vadd.f32 %v8456_v14, %v619_v44  ;;  %v755_v43 = vmax.f32 %v748_v0, 0.0  ;;  %v858_v44 = vmul.f32 %v8448_v9, %v8427_v61  ;;  %v742_v57 = vmul.f32 %v8448_v9, %v8433_v1  ;;  %v1500_v1 = vld [vmem:[%s8310_s28 + $0xf8] sm:$0xf] }
  0xdb   : > { %658 = vst.msk [vmem:[#allocation4] sm:$0xff] %vm482_vm0, %v654_v50  ;;  %v752_v54 = vadd.f32 %v8456_v14, %v745_v45  ;;  %v8587_v45 = vadd.f32 %v8456_v14, %v860_v31  ;;  %v767_v49 = vsel %vm642_vm1, %v765_v34, %v766_v35  ;;  %v633_v61 = vmax.f32 %v626_v17, 0.0  ;;  %v7610_v34 = vld [vmem:[%s8310_s28 + $0x16c] sm:$0xff] }
  0xdc   : > { %v636_v58 = vmax.f32 %v629_v53, 0.0  ;;  %v875_v53 = vmax.f32 %v868_v37, 0.0  ;;  %v776_v6 = vmax.f32 %v754_v39, %v767_v49  ;;  %v865_v59 = vadd.f32 %v8456_v14, %v858_v44  ;;  %v7619_v49 = vld [vmem:[%s10516_s4 + $0x30] sm:$0xff] }
  0xdd   : > { %v759_v20 = vmax.f32 %v752_v54, 0.0  ;;  %v874_v4 = vmax.f32 %v8587_v45, 0.0 }
  0xde   : > { %v646_v11 = vrot.slane %v636_v58, 4  ;;  %v850_v12 = vpop.f32.mrf.mxu2  ;;  %v883_v19 = vrot.slane %v875_v53, 4 }
  0xdf   : > { %v607_v21 = vpop.f32.mrf.mxu0  ;;  %v862_v26 = vmul.f32 %v8448_v9, %v850_v12  ;;  %v8574_v38 = vrot.slane %v759_v20, 4  ;;  %v8622_v20 = vadd.f32 %v8456_v14, %v977_v48  ;;  %v7624_v48 = vld [vmem:[%s10516_s4 + $0x58] sm:$0xff] }
  0xe0   : > { %v736_v22 = vpop.f32.mrf.mxu1  ;;  %v647_v24 = vsel %vm642_vm1, %v644_v36, %v646_v11  ;;  %v620_v27 = vmul.f32 %v8448_v9, %v607_v21  ;;  %v972_v28 = vpop.f32.mrf.mxu3  ;;  %v985_v21 = vadd.f32 %v8456_v14, %v978_v3  ;;  %2479 = vmatpush.bf16.msra.mxu1 %v7624_v48 }
  0xe1   : > { %v655_v32 = vmax.f32 %v632_v63, %v647_v24  ;;  %v746_v33 = vmul.f32 %v8448_v9, %v736_v22  ;;  %v869_v41 = vadd.f32 %v8456_v14, %v862_v26  ;;  %v769_v55 = vsel %vm642_vm1, %v766_v35, %v8574_v38  ;;  %v2209_v24 = vld [vmem:[#allocation2 + $0x9] sm:$0xff]  ;;  %v7620_v26 = vld [vmem:[%s10516_s4 + $0x38] sm:$0xff] }
  0xe2   : > { %v630_v36 = vadd.f32 %v8456_v14, %v620_v27  ;;  %6675 = vmatmul.msk.bf16.gmra.mxu0 %vm482_vm0, %v7597_v15  ;;  %v749_v27 = vadd.f32 %v8456_v14, %v742_v57  ;;  %v882_v28 = vrot.slane %v874_v4, 4  ;;  %2377 = vmatpush.bf16.msra.mxu3 %v7620_v26  ;;  %v7622_v57 = vld [vmem:[%s10516_s4 + $0x48] sm:$0xff] }
  0xe3   : > { %6692 = vmatmul.msk.bf16.gmra.mxu1 %vm482_vm0, %v1635_v18  ;;  %659 = vst.msk [vmem:[#allocation4 + $0x8] sm:$0xff] %vm482_vm0, %v655_v32  ;;  %6708 = vmatmul.msk.bf16.gmra.mxu2 %vm482_vm0, %v1752_v23  ;;  %v753_v47 = vadd.f32 %v8456_v14, %v746_v33  ;;  %v876_v58 = vmax.f32 %v869_v41, 0.0  ;;  %v777_v18 = vmax.f32 %v755_v43, %v769_v55  ;;  %v2208_v23 = vld [vmem:[#allocation2 + $0x1] sm:$0xff]  ;;  %v991_v41 = vmax.f32 %v8622_v20, 0.0 }
  0xe4   : > { %v637_v42 = vmax.f32 %v630_v36, 0.0  ;;  %v884_v17 = vsel %vm642_vm1, %v882_v28, %v883_v19  ;;  %v756_v53 = vmax.f32 %v749_v27, 0.0  ;;  %v859_v55 = vmul.f32 %v8448_v9, %v8443_v5  ;;  %2428 = vmatpush.bf16.msrb.mxu0 %v7622_v57  ;;  %v7617_v5 = vld [vmem:[%s10516_s4 + $0x20] sm:$0xff] }
  0xe5   : > { %6775 = vmatmul.msk.bf16.vlgmr.msrb.gmra.mxu3 %vm482_vm0, %v2202_v30  ;;  %v760_v12 = vmax.f32 %v753_v47, 0.0  ;;  %v8626_v22 = vrot.slane %v876_v58, 4  ;;  %v979_v30 = vmul.f32 %v8448_v9, %v8476_v25  ;;  %v2212_v25 = vpack.c.bf16 %v2209_v24, %v2208_v23 }
  0xe6   : > { %v648_v50 = vrot.slane %v637_v42, 4  ;;  %v853_v52 = vpop.f32.mrf.mxu2  ;;  %v992_v42 = vmax.f32 %v985_v21, 0.0  ;;  %2378 = vmatpush.bf16.msra.mxu3 %v7619_v49  ;;  %v976_v28 = vmul.f32 %v8448_v9, %v8425_v60 }
  0xe7   : > { %v609_v54 = vpop.f32.mrf.mxu0  ;;  %v863_v16 = vmul.f32 %v8448_v9, %v853_v52  ;;  %v770_v0 = vrot.slane %v760_v12, 4  ;;  %v886_v43 = vsel %vm642_vm1, %v883_v19, %v8626_v22  ;;  %v986_v52 = vadd.f32 %v8456_v14, %v979_v30 }
  0xe8   : > { %v738_v56 = vpop.f32.mrf.mxu1  ;;  %v649_v62 = vsel %vm642_vm1, %v646_v11, %v648_v50  ;;  %v657_v63 = vmax.f32 %v634_v29, %v648_v50  ;;  %v8611_v2 = vpop.f32.mrf.mxu3  ;;  %v1514_v29 = vunpack.c.l.b16 %v1500_v1  ;;  %v864_v11 = vadd.f32 %v8456_v14, %v857_v40  ;;  %v7618_v40 = vld [vmem:[%s10516_s4 + $0x28] sm:$0xff] }
  0xe9   : > { %v656_v8 = vmax.f32 %v633_v61, %v649_v62  ;;  %v870_v31 = vadd.f32 %v8456_v14, %v863_v16  ;;  %v872_v50 = vmax.f32 %v865_v59, 0.0  ;;  %v771_v61 = vsel %vm642_vm1, %v8574_v38, %v770_v0  ;;  %2326 = vmatpush.bf16.msra.mxu2 %v7618_v40  ;;  %v7611_v40 = vld [vmem:[%s8310_s28 + $0x174] sm:$0xff] }
  0xea   : > { %v663_v10 = vld [vmem:[#allocation4] ss:$2 sm:$0xff]  ;;  %v667_v15 = vld [vmem:[#allocation4 + $0x1] ss:$2 sm:$0xff]  ;;  %662 = vst.msk [vmem:[#allocation4 + $0x18] sm:$0xf] %vm661_vm2, %v657_v63  ;;  %v1518_v33 = vpack.c.b16 %v1514_v29, %v1514_v29  ;;  %v980_v38 = vmul.f32 %v8448_v9, %v8516_v46  ;;  %v778_v12 = vmax.f32 %v756_v53, %v771_v61  ;;  %v866_v19 = vadd.f32 %v8456_v14, %v859_v55 }
  0xeb   : > { %780 = vst.msk [vmem:[#allocation4] sm:$0xff] %vm482_vm0, %v776_v6  ;;  %v670_v35 = vmax.f32 %v663_v10, %v667_v15  ;;  %v871_v36 = vmax.f32 %v864_v11, 0.0  ;;  %v877_v56 = vmax.f32 %v870_v31, 0.0  ;;  %v894_v58 = vmax.f32 %v872_v50, %v886_v43 }
  0xec   : > { %781 = vst.msk [vmem:[#allocation4 + $0x8] sm:$0xff] %vm482_vm0, %v777_v18  ;;  %v999_v63 = vrot.slane %v991_v41, 4  ;;  %v1000_v6 = vrot.slane %v992_v42, 4  ;;  %v993_v46 = vmax.f32 %v986_v52, 0.0  ;;  %v779_v15 = vmax.f32 %v757_v7, %v770_v0 }
  0xed   : > { %660 = vst.msk [vmem:[#allocation4 + $0x10] sm:$0xff] %vm482_vm0, %v656_v8  ;;  %v893_v54 = vmax.f32 %v871_v36, %v884_v17  ;;  %2327 = vmatpush.bf16.msra.mxu2 %v7617_v5  ;;  %v887_v16 = vrot.slane %v877_v56, 4  ;;  %v987_v59 = vadd.f32 %v8456_v14, %v980_v38  ;;  %v873_v31 = vmax.f32 %v866_v19, 0.0 }
  0xee   : > { %v855_v32 = vpop.f32.mrf.mxu2  ;;  %672 = vst.msk [vmem:[#allocation2 + $0x11] sm:$0xff] %vm482_vm0, %v670_v35  ;;  %v1001_v51 = vsel %vm642_vm1, %v999_v63, %v1000_v6  ;;  %v1002_v27 = vrot.slane %v993_v46, 4  ;;  %v983_v60 = vadd.f32 %v8456_v14, %v976_v28  ;;  %v1442_v63 = vmul.f32 %v8448_v9, %v8611_v2 }
  0xef   : > { %v955_v37 = vpop.f32.mrf.mxu0  ;;  %v888_v30 = vsel %vm642_vm1, %v8626_v22, %v887_v16  ;;  %v994_v32 = vmax.f32 %v987_v59, 0.0  ;;  %v896_v22 = vmax.f32 %v874_v4, %v887_v16 }
  0xf0   : > { %v8642_v39 = vpop.f32.mrf.mxu1  ;;  %v974_v44 = vmul.f32 %v8448_v9, %v955_v37  ;;  %v8655_v47 = vpop.f32.mrf.mxu3  ;;  %v895_v37 = vmax.f32 %v873_v31, %v888_v30 }
  0xf1   : > { %v1004_v48 = vrot.slane %v994_v32, 4  ;;  %v7608_v32 = vld [vmem:[%s8310_s28 + $0x158] sm:$0xff] }
  0xf2   : > { %6676 = vmatmul.msk.bf16.gmra.mxu0 %vm482_vm0, %v1518_v33  ;;  %v981_v62 = vadd.f32 %v8456_v14, %v974_v44 }
  0xf3   : > { %6753 = vmatmul.msk.bf16.vlgmr.msrb.gmra.mxu1 %vm482_vm0, %v7610_v34  ;;  %v784_v1 = vld [vmem:[#allocation4] ss:$2 sm:$0xff]  ;;  %v786_v3 = vld [vmem:[#allocation4 + $0x1] ss:$2 sm:$0xff]  ;;  %6765 = vmatmul.msk.bf16.vlgmr.msrb.gmra.mxu2 %vm482_vm0, %v2212_v25  ;;  %v1003_v34 = vsel %vm642_vm1, %v1000_v6, %v1002_v27  ;;  %v7607_v25 = vld [vmem:[%s8310_s28 + $0x150] sm:$0xff]  ;;  %v1005_v38 = vsel %vm642_vm1, %v1002_v27, %v1004_v48 }
  0xf4   : > { %897 = vst.msk [vmem:[#allocation4] sm:$0xff] %vm482_vm0, %v893_v54  ;;  %v665_v8 = vld [vmem:[#allocation4 + $0x10] ss:$2 sm:$0x3f]  ;;  %v788_v18 = vmax.f32 %v784_v1, %v786_v3  ;;  %v988_v21 = vmax.f32 %v981_v62, 0.0 }
  0xf5   : > { %898 = vst.msk [vmem:[#allocation4 + $0x8] sm:$0xff] %vm482_vm0, %v894_v58  ;;  %v669_v10 = vld [vmem:[#allocation4 + $0x11] ss:$2 sm:$0x3f]  ;;  %v990_v58 = vmax.f32 %v983_v60, 0.0 }
  0xf6   : > { %782 = vst.msk [vmem:[#allocation4 + $0x10] sm:$0xff] %vm482_vm0, %v778_v12  ;;  %v8690_v29 = vpop.f32.mrf.mxu2  ;;  %v671_v11 = vmax.f32 %v665_v8, %v669_v10  ;;  %v1010_v33 = vmax.f32 %v988_v21, %v1001_v51  ;;  %v2200_v52 = vld [vmem:[#allocation2 + $0x10] sm:$0xff]  ;;  %v1013_v8 = vmax.f32 %v991_v41, %v1004_v48  ;;  %v1449_v41 = vadd.f32 %v8456_v14, %v1442_v63  ;;  %v7621_v51 = vld [vmem:[%s10516_s4 + $0x40] sm:$0xff]  ;;  %v7628_v27 = vld [vmem:[%s10516_s4 + $0x78] sm:$0xff] }
  0xf7   : > { %783 = vst.msk [vmem:[#allocation4 + $0x18] sm:$0xf] %vm661_vm2, %v779_v15  ;;  %v957_v23 = vpop.f32.mrf.mxu0  ;;  %v2210_v45 = vld [vmem:[#allocation2 + $0x11] sm:$0xff]  ;;  %v1012_v5 = vmax.f32 %v990_v58, %v1005_v38  ;;  %2429 = vmatpush.bf16.msrb.mxu0 %v7621_v51  ;;  %2581 = vmatpush.bf16.msrb.mxu3 %v7628_v27  ;;  %v7630_v27 = vld [vmem:[%s10516_s4 + $0x88] sm:$0xff] }
  0xf8   : > { %v8695_v24 = vpop.f32.mrf.mxu1  ;;  %v975_v7 = vmul.f32 %v8448_v9, %v957_v23  ;;  %674 = vst.msk [vmem:[#allocation2 + $0x19] sm:$0x3f] %vm673_vm3, %v671_v11  ;;  %v8700_v26 = vpop.f32.mrf.mxu3  ;;  %v7626_v23 = vld [vmem:[%s10516_s4 + $0x68] sm:$0xff] }
  0xf9   : > { %790 = vst.msk [vmem:[#allocation2 + $0x21] sm:$0xff] %vm482_vm0, %v788_v18  ;;  %2530 = vmatpush.bf16.msrb.mxu2 %v7626_v23 }
  0xfa   : > { %v982_v0 = vadd.f32 %v8456_v14, %v975_v7  ;;  %v7623_v7 = vld [vmem:[%s10516_s4 + $0x50] sm:$0xff] }
  0xfb   : > { %2480 = vmatpush.bf16.msra.mxu1 %v7623_v7  ;;  %v7632_v7 = vld [vmem:[%s10516_s4 + $0x8] sm:$0xff] }
  0xfc   : > { %v901_v35 = vld [vmem:[#allocation4] ss:$2 sm:$0xff]  ;;  %v903_v36 = vld [vmem:[#allocation4 + $0x1] ss:$2 sm:$0xff]  ;;  %v989_v17 = vmax.f32 %v982_v0, 0.0  ;;  %v1456_v0 = vmax.f32 %v1449_v41, 0.0 }
  0xfd   : > { %1014 = vst.msk [vmem:[#allocation4] sm:$0xff] %vm482_vm0, %v1010_v33  ;;  %v905_v54 = vmax.f32 %v901_v35, %v903_v36  ;;  %v2292_v33 = vld [vmem:[#allocation2 + $0x2] sm:$0xff] }
  0xfe   : > { %v785_v42 = vld [vmem:[#allocation4 + $0x10] ss:$2 sm:$0x3f]  ;;  %v787_v43 = vld [vmem:[#allocation4 + $0x11] ss:$2 sm:$0x3f]  ;;  %v1011_v44 = vmax.f32 %v989_v17, %v1003_v34  ;;  %v8715_v57 = vpop.f32.mrf.mxu2 }
  0xff   : > { %899 = vst.msk [vmem:[#allocation4 + $0x10] sm:$0xff] %vm482_vm0, %v895_v37  ;;  %v8718_v49 = vpop.f32.mrf.mxu0  ;;  %v2201_v61 = vld [vmem:[#allocation2 + $0x18] sm:$0xff]  ;;  %v789_v55 = vmax.f32 %v785_v42, %v787_v43  ;;  %v2293_v34 = vld [vmem:[#allocation2 + $0xa] sm:$0xff] }
 0x100   : > { %v8720_v50 = vpop.f32.mrf.mxu1  ;;  %v2211_v53 = vld [vmem:[#allocation2 + $0x19] sm:$0xff]  ;;  %900 = vst.msk [vmem:[#allocation4 + $0x18] sm:$0xf] %vm661_vm2, %v896_v22  ;;  %v2203_v56 = vpack.c.bf16 %v2201_v61, %v2200_v52  ;;  %v1430_v4 = vpop.f32.mrf.mxu3  ;;  %v2296_v43 = vpack.c.bf16 %v2293_v34, %v2292_v33  ;;  %v7627_v22 = vld [vmem:[%s10516_s4 + $0x70] sm:$0xff] }
 0x101   : > { %1015 = vst.msk [vmem:[#allocation4 + $0x8] sm:$0xff] %vm482_vm0, %v1011_v44  ;;  %v8724_v1 = vpack.c.bf16 %v2211_v53, %v2210_v45  ;;  %v1445_v3 = vmul.f32 %v8448_v9, %v1430_v4  ;;  %v7612_v37 = vld [vmem:[%s8310_s28 + $0x17c] sm:$0xff]  ;;  %2582 = vmatpush.bf16.msrb.mxu3 %v7627_v22  ;;  %v2294_v63 = vld [vmem:[#allocation2 + $0x12] sm:$0xff] }
 0x102   : > { %6776 = vmatmul.msk.bf16.gmra.mxu3 %vm482_vm0, %v2203_v56  ;;  %6737 = vmatmul.msk.bf16.vlgmr.msra.gmra.mxu0 %vm482_vm0, %v7607_v25  ;;  %791 = vst.msk [vmem:[#allocation2 + $0x29] sm:$0x3f] %vm673_vm3, %v789_v55  ;;  %v7625_v52 = vld [vmem:[%s10516_s4 + $0x60] sm:$0xff] }
 0x103   : > { %6754 = vmatmul.msk.bf16.gmra.mxu1 %vm482_vm0, %v7611_v40  ;;  %6766 = vmatmul.msk.bf16.gmra.mxu2 %vm482_vm0, %v8724_v1  ;;  %907 = vst.msk [vmem:[#allocation2 + $0x31] sm:$0xff] %vm482_vm0, %v905_v54  ;;  %v8736_v62 = vadd.f32 %v8456_v14, %v1445_v3 }
 0x104   : > { %2531 = vmatpush.bf16.msrb.mxu2 %v7625_v52  ;;  %2632 = vmatpush.bf16.msra.mxu0 %v7630_v27 }
 0x105   : > { %v1459_v2 = vmax.f32 %v8736_v62, 0.0 }
 0x106   : > { %v8740_v6 = vpop.f32.mrf.mxu2 }
 0x107   : > { %v902_v12 = vld [vmem:[#allocation4 + $0x10] ss:$2 sm:$0x3f]  ;;  %v904_v46 = vld [vmem:[#allocation4 + $0x11] ss:$2 sm:$0x3f]  ;;  %v8744_v10 = vpop.f32.mrf.mxu0 }
 0x108   : > { %v8746_v15 = vpop.f32.mrf.mxu1  ;;  %1016 = vst.msk [vmem:[#allocation4 + $0x10] sm:$0xff] %vm482_vm0, %v1012_v5  ;;  %v1018_v18 = vld [vmem:[#allocation4] ss:$2 sm:$0xff]  ;;  %v1020_v16 = vld [vmem:[#allocation4 + $0x1] ss:$2 sm:$0xff]  ;;  %v1433_v11 = vpop.f32.mrf.mxu3  ;;  %v906_v19 = vmax.f32 %v902_v12, %v904_v46  ;;  %v1467_v28 = vrot.slane %v1459_v2, 4  ;;  %v1091_v12 = vmul.f32 %v8448_v9, %v8718_v49 }
 0x109   : > { %1017 = vst.msk [vmem:[#allocation4 + $0x18] sm:$0xf] %vm661_vm2, %v1013_v8  ;;  %v1446_v59 = vmul.f32 %v8448_v9, %v1433_v11  ;;  %v1022_v20 = vmax.f32 %v1018_v18, %v1020_v16  ;;  %v2346_v3 = vld [vmem:[#allocation2 + $0x28] sm:$0xff]  ;;  %v7609_v5 = vld [vmem:[%s8310_s28 + $0x160] sm:$0xff] }
 0x10a   : > { %908 = vst.msk [vmem:[#allocation2 + $0x39] sm:$0x3f] %vm673_vm3, %v906_v19  ;;  %v2295_v8 = vld [vmem:[#allocation2 + $0x1a] sm:$0xff]  ;;  %v1098_v49 = vadd.f32 %v8456_v14, %v1091_v12 }
 0x10b   : > { %v1453_v21 = vadd.f32 %v8456_v14, %v1446_v59  ;;  %1024 = vst.msk [vmem:[#allocation2 + $0x41] sm:$0xff] %vm482_vm0, %v1022_v20  ;;  %v2345_v16 = vld [vmem:[#allocation2 + $0x20] sm:$0xff]  ;;  %v8814_v41 = vpack.c.bf16 %v2295_v8, %v2294_v63  ;;  %v1209_v63 = vmul.f32 %v8448_v9, %v8695_v24 }
 0x10c   : > { %v8812_v59 = vpack.c.bf16 %v2346_v3, %v2345_v16  ;;  %v1105_v33 = vmax.f32 %v1098_v49, 0.0  ;;  %v2548_v3 = vld [vmem:[#allocation2 + $0x29] sm:$0xff]  ;;  %v2547_v16 = vld [vmem:[#allocation2 + $0x21] sm:$0xff] }
 0x10d   : > { %v1460_v30 = vmax.f32 %v1453_v21, 0.0 }
 0x10e   : > { %v8770_v31 = vpop.f32.mrf.mxu2 }
 0x10f   : > { %v8773_v35 = vpop.f32.mrf.mxu0  ;;  %v8777_v17 = vrot.slane %v1460_v30, 4 }
 0x110   : > { %v8775_v36 = vpop.f32.mrf.mxu1  ;;  %v1019_v25 = vld [vmem:[#allocation4 + $0x10] ss:$2 sm:$0x3f]  ;;  %v1021_v40 = vld [vmem:[#allocation4 + $0x11] ss:$2 sm:$0x3f]  ;;  %v8780_v60 = vpop.f32.mrf.mxu3 }
 0x111   : > { %v1469_v42 = vsel %vm642_vm1, %v1467_v28, %v8777_v17  ;;  %v1023_v44 = vmax.f32 %v1019_v25, %v1021_v40  ;;  %v7634_v28 = vld [vmem:[%s10516_s4 + $0x18] sm:$0xff]  ;;  %v1968_v40 = vld [vmem:[%s8310_s28 + $0x168] sm:$0xf]  ;;  %v1212_v22 = vmul.f32 %v8448_v9, %v8775_v36 }
 0x112   : > { %6795 = vmatmul.msk.bf16.vlgmr.msra.gmra.mxu3 %vm482_vm0, %v2203_v56  ;;  %v8788_v48 = vmax.f32 %v1456_v0, %v1469_v42  ;;  %6738 = vmatmul.msk.bf16.gmra.mxu0 %vm482_vm0, %v7608_v32  ;;  %v2085_v56 = vld [vmem:[%s8310_s28 + $0x184] sm:$0xf]  ;;  %v1092_v42 = vmul.f32 %v8448_v9, %v8744_v10 }
 0x113   : > { %6755 = vmatmul.msk.bf16.gmra.mxu1 %vm482_vm0, %v7612_v37  ;;  %6785 = vmatmul.msk.bf16.vlgmr.msra.gmra.mxu2 %vm482_vm0, %v2296_v43  ;;  %1025 = vst.msk [vmem:[#allocation2 + $0x49] sm:$0x3f] %vm673_vm3, %v1023_v44  ;;  %v2099_v4 = vunpack.c.l.b16 %v2085_v56  ;;  %v1211_v43 = vmul.f32 %v8448_v9, %v8746_v15  ;;  %v1982_v56 = vunpack.c.l.b16 %v1968_v40  ;;  %v1219_v36 = vadd.f32 %v8456_v14, %v1212_v22 }
 0x114   : > { %2758 = vmatpush.bf16.msra.mxu2 %v7632_v7  ;;  %2721 = vmatpush.bf16.msrb.mxu1 %v7634_v28  ;;  %v8868_v7 = vpack.c.bf16 %v2548_v3, %v2547_v16 }
 0x115   : > { %v2103_v11 = vpack.c.b16 %v2099_v4, %v2099_v4  ;;  %v1099_v4 = vadd.f32 %v8456_v14, %v1092_v42  ;;  %v8855_v15 = vadd.f32 %v8456_v14, %v1211_v43  ;;  %v1226_v28 = vmax.f32 %v1219_v36, 0.0 }
 0x116   : > { %v8797_v61 = vpop.f32.mrf.mxu2 }
 0x117   : > { %v1079_v53 = vpop.f32.mrf.mxu0  ;;  %v1106_v27 = vmax.f32 %v1099_v4, 0.0  ;;  %v1225_v24 = vmax.f32 %v8855_v15, 0.0 }
 0x118   : > { %v1201_v55 = vpop.f32.mrf.mxu1  ;;  %v8799_v54 = vpop.f32.mrf.mxu3  ;;  %v1094_v45 = vmul.f32 %v8448_v9, %v1079_v53 }
 0x119   : > { %v1213_v34 = vmul.f32 %v8448_v9, %v1201_v55 }
 0x11a   : > { %v8804_v58 = vadd.f32 %v8456_v14, %v1094_v45 }
 0x11b   : > { %v1220_v45 = vadd.f32 %v8456_v14, %v1213_v34  ;;  %v1216_v34 = vadd.f32 %v8456_v14, %v1209_v63 }
 0x11c   : > { %v1108_v21 = vmax.f32 %v8804_v58, 0.0 }
 0x11e   : > { %v8806_v38 = vpop.f32.mrf.mxu2  ;;  %v1116_v30 = vrot.slane %v1108_v21, 4 }
 0x11f   : > { %v1082_v46 = vpop.f32.mrf.mxu0 }
 0x120   : > { %v1204_v18 = vpop.f32.mrf.mxu1  ;;  %v1095_v19 = vmul.f32 %v8448_v9, %v1082_v46  ;;  %v1440_v20 = vpop.f32.mrf.mxu3 }
 0x121   : > { %v1214_v12 = vmul.f32 %v8448_v9, %v1204_v18  ;;  %v1227_v20 = vmax.f32 %v1220_v45, 0.0  ;;  %v1325_v45 = vmul.f32 %v8448_v9, %v8690_v29 }
 0x122   : > { %v1102_v23 = vadd.f32 %v8456_v14, %v1095_v19  ;;  %6796 = vmatmul.msk.bf16.gmra.mxu3 %vm482_vm0, %v8812_v59  ;;  %6739 = vmatmul.msk.bf16.gmra.mxu0 %vm482_vm0, %v7609_v5  ;;  %v7636_v5 = vld [vmem:[%s10516_s4 + $0x28] sm:$0xff]  ;;  %v1093_v19 = vmul.f32 %v8448_v9, %v8773_v35  ;;  %v1208_v35 = vmul.f32 %v8448_v9, %v8642_v39 }
 0x123   : > { %6756 = vmatmul.msk.bf16.gmra.mxu1 %vm482_vm0, %v2103_v11  ;;  %6786 = vmatmul.msk.bf16.gmra.mxu2 %vm482_vm0, %v8814_v41  ;;  %v1986_v11 = vpack.c.b16 %v1982_v56, %v1982_v56  ;;  %v1221_v40 = vadd.f32 %v8456_v14, %v1214_v12  ;;  %v1236_v39 = vrot.slane %v1227_v20, 4 }
 0x124   : > { %v1109_v51 = vmax.f32 %v1102_v23, 0.0  ;;  %2805 = vmatpush.bf16.msra.mxu3 %v7636_v5  ;;  %v1100_v22 = vadd.f32 %v8456_v14, %v1093_v19  ;;  %v1215_v56 = vadd.f32 %v8456_v14, %v1208_v35 }
 0x125   : > { %v1228_v36 = vmax.f32 %v1221_v40, 0.0 }
 0x126   : > { %v1117_v0 = vrot.slane %v1109_v51, 4  ;;  %v8836_v32 = vpop.f32.mrf.mxu2  ;;  %v1107_v63 = vmax.f32 %v1100_v22, 0.0 }
 0x127   : > { %v1084_v37 = vpop.f32.mrf.mxu0 }
 0x128   : > { %v1206_v25 = vpop.f32.mrf.mxu1  ;;  %v1118_v44 = vsel %vm642_vm1, %v1116_v30, %v1117_v0  ;;  %v8847_v52 = vpop.f32.mrf.mxu3  ;;  %v1096_v55 = vmul.f32 %v8448_v9, %v1084_v37  ;;  %v1329_v37 = vmul.f32 %v8448_v9, %v8797_v61  ;;  %v7633_v61 = vld [vmem:[%s10516_s4 + $0x10] sm:$0xff] }
 0x129   : > { %v1127_v53 = vmax.f32 %v1105_v33, %v1118_v44  ;;  %v7635_v33 = vld [vmem:[%s10516_s4 + $0x20] sm:$0xff]  ;;  %v1330_v44 = vmul.f32 %v8448_v9, %v8806_v38  ;;  %v1328_v38 = vmul.f32 %v8448_v9, %v8770_v31  ;;  %2722 = vmatpush.bf16.msrb.mxu1 %v7633_v61  ;;  %v1210_v31 = vmul.f32 %v8448_v9, %v8720_v50 }
 0x12a   : > { %v1103_v10 = vadd.f32 %v8456_v14, %v1096_v55  ;;  %v1234_v55 = vrot.slane %v1226_v28, 4  ;;  %2806 = vmatpush.bf16.msra.mxu3 %v7635_v33  ;;  %v1336_v4 = vadd.f32 %v8456_v14, %v1329_v37  ;;  %v1222_v50 = vmax.f32 %v1215_v56, 0.0  ;;  %v2447_v61 = vld [vmem:[#allocation2 + $0x22] sm:$0xff] }
 0x12b   : > { %1131 = vst.msk [vmem:[#allocation4] sm:$0xff] %vm482_vm0, %v1127_v53  ;;  %v1233_v53 = vrot.slane %v1225_v24, 4  ;;  %v1337_v12 = vadd.f32 %v8456_v14, %v1330_v44  ;;  %v8919_v29 = vadd.f32 %v8456_v14, %v1328_v38  ;;  %v1217_v58 = vadd.f32 %v8456_v14, %v1210_v31  ;;  %v2550_v44 = vld [vmem:[#allocation2 + $0x39] sm:$0xff] }
 0x12c   : > { %v1110_v8 = vmax.f32 %v1103_v10, 0.0  ;;  %v1223_v10 = vmax.f32 %v1216_v34, 0.0  ;;  %v1343_v33 = vmax.f32 %v1336_v4, 0.0  ;;  %v1238_v34 = vrot.slane %v1228_v36, 4 }
 0x12d   : > { %v1344_v37 = vmax.f32 %v1337_v12, 0.0  ;;  %v1224_v56 = vmax.f32 %v1217_v58, 0.0  ;;  %v2498_v12 = vld [vmem:[#allocation2 + $0x30] sm:$0xff] }
 0x12e   : > { %v1323_v46 = vpop.f32.mrf.mxu2  ;;  %v1119_v23 = vrot.slane %v1110_v8, 4  ;;  %v1237_v8 = vsel %vm642_vm1, %v1234_v55, %v1236_v39  ;;  %v1239_v38 = vsel %vm642_vm1, %v1236_v39, %v1238_v34 }
 0x12f   : > { %v1087_v49 = vpop.f32.mrf.mxu0  ;;  %v1245_v35 = vmax.f32 %v1223_v10, %v1237_v8  ;;  %v1353_v10 = vrot.slane %v1344_v37, 4 }
 0x130   : > { %v8866_v51 = vpop.f32.mrf.mxu1  ;;  %v1097_v18 = vmul.f32 %v8448_v9, %v1087_v49  ;;  %v8872_v30 = vpop.f32.mrf.mxu3  ;;  %v1120_v25 = vsel %vm642_vm1, %v1117_v0, %v1119_v23  ;;  %v7631_v0 = vld [vmem:[%s10516_s4] sm:$0xff] }
 0x131   : > { %v1128_v42 = vmax.f32 %v1106_v27, %v1120_v25  ;;  %2759 = vmatpush.bf16.msra.mxu2 %v7631_v0  ;;  %v1331_v27 = vmul.f32 %v8448_v9, %v8836_v32  ;;  %v1326_v32 = vmul.f32 %v8448_v9, %v8715_v57  ;;  %v2448_v0 = vld [vmem:[#allocation2 + $0x2a] sm:$0xff] }
 0x132   : > { %v1104_v43 = vadd.f32 %v8456_v14, %v1097_v18  ;;  %6835 = vmatmul.msk.bf16.vlgmr.msrb.gmra.mxu3 %vm482_vm0, %v8868_v7  ;;  %6740 = vmatmul.msk.bf16.gmra.mxu0 %vm482_vm0, %v1986_v11  ;;  %v1235_v11 = vsel %vm642_vm1, %v1233_v53, %v1234_v55  ;;  %v7629_v18 = vld [vmem:[%s10516_s4 + $0x80] sm:$0xff]  ;;  %v1351_v53 = vrot.slane %v1343_v33, 4  ;;  %v8957_v8 = vpack.c.bf16 %v2448_v0, %v2447_v61 }
 0x133   : > { %6815 = vmatmul.msk.bf16.vlgmr.msra.gmra.mxu1 %vm482_vm0, %v8814_v41  ;;  %6825 = vmatmul.msk.bf16.vlgmr.msrb.gmra.mxu2 %vm482_vm0, %v8812_v59  ;;  %1132 = vst.msk [vmem:[#allocation4 + $0x8] sm:$0xff] %vm482_vm0, %v1128_v42  ;;  %v1342_v42 = vmax.f32 %v8919_v29, 0.0  ;;  %v1338_v22 = vadd.f32 %v8456_v14, %v1331_v27  ;;  %v1333_v31 = vadd.f32 %v8456_v14, %v1326_v32  ;;  %v8973_v33 = vld [vmem:[#allocation10] ss:$0 sm:$0xff] }
 0x134   : > { %v1111_v41 = vmax.f32 %v1104_v43, 0.0  ;;  %2633 = vmatpush.bf16.msra.mxu0 %v7629_v18  ;;  %v1247_v27 = vmax.f32 %v1225_v24, %v1238_v34 }
 0x135   : > { %v1350_v39 = vrot.slane %v1342_v42, 4  ;;  %v1340_v15 = vmax.f32 %v1333_v31, 0.0 }
 0x136   : > { %v1121_v3 = vrot.slane %v1111_v41, 4  ;;  %v8910_v5 = vpop.f32.mrf.mxu2  ;;  %v2499_v41 = vld [vmem:[#allocation2 + $0x38] sm:$0xff] }
 0x137   : > { %v1089_v46 = vpop.f32.mrf.mxu0 }
 0x138   : > { %v8916_v16 = vpop.f32.mrf.mxu1  ;;  %v1122_v19 = vsel %vm642_vm1, %v1119_v23, %v1121_v3  ;;  %v1130_v20 = vmax.f32 %v1108_v21, %v1121_v3  ;;  %v8925_v49 = vpop.f32.mrf.mxu3  ;;  %v1332_v23 = vadd.f32 %v8456_v14, %v1325_v45  ;;  %v1244_v21 = vmax.f32 %v1222_v50, %v1235_v11  ;;  %v2549_v3 = vld [vmem:[#allocation2 + $0x31] sm:$0xff] }
 0x139   : > { %v1129_v28 = vmax.f32 %v1107_v63, %v1122_v19  ;;  %v1447_v45 = vmul.f32 %v8448_v9, %v8780_v60  ;;  %v8955_v63 = vpack.c.bf16 %v2550_v44, %v2549_v3  ;;  %v1246_v11 = vmax.f32 %v1224_v56, %v1239_v38  ;;  %v8961_v60 = vld [vmem:[#allocation8] ss:$0 sm:$0xff]  ;;  %v7638_v56 = vld [vmem:[%s10516_s4 + $0x38] sm:$0xff] }
 0x13a   : > { %1134 = vst.msk [vmem:[#allocation4 + $0x18] sm:$0xf] %vm661_vm2, %v1130_v20  ;;  %v1135_v25 = vld [vmem:[#allocation4] ss:$2 sm:$0xff]  ;;  %v1137_v40 = vld [vmem:[#allocation4 + $0x1] ss:$2 sm:$0xff]  ;;  %v8959_v9 = vpack.c.bf16 %v2499_v41, %v2498_v12  ;;  %v1327_v14 = vmul.f32 %v8961_v60, %v8740_v6  ;;  %v1352_v50 = vsel %vm642_vm1, %v1350_v39, %v1351_v53  ;;  %v1448_v24 = vmul.f32 %v8961_v60, %v8799_v54 }
 0x13b   : > { %1133 = vst.msk [vmem:[#allocation4 + $0x10] sm:$0xff] %vm482_vm0, %v1129_v28  ;;  %v1139_v43 = vmax.f32 %v1135_v25, %v1137_v40  ;;  %v1339_v57 = vmax.f32 %v1332_v23, 0.0  ;;  %v1345_v19 = vmax.f32 %v1338_v22, 0.0  ;;  %v1354_v23 = vsel %vm642_vm1, %v1351_v53, %v1353_v10 }
 0x13c   : > { %1249 = vst.msk [vmem:[#allocation4 + $0x8] sm:$0xff] %vm482_vm0, %v1245_v35  ;;  %v1454_v35 = vadd.f32 %v8973_v33, %v1447_v45  ;;  %v1443_v37 = vmul.f32 %v8961_v60, %v8655_v47  ;;  %v1334_v25 = vadd.f32 %v8973_v33, %v1327_v14  ;;  %v1362_v40 = vmax.f32 %v1340_v15, %v1354_v23  ;;  %v7640_v45 = vld [vmem:[%s10516_s4 + $0x48] sm:$0xff] }
 0x13d   : > { %1248 = vst.msk [vmem:[#allocation4] sm:$0xff] %vm482_vm0, %v1244_v21  ;;  %v1361_v34 = vmax.f32 %v1339_v57, %v1352_v50  ;;  %v1355_v58 = vrot.slane %v1345_v19, 4  ;;  %v1910_v32 = vmul.f32 %v8961_v60, %v8847_v52  ;;  %v1455_v53 = vadd.f32 %v8973_v33, %v1448_v24  ;;  %v7642_v57 = vld [vmem:[%s10516_s4 + $0x58] sm:$0xff]  ;;  %2907 = vmatpush.bf16.msra.mxu1 %v7640_v45  ;;  %v7644_v14 = vld [vmem:[%s10516_s4 + $0x68] sm:$0xff] }
 0x13e   : > { %v8943_v55 = vpop.f32.mrf.mxu2  ;;  %1141 = vst.msk [vmem:[#allocation2 + $0x51] sm:$0xff] %vm482_vm0, %v1139_v43  ;;  %v1461_v22 = vmax.f32 %v1454_v35, 0.0  ;;  %v1341_v3 = vmax.f32 %v1334_v25, 0.0  ;;  %v1444_v39 = vmul.f32 %v8961_v60, %v8700_v26  ;;  %2958 = vmatpush.bf16.msrb.mxu2 %v7642_v57  ;;  %3009 = vmatpush.bf16.msrb.mxu3 %v7644_v14 }
 0x13f   : > { %v8948_v4 = vpop.f32.mrf.mxu0  ;;  %v1356_v38 = vsel %vm642_vm1, %v1353_v10, %v1355_v58  ;;  %v1450_v10 = vadd.f32 %v8973_v33, %v1443_v37  ;;  %v1917_v31 = vadd.f32 %v8973_v33, %v1910_v32  ;;  %v1462_v19 = vmax.f32 %v1455_v53, 0.0  ;;  %v7639_v53 = vld [vmem:[%s10516_s4 + $0x40] sm:$0xff] }
 0x140   : > { %v8950_v36 = vpop.f32.mrf.mxu1  ;;  %v1898_v46 = vpop.f32.mrf.mxu3  ;;  %v1470_v12 = vrot.slane %v1461_v22, 4  ;;  %v1364_v24 = vmax.f32 %v1342_v42, %v1355_v58  ;;  %v7643_v22 = vld [vmem:[%s10516_s4 + $0x60] sm:$0xff] }
 0x141   : > { %v1913_v20 = vmul.f32 %v8961_v60, %v1898_v46  ;;  %v1924_v26 = vmax.f32 %v1917_v31, 0.0  ;;  %v1472_v32 = vrot.slane %v1462_v19, 4  ;;  %2908 = vmatpush.bf16.msra.mxu1 %v7639_v53 }
 0x142   : > { %v1136_v28 = vld [vmem:[#allocation4 + $0x10] ss:$2 sm:$0x3f]  ;;  %v1138_v18 = vld [vmem:[#allocation4 + $0x11] ss:$2 sm:$0x3f]  ;;  %6836 = vmatmul.msk.bf16.gmra.mxu3 %vm482_vm0, %v8955_v63  ;;  %6805 = vmatmul.msk.bf16.vlgmr.msrb.gmra.mxu0 %vm482_vm0, %v8724_v1  ;;  %v1471_v15 = vsel %vm642_vm1, %v8777_v17, %v1470_v12 }
 0x143   : > { %1250 = vst.msk [vmem:[#allocation4 + $0x10] sm:$0xff] %vm482_vm0, %v1246_v11  ;;  %6816 = vmatmul.msk.bf16.gmra.mxu1 %vm482_vm0, %v8957_v8  ;;  %6826 = vmatmul.msk.bf16.gmra.mxu2 %vm482_vm0, %v8959_v9  ;;  %v1140_v6 = vmax.f32 %v1136_v28, %v1138_v18  ;;  %v8986_v21 = vadd.f32 %v8973_v33, %v1913_v20  ;;  %v1457_v18 = vmax.f32 %v1450_v10, 0.0 }
 0x144   : > { %1251 = vst.msk [vmem:[#allocation4 + $0x18] sm:$0xf] %vm661_vm2, %v1247_v27  ;;  %v1252_v1 = vld [vmem:[#allocation4] ss:$2 sm:$0xff]  ;;  %v1254_v43 = vld [vmem:[#allocation4 + $0x1] ss:$2 sm:$0xff]  ;;  %2856 = vmatpush.bf16.msrb.mxu0 %v7638_v56  ;;  %v1363_v20 = vmax.f32 %v1341_v3, %v1356_v38  ;;  %v1473_v38 = vsel %vm642_vm1, %v1470_v12, %v1472_v32  ;;  %3010 = vmatpush.bf16.msrb.mxu3 %v7643_v22 }
 0x145   : > { %1142 = vst.msk [vmem:[#allocation2 + $0x59] sm:$0x3f] %vm673_vm3, %v1140_v6  ;;  %v1256_v0 = vmax.f32 %v1252_v1, %v1254_v43  ;;  %v1927_v52 = vmax.f32 %v8986_v21, 0.0  ;;  %v1451_v6 = vadd.f32 %v8973_v33, %v1444_v39  ;;  %v1479_v42 = vmax.f32 %v1457_v18, %v1471_v15  ;;  %v7646_v22 = vld [vmem:[%s10516_s4 + $0x78] sm:$0xff] }
 0x146   : > { %v8994_v54 = vpop.f32.mrf.mxu2  ;;  %1365 = vst.msk [vmem:[#allocation4] sm:$0xff] %vm482_vm0, %v1361_v34  ;;  %v1481_v56 = vmax.f32 %v1459_v2, %v1472_v32  ;;  %v2774_v2 = vld [vmem:[#allocation2 + $0x3a] sm:$0xff] }
 0x147   : > { %v8996_v44 = vpop.f32.mrf.mxu0  ;;  %1366 = vst.msk [vmem:[#allocation4 + $0x8] sm:$0xff] %vm482_vm0, %v1362_v40  ;;  %v1935_v50 = vrot.slane %v1927_v52, 4  ;;  %v7652_v32 = vld [vmem:[%s10516_s4 + $0x18] sm:$0xff] }
 0x148   : > { %v8998_v61 = vpop.f32.mrf.mxu1  ;;  %v1901_v47 = vpop.f32.mrf.mxu3  ;;  %1258 = vst.msk [vmem:[#allocation2 + $0x61] sm:$0xff] %vm482_vm0, %v1256_v0  ;;  %v1458_v0 = vmax.f32 %v1451_v6, 0.0 }
 0x149   : > { %v1914_v41 = vmul.f32 %v8961_v60, %v1901_v47  ;;  %v7641_v47 = vld [vmem:[%s10516_s4 + $0x50] sm:$0xff]  ;;  %v1679_v53 = vmul.f32 %v8961_v60, %v8998_v61 }
 0x14a   : > { %2959 = vmatpush.bf16.msrb.mxu2 %v7641_v47 }
 0x14b   : > { %v1921_v46 = vadd.f32 %v8973_v33, %v1914_v41  ;;  %v1253_v11 = vld [vmem:[#allocation4 + $0x10] ss:$2 sm:$0x3f]  ;;  %v1255_v28 = vld [vmem:[#allocation4 + $0x11] ss:$2 sm:$0x3f]  ;;  %v9129_v61 = vadd.f32 %v8973_v33, %v1679_v53 }
 0x14c   : > { %v1257_v23 = vmax.f32 %v1253_v11, %v1255_v28  ;;  %1367 = vst.msk [vmem:[#allocation4 + $0x10] sm:$0xff] %vm482_vm0, %v1363_v20  ;;  %v1559_v20 = vmul.f32 %v8961_v60, %v8948_v4 }
 0x14d   : > { %v1928_v27 = vmax.f32 %v1921_v46, 0.0  ;;  %1368 = vst.msk [vmem:[#allocation4 + $0x18] sm:$0xf] %vm661_vm2, %v1364_v24 }
 0x14e   : > { %v9026_v35 = vpop.f32.mrf.mxu2  ;;  %v1369_v25 = vld [vmem:[#allocation4] ss:$2 sm:$0xff]  ;;  %v1371_v40 = vld [vmem:[#allocation4 + $0x1] ss:$2 sm:$0xff]  ;;  %1259 = vst.msk [vmem:[#allocation2 + $0x69] sm:$0x3f] %vm673_vm3, %v1257_v23  ;;  %v1566_v4 = vadd.f32 %v8973_v33, %v1559_v20 }
 0x14f   : > { %v9034_v1 = vpop.f32.mrf.mxu0  ;;  %v9038_v37 = vrot.slane %v1928_v27, 4  ;;  %v1373_v17 = vmax.f32 %v1369_v25, %v1371_v40  ;;  %1482 = vst.msk [vmem:[#allocation4] sm:$0xff] %vm482_vm0, %v8788_v48  ;;  %v7637_v48 = vld [vmem:[%s10516_s4 + $0x30] sm:$0xff] }
 0x150   : > { %v9036_v34 = vpop.f32.mrf.mxu1  ;;  %v9040_v43 = vpop.f32.mrf.mxu3  ;;  %1483 = vst.msk [vmem:[#allocation4 + $0x8] sm:$0xff] %vm482_vm0, %v1479_v42  ;;  %2857 = vmatpush.bf16.msrb.mxu0 %v7637_v48  ;;  %v2773_v27 = vld [vmem:[#allocation2 + $0x32] sm:$0xff] }
 0x151   : > { %v1937_v29 = vsel %vm642_vm1, %v1935_v50, %v9038_v37  ;;  %1375 = vst.msk [vmem:[#allocation2 + $0x71] sm:$0xff] %vm482_vm0, %v1373_v17  ;;  %v9092_v18 = vpack.c.bf16 %v2774_v2, %v2773_v27  ;;  %v1680_v47 = vmul.f32 %v8961_v60, %v9036_v34  ;;  %v1561_v27 = vmul.f32 %v8961_v60, %v9034_v1 }
 0x152   : > { %6875 = vmatmul.msk.bf16.vlgmr.msra.gmra.mxu3 %vm482_vm0, %v8957_v8  ;;  %v9051_v58 = vmax.f32 %v1924_v26, %v1937_v29  ;;  %6806 = vmatmul.msk.bf16.gmra.mxu0 %vm482_vm0, %v8868_v7  ;;  %v1677_v1 = vmul.f32 %v8961_v60, %v8916_v16 }
 0x153   : > { %6855 = vmatmul.msk.bf16.vlgmr.msrb.gmra.mxu1 %vm482_vm0, %v8868_v7  ;;  %6865 = vmatmul.msk.bf16.vlgmr.msra.gmra.mxu2 %vm482_vm0, %v8812_v59  ;;  %v1480_v59 = vmax.f32 %v1458_v0, %v1473_v38  ;;  %v1573_v0 = vmax.f32 %v1566_v4, 0.0  ;;  %v1687_v34 = vadd.f32 %v8973_v33, %v1680_v47 }
 0x154   : > { %v1370_v10 = vld [vmem:[#allocation4 + $0x10] ss:$2 sm:$0x3f]  ;;  %v1372_v3 = vld [vmem:[#allocation4 + $0x11] ss:$2 sm:$0x3f]  ;;  %3192 = vmatpush.bf16.msra.mxu2 %v7652_v32 }
 0x155   : > { %1484 = vst.msk [vmem:[#allocation4 + $0x10] sm:$0xff] %vm482_vm0, %v1480_v59  ;;  %v1374_v39 = vmax.f32 %v1370_v10, %v1372_v3 }
 0x156   : > { %v9070_v7 = vpop.f32.mrf.mxu2  ;;  %1485 = vst.msk [vmem:[#allocation4 + $0x18] sm:$0xf] %vm661_vm2, %v1481_v56 }
 0x157   : > { %v1547_v41 = vpop.f32.mrf.mxu0  ;;  %v1486_v12 = vld [vmem:[#allocation4] ss:$2 sm:$0xff]  ;;  %v1488_v46 = vld [vmem:[#allocation4 + $0x1] ss:$2 sm:$0xff]  ;;  %1376 = vst.msk [vmem:[#allocation2 + $0x79] sm:$0x3f] %vm673_vm3, %v1374_v39 }
 0x158   : > { %v1669_v57 = vpop.f32.mrf.mxu1  ;;  %v9074_v45 = vpop.f32.mrf.mxu3  ;;  %v1562_v31 = vmul.f32 %v8961_v60, %v1547_v41  ;;  %v1490_v62 = vmax.f32 %v1486_v12, %v1488_v46  ;;  %v1560_v41 = vmul.f32 %v8961_v60, %v8996_v44  ;;  %v2976_v46 = vld [vmem:[#allocation2 + $0x48] sm:$0xff] }
 0x159   : > { %v1681_v56 = vmul.f32 %v8961_v60, %v1669_v57  ;;  %v1676_v57 = vmul.f32 %v8961_v60, %v8866_v51  ;;  %v2975_v51 = vld [vmem:[#allocation2 + $0x40] sm:$0xff] }
 0x15a   : > { %v9084_v11 = vadd.f32 %v8973_v33, %v1562_v31  ;;  %1492 = vst.msk [vmem:[#allocation2 + $0x81] sm:$0xff] %vm482_vm0, %v1490_v62  ;;  %v1567_v39 = vadd.f32 %v8973_v33, %v1560_v41  ;;  %v7650_v62 = vld [vmem:[%s10516_s4 + $0x8] sm:$0xff] }
 0x15b   : > { %v1688_v44 = vadd.f32 %v8973_v33, %v1681_v56  ;;  %3229 = vmatpush.bf16.msra.mxu3 %v7650_v62  ;;  %v1683_v32 = vadd.f32 %v8973_v33, %v1676_v57 }
 0x15c   : > { %v1576_v15 = vmax.f32 %v9084_v11, 0.0 }
 0x15d   : > { %v1487_v23 = vld [vmem:[#allocation4 + $0x10] ss:$2 sm:$0x3f]  ;;  %v1489_v6 = vld [vmem:[#allocation4 + $0x11] ss:$2 sm:$0x3f] }
 0x15e   : > { %v9086_v19 = vpop.f32.mrf.mxu2  ;;  %v1491_v25 = vmax.f32 %v1487_v23, %v1489_v6  ;;  %v1584_v17 = vrot.slane %v1576_v15, 4  ;;  %v1695_v4 = vmax.f32 %v1688_v44, 0.0 }
 0x15f   : > { %v1550_v14 = vpop.f32.mrf.mxu0  ;;  %v1798_v41 = vmul.f32 %v8961_v60, %v9086_v19  ;;  %v1678_v19 = vmul.f32 %v8961_v60, %v8950_v36 }
 0x160   : > { %v1672_v50 = vpop.f32.mrf.mxu1  ;;  %v1563_v28 = vmul.f32 %v8961_v60, %v1550_v14  ;;  %v1908_v26 = vpop.f32.mrf.mxu3  ;;  %1493 = vst.msk [vmem:[#allocation2 + $0x89] sm:$0x3f] %vm673_vm3, %v1491_v25  ;;  %v1693_v14 = vmax.f32 %v9129_v61, 0.0 }
 0x161   : > { %v1682_v2 = vmul.f32 %v8961_v60, %v1672_v50  ;;  %v7649_v50 = vld [vmem:[%s10516_s4] sm:$0xff] }
 0x162   : > { %v1570_v24 = vadd.f32 %v8973_v33, %v1563_v28  ;;  %6876 = vmatmul.msk.bf16.gmra.mxu3 %vm482_vm0, %v9092_v18  ;;  %6845 = vmatmul.msk.bf16.vlgmr.msra.gmra.mxu0 %vm482_vm0, %v8957_v8  ;;  %v7648_v8 = vld [vmem:[%s10516_s4 + $0x88] sm:$0xff]  ;;  %v1694_v28 = vmax.f32 %v1687_v34, 0.0  ;;  %v1701_v47 = vrot.slane %v1693_v14, 4 }
 0x163   : > { %6856 = vmatmul.msk.bf16.gmra.mxu1 %vm482_vm0, %v8955_v63  ;;  %6866 = vmatmul.msk.bf16.gmra.mxu2 %vm482_vm0, %v8959_v9 }
 0x164   : > { %v1577_v40 = vmax.f32 %v1570_v24, 0.0  ;;  %3060 = vmatpush.bf16.msra.mxu0 %v7646_v22  ;;  %3111 = vmatpush.bf16.msrb.mxu1 %v7648_v8  ;;  %v1574_v24 = vmax.f32 %v1567_v39, 0.0  ;;  %v1702_v16 = vrot.slane %v1694_v28, 4 }
 0x165   : > { %3230 = vmatpush.bf16.msra.mxu3 %v7649_v50 }
 0x166   : > { %v1585_v29 = vrot.slane %v1577_v40, 4  ;;  %v9117_v42 = vpop.f32.mrf.mxu2  ;;  %v9148_v40 = vpack.c.bf16 %v2976_v46, %v2975_v51  ;;  %v1703_v44 = vsel %vm642_vm1, %v1701_v47, %v1702_v16 }
 0x167   : > { %v1552_v38 = vpop.f32.mrf.mxu0 }
 0x168   : > { %v1674_v59 = vpop.f32.mrf.mxu1  ;;  %v1586_v10 = vsel %vm642_vm1, %v1584_v17, %v1585_v29  ;;  %v1564_v48 = vmul.f32 %v8961_v60, %v1552_v38  ;;  %v2282_v8 = vpop.f32.mrf.mxu3  ;;  %v1689_v17 = vadd.f32 %v8973_v33, %v1682_v2  ;;  %v1568_v38 = vadd.f32 %v8973_v33, %v1561_v27 }
 0x169   : > { %v1595_v3 = vmax.f32 %v1573_v0, %v1586_v10  ;;  %v1704_v59 = vrot.slane %v1695_v4, 4  ;;  %v7647_v10 = vld [vmem:[%s10516_s4 + $0x80] sm:$0xff]  ;;  %v1805_v2 = vadd.f32 %v8973_v33, %v1798_v41  ;;  %v2927_v41 = vld [vmem:[#allocation2 + $0x4a] sm:$0xff] }
 0x16a   : > { %v1571_v31 = vadd.f32 %v8973_v33, %v1564_v48  ;;  %v1696_v48 = vmax.f32 %v1689_v17, 0.0  ;;  %3112 = vmatpush.bf16.msrb.mxu1 %v7647_v10  ;;  %v1575_v39 = vmax.f32 %v1568_v38, 0.0  ;;  %v2876_v17 = vld [vmem:[#allocation2 + $0x49] sm:$0xff]  ;;  %v2978_v38 = vld [vmem:[#allocation2 + $0x58] sm:$0xff] }
 0x16b   : > { %1599 = vst.msk [vmem:[#allocation4] sm:$0xff] %vm482_vm0, %v1595_v3  ;;  %v1690_v3 = vmax.f32 %v1683_v32, 0.0 }
 0x16c   : > { %v1578_v12 = vmax.f32 %v1571_v31, 0.0  ;;  %v1706_v4 = vrot.slane %v1696_v48, 4 }
 0x16e   : > { %v1791_v20 = vpop.f32.mrf.mxu2  ;;  %v1587_v26 = vrot.slane %v1578_v12, 4 }
 0x16f   : > { %v1555_v23 = vpop.f32.mrf.mxu0 }
 0x170   : > { %v9145_v6 = vpop.f32.mrf.mxu1  ;;  %v1565_v25 = vmul.f32 %v8961_v60, %v1555_v23  ;;  %v1588_v22 = vsel %vm642_vm1, %v1585_v29, %v1587_v26  ;;  %v1797_v29 = vmul.f32 %v8961_v60, %v9070_v7  ;;  %v7651_v7 = vld [vmem:[%s10516_s4 + $0x10] sm:$0xff]  ;;  %v1799_v23 = vmul.f32 %v8961_v60, %v9117_v42  ;;  %v2284_v50 = vpop.f32.mrf.mxu3 }
 0x171   : > { %v1596_v0 = vmax.f32 %v1574_v24, %v1588_v22  ;;  %3193 = vmatpush.bf16.msra.mxu2 %v7651_v7  ;;  %v1712_v24 = vmax.f32 %v1690_v3, %v1703_v44  ;;  %v1793_v42 = vmul.f32 %v8961_v60, %v8910_v5  ;;  %v1794_v22 = vmul.f32 %v8961_v60, %v8943_v55  ;;  %v2875_v55 = vld [vmem:[#allocation2 + $0x41] sm:$0xff] }
 0x172   : > { %v1572_v53 = vadd.f32 %v8973_v33, %v1565_v25  ;;  %6915 = vmatmul.msk.bf16.vlgmr.msrb.gmra.mxu3 %vm482_vm0, %v9148_v40  ;;  %6846 = vmatmul.msk.bf16.gmra.mxu0 %vm482_vm0, %v9092_v18  ;;  %v1804_v57 = vadd.f32 %v8973_v33, %v1797_v29  ;;  %v7645_v25 = vld [vmem:[%s10516_s4 + $0x70] sm:$0xff]  ;;  %v1806_v47 = vadd.f32 %v8973_v33, %v1799_v23 }
 0x173   : > { %6895 = vmatmul.msk.bf16.vlgmr.msra.gmra.mxu1 %vm482_vm0, %v8955_v63  ;;  %6905 = vmatmul.msk.bf16.vlgmr.msrb.gmra.mxu2 %vm482_vm0, %v9092_v18  ;;  %1600 = vst.msk [vmem:[#allocation4 + $0x8] sm:$0xff] %vm482_vm0, %v1596_v0  ;;  %v1684_v63 = vadd.f32 %v8973_v33, %v1677_v1  ;;  %v1796_v18 = vmul.f32 %v8961_v60, %v9026_v35 }
 0x174   : > { %v1579_v56 = vmax.f32 %v1572_v53, 0.0  ;;  %v1705_v35 = vsel %vm642_vm1, %v1702_v16, %v1704_v59  ;;  %v1811_v11 = vmax.f32 %v1804_v57, 0.0  ;;  %3061 = vmatpush.bf16.msra.mxu0 %v7645_v25  ;;  %v1915_v16 = vmul.f32 %v8961_v60, %v9040_v43 }
 0x175   : > { %v1691_v27 = vmax.f32 %v1684_v63, 0.0  ;;  %v9198_v28 = vadd.f32 %v8973_v33, %v1796_v18  ;;  %v1707_v5 = vsel %vm642_vm1, %v1704_v59, %v1706_v4  ;;  %v2977_v18 = vld [vmem:[#allocation2 + $0x50] sm:$0xff]  ;;  %v9224_v3 = vpack.c.bf16 %v2876_v17, %v2875_v55 }
 0x176   : > { %v1589_v34 = vrot.slane %v1579_v56, 4  ;;  %v2245_v31 = vpop.f32.mrf.mxu2  ;;  %v1819_v10 = vrot.slane %v1811_v11, 4  ;;  %v1801_v43 = vadd.f32 %v8973_v33, %v1794_v22  ;;  %v1813_v57 = vmax.f32 %v1806_v47, 0.0 }
 0x177   : > { %v9188_v12 = vadd.f32 %v2282_v8, %v2245_v31  ;;  %v1557_v46 = vpop.f32.mrf.mxu0  ;;  %v1812_v8 = vmax.f32 %v1805_v2, 0.0  ;;  %v1810_v53 = vmax.f32 %v9198_v28, 0.0  ;;  %v2926_v31 = vld [vmem:[#allocation2 + $0x42] sm:$0xff]  ;;  %v1922_v2 = vadd.f32 %v8973_v33, %v1915_v16 }
 0x178   : > { %v9190_v62 = vpop.f32.mrf.mxu1  ;;  %v1590_v36 = vsel %vm642_vm1, %v1587_v26, %v1589_v34  ;;  %v1598_v20 = vmax.f32 %v1576_v15, %v1589_v34  ;;  %v1685_v26 = vadd.f32 %v8973_v33, %v1678_v19  ;;  %v1713_v15 = vmax.f32 %v1691_v27, %v1705_v35  ;;  %v7658_v16 = vld [vmem:[%s10516_s4 + $0x48] sm:$0xff] }
 0x179   : > { %v1597_v51 = vmax.f32 %v1575_v39, %v1590_v36  ;;  %v1800_v19 = vadd.f32 %v8973_v33, %v1793_v42  ;;  %v1821_v48 = vrot.slane %v1812_v8, 4  ;;  %v9230_v34 = vpack.c.bf16 %v2978_v38, %v2977_v18  ;;  %3378 = vmatpush.bf16.msrb.mxu2 %v7658_v16  ;;  %v7660_v18 = vld [vmem:[%s10516_s4 + $0x58] sm:$0xff] }
 0x17a   : > { %1602 = vst.msk [vmem:[#allocation4 + $0x18] sm:$0xf] %vm661_vm2, %v1598_v20  ;;  %v1603_v32 = vld [vmem:[#allocation4] ss:$2 sm:$0xff]  ;;  %v1605_v1 = vld [vmem:[#allocation4 + $0x1] ss:$2 sm:$0xff]  ;;  %v9234_v46 = vpack.c.bf16 %v2927_v41, %v2926_v31  ;;  %v1795_v35 = vmul.f32 %v8961_v60, %v8994_v54  ;;  %v1916_v23 = vmul.f32 %v8961_v60, %v9074_v45  ;;  %v1912_v47 = vmul.f32 %v8961_v60, %v8925_v49 }
 0x17b   : > { %1601 = vst.msk [vmem:[#allocation4 + $0x10] sm:$0xff] %vm482_vm0, %v1597_v51  ;;  %v1607_v0 = vmax.f32 %v1603_v32, %v1605_v1  ;;  %v1692_v56 = vmax.f32 %v1685_v26, 0.0  ;;  %v1818_v39 = vrot.slane %v1810_v53, 4  ;;  %v1807_v51 = vmax.f32 %v1800_v19, 0.0  ;;  %3429 = vmatpush.bf16.msrb.mxu3 %v7660_v18  ;;  %v3080_v16 = vld [vmem:[#allocation2 + $0x5a] sm:$0xff] }
 0x17c   : > { %1716 = vst.msk [vmem:[#allocation4] sm:$0xff] %vm482_vm0, %v1712_v24  ;;  %v1822_v24 = vsel %vm642_vm1, %v1819_v10, %v1821_v48  ;;  %v1808_v11 = vmax.f32 %v1801_v43, 0.0  ;;  %v1802_v32 = vadd.f32 %v8973_v33, %v1795_v35  ;;  %v1823_v42 = vrot.slane %v1813_v57, 4 }
 0x17d   : > { %1717 = vst.msk [vmem:[#allocation4 + $0x8] sm:$0xff] %vm482_vm0, %v1713_v15  ;;  %v1714_v44 = vmax.f32 %v1692_v56, %v1707_v5  ;;  %v1820_v27 = vsel %vm642_vm1, %v1818_v39, %v1819_v10  ;;  %v1929_v8 = vmax.f32 %v1922_v2, 0.0  ;;  %v7654_v5 = vld [vmem:[%s10516_s4 + $0x28] sm:$0xff] }
 0x17e   : > { %v2247_v29 = vpop.f32.mrf.mxu2  ;;  %1609 = vst.msk [vmem:[#allocation2 + $0x91] sm:$0xff] %vm482_vm0, %v1607_v0  ;;  %v1829_v1 = vmax.f32 %v1807_v51, %v1820_v27  ;;  %v1830_v61 = vmax.f32 %v1808_v11, %v1822_v24  ;;  %v1824_v38 = vsel %vm642_vm1, %v1821_v48, %v1823_v42  ;;  %v1809_v55 = vmax.f32 %v1802_v32, 0.0 }
 0x17f   : > { %v9220_v7 = vadd.f32 %v2284_v50, %v2247_v29  ;;  %v9222_v63 = vpop.f32.mrf.mxu0  ;;  %v1911_v50 = vmul.f32 %v8961_v60, %v8872_v30  ;;  %v7656_v29 = vld [vmem:[%s10516_s4 + $0x38] sm:$0xff]  ;;  %v1938_v41 = vrot.slane %v1929_v8, 4  ;;  %v1919_v48 = vadd.f32 %v8973_v33, %v1912_v47 }
 0x180   : > { %v9228_v59 = vpop.f32.mrf.mxu1  ;;  %v1831_v49 = vmax.f32 %v1809_v55, %v1824_v38  ;;  %3327 = vmatpush.bf16.msra.mxu1 %v7656_v29  ;;  %v1832_v31 = vmax.f32 %v1810_v53, %v1823_v42  ;;  %v7653_v42 = vld [vmem:[%s10516_s4 + $0x20] sm:$0xff]  ;;  %v3079_v38 = vld [vmem:[#allocation2 + $0x52] sm:$0xff]  ;;  %v2027_v29 = vmul.f32 %v8961_v60, %v9222_v63 }
 0x181   : > { %v1918_v30 = vadd.f32 %v8973_v33, %v1911_v50  ;;  %v1939_v57 = vsel %vm642_vm1, %v9038_v37, %v1938_v41  ;;  %v1926_v51 = vmax.f32 %v1919_v48, 0.0  ;;  %v9341_v18 = vpack.c.bf16 %v3080_v16, %v3079_v38 }
 0x182   : > { %6916 = vmatmul.msk.bf16.gmra.mxu3 %vm482_vm0, %v9230_v34  ;;  %6885 = vmatmul.msk.bf16.vlgmr.msrb.gmra.mxu0 %vm482_vm0, %v8959_v9  ;;  %v1604_v36 = vld [vmem:[#allocation4 + $0x10] ss:$2 sm:$0x3f]  ;;  %v1606_v20 = vld [vmem:[#allocation4 + $0x11] ss:$2 sm:$0x3f]  ;;  %v1715_v9 = vmax.f32 %v1693_v14, %v1706_v4  ;;  %v1923_v14 = vadd.f32 %v8973_v33, %v1916_v23 }
 0x183   : > { %6896 = vmatmul.msk.bf16.gmra.mxu1 %vm482_vm0, %v9224_v3  ;;  %6906 = vmatmul.msk.bf16.gmra.mxu2 %vm482_vm0, %v9234_v46  ;;  %v1608_v54 = vmax.f32 %v1604_v36, %v1606_v20  ;;  %1718 = vst.msk [vmem:[#allocation4 + $0x10] sm:$0xff] %vm482_vm0, %v1714_v44  ;;  %v1925_v43 = vmax.f32 %v1918_v30, 0.0  ;;  %v7659_v23 = vld [vmem:[%s10516_s4 + $0x50] sm:$0xff] }
 0x184   : > { %v1720_v25 = vld [vmem:[#allocation4] ss:$2 sm:$0xff]  ;;  %v1722_v26 = vld [vmem:[#allocation4 + $0x1] ss:$2 sm:$0xff]  ;;  %1719 = vst.msk [vmem:[#allocation4 + $0x18] sm:$0xf] %vm661_vm2, %v1715_v9  ;;  %3276 = vmatpush.bf16.msrb.mxu0 %v7654_v5  ;;  %3430 = vmatpush.bf16.msrb.mxu3 %v7659_v23 }
 0x185   : > { %v2287_v15 = vpop.f32.mrf.mxu3  ;;  %1610 = vst.msk [vmem:[#allocation2 + $0x99] sm:$0x3f] %vm673_vm3, %v1608_v54  ;;  %v1724_v45 = vmax.f32 %v1720_v25, %v1722_v26  ;;  %v1930_v56 = vmax.f32 %v1923_v14, 0.0  ;;  %v1947_v54 = vmax.f32 %v1925_v43, %v1939_v57  ;;  %v7655_v9 = vld [vmem:[%s10516_s4 + $0x30] sm:$0xff]  ;;  %v3161_v5 = vld [vmem:[#allocation2 + $0x59] sm:$0xff]  ;;  %v2034_v57 = vadd.f32 %v8973_v33, %v2027_v29 }
 0x186   : > { %v2250_v22 = vpop.f32.mrf.mxu2  ;;  %1833 = vst.msk [vmem:[#allocation4] sm:$0xff] %vm482_vm0, %v1829_v1  ;;  %3328 = vmatpush.bf16.msra.mxu1 %v7655_v9 }
 0x187   : > { %v9260_v4 = vadd.f32 %v2287_v15, %v2250_v22  ;;  %v9262_v17 = vpop.f32.mrf.mxu0  ;;  %1726 = vst.msk [vmem:[#allocation2 + $0xa1] sm:$0xff] %vm482_vm0, %v1724_v45  ;;  %v1940_v35 = vrot.slane %v1930_v56, 4 }
 0x188   : > { %v9265_v0 = vpop.f32.mrf.mxu1  ;;  %1834 = vst.msk [vmem:[#allocation4 + $0x8] sm:$0xff] %vm482_vm0, %v1830_v61  ;;  %3277 = vmatpush.bf16.msrb.mxu0 %v7653_v42 }
 0x189   : > { %v1941_v24 = vsel %vm642_vm1, %v1938_v41, %v1940_v35  ;;  %v1949_v50 = vmax.f32 %v1927_v52, %v1940_v35 }
 0x18a   : > { %v1948_v26 = vmax.f32 %v1926_v51, %v1941_v24  ;;  %v2041_v51 = vmax.f32 %v2034_v57, 0.0  ;;  %v2147_v24 = vmul.f32 %v8961_v60, %v9265_v0  ;;  %v7670_v0 = vld [vmem:[%s10516_s4 + $0x18] sm:$0xff] }
 0x18b   : > { %v1721_v19 = vld [vmem:[#allocation4 + $0x10] ss:$2 sm:$0x3f]  ;;  %v1723_v44 = vld [vmem:[#allocation4 + $0x11] ss:$2 sm:$0x3f] }
 0x18c   : > { %v1725_v20 = vmax.f32 %v1721_v19, %v1723_v44  ;;  %1835 = vst.msk [vmem:[#allocation4 + $0x10] sm:$0xff] %vm482_vm0, %v1831_v49 }
 0x18d   : > { %v2289_v10 = vpop.f32.mrf.mxu3  ;;  %1836 = vst.msk [vmem:[#allocation4 + $0x18] sm:$0xf] %vm661_vm2, %v1832_v31 }
 0x18e   : > { %v2252_v39 = vpop.f32.mrf.mxu2  ;;  %1727 = vst.msk [vmem:[#allocation2 + $0xa9] sm:$0x3f] %vm673_vm3, %v1725_v20 }
 0x18f   : > { %v9290_v2 = vadd.f32 %v2289_v10, %v2252_v39  ;;  %v9292_v36 = vpop.f32.mrf.mxu0  ;;  %v1837_v28 = vld [vmem:[#allocation4] ss:$2 sm:$0xff]  ;;  %v1839_v53 = vld [vmem:[#allocation4 + $0x1] ss:$2 sm:$0xff]  ;;  %v3160_v10 = vld [vmem:[#allocation2 + $0x51] sm:$0xff] }
 0x190   : > { %v9295_v27 = vpop.f32.mrf.mxu1  ;;  %v1841_v37 = vmax.f32 %v1837_v28, %v1839_v53  ;;  %1950 = vst.msk [vmem:[#allocation4] sm:$0xff] %vm482_vm0, %v9051_v58  ;;  %v7657_v58 = vld [vmem:[%s10516_s4 + $0x40] sm:$0xff]  ;;  %v9343_v19 = vpack.c.bf16 %v3161_v5, %v3160_v10  ;;  %v7664_v28 = vld [vmem:[%s10516_s4 + $0x78] sm:$0xff]  ;;  %v2028_v53 = vmul.f32 %v8961_v60, %v9262_v17  ;;  %v2144_v5 = vmul.f32 %v8961_v60, %v9145_v6  ;;  %v7663_v6 = vld [vmem:[%s10516_s4 + $0x70] sm:$0xff] }
 0x191   : > { %1951 = vst.msk [vmem:[#allocation4 + $0x8] sm:$0xff] %vm482_vm0, %v1947_v54  ;;  %3379 = vmatpush.bf16.msrb.mxu2 %v7657_v58  ;;  %v2148_v9 = vmul.f32 %v8961_v60, %v9295_v27  ;;  %v9389_v27 = vadd.f32 %v8973_v33, %v2147_v24 }
 0x192   : > { %6955 = vmatmul.msk.bf16.vlgmr.msra.gmra.mxu3 %vm482_vm0, %v9148_v40  ;;  %6886 = vmatmul.msk.bf16.gmra.mxu0 %vm482_vm0, %v9148_v40  ;;  %1843 = vst.msk [vmem:[#allocation2 + $0xb1] sm:$0xff] %vm482_vm0, %v1841_v37 }
 0x193   : > { %6935 = vmatmul.msk.bf16.vlgmr.msrb.gmra.mxu1 %vm482_vm0, %v9234_v46  ;;  %6945 = vmatmul.msk.bf16.vlgmr.msra.gmra.mxu2 %vm482_vm0, %v9224_v3 }
 0x194   : > { %v1838_v45 = vld [vmem:[#allocation4 + $0x10] ss:$2 sm:$0x3f]  ;;  %v1840_v1 = vld [vmem:[#allocation4 + $0x11] ss:$2 sm:$0x3f]  ;;  %3531 = vmatpush.bf16.msrb.mxu1 %v7664_v28  ;;  %3663 = vmatpush.bf16.msra.mxu3 %v7670_v0 }
 0x195   : > { %v2380_v40 = vpop.f32.mrf.mxu3  ;;  %1952 = vst.msk [vmem:[#allocation4 + $0x10] sm:$0xff] %vm482_vm0, %v1948_v26  ;;  %v1842_v61 = vmax.f32 %v1838_v45, %v1840_v1 }
 0x196   : > { %v2329_v25 = vpop.f32.mrf.mxu2  ;;  %1953 = vst.msk [vmem:[#allocation4 + $0x18] sm:$0xf] %vm661_vm2, %v1949_v50  ;;  %v2155_v50 = vadd.f32 %v8973_v33, %v2148_v9 }
 0x197   : > { %v2339_v11 = vadd.f32 %v2329_v25, %v9188_v12  ;;  %v2015_v15 = vpop.f32.mrf.mxu0  ;;  %1844 = vst.msk [vmem:[#allocation2 + $0xb9] sm:$0x3f] %vm673_vm3, %v1842_v61 }
 0x198   : > { %v2137_v32 = vpop.f32.mrf.mxu1  ;;  %v2030_v8 = vmul.f32 %v8961_v60, %v2015_v15  ;;  %v1954_v12 = vld [vmem:[#allocation4] ss:$2 sm:$0xff]  ;;  %v1956_v14 = vld [vmem:[#allocation4 + $0x1] ss:$2 sm:$0xff]  ;;  %v2035_v15 = vadd.f32 %v8973_v33, %v2028_v53  ;;  %3532 = vmatpush.bf16.msrb.mxu1 %v7663_v6 }
 0x199   : > { %v9327_v22 = vadd.f32 %v2380_v40, %v2339_v11  ;;  %v1958_v21 = vmax.f32 %v1954_v12, %v1956_v14  ;;  %v2149_v26 = vmul.f32 %v8961_v60, %v2137_v32  ;;  %v7661_v53 = vld [vmem:[%s10516_s4 + $0x60] sm:$0xff] }
 0x19a   : > { %v9334_v30 = vadd.f32 %v8973_v33, %v2030_v8  ;;  %v7669_v8 = vld [vmem:[%s10516_s4 + $0x10] sm:$0xff]  ;;  %v2042_v61 = vmax.f32 %v2035_v15, 0.0 }
 0x19b   : > { %1960 = vst.msk [vmem:[#allocation2 + $0xc1] sm:$0xff] %vm482_vm0, %v1958_v21  ;;  %v2156_v32 = vadd.f32 %v8973_v33, %v2149_v26  ;;  %v2161_v21 = vmax.f32 %v9389_v27, 0.0  ;;  %3664 = vmatpush.bf16.msra.mxu3 %v7669_v8  ;;  %v3398_v8 = vld [vmem:[#allocation2 + $0x6a] sm:$0xff]  ;;  %v7674_v27 = vld [vmem:[%s10516_s4 + $0x38] sm:$0xff] }
 0x19c   : > { %v2044_v39 = vmax.f32 %v9334_v30, 0.0 }
 0x19d   : > { %v2382_v52 = vpop.f32.mrf.mxu3  ;;  %v1955_v48 = vld [vmem:[#allocation4 + $0x10] ss:$2 sm:$0x3f]  ;;  %v1957_v31 = vld [vmem:[#allocation4 + $0x11] ss:$2 sm:$0x3f] }
 0x19e   : > { %v2331_v47 = vpop.f32.mrf.mxu2  ;;  %v1959_v63 = vmax.f32 %v1955_v48, %v1957_v31  ;;  %v2052_v23 = vrot.slane %v2044_v39, 4  ;;  %v2163_v10 = vmax.f32 %v2156_v32, 0.0 }
 0x19f   : > { %v2340_v55 = vadd.f32 %v2331_v47, %v9220_v7  ;;  %v2018_v41 = vpop.f32.mrf.mxu0  ;;  %v7666_v7 = vld [vmem:[%s10516_s4 + $0x88] sm:$0xff]  ;;  %v2162_v47 = vmax.f32 %v2155_v50, 0.0 }
 0x1a0   : > { %v2031_v56 = vmul.f32 %v8961_v60, %v2018_v41  ;;  %v2140_v49 = vpop.f32.mrf.mxu1  ;;  %3582 = vmatpush.bf16.msra.mxu2 %v7666_v7  ;;  %1961 = vst.msk [vmem:[#allocation2 + $0xc9] sm:$0x3f] %vm673_vm3, %v1959_v63  ;;  %v2151_v63 = vadd.f32 %v8973_v33, %v2144_v5 }
 0x1a1   : > { %v9345_v43 = vadd.f32 %v2382_v52, %v2340_v55  ;;  %v2029_v52 = vmul.f32 %v8961_v60, %v9292_v36  ;;  %v2150_v38 = vmul.f32 %v8961_v60, %v2140_v49  ;;  %v7665_v49 = vld [vmem:[%s10516_s4 + $0x80] sm:$0xff] }
 0x1a2   : > { %v2038_v44 = vadd.f32 %v8973_v33, %v2031_v56  ;;  %6956 = vmatmul.msk.bf16.gmra.mxu3 %vm482_vm0, %v9230_v34  ;;  %6925 = vmatmul.msk.bf16.vlgmr.msra.gmra.mxu0 %vm482_vm0, %v9224_v3  ;;  %v7662_v3 = vld [vmem:[%s10516_s4 + $0x68] sm:$0xff]  ;;  %v2145_v56 = vmul.f32 %v8961_v60, %v9190_v62  ;;  %v2169_v62 = vrot.slane %v2161_v21, 4  ;;  %v2158_v9 = vmax.f32 %v2151_v63, 0.0 }
 0x1a3   : > { %6936 = vmatmul.msk.bf16.gmra.mxu1 %vm482_vm0, %v9341_v18  ;;  %6946 = vmatmul.msk.bf16.gmra.mxu2 %vm482_vm0, %v9343_v19  ;;  %v2036_v31 = vadd.f32 %v8973_v33, %v2029_v52  ;;  %v2157_v7 = vadd.f32 %v8973_v33, %v2150_v38  ;;  %v3347_v52 = vld [vmem:[#allocation2 + $0x69] sm:$0xff] }
 0x1a4   : > { %v2045_v35 = vmax.f32 %v2038_v44, 0.0  ;;  %3480 = vmatpush.bf16.msra.mxu0 %v7662_v3  ;;  %v2170_v44 = vrot.slane %v2162_v47, 4  ;;  %3583 = vmatpush.bf16.msra.mxu2 %v7665_v49  ;;  %v2172_v3 = vrot.slane %v2163_v10, 4  ;;  %v7672_v63 = vld [vmem:[%s10516_s4 + $0x28] sm:$0xff] }
 0x1a5   : > { %v9362_v20 = vpop.f32.mrf.mxu3 }
 0x1a6   : > { %v2053_v37 = vrot.slane %v2045_v35, 4  ;;  %v9374_v54 = vpop.f32.mrf.mxu2  ;;  %v2152_v35 = vadd.f32 %v8973_v33, %v2145_v56 }
 0x1a7   : > { %v2020_v58 = vpop.f32.mrf.mxu0 }
 0x1a8   : > { %v2054_v40 = vsel %vm642_vm1, %v2052_v23, %v2053_v37  ;;  %v2032_v17 = vmul.f32 %v8961_v60, %v2020_v58  ;;  %v2142_v25 = vpop.f32.mrf.mxu1  ;;  %3481 = vmatpush.bf16.msra.mxu0 %v7661_v53  ;;  %v2146_v58 = vmul.f32 %v8961_v60, %v9228_v59  ;;  %v2159_v26 = vmax.f32 %v2152_v35, 0.0 }
 0x1a9   : > { %v2063_v11 = vmax.f32 %v2041_v51, %v2054_v40  ;;  %v2164_v51 = vmax.f32 %v2157_v7, 0.0 }
 0x1aa   : > { %v2039_v45 = vadd.f32 %v8973_v33, %v2032_v17  ;;  %v2153_v59 = vadd.f32 %v8973_v33, %v2146_v58 }
 0x1ab   : > { %2067 = vst.msk [vmem:[#allocation4] sm:$0xff] %vm482_vm0, %v2063_v11  ;;  %v2173_v11 = vsel %vm642_vm1, %v2170_v44, %v2172_v3 }
 0x1ac   : > { %v2046_v1 = vmax.f32 %v2039_v45, 0.0  ;;  %v2181_v32 = vmax.f32 %v2159_v26, %v2173_v11 }
 0x1ad   : > { %v9394_v42 = vpop.f32.mrf.mxu3 }
 0x1ae   : > { %v2055_v12 = vrot.slane %v2046_v1, 4  ;;  %v9399_v14 = vpop.f32.mrf.mxu2  ;;  %v2174_v1 = vrot.slane %v2164_v51, 4 }
 0x1af   : > { %v2023_v16 = vpop.f32.mrf.mxu0 }
 0x1b0   : > { %v2056_v29 = vsel %vm642_vm1, %v2053_v37, %v2055_v12  ;;  %v2033_v55 = vmul.f32 %v8961_v60, %v2023_v16  ;;  %v9409_v41 = vpop.f32.mrf.mxu1  ;;  %v2171_v37 = vsel %vm642_vm1, %v2169_v62, %v2170_v44  ;;  %v2175_v47 = vsel %vm642_vm1, %v2172_v3, %v2174_v1 }
 0x1b1   : > { %v2064_v48 = vmax.f32 %v2042_v61, %v2056_v29  ;;  %v2180_v45 = vmax.f32 %v2158_v9, %v2171_v37  ;;  %v3295_v29 = vld [vmem:[#allocation2 + $0x60] sm:$0xff]  ;;  %v2183_v6 = vmax.f32 %v2161_v21, %v2174_v1  ;;  %v7668_v21 = vld [vmem:[%s10516_s4 + $0x8] sm:$0xff] }
 0x1b2   : > { %v2040_v36 = vadd.f32 %v8973_v33, %v2033_v55  ;;  %6995 = vmatmul.msk.bf16.vlgmr.msrb.gmra.mxu3 %vm482_vm0, %v9341_v18  ;;  %6926 = vmatmul.msk.bf16.gmra.mxu0 %vm482_vm0, %v9343_v19  ;;  %v2160_v33 = vmax.f32 %v2153_v59, 0.0  ;;  %v3346_v55 = vld [vmem:[#allocation2 + $0x61] sm:$0xff] }
 0x1b3   : > { %6975 = vmatmul.msk.bf16.vlgmr.msra.gmra.mxu1 %vm482_vm0, %v9230_v34  ;;  %6985 = vmatmul.msk.bf16.vlgmr.msrb.gmra.mxu2 %vm482_vm0, %v9343_v19  ;;  %2068 = vst.msk [vmem:[#allocation4 + $0x8] sm:$0xff] %vm482_vm0, %v2064_v48  ;;  %v2043_v19 = vmax.f32 %v2036_v31, 0.0  ;;  %v3349_v10 = vpack.c.bf16 %v3347_v52, %v3346_v55  ;;  %v7667_v1 = vld [vmem:[%s10516_s4] sm:$0xff] }
 0x1b4   : > { %v2047_v57 = vmax.f32 %v2040_v36, 0.0  ;;  %v2182_v48 = vmax.f32 %v2160_v33, %v2175_v47  ;;  %3798 = vmatpush.bf16.msrb.mxu2 %v7674_v27  ;;  %3747 = vmatpush.bf16.msra.mxu1 %v7672_v63  ;;  %v3551_v52 = vld [vmem:[#allocation2 + $0x7a] sm:$0xff] }
 0x1b5   : > { %v9435_v28 = vpop.f32.mrf.mxu3 }
 0x1b6   : > { %v2057_v34 = vrot.slane %v2047_v57, 4  ;;  %v9440_v23 = vpop.f32.mrf.mxu2 }
 0x1b7   : > { %v2025_v24 = vpop.f32.mrf.mxu0 }
 0x1b8   : > { %v2058_v40 = vsel %vm642_vm1, %v2055_v12, %v2057_v34  ;;  %v2066_v17 = vmax.f32 %v2044_v39, %v2057_v34  ;;  %v9448_v25 = vpop.f32.mrf.mxu1  ;;  %v3397_v39 = vld [vmem:[#allocation2 + $0x62] sm:$0xff] }
 0x1b9   : > { %v2065_v15 = vmax.f32 %v2043_v19, %v2058_v40  ;;  %v3296_v12 = vld [vmem:[#allocation2 + $0x68] sm:$0xff]  ;;  %v9466_v5 = vpack.c.bf16 %v3398_v8, %v3397_v39  ;;  %v7675_v40 = vld [vmem:[%s10516_s4 + $0x40] sm:$0xff] }
 0x1ba   : > { %2070 = vst.msk [vmem:[#allocation4 + $0x18] sm:$0xf] %vm661_vm2, %v2066_v17  ;;  %v2071_v0 = vld [vmem:[#allocation4] ss:$2 sm:$0xff]  ;;  %v2073_v50 = vld [vmem:[#allocation4 + $0x1] ss:$2 sm:$0xff]  ;;  %v9468_v56 = vpack.c.bf16 %v3296_v12, %v3295_v29 }
 0x1bb   : > { %2069 = vst.msk [vmem:[#allocation4 + $0x10] sm:$0xff] %vm482_vm0, %v2065_v15  ;;  %v2075_v60 = vmax.f32 %v2071_v0, %v2073_v50  ;;  %v7676_v24 = vld [vmem:[%s10516_s4 + $0x48] sm:$0xff]  ;;  %v7671_v15 = vld [vmem:[%s10516_s4 + $0x20] sm:$0xff]  ;;  %v3550_v12 = vld [vmem:[#allocation2 + $0x72] sm:$0xff] }
 0x1bc   : > { %2184 = vst.msk [vmem:[#allocation4] sm:$0xff] %vm482_vm0, %v2180_v45  ;;  %3849 = vmatpush.bf16.msrb.mxu3 %v7676_v24  ;;  %v7673_v45 = vld [vmem:[%s10516_s4 + $0x30] sm:$0xff]  ;;  %3748 = vmatpush.bf16.msra.mxu1 %v7671_v15  ;;  %v3632_v39 = vld [vmem:[#allocation2 + $0x79] sm:$0xff] }
 0x1bd   : > { %v9455_v30 = vpop.f32.mrf.mxu3  ;;  %2077 = vst.msk [vmem:[#allocation2 + $0xd1] sm:$0xff] %vm482_vm0, %v2075_v60  ;;  %3799 = vmatpush.bf16.msrb.mxu2 %v7673_v45  ;;  %v2341_v60 = vadd.f32 %v9374_v54, %v9260_v4  ;;  %v3631_v29 = vld [vmem:[#allocation2 + $0x71] sm:$0xff]  ;;  %v9558_v4 = vpack.c.bf16 %v3551_v52, %v3550_v12 }
 0x1be   : > { %v9458_v61 = vpop.f32.mrf.mxu2  ;;  %2185 = vst.msk [vmem:[#allocation4 + $0x8] sm:$0xff] %vm482_vm0, %v2181_v32 }
 0x1bf   : > { %v9462_v38 = vpop.f32.mrf.mxu0  ;;  %v2392_v55 = vadd.f32 %v9362_v20, %v2341_v60 }
 0x1c0   : > { %v9464_v16 = vpop.f32.mrf.mxu1  ;;  %3850 = vmatpush.bf16.msrb.mxu3 %v7675_v40  ;;  %v2441_v59 = vadd.f32 %v9462_v38, %v9327_v22  ;;  %v2342_v38 = vadd.f32 %v9399_v14, %v9290_v2 }
 0x1c2   : > { %6996 = vmatmul.msk.bf16.gmra.mxu3 %vm482_vm0, %v9466_v5  ;;  %6965 = vmatmul.msk.bf16.vlgmr.msrb.gmra.mxu0 %vm482_vm0, %v9234_v46  ;;  %v2072_v36 = vld [vmem:[#allocation4 + $0x10] ss:$2 sm:$0x3f]  ;;  %v2074_v49 = vld [vmem:[#allocation4 + $0x11] ss:$2 sm:$0x3f]  ;;  %v2492_v13 = vadd.f32 %v9409_v41, %v2441_v59 }
 0x1c3   : > { %6976 = vmatmul.msk.bf16.gmra.mxu1 %vm482_vm0, %v9468_v56  ;;  %6986 = vmatmul.msk.bf16.gmra.mxu2 %vm482_vm0, %v3349_v10  ;;  %v2076_v62 = vmax.f32 %v2072_v36, %v2074_v49  ;;  %2186 = vst.msk [vmem:[#allocation4 + $0x10] sm:$0xff] %vm482_vm0, %v2182_v48  ;;  %v3634_v48 = vpack.c.bf16 %v3632_v39, %v3631_v29 }
 0x1c4   : > { %2187 = vst.msk [vmem:[#allocation4 + $0x18] sm:$0xf] %vm661_vm2, %v2183_v6  ;;  %3700 = vmatpush.bf16.msrb.mxu0 %v7668_v21  ;;  %v2543_v41 = vadd.f32 %v9440_v23, %v2492_v13  ;;  %v7678_v23 = vld [vmem:[%s10516_s4 + $0x58] sm:$0xff]  ;;  %v9592_v21 = vld [vmem:[#allocation11] ss:$0 sm:$0xff] }
 0x1c5   : > { %v9480_v31 = vpop.f32.mrf.mxu3  ;;  %v2188_v44 = vld [vmem:[#allocation4] ss:$2 sm:$0xff]  ;;  %v2190_v7 = vld [vmem:[#allocation4 + $0x1] ss:$2 sm:$0xff]  ;;  %2078 = vst.msk [vmem:[#allocation2 + $0xd9] sm:$0x3f] %vm673_vm3, %v2076_v62  ;;  %v2393_v62 = vadd.f32 %v9394_v42, %v2342_v38 }
 0x1c6   : > { %v9483_v46 = vpop.f32.mrf.mxu2  ;;  %v2192_v57 = vmax.f32 %v2188_v44, %v2190_v7  ;;  %v2594_v14 = vadd.f32 %v9435_v28, %v2543_v41  ;;  %v7680_v42 = vld [vmem:[%s10516_s4 + $0x68] sm:$0xff] }
 0x1c7   : > { %v9495_v35 = vpop.f32.mrf.mxu0 }
 0x1c8   : > { %v9497_v3 = vpop.f32.mrf.mxu1  ;;  %2194 = vst.msk [vmem:[#allocation2 + $0xe1] sm:$0xff] %vm482_vm0, %v2192_v57  ;;  %3701 = vmatpush.bf16.msrb.mxu0 %v7667_v1  ;;  %v2442_v20 = vadd.f32 %v9495_v35, %v9345_v43  ;;  %v7682_v43 = vld [vmem:[%s10516_s4 + $0x78] sm:$0xff]  ;;  %v7677_v1 = vld [vmem:[%s10516_s4 + $0x50] sm:$0xff] }
 0x1ca   : > { %v2493_v2 = vadd.f32 %v9448_v25, %v2442_v20  ;;  %v7684_v25 = vld [vmem:[%s10516_s4 + $0x88] sm:$0xff] }
 0x1cb   : > { %v2189_v53 = vld [vmem:[#allocation4 + $0x10] ss:$2 sm:$0x3f]  ;;  %v2191_v34 = vld [vmem:[#allocation4 + $0x11] ss:$2 sm:$0x3f] }
 0x1cc   : > { %v2193_v37 = vmax.f32 %v2189_v53, %v2191_v34  ;;  %v2544_v63 = vadd.f32 %v9458_v61, %v2493_v2  ;;  %v3449_v53 = vld [vmem:[#allocation2 + $0x78] sm:$0xff]  ;;  %v7683_v34 = vld [vmem:[%s10516_s4 + $0x80] sm:$0xff]  ;;  %v3767_v20 = vld [vmem:[#allocation2 + $0x88] sm:$0xff] }
 0x1cd   : > { %v9500_v19 = vpop.f32.mrf.mxu3 }
 0x1ce   : > { %v9502_v51 = vpop.f32.mrf.mxu2  ;;  %2195 = vst.msk [vmem:[#allocation2 + $0xe9] sm:$0x3f] %vm673_vm3, %v2193_v37  ;;  %v9606_v37 = vld [vmem:[#allocation13] ss:$0 sm:$0xff]  ;;  %v2595_v40 = vadd.f32 %v9455_v30, %v2544_v63 }
 0x1cf   : > { %v2436_v9 = vpop.f32.mrf.mxu0  ;;  %v7679_v30 = vld [vmem:[%s10516_s4 + $0x60] sm:$0xff] }
 0x1d0   : > { %v2724_v58 = vpop.f32.mrf.mxu1  ;;  %v2443_v22 = vadd.f32 %v2436_v9, %v2392_v55 }
 0x1d2   : > { %7035 = vmatmul.msk.bf16.vlgmr.msra.gmra.mxu3 %vm482_vm0, %v3349_v10  ;;  %6966 = vmatmul.msk.bf16.gmra.mxu0 %vm482_vm0, %v9341_v18  ;;  %v2494_v6 = vadd.f32 %v9464_v16, %v2443_v22 }
 0x1d3   : > { %7015 = vmatmul.msk.bf16.vlgmr.msrb.gmra.mxu1 %vm482_vm0, %v3349_v10  ;;  %7025 = vmatmul.msk.bf16.vlgmr.msra.gmra.mxu2 %vm482_vm0, %v9466_v5 }
 0x1d4   : > { %v2545_v28 = vadd.f32 %v9483_v46, %v2494_v6  ;;  %4002 = vmatpush.bf16.msra.mxu2 %v7682_v43  ;;  %3951 = vmatpush.bf16.msrb.mxu1 %v7680_v42  ;;  %v3817_v6 = vld [vmem:[#allocation2 + $0x81] sm:$0xff] }
 0x1d5   : > { %v2808_v17 = vpop.f32.mrf.mxu3  ;;  %4053 = vmatpush.bf16.msra.mxu3 %v7684_v25  ;;  %v7686_v25 = vld [vmem:[%s10516_s4 + $0x8] sm:$0xff] }
 0x1d6   : > { %v2761_v18 = vpop.f32.mrf.mxu2  ;;  %v2596_v9 = vadd.f32 %v9480_v31, %v2545_v28  ;;  %v7681_v31 = vld [vmem:[%s10516_s4 + $0x70] sm:$0xff]  ;;  %v7690_v28 = vld [vmem:[%s10516_s4 + $0x28] sm:$0xff] }
 0x1d7   : > { %v2762_v26 = vadd.f32 %v2761_v18, %v2724_v58  ;;  %v2438_v11 = vpop.f32.mrf.mxu0  ;;  %v3448_v58 = vld [vmem:[#allocation2 + $0x70] sm:$0xff] }
 0x1d8   : > { %v2726_v0 = vpop.f32.mrf.mxu1  ;;  %v2444_v27 = vadd.f32 %v2438_v11, %v2393_v62  ;;  %v9614_v18 = vpack.c.bf16 %v3449_v53, %v3448_v58  ;;  %3952 = vmatpush.bf16.msrb.mxu1 %v7679_v30  ;;  %4003 = vmatpush.bf16.msra.mxu2 %v7681_v31  ;;  %v4019_v58 = vld [vmem:[#allocation2 + $0x82] sm:$0xff] }
 0x1d9   : > { %v9543_v50 = vadd.f32 %v2808_v17, %v2762_v26  ;;  %4054 = vmatpush.bf16.msra.mxu3 %v7683_v34 }
 0x1da   : > { %v2495_v57 = vadd.f32 %v9497_v3, %v2444_v27 }
 0x1dc   : > { %v2546_v26 = vadd.f32 %v9502_v51, %v2495_v57 }
 0x1dd   : > { %v2810_v32 = vpop.f32.mrf.mxu3 }
 0x1de   : > { %v2763_v8 = vpop.f32.mrf.mxu2 }
 0x1df   : > { %v2764_v47 = vadd.f32 %v2763_v8, %v2726_v0  ;;  %v2635_v33 = vpop.f32.mrf.mxu0 }
 0x1e0   : > { %v9556_v10 = vpop.f32.mrf.mxu1  ;;  %v2645_v16 = vadd.f32 %v2635_v33, %v2594_v14  ;;  %v3766_v14 = vld [vmem:[#allocation2 + $0x80] sm:$0xff] }
 0x1e1   : > { %v9560_v54 = vadd.f32 %v2810_v32, %v2764_v47  ;;  %v9656_v27 = vpack.c.bf16 %v3767_v20, %v3766_v14  ;;  %v3970_v20 = vld [vmem:[#allocation2 + $0x91] sm:$0xff] }
 0x1e2   : > { %7036 = vmatmul.msk.bf16.gmra.mxu3 %vm482_vm0, %v3634_v48  ;;  %7005 = vmatmul.msk.bf16.vlgmr.msra.gmra.mxu0 %vm482_vm0, %v9468_v56  ;;  %v2652_v46 = vmul.f32 %v9592_v21, %v2645_v16 }
 0x1e3   : > { %7016 = vmatmul.msk.bf16.gmra.mxu1 %vm482_vm0, %v3634_v48  ;;  %7026 = vmatmul.msk.bf16.gmra.mxu2 %vm482_vm0, %v9558_v4 }
 0x1e4   : > { %3900 = vmatpush.bf16.msra.mxu0 %v7678_v23  ;;  %v2659_v11 = vadd.f32 %v9606_v37, %v2652_v46  ;;  %v4020_v46 = vld [vmem:[#allocation2 + $0x8a] sm:$0xff] }
 0x1e5   : > { %v9573_v36 = vpop.f32.mrf.mxu3 }
 0x1e6   : > { %v9576_v49 = vpop.f32.mrf.mxu2  ;;  %v2663_v60 = vmax.f32 %v2659_v11, 0.0  ;;  %v7691_v11 = vld [vmem:[%s10516_s4 + $0x30] sm:$0xff] }
 0x1e7   : > { %v2637_v44 = vpop.f32.mrf.mxu0 }
 0x1e8   : > { %v9581_v7 = vpop.f32.mrf.mxu1  ;;  %v2646_v15 = vadd.f32 %v2637_v44, %v2595_v40  ;;  %3901 = vmatpush.bf16.msra.mxu0 %v7677_v1 }
 0x1ea   : > { %v2653_v59 = vmul.f32 %v9592_v21, %v2646_v15 }
 0x1ec   : > { %v2660_v33 = vadd.f32 %v9606_v37, %v2653_v59  ;;  %v2767_v59 = vadd.f32 %v9576_v49, %v9556_v10  ;;  %v3919_v49 = vld [vmem:[#allocation2 + $0x90] sm:$0xff] }
 0x1ed   : > { %v9600_v35 = vpop.f32.mrf.mxu3 }
 0x1ee   : > { %v9608_v24 = vpop.f32.mrf.mxu2  ;;  %v2664_v22 = vmax.f32 %v2660_v33, 0.0 }
 0x1ef   : > { %v2640_v61 = vpop.f32.mrf.mxu0 }
 0x1f0   : > { %v2647_v3 = vadd.f32 %v2640_v61, %v2596_v9  ;;  %v9612_v17 = vpop.f32.mrf.mxu1 }
 0x1f2   : > { %v2654_v45 = vmul.f32 %v9592_v21, %v2647_v3  ;;  %7075 = vmatmul.msk.bf16.vlgmr.msrb.gmra.mxu3 %vm482_vm0, %v3634_v48  ;;  %7006 = vmatmul.msk.bf16.gmra.mxu0 %vm482_vm0, %v9614_v18  ;;  %v3818_v48 = vld [vmem:[#allocation2 + $0x89] sm:$0xff]  ;;  %v9687_v3 = vpack.c.bf16 %v4020_v46, %v4019_v58 }
 0x1f3   : > { %7055 = vmatmul.msk.bf16.vlgmr.msra.gmra.mxu1 %vm482_vm0, %v9466_v5  ;;  %7065 = vmatmul.msk.bf16.vlgmr.msrb.gmra.mxu2 %vm482_vm0, %v9614_v18  ;;  %v2597_v5 = vadd.f32 %v9500_v19, %v2546_v26  ;;  %v9654_v2 = vpack.c.bf16 %v3818_v48, %v3817_v6  ;;  %v7692_v26 = vld [vmem:[%s10516_s4 + $0x38] sm:$0xff] }
 0x1f4   : > { %v2661_v51 = vadd.f32 %v9606_v37, %v2654_v45  ;;  %4218 = vmatpush.bf16.msrb.mxu2 %v7690_v28  ;;  %4171 = vmatpush.bf16.msra.mxu1 %v7686_v25 }
 0x1f5   : > { %v9633_v0 = vpop.f32.mrf.mxu3  ;;  %4269 = vmatpush.bf16.msrb.mxu3 %v7692_v26 }
 0x1f6   : > { %v2665_v32 = vmax.f32 %v2661_v51, 0.0  ;;  %v9639_v39 = vpop.f32.mrf.mxu2  ;;  %v7689_v51 = vld [vmem:[%s10516_s4 + $0x20] sm:$0xff] }
 0x1f7   : > { %v2642_v8 = vpop.f32.mrf.mxu0 }
 0x1f8   : > { %v2667_v12 = vmax.f32 %v2663_v60, %v2665_v32  ;;  %v2648_v52 = vadd.f32 %v2642_v8, %v2597_v5  ;;  %v9642_v47 = vpop.f32.mrf.mxu1  ;;  %4219 = vmatpush.bf16.msrb.mxu2 %v7689_v51  ;;  %v7687_v32 = vld [vmem:[%s10516_s4 + $0x10] sm:$0xff]  ;;  %v7697_v51 = vld [vmem:[%s10516_s4 + $0x60] sm:$0xff] }
 0x1f9   : > { %4270 = vmatpush.bf16.msrb.mxu3 %v7691_v11  ;;  %v4021_v8 = vld [vmem:[#allocation2 + $0x92] sm:$0xff] }
 0x1fa   : > { %2669 = vst.msk [vmem:[#allocation5] sm:$0xff] %vm516_vm4, %v2667_v12  ;;  %v2655_v29 = vmul.f32 %v9592_v21, %v2648_v52  ;;  %v4022_v12 = vld [vmem:[#allocation2 + $0x9a] sm:$0xff] }
 0x1fb   : > { %v9723_v10 = vpack.c.bf16 %v4022_v12, %v4021_v8 }
 0x1fc   : > { %v2662_v13 = vadd.f32 %v9606_v37, %v2655_v29  ;;  %v3920_v29 = vld [vmem:[#allocation2 + $0x98] sm:$0xff] }
 0x1fd   : > { %v9648_v55 = vpop.f32.mrf.mxu3 }
 0x1fe   : > { %v2666_v38 = vmax.f32 %v2662_v13, 0.0  ;;  %v9650_v19 = vpop.f32.mrf.mxu2  ;;  %v3971_v13 = vld [vmem:[#allocation2 + $0x99] sm:$0xff] }
 0x1ff   : > { %v2859_v41 = vpop.f32.mrf.mxu0  ;;  %v9727_v6 = vpack.c.bf16 %v3971_v13, %v3970_v20 }
 0x200   : > { %v2668_v62 = vmax.f32 %v2664_v22, %v2666_v38  ;;  %v9652_v44 = vpop.f32.mrf.mxu1  ;;  %v2869_v60 = vadd.f32 %v2859_v41, %v9543_v50  ;;  %v2820_v50 = vadd.f32 %v9573_v36, %v2767_v59  ;;  %v9725_v41 = vpack.c.bf16 %v3920_v29, %v3919_v49 }
 0x201   : > { %v2769_v36 = vadd.f32 %v9608_v24, %v9581_v7  ;;  %v7698_v24 = vld [vmem:[%s10516_s4 + $0x68] sm:$0xff] }
 0x202   : > { %2670 = vst.msk [vmem:[#allocation5 + $0x8] sm:$0xff] %vm516_vm4, %v2668_v62  ;;  %7076 = vmatmul.msk.bf16.gmra.mxu3 %vm482_vm0, %v9654_v2  ;;  %7045 = vmatmul.msk.bf16.vlgmr.msrb.gmra.mxu0 %vm482_vm0, %v9468_v56  ;;  %v7688_v56 = vld [vmem:[%s10516_s4 + $0x18] sm:$0xff]  ;;  %v2920_v52 = vadd.f32 %v9612_v17, %v2869_v60 }
 0x203   : > { %7056 = vmatmul.msk.bf16.gmra.mxu1 %vm482_vm0, %v9558_v4  ;;  %7066 = vmatmul.msk.bf16.gmra.mxu2 %vm482_vm0, %v9656_v27  ;;  %v2821_v25 = vadd.f32 %v9600_v35, %v2769_v36  ;;  %v4237_v36 = vld [vmem:[#allocation2 + $0xa0] sm:$0xff] }
 0x204   : > { %4134 = vmatpush.bf16.msrb.mxu0 %v7688_v56  ;;  %v2971_v14 = vadd.f32 %v9639_v39, %v2920_v52 }
 0x205   : > { %v9667_v43 = vpop.f32.mrf.mxu3 }
 0x206   : > { %v9669_v23 = vpop.f32.mrf.mxu2 }
 0x207   : > { %v2861_v42 = vpop.f32.mrf.mxu0 }
 0x208   : > { %v9671_v16 = vpop.f32.mrf.mxu1  ;;  %4135 = vmatpush.bf16.msrb.mxu0 %v7687_v32  ;;  %v2870_v17 = vadd.f32 %v2861_v42, %v9560_v54  ;;  %v3022_v42 = vadd.f32 %v9633_v0, %v2971_v14  ;;  %v7694_v0 = vld [vmem:[%s10516_s4 + $0x48] sm:$0xff] }
 0x209   : > { %v2671_v63 = vld [vmem:[#allocation5] ss:$2 sm:$0x7f]  ;;  %v2673_v57 = vld [vmem:[#allocation5 + $0x1] ss:$2 sm:$0x7f] }
 0x20a   : > { %v2674_v53 = vmax.f32 %v2671_v63, %v2673_v57  ;;  %v2921_v54 = vadd.f32 %v9642_v47, %v2870_v17  ;;  %v7696_v47 = vld [vmem:[%s10516_s4 + $0x58] sm:$0xff] }
 0x20c   : > { %2676 = vst.msk [vmem:[#allocation3 + $0xa] sm:$0x7f] %vm2675_vm5, %v2674_v53  ;;  %v2972_v46 = vadd.f32 %v9650_v19, %v2921_v54 }
 0x20d   : > { %v9683_v34 = vpop.f32.mrf.mxu3 }
 0x20e   : > { %v9685_v9 = vpop.f32.mrf.mxu2 }
 0x20f   : > { %v2864_v61 = vpop.f32.mrf.mxu0 }
 0x210   : > { %v3114_v40 = vpop.f32.mrf.mxu1  ;;  %v2871_v62 = vadd.f32 %v2864_v61, %v2820_v50  ;;  %v3023_v61 = vadd.f32 %v9648_v55, %v2972_v46 }
 0x212   : > { %7115 = vmatmul.msk.bf16.vlgmr.msra.gmra.mxu3 %vm482_vm0, %v9687_v3  ;;  %7046 = vmatmul.msk.bf16.gmra.mxu0 %vm482_vm0, %v9614_v18  ;;  %v7685_v18 = vld [vmem:[%s10516_s4] sm:$0xff]  ;;  %v2922_v39 = vadd.f32 %v9652_v44, %v2871_v62  ;;  %v7700_v44 = vld [vmem:[%s10516_s4 + $0x78] sm:$0xff] }
 0x213   : > { %7095 = vmatmul.msk.bf16.vlgmr.msrb.gmra.mxu1 %vm482_vm0, %v9656_v27  ;;  %7105 = vmatmul.msk.bf16.vlgmr.msra.gmra.mxu2 %vm482_vm0, %v9654_v2 }
 0x214   : > { %4172 = vmatpush.bf16.msra.mxu1 %v7685_v18  ;;  %v2973_v7 = vadd.f32 %v9669_v23, %v2922_v39  ;;  %4422 = vmatpush.bf16.msra.mxu2 %v7698_v24  ;;  %v7699_v18 = vld [vmem:[%s10516_s4 + $0x70] sm:$0xff] }
 0x215   : > { %v3232_v15 = vpop.f32.mrf.mxu3  ;;  %4473 = vmatpush.bf16.msra.mxu3 %v7700_v44  ;;  %v4440_v44 = vld [vmem:[#allocation2 + $0xa9] sm:$0xff] }
 0x216   : > { %v3195_v45 = vpop.f32.mrf.mxu2  ;;  %v3024_v26 = vadd.f32 %v9667_v43, %v2973_v7  ;;  %v7695_v43 = vld [vmem:[%s10516_s4 + $0x50] sm:$0xff]  ;;  %v7704_v7 = vld [vmem:[%s10516_s4 + $0x8] sm:$0xff] }
 0x217   : > { %v9703_v30 = vadd.f32 %v3232_v15, %v3195_v45  ;;  %v2866_v31 = vpop.f32.mrf.mxu0 }
 0x218   : > { %v9711_v1 = vpop.f32.mrf.mxu1  ;;  %v2872_v53 = vadd.f32 %v2866_v31, %v2821_v25  ;;  %4371 = vmatpush.bf16.msrb.mxu1 %v7696_v47  ;;  %4423 = vmatpush.bf16.msra.mxu2 %v7697_v51 }
 0x219   : > { %4474 = vmatpush.bf16.msra.mxu3 %v7699_v18 }
 0x21a   : > { %v2923_v23 = vadd.f32 %v9671_v16, %v2872_v53 }
 0x21c   : > { %v2974_v55 = vadd.f32 %v9685_v9, %v2923_v23  ;;  %4372 = vmatpush.bf16.msrb.mxu1 %v7695_v43  ;;  %v7705_v43 = vld [vmem:[%s10516_s4 + $0x10] sm:$0xff] }
 0x21d   : > { %v3234_v5 = vpop.f32.mrf.mxu3 }
 0x21e   : > { %v3197_v33 = vpop.f32.mrf.mxu2 }
 0x21f   : > { %v9720_v48 = vadd.f32 %v3234_v5, %v3197_v33  ;;  %v3063_v22 = vpop.f32.mrf.mxu0  ;;  %v7693_v5 = vld [vmem:[%s10516_s4 + $0x40] sm:$0xff] }
 0x220   : > { %v3119_v38 = vpop.f32.mrf.mxu1  ;;  %v3073_v63 = vadd.f32 %v3063_v22, %v3022_v42 }
 0x222   : > { %7116 = vmatmul.msk.bf16.gmra.mxu3 %vm482_vm0, %v9723_v10  ;;  %7085 = vmatmul.msk.bf16.vlgmr.msra.gmra.mxu0 %vm482_vm0, %v9558_v4  ;;  %v3124_v35 = vadd.f32 %v3114_v40, %v3073_v63 }
 0x223   : > { %7096 = vmatmul.msk.bf16.gmra.mxu1 %vm482_vm0, %v9725_v41  ;;  %7106 = vmatmul.msk.bf16.gmra.mxu2 %vm482_vm0, %v9727_v6 }
 0x224   : > { %4320 = vmatpush.bf16.msra.mxu0 %v7694_v0  ;;  %v3128_v40 = vmul.f32 %v9592_v21, %v3124_v35 }
 0x225   : > { %v9741_v28 = vpop.f32.mrf.mxu3 }
 0x226   : > { %v9746_v56 = vpop.f32.mrf.mxu2  ;;  %v3132_v60 = vadd.f32 %v9606_v37, %v3128_v40 }
 0x227   : > { %v3065_v4 = vpop.f32.mrf.mxu0 }
 0x228   : > { %v3121_v57 = vpop.f32.mrf.mxu1  ;;  %v3074_v15 = vadd.f32 %v3065_v4, %v3023_v61  ;;  %4321 = vmatpush.bf16.msra.mxu0 %v7693_v5  ;;  %v4442_v5 = vld [vmem:[#allocation2 + $0xb9] sm:$0xff] }
 0x22a   : > { %v3125_v59 = vadd.f32 %v9711_v1, %v3074_v15  ;;  %v3136_v1 = vmax.f32 %v3132_v60, 0.0  ;;  %v7708_v15 = vld [vmem:[%s10516_s4 + $0x28] sm:$0xff] }
 0x22c   : > { %v3129_v52 = vmul.f32 %v9592_v21, %v3125_v59 }
 0x22d   : > { %v9763_v19 = vpop.f32.mrf.mxu3 }
 0x22e   : > { %v9767_v58 = vpop.f32.mrf.mxu2 }
 0x22f   : > { %v3068_v11 = vpop.f32.mrf.mxu0 }
 0x230   : > { %v3075_v45 = vadd.f32 %v3068_v11, %v3024_v26  ;;  %v9771_v31 = vpop.f32.mrf.mxu1  ;;  %v4439_v26 = vld [vmem:[#allocation2 + $0xa1] sm:$0xff] }
 0x231   : > { %v9847_v40 = vpack.c.bf16 %v4440_v44, %v4439_v26  ;;  %v7715_v26 = vld [vmem:[%s10516_s4 + $0x60] sm:$0xff] }
 0x232   : > { %v3126_v16 = vadd.f32 %v3119_v38, %v3075_v45  ;;  %7155 = vmatmul.msk.bf16.vlgmr.msrb.gmra.mxu3 %vm482_vm0, %v9725_v41  ;;  %7086 = vmatmul.msk.bf16.gmra.mxu0 %vm482_vm0, %v9687_v3  ;;  %v3133_v38 = vadd.f32 %v9606_v37, %v3129_v52  ;;  %v7707_v45 = vld [vmem:[%s10516_s4 + $0x20] sm:$0xff] }
 0x233   : > { %7135 = vmatmul.msk.bf16.vlgmr.msra.gmra.mxu1 %vm482_vm0, %v9656_v27  ;;  %7145 = vmatmul.msk.bf16.vlgmr.msrb.gmra.mxu2 %vm482_vm0, %v9687_v3  ;;  %v3025_v3 = vadd.f32 %v9683_v34, %v2974_v55  ;;  %v4238_v34 = vld [vmem:[#allocation2 + $0xa8] sm:$0xff]  ;;  %v7701_v52 = vld [vmem:[%s10516_s4 + $0x80] sm:$0xff] }
 0x234   : > { %v3130_v9 = vmul.f32 %v9592_v21, %v3126_v16  ;;  %v3137_v54 = vmax.f32 %v3133_v38, 0.0  ;;  %v9816_v4 = vpack.c.bf16 %v4238_v34, %v4237_v36  ;;  %4642 = vmatpush.bf16.msrb.mxu2 %v7704_v7  ;;  %4689 = vmatpush.bf16.msrb.mxu3 %v7708_v15 }
 0x235   : > { %v9794_v32 = vpop.f32.mrf.mxu3 }
 0x236   : > { %v3134_v27 = vadd.f32 %v9606_v37, %v3130_v9  ;;  %v9800_v8 = vpop.f32.mrf.mxu2 }
 0x237   : > { %v3070_v12 = vpop.f32.mrf.mxu0 }
 0x238   : > { %v3138_v33 = vmax.f32 %v3134_v27, 0.0  ;;  %v3076_v29 = vadd.f32 %v3070_v12, %v3025_v3  ;;  %v9804_v13 = vpop.f32.mrf.mxu1  ;;  %4690 = vmatpush.bf16.msrb.mxu3 %v7707_v45  ;;  %v4339_v27 = vld [vmem:[#allocation2 + $0xa2] sm:$0xff]  ;;  %v4340_v12 = vld [vmem:[#allocation2 + $0xaa] sm:$0xff] }
 0x239   : > { %v9886_v34 = vpack.c.bf16 %v4340_v12, %v4339_v27 }
 0x23a   : > { %v3140_v22 = vmax.f32 %v3136_v1, %v3138_v33  ;;  %v3127_v50 = vadd.f32 %v3121_v57, %v3076_v29  ;;  %v4391_v1 = vld [vmem:[#allocation2 + $0xb8] sm:$0xff]  ;;  %v3238_v29 = vadd.f32 %v9741_v28, %v9746_v56 }
 0x23c   : > { %3142 = vst.msk [vmem:[#allocation5] sm:$0xff] %vm516_vm4, %v3140_v22  ;;  %v3131_v49 = vmul.f32 %v9592_v21, %v3127_v50 }
 0x23d   : > { %v9809_v20 = vpop.f32.mrf.mxu3 }
 0x23e   : > { %v3135_v17 = vadd.f32 %v9606_v37, %v3131_v49  ;;  %v9812_v62 = vpop.f32.mrf.mxu2  ;;  %v4390_v49 = vld [vmem:[#allocation2 + $0xb0] sm:$0xff] }
 0x23f   : > { %v3279_v14 = vpop.f32.mrf.mxu0 }
 0x240   : > { %v3139_v39 = vmax.f32 %v3135_v17, 0.0  ;;  %v9814_v42 = vpop.f32.mrf.mxu1  ;;  %v3289_v51 = vadd.f32 %v3279_v14, %v9703_v30  ;;  %v4441_v30 = vld [vmem:[#allocation2 + $0xb1] sm:$0xff]  ;;  %v9888_v17 = vpack.c.bf16 %v4391_v1, %v4390_v49  ;;  %v4658_v49 = vld [vmem:[#allocation2 + $0xba] sm:$0xff] }
 0x241   : > { %v9884_v38 = vpack.c.bf16 %v4442_v5, %v4441_v30 }
 0x242   : > { %v3141_v25 = vmax.f32 %v3137_v54, %v3139_v39  ;;  %7156 = vmatmul.msk.bf16.gmra.mxu3 %vm482_vm0, %v9816_v4  ;;  %7125 = vmatmul.msk.bf16.vlgmr.msrb.gmra.mxu0 %vm482_vm0, %v9654_v2  ;;  %v7702_v2 = vld [vmem:[%s10516_s4 + $0x88] sm:$0xff]  ;;  %v3340_v59 = vadd.f32 %v9771_v31, %v3289_v51  ;;  %v3240_v39 = vadd.f32 %v9763_v19, %v9767_v58  ;;  %v7710_v19 = vld [vmem:[%s10516_s4 + $0x38] sm:$0xff] }
 0x243   : > { %7136 = vmatmul.msk.bf16.gmra.mxu1 %vm482_vm0, %v9725_v41  ;;  %7146 = vmatmul.msk.bf16.gmra.mxu2 %vm482_vm0, %v9723_v10  ;;  %v7706_v41 = vld [vmem:[%s10516_s4 + $0x18] sm:$0xff]  ;;  %v7712_v58 = vld [vmem:[%s10516_s4 + $0x48] sm:$0xff] }
 0x244   : > { %3143 = vst.msk [vmem:[#allocation5 + $0x8] sm:$0xff] %vm516_vm4, %v3141_v25  ;;  %4524 = vmatpush.bf16.msrb.mxu0 %v7702_v2  ;;  %4605 = vmatpush.bf16.msra.mxu1 %v7706_v41  ;;  %v3391_v31 = vadd.f32 %v9800_v8, %v3340_v59 }
 0x245   : > { %v9827_v63 = vpop.f32.mrf.mxu3 }
 0x246   : > { %v9829_v57 = vpop.f32.mrf.mxu2  ;;  %v3442_v28 = vadd.f32 %v9794_v32, %v3391_v31 }
 0x247   : > { %v3281_v53 = vpop.f32.mrf.mxu0 }
 0x248   : > { %v9831_v46 = vpop.f32.mrf.mxu1  ;;  %4606 = vmatpush.bf16.msra.mxu1 %v7705_v43  ;;  %v3290_v22 = vadd.f32 %v3281_v53, %v9720_v48  ;;  %4525 = vmatpush.bf16.msrb.mxu0 %v7701_v52 }
 0x24a   : > { %v3341_v48 = vadd.f32 %v9804_v13, %v3290_v22 }
 0x24b   : > { %v3144_v24 = vld [vmem:[#allocation5] ss:$2 sm:$0x7f]  ;;  %v3145_v0 = vld [vmem:[#allocation5 + $0x1] ss:$2 sm:$0x7f] }
 0x24c   : > { %v3146_v47 = vmax.f32 %v3144_v24, %v3145_v0  ;;  %v3392_v25 = vadd.f32 %v9812_v62, %v3341_v48 }
 0x24d   : > { %v9842_v35 = vpop.f32.mrf.mxu3 }
 0x24e   : > { %v9844_v23 = vpop.f32.mrf.mxu2  ;;  %3147 = vst.msk [vmem:[#allocation3 + $0x13] sm:$0x7f] %vm2675_vm5, %v3146_v47  ;;  %v3443_v13 = vadd.f32 %v9809_v20, %v3392_v25 }
 0x24f   : > { %v3284_v61 = vpop.f32.mrf.mxu0 }
 0x250   : > { %v3534_v11 = vpop.f32.mrf.mxu1  ;;  %v3291_v14 = vadd.f32 %v3284_v61, %v3238_v29 }
 0x252   : > { %7195 = vmatmul.msk.bf16.vlgmr.msra.gmra.mxu3 %vm482_vm0, %v9847_v40  ;;  %7126 = vmatmul.msk.bf16.gmra.mxu0 %vm482_vm0, %v9727_v6  ;;  %v3342_v8 = vadd.f32 %v9814_v42, %v3291_v14  ;;  %v7714_v42 = vld [vmem:[%s10516_s4 + $0x58] sm:$0xff] }
 0x253   : > { %7175 = vmatmul.msk.bf16.vlgmr.msrb.gmra.mxu1 %vm482_vm0, %v9723_v10  ;;  %7185 = vmatmul.msk.bf16.vlgmr.msra.gmra.mxu2 %vm482_vm0, %v9816_v4  ;;  %v7703_v10 = vld [vmem:[%s10516_s4] sm:$0xff] }
 0x254   : > { %4643 = vmatpush.bf16.msrb.mxu2 %v7703_v10  ;;  %v3393_v41 = vadd.f32 %v9829_v57, %v3342_v8  ;;  %4791 = vmatpush.bf16.msrb.mxu1 %v7712_v58  ;;  %v7709_v10 = vld [vmem:[%s10516_s4 + $0x30] sm:$0xff] }
 0x255   : > { %v9863_v18 = vpop.f32.mrf.mxu3 }
 0x256   : > { %v3585_v16 = vpop.f32.mrf.mxu2  ;;  %v3444_v20 = vadd.f32 %v9827_v63, %v3393_v41 }
 0x257   : > { %v3286_v55 = vpop.f32.mrf.mxu0 }
 0x258   : > { %v3536_v60 = vpop.f32.mrf.mxu1  ;;  %v3292_v7 = vadd.f32 %v3286_v55, %v3240_v39  ;;  %4842 = vmatpush.bf16.msra.mxu2 %v7714_v42  ;;  %v7713_v55 = vld [vmem:[%s10516_s4 + $0x50] sm:$0xff]  ;;  %v7720_v42 = vld [vmem:[%s10516_s4 + $0x88] sm:$0xff] }
 0x25a   : > { %v3343_v32 = vadd.f32 %v9831_v46, %v3292_v7  ;;  %v7716_v46 = vld [vmem:[%s10516_s4 + $0x68] sm:$0xff] }
 0x25b   : > { %4893 = vmatpush.bf16.msra.mxu3 %v7716_v46  ;;  %v4859_v46 = vld [vmem:[#allocation2 + $0xc0] sm:$0xff] }
 0x25c   : > { %4843 = vmatpush.bf16.msra.mxu2 %v7713_v55  ;;  %v7719_v55 = vld [vmem:[%s10516_s4 + $0x80] sm:$0xff] }
 0x25d   : > { %v9873_v9 = vpop.f32.mrf.mxu3 }
 0x25e   : > { %v9875_v3 = vpop.f32.mrf.mxu2 }
 0x25f   : > { %v3483_v33 = vpop.f32.mrf.mxu0  ;;  %4894 = vmatpush.bf16.msra.mxu3 %v7715_v26  ;;  %v7722_v26 = vld [vmem:[%s10516_s4 + $0x8] sm:$0xff] }
 0x260   : > { %v3539_v50 = vpop.f32.mrf.mxu1  ;;  %v3493_v36 = vadd.f32 %v3483_v33, %v3442_v28 }
 0x262   : > { %7196 = vmatmul.msk.bf16.gmra.mxu3 %vm482_vm0, %v9884_v38  ;;  %7165 = vmatmul.msk.bf16.vlgmr.msra.gmra.mxu0 %vm482_vm0, %v9727_v6  ;;  %v3544_v2 = vadd.f32 %v3534_v11, %v3493_v36  ;;  %v3394_v11 = vadd.f32 %v9844_v23, %v3343_v32  ;;  %v7718_v32 = vld [vmem:[%s10516_s4 + $0x78] sm:$0xff] }
 0x263   : > { %7176 = vmatmul.msk.bf16.gmra.mxu1 %vm482_vm0, %v9886_v34  ;;  %7186 = vmatmul.msk.bf16.gmra.mxu2 %vm482_vm0, %v9888_v17 }
 0x264   : > { %v3595_v62 = vadd.f32 %v3585_v16, %v3544_v2  ;;  %4740 = vmatpush.bf16.msra.mxu0 %v7710_v19  ;;  %v7711_v16 = vld [vmem:[%s10516_s4 + $0x40] sm:$0xff] }
 0x265   : > { %v9900_v56 = vpop.f32.mrf.mxu3  ;;  %4792 = vmatpush.bf16.msrb.mxu1 %v7711_v16 }
 0x266   : > { %v3590_v54 = vpop.f32.mrf.mxu2  ;;  %v3599_v63 = vmul.f32 %v9592_v21, %v3595_v62 }
 0x267   : > { %v3485_v6 = vpop.f32.mrf.mxu0 }
 0x268   : > { %v3541_v53 = vpop.f32.mrf.mxu1  ;;  %v3494_v57 = vadd.f32 %v3485_v6, %v3443_v13  ;;  %v3603_v51 = vadd.f32 %v9606_v37, %v3599_v63  ;;  %4741 = vmatpush.bf16.msra.mxu0 %v7709_v10  ;;  %v4860_v13 = vld [vmem:[#allocation2 + $0xc8] sm:$0xff] }
 0x26a   : > { %v3545_v15 = vadd.f32 %v3536_v60, %v3494_v57  ;;  %v3607_v52 = vmax.f32 %v3603_v51, 0.0 }
 0x26c   : > { %v3596_v60 = vadd.f32 %v9875_v3, %v3545_v15 }
 0x26d   : > { %v9909_v24 = vpop.f32.mrf.mxu3 }
 0x26e   : > { %v3592_v0 = vpop.f32.mrf.mxu2  ;;  %v3600_v33 = vmul.f32 %v9592_v21, %v3596_v60  ;;  %v4862_v60 = vld [vmem:[#allocation2 + $0xd8] sm:$0xff] }
 0x26f   : > { %v3488_v47 = vpop.f32.mrf.mxu0 }
 0x270   : > { %v3495_v44 = vadd.f32 %v3488_v47, %v3444_v20  ;;  %v9924_v61 = vpop.f32.mrf.mxu1 }
 0x272   : > { %v3546_v45 = vadd.f32 %v3539_v50, %v3495_v44  ;;  %7235 = vmatmul.msk.bf16.vlgmr.msrb.gmra.mxu3 %vm482_vm0, %v9886_v34  ;;  %7166 = vmatmul.msk.bf16.gmra.mxu0 %vm482_vm0, %v9847_v40  ;;  %v4657_v50 = vld [vmem:[#allocation2 + $0xb2] sm:$0xff]  ;;  %v9997_v44 = vpack.c.bf16 %v4860_v13, %v4859_v46 }
 0x273   : > { %7215 = vmatmul.msk.bf16.vlgmr.msra.gmra.mxu1 %vm482_vm0, %v9847_v40  ;;  %7225 = vmatmul.msk.bf16.vlgmr.msrb.gmra.mxu2 %vm482_vm0, %v9816_v4  ;;  %v3445_v4 = vadd.f32 %v9842_v35, %v3394_v11  ;;  %v3604_v35 = vadd.f32 %v9606_v37, %v3600_v33  ;;  %v7721_v11 = vld [vmem:[%s10516_s4] sm:$0xff] }
 0x274   : > { %v3597_v23 = vadd.f32 %v3590_v54, %v3546_v45  ;;  %v4660_v54 = vpack.c.bf16 %v4658_v49, %v4657_v50  ;;  %4995 = vmatpush.bf16.msra.mxu1 %v7720_v42  ;;  %5113 = vmatpush.bf16.msrb.mxu3 %v7722_v26  ;;  %v7731_v42 = vld [vmem:[%s10516_s4 + $0x50] sm:$0xff] }
 0x275   : > { %v9945_v43 = vpop.f32.mrf.mxu3  ;;  %v3608_v39 = vmax.f32 %v3604_v35, 0.0 }
 0x276   : > { %v3601_v59 = vmul.f32 %v9592_v21, %v3597_v23  ;;  %v9953_v40 = vpop.f32.mrf.mxu2 }
 0x277   : > { %v3490_v5 = vpop.f32.mrf.mxu0 }
 0x278   : > { %v3605_v27 = vadd.f32 %v9606_v37, %v3601_v59  ;;  %v3496_v12 = vadd.f32 %v3490_v5, %v3445_v4  ;;  %v9957_v1 = vpop.f32.mrf.mxu1  ;;  %5114 = vmatpush.bf16.msrb.mxu3 %v7721_v11  ;;  %4996 = vmatpush.bf16.msra.mxu1 %v7719_v55  ;;  %v4760_v5 = vld [vmem:[#allocation2 + $0xc9] sm:$0xff] }
 0x27a   : > { %v3609_v30 = vmax.f32 %v3605_v27, 0.0  ;;  %v3547_v29 = vadd.f32 %v3541_v53, %v3496_v12  ;;  %v4811_v27 = vld [vmem:[#allocation2 + $0xca] sm:$0xff] }
 0x27c   : > { %v3611_v22 = vmax.f32 %v3607_v52, %v3609_v30  ;;  %v3598_v3 = vadd.f32 %v3592_v0, %v3547_v29  ;;  %v4861_v52 = vld [vmem:[#allocation2 + $0xd0] sm:$0xff]  ;;  %v4759_v29 = vld [vmem:[#allocation2 + $0xc1] sm:$0xff] }
 0x27d   : > { %v9960_v31 = vpop.f32.mrf.mxu3  ;;  %v10024_v30 = vpack.c.bf16 %v4862_v60, %v4861_v52 }
 0x27e   : > { %3613 = vst.msk [vmem:[#allocation5] sm:$0xff] %vm516_vm4, %v3611_v22  ;;  %v3602_v14 = vmul.f32 %v9592_v21, %v3598_v3  ;;  %v9965_v48 = vpop.f32.mrf.mxu2  ;;  %v4810_v22 = vld [vmem:[#allocation2 + $0xc2] sm:$0xff]  ;;  %v10029_v3 = vpack.c.bf16 %v4760_v5, %v4759_v29 }
 0x27f   : > { %v3703_v28 = vpop.f32.mrf.mxu0  ;;  %v10031_v50 = vpack.c.bf16 %v4811_v27, %v4810_v22 }
 0x280   : > { %v3606_v8 = vadd.f32 %v9606_v37, %v3602_v14  ;;  %v9968_v36 = vpop.f32.mrf.mxu1  ;;  %v3704_v15 = vadd.f32 %v3703_v28, %v9863_v18 }
 0x282   : > { %v3610_v6 = vmax.f32 %v3606_v8, 0.0  ;;  %7236 = vmatmul.msk.bf16.gmra.mxu3 %vm482_vm0, %v4660_v54  ;;  %7205 = vmatmul.msk.bf16.vlgmr.msrb.gmra.mxu0 %vm482_vm0, %v9886_v34  ;;  %v7724_v34 = vld [vmem:[%s10516_s4 + $0x18] sm:$0xff]  ;;  %v3760_v10 = vadd.f32 %v9924_v61, %v3704_v15  ;;  %v7717_v61 = vld [vmem:[%s10516_s4 + $0x70] sm:$0xff]  ;;  %v7725_v15 = vld [vmem:[%s10516_s4 + $0x20] sm:$0xff] }
 0x283   : > { %7216 = vmatmul.msk.bf16.gmra.mxu1 %vm482_vm0, %v9884_v38  ;;  %7226 = vmatmul.msk.bf16.gmra.mxu2 %vm482_vm0, %v9888_v17 }
 0x284   : > { %v3612_v25 = vmax.f32 %v3608_v39, %v3610_v6  ;;  %5076 = vmatpush.bf16.msrb.mxu2 %v7724_v34  ;;  %4944 = vmatpush.bf16.msrb.mxu0 %v7718_v32  ;;  %v3811_v4 = vadd.f32 %v9953_v40, %v3760_v10  ;;  %v7726_v39 = vld [vmem:[%s10516_s4 + $0x28] sm:$0xff]  ;;  %v7728_v6 = vld [vmem:[%s10516_s4 + $0x38] sm:$0xff] }
 0x285   : > { %v9977_v53 = vpop.f32.mrf.mxu3 }
 0x286   : > { %3614 = vst.msk [vmem:[#allocation5 + $0x8] sm:$0xff] %vm516_vm4, %v3612_v25  ;;  %v9980_v7 = vpop.f32.mrf.mxu2  ;;  %v3862_v49 = vadd.f32 %v9945_v43, %v3811_v4 }
 0x287   : > { %v3705_v2 = vpop.f32.mrf.mxu0 }
 0x288   : > { %v9982_v41 = vpop.f32.mrf.mxu1  ;;  %v3706_v18 = vadd.f32 %v3705_v2, %v9873_v9  ;;  %4945 = vmatpush.bf16.msrb.mxu0 %v7717_v61  ;;  %v7732_v2 = vld [vmem:[%s10516_s4 + $0x58] sm:$0xff] }
 0x28a   : > { %v3761_v9 = vadd.f32 %v9957_v1, %v3706_v18 }
 0x28c   : > { %v3812_v43 = vadd.f32 %v9965_v48, %v3761_v9  ;;  %v4963_v9 = vld [vmem:[#allocation2 + $0xd2] sm:$0xff] }
 0x28d   : > { %v3615_v19 = vld [vmem:[#allocation5] ss:$2 sm:$0x7f]  ;;  %v3616_v58 = vld [vmem:[#allocation5 + $0x1] ss:$2 sm:$0x7f]  ;;  %v9993_v62 = vpop.f32.mrf.mxu3 }
 0x28e   : > { %v9995_v57 = vpop.f32.mrf.mxu2  ;;  %v3617_v0 = vmax.f32 %v3615_v19, %v3616_v58  ;;  %v3863_v25 = vadd.f32 %v9960_v31, %v3812_v43  ;;  %v5044_v43 = vld [vmem:[#allocation2 + $0xd1] sm:$0xff] }
 0x28f   : > { %v3708_v20 = vpop.f32.mrf.mxu0 }
 0x290   : > { %v3954_v47 = vpop.f32.mrf.mxu1  ;;  %3618 = vst.msk [vmem:[#allocation3 + $0x1c] sm:$0x7f] %vm2675_vm5, %v3617_v0  ;;  %v3709_v40 = vadd.f32 %v3708_v20, %v9900_v56 }
 0x292   : > { %7275 = vmatmul.msk.bf16.vlgmr.msra.gmra.mxu3 %vm482_vm0, %v9997_v44  ;;  %7206 = vmatmul.msk.bf16.gmra.mxu0 %vm482_vm0, %v4660_v54  ;;  %v3762_v1 = vadd.f32 %v9968_v36, %v3709_v40  ;;  %v4964_v40 = vld [vmem:[#allocation2 + $0xda] sm:$0xff] }
 0x293   : > { %7255 = vmatmul.msk.bf16.vlgmr.msrb.gmra.mxu1 %vm482_vm0, %v9884_v38  ;;  %7265 = vmatmul.msk.bf16.vlgmr.msra.gmra.mxu2 %vm482_vm0, %v4660_v54  ;;  %v7723_v38 = vld [vmem:[%s10516_s4 + $0x10] sm:$0xff] }
 0x294   : > { %5077 = vmatpush.bf16.msrb.mxu2 %v7723_v38  ;;  %v3813_v48 = vadd.f32 %v9980_v7, %v3762_v1  ;;  %5211 = vmatpush.bf16.msrb.mxu1 %v7728_v6 }
 0x295   : > { %v4056_v63 = vpop.f32.mrf.mxu3  ;;  %5313 = vmatpush.bf16.msra.mxu3 %v7732_v2 }
 0x296   : > { %v4005_v45 = vpop.f32.mrf.mxu2  ;;  %v3864_v7 = vadd.f32 %v9977_v53, %v3813_v48  ;;  %v7729_v53 = vld [vmem:[%s10516_s4 + $0x40] sm:$0xff]  ;;  %v7745_v48 = vld [vmem:[#allocation14 + $0x30] sm:$0xff] }
 0x297   : > { %v3710_v16 = vpop.f32.mrf.mxu0 }
 0x298   : > { %v3956_v23 = vpop.f32.mrf.mxu1  ;;  %v3711_v36 = vadd.f32 %v3710_v16, %v9909_v24 }
 0x299   : > { %5314 = vmatpush.bf16.msra.mxu3 %v7731_v42 }
 0x29a   : > { %v3763_v24 = vadd.f32 %v9982_v41, %v3711_v36  ;;  %v7727_v41 = vld [vmem:[%s10516_s4 + $0x30] sm:$0xff] }
 0x29b   : > { %5212 = vmatpush.bf16.msrb.mxu1 %v7727_v41  ;;  %v7735_v41 = vld [vmem:[%s10516_s4 + $0x70] sm:$0xff] }
 0x29c   : > { %v3814_v26 = vadd.f32 %v9995_v57, %v3763_v24 }
 0x29d   : > { %v10020_v51 = vpop.f32.mrf.mxu3 }
 0x29e   : > { %v4007_v59 = vpop.f32.mrf.mxu2  ;;  %v3865_v55 = vadd.f32 %v9993_v62, %v3814_v26 }
 0x29f   : > { %v3903_v12 = vpop.f32.mrf.mxu0 }
 0x2a0   : > { %v3959_v33 = vpop.f32.mrf.mxu1  ;;  %v3913_v35 = vadd.f32 %v3903_v12, %v3862_v49 }
 0x2a2   : > { %7276 = vmatmul.msk.bf16.gmra.mxu3 %vm482_vm0, %v10024_v30  ;;  %7245 = vmatmul.msk.bf16.vlgmr.msra.gmra.mxu0 %vm482_vm0, %v9888_v17  ;;  %v3964_v8 = vadd.f32 %v3954_v47, %v3913_v35  ;;  %v7730_v17 = vld [vmem:[%s10516_s4 + $0x48] sm:$0xff] }
 0x2a3   : > { %7256 = vmatmul.msk.bf16.gmra.mxu1 %vm482_vm0, %v10029_v3  ;;  %7266 = vmatmul.msk.bf16.gmra.mxu2 %vm482_vm0, %v10031_v50 }
 0x2a4   : > { %5262 = vmatpush.bf16.msra.mxu2 %v7730_v17  ;;  %5160 = vmatpush.bf16.msra.mxu0 %v7726_v39  ;;  %v4015_v13 = vadd.f32 %v4005_v45, %v3964_v8  ;;  %v7746_v39 = vld [vmem:[#allocation14 + $0x38] sm:$0xff] }
 0x2a5   : > { %v4061_v14 = vpop.f32.mrf.mxu3 }
 0x2a6   : > { %v4010_v56 = vpop.f32.mrf.mxu2  ;;  %v4066_v58 = vadd.f32 %v4056_v63, %v4015_v13 }
 0x2a7   : > { %v3905_v28 = vpop.f32.mrf.mxu0 }
 0x2a8   : > { %v3961_v54 = vpop.f32.mrf.mxu1  ;;  %v3914_v34 = vadd.f32 %v3905_v28, %v3863_v25  ;;  %v4070_v11 = vmul.f32 %v9592_v21, %v4066_v58  ;;  %5263 = vmatpush.bf16.msra.mxu2 %v7729_v53  ;;  %5161 = vmatpush.bf16.msra.mxu0 %v7725_v15  ;;  %v10100_v28 = vpack.c.bf16 %v4964_v40, %v4963_v9  ;;  %v7736_v25 = vld [vmem:[%s10516_s4 + $0x78] sm:$0xff]  ;;  %v7737_v53 = vld [vmem:[%s10516_s4 + $0x80] sm:$0xff]  ;;  %v5525_v40 = vld [vmem:[#allocation3 + $0x1] sm:$0xff] }
 0x2aa   : > { %v3965_v0 = vadd.f32 %v3956_v23, %v3914_v34  ;;  %v4074_v23 = vadd.f32 %v9606_v37, %v4070_v11  ;;  %v7733_v11 = vld [vmem:[%s10516_s4 + $0x60] sm:$0xff] }
 0x2ac   : > { %v4016_v63 = vadd.f32 %v4007_v59, %v3965_v0  ;;  %v4078_v27 = vmax.f32 %v4074_v23, 0.0  ;;  %v5231_v23 = vld [vmem:[#allocation2 + $0xe9] sm:$0xff] }
 0x2ad   : > { %v4063_v32 = vpop.f32.mrf.mxu3 }
 0x2ae   : > { %v4012_v31 = vpop.f32.mrf.mxu2  ;;  %v4067_v10 = vadd.f32 %v10020_v51, %v4016_v63  ;;  %v5045_v51 = vld [vmem:[#allocation2 + $0xd9] sm:$0xff] }
 0x2af   : > { %v3908_v19 = vpop.f32.mrf.mxu0  ;;  %v5047_v8 = vpack.c.bf16 %v5045_v51, %v5044_v43  ;;  %v10184_v51 = vld [vmem:[#allocation3 + $0x9] sm:$0xff] }
 0x2b0   : > { %v3915_v20 = vadd.f32 %v3908_v19, %v3864_v7  ;;  %v4174_v46 = vpop.f32.mrf.mxu1  ;;  %v4071_v12 = vmul.f32 %v9592_v21, %v4067_v10  ;;  %v7743_v19 = vld [vmem:[#allocation14 + $0x20] sm:$0xff]  ;;  %v5533_v43 = vpack.c.bf16 %v10184_v51, %v5525_v40 }
 0x2b2   : > { %v3966_v47 = vadd.f32 %v3959_v33, %v3915_v20  ;;  %7315 = vmatmul.msk.bf16.vlgmr.msrb.gmra.mxu3 %vm482_vm0, %v9997_v44  ;;  %7246 = vmatmul.msk.bf16.gmra.mxu0 %vm482_vm0, %v9997_v44  ;;  %v4075_v35 = vadd.f32 %v9606_v37, %v4071_v12 }
 0x2b3   : > { %7295 = vmatmul.msk.bf16.vlgmr.msra.gmra.mxu1 %vm482_vm0, %v10031_v50  ;;  %7305 = vmatmul.msk.bf16.vlgmr.msrb.gmra.mxu2 %vm482_vm0, %v10029_v3 }
 0x2b4   : > { %v4017_v44 = vadd.f32 %v4010_v56, %v3966_v47  ;;  %v4079_v6 = vmax.f32 %v4075_v35, 0.0  ;;  %5585 = vmatpush.bf16.msrb.mxu3 %v7746_v39  ;;  %5415 = vmatpush.bf16.msra.mxu1 %v7736_v25  ;;  %v7753_v35 = vld [vmem:[#allocation14 + $0x70] sm:$0xff]  ;;  %v7751_v25 = vld [vmem:[#allocation14 + $0x60] sm:$0xff] }
 0x2b5   : > { %v10082_v57 = vpop.f32.mrf.mxu3 }
 0x2b6   : > { %v4068_v45 = vadd.f32 %v4061_v14, %v4017_v44  ;;  %v4221_v16 = vpop.f32.mrf.mxu2 }
 0x2b7   : > { %v3910_v38 = vpop.f32.mrf.mxu0 }
 0x2b8   : > { %v4072_v60 = vmul.f32 %v9592_v21, %v4068_v45  ;;  %v3916_v18 = vadd.f32 %v3910_v38, %v3865_v55  ;;  %v4176_v59 = vpop.f32.mrf.mxu1  ;;  %5586 = vmatpush.bf16.msrb.mxu3 %v7745_v48  ;;  %5416 = vmatpush.bf16.msra.mxu1 %v7735_v41  ;;  %v5282_v55 = vld [vmem:[#allocation2 + $0xea] sm:$0xff]  ;;  %v10205_v41 = vld [vmem:[#allocation3 + $0x19] sm:$0xff] }
 0x2b9   : > { %v5180_v38 = vld [vmem:[#allocation2 + $0xe8] sm:$0xff] }
 0x2ba   : > { %v4076_v4 = vadd.f32 %v9606_v37, %v4072_v60  ;;  %v3967_v5 = vadd.f32 %v3961_v54, %v3916_v18 }
 0x2bc   : > { %v4080_v52 = vmax.f32 %v4076_v4, 0.0  ;;  %v4018_v33 = vadd.f32 %v4012_v31, %v3967_v5  ;;  %v7744_v31 = vld [vmem:[#allocation14 + $0x28] sm:$0xff]  ;;  %v5230_v4 = vld [vmem:[#allocation2 + $0xe1] sm:$0xff] }
 0x2bd   : > { %v10093_v29 = vpop.f32.mrf.mxu3  ;;  %5587 = vmatpush.bf16.msrb.mxu3 %v7744_v31  ;;  %v5233_v12 = vpack.c.bf16 %v5231_v23, %v5230_v4 }
 0x2be   : > { %v4082_v62 = vmax.f32 %v4078_v27, %v4080_v52  ;;  %v4069_v22 = vadd.f32 %v4063_v32, %v4018_v33  ;;  %v4223_v61 = vpop.f32.mrf.mxu2 }
 0x2bf   : > { %v4137_v49 = vpop.f32.mrf.mxu0 }
 0x2c0   : > { %4084 = vst.msk [vmem:[#allocation5] sm:$0xff] %vm516_vm4, %v4082_v62  ;;  %v4073_v14 = vmul.f32 %v9592_v21, %v4069_v22  ;;  %v4175_v1 = vadd.f32 %v4174_v46, %v4137_v49  ;;  %v10098_v56 = vpop.f32.mrf.mxu1  ;;  %v7738_v21 = vld [vmem:[%s10516_s4 + $0x88] sm:$0xff]  ;;  %v7750_v62 = vld [vmem:[#allocation14 + $0x58] sm:$0xff]  ;;  %v7749_v49 = vld [vmem:[#allocation14 + $0x50] sm:$0xff] }
 0x2c1   : > { %5466 = vmatpush.bf16.msrb.mxu2 %v7738_v21  ;;  %5588 = vmatpush.bf16.msrb.mxu3 %v7743_v19  ;;  %v7754_v22 = vld [vmem:[#allocation14 + $0x78] sm:$0xff] }
 0x2c2   : > { %v4077_v54 = vadd.f32 %v9606_v37, %v4073_v14  ;;  %v10103_v17 = vadd.f32 %v4221_v16, %v4175_v1  ;;  %7316 = vmatmul.msk.bf16.gmra.mxu3 %vm482_vm0, %v10024_v30  ;;  %7285 = vmatmul.msk.bf16.vlgmr.msrb.gmra.mxu0 %vm482_vm0, %v10029_v3  ;;  %v7734_v3 = vld [vmem:[%s10516_s4 + $0x68] sm:$0xff] }
 0x2c3   : > { %7296 = vmatmul.msk.bf16.gmra.mxu1 %vm482_vm0, %v10100_v28  ;;  %7306 = vmatmul.msk.bf16.gmra.mxu2 %vm482_vm0, %v5047_v8  ;;  %v5281_v16 = vld [vmem:[#allocation2 + $0xe2] sm:$0xff] }
 0x2c4   : > { %v4081_v37 = vmax.f32 %v4077_v54, 0.0  ;;  %5364 = vmatpush.bf16.msrb.mxu0 %v7734_v3  ;;  %v5284_v18 = vpack.c.bf16 %v5282_v55, %v5281_v16  ;;  %v7752_v54 = vld [vmem:[#allocation14 + $0x68] sm:$0xff]  ;;  %v7747_v3 = vld [vmem:[#allocation14 + $0x40] sm:$0xff] }
 0x2c5   : > { %v10115_v36 = vpop.f32.mrf.mxu3  ;;  %5467 = vmatpush.bf16.msrb.mxu2 %v7737_v53 }
 0x2c6   : > { %v4083_v2 = vmax.f32 %v4079_v6, %v4081_v37  ;;  %v10123_v13 = vpop.f32.mrf.mxu2 }
 0x2c7   : > { %v4139_v34 = vpop.f32.mrf.mxu0 }
 0x2c8   : > { %4085 = vst.msk [vmem:[#allocation5 + $0x8] sm:$0xff] %vm516_vm4, %v4083_v2  ;;  %v4177_v32 = vadd.f32 %v4176_v59, %v4139_v34  ;;  %v10126_v42 = vpop.f32.mrf.mxu1  ;;  %5365 = vmatpush.bf16.msrb.mxu0 %v7733_v11  ;;  %v5179_v59 = vld [vmem:[#allocation2 + $0xe0] sm:$0xff]  ;;  %v4282_v34 = vadd.f32 %v10082_v57, %v10103_v17 }
 0x2c9   : > { %v10168_v27 = vpack.c.bf16 %v5180_v38, %v5179_v59  ;;  %v5527_v11 = vld [vmem:[#allocation3 + $0x11] sm:$0xff] }
 0x2ca   : > { %v10128_v24 = vadd.f32 %v4223_v61, %v4177_v32  ;;  %v5383_v32 = vld [vmem:[#allocation2 + $0xf1] sm:$0xff] }
 0x2cb   : > { %v7741_v38 = vld [vmem:[#allocation14 + $0x10] sm:$0xff] }
 0x2cc   : > { %v4283_v59 = vadd.f32 %v10093_v29, %v10128_v24 }
 0x2cd   : > { %v10130_v7 = vpop.f32.mrf.mxu3 }
 0x2ce   : > { %v10132_v58 = vpop.f32.mrf.mxu2 }
 0x2cf   : > { %v10134_v0 = vpop.f32.mrf.mxu0  ;;  %v4086_v20 = vld [vmem:[#allocation5] ss:$2 sm:$0x7f]  ;;  %v4087_v46 = vld [vmem:[#allocation5 + $0x1] ss:$2 sm:$0x7f] }
 0x2d0   : > { %v10136_v47 = vpop.f32.mrf.mxu1  ;;  %v4088_v26 = vmax.f32 %v4086_v20, %v4087_v46  ;;  %v4180_v48 = vadd.f32 %v10098_v56, %v10134_v0  ;;  %v5384_v20 = vld [vmem:[#allocation2 + $0xf9] sm:$0xff] }
 0x2d1   : > { %v5434_v46 = vld [vmem:[#allocation2 + $0xf2] sm:$0xff]  ;;  %v5386_v16 = vpack.c.bf16 %v5384_v20, %v5383_v32 }
 0x2d2   : > { %7355 = vmatmul.msk.bf16.vlgmr.msra.gmra.mxu3 %vm482_vm0, %v10100_v28  ;;  %7286 = vmatmul.msk.bf16.gmra.mxu0 %vm482_vm0, %v5047_v8  ;;  %4089 = vst.msk [vmem:[#allocation3 + $0x25] sm:$0x7f] %vm2675_vm5, %v4088_v26  ;;  %v4233_v31 = vadd.f32 %v10123_v13, %v4180_v48  ;;  %v5435_v26 = vld [vmem:[#allocation2 + $0xfa] sm:$0xff]  ;;  %v10254_v48 = vld [vmem:[#allocation13] ss:$0 sm:$0xff] }
 0x2d3   : > { %7335 = vmatmul.msk.bf16.vlgmr.msrb.gmra.mxu1 %vm482_vm0, %v10024_v30  ;;  %7345 = vmatmul.msk.bf16.vlgmr.msra.gmra.mxu2 %vm482_vm0, %v5047_v8  ;;  %v7748_v8 = vld [vmem:[#allocation14 + $0x48] sm:$0xff]  ;;  %v5437_v55 = vpack.c.bf16 %v5435_v26, %v5434_v46 }
 0x2d4   : > { %5735 = vmatpush.bf16.msrb.mxu1 %v7750_v62  ;;  %5828 = vmatpush.bf16.msra.mxu2 %v7754_v22  ;;  %v4284_v13 = vadd.f32 %v10115_v36, %v4233_v31 }
 0x2d5   : > { %v10156_v44 = vpop.f32.mrf.mxu3 }
 0x2d6   : > { %v10154_v63 = vpop.f32.mrf.mxu2 }
 0x2d7   : > { %v10158_v15 = vpop.f32.mrf.mxu0 }
 0x2d8   : > { %v10160_v45 = vpop.f32.mrf.mxu1  ;;  %5736 = vmatpush.bf16.msrb.mxu1 %v7749_v49  ;;  %5829 = vmatpush.bf16.msra.mxu2 %v7753_v35  ;;  %v4182_v57 = vadd.f32 %v10126_v42, %v10158_v15  ;;  %v7739_v15 = vld [vmem:[#allocation14] sm:$0xff]  ;;  %v5332_v35 = vld [vmem:[#allocation2 + $0xf0] sm:$0xff] }
 0x2da   : > { %v4234_v36 = vadd.f32 %v10132_v58, %v4182_v57 }
 0x2dc   : > { %5737 = vmatpush.bf16.msrb.mxu1 %v7748_v8  ;;  %5830 = vmatpush.bf16.msra.mxu2 %v7752_v54  ;;  %v5675_v54 = vld [vmem:[#allocation3 + $0x2] sm:$0xff] }
 0x2dd   : > { %v10166_v5 = vpop.f32.mrf.mxu3 }
 0x2de   : > { %v10162_v30 = vpop.f32.mrf.mxu2 }
 0x2df   : > { %v4323_v10 = vpop.f32.mrf.mxu0 }
 0x2e0   : > { %v10164_v60 = vpop.f32.mrf.mxu1  ;;  %5738 = vmatpush.bf16.msrb.mxu1 %v7747_v3  ;;  %5831 = vmatpush.bf16.msra.mxu2 %v7751_v25  ;;  %v4333_v19 = vadd.f32 %v4323_v10, %v4282_v34  ;;  %v5534_v10 = vpack.c.bf16 %v10205_v41, %v5527_v11 }
 0x2e2   : > { %7356 = vmatmul.msk.bf16.gmra.mxu3 %vm482_vm0, %v5284_v18  ;;  %7325 = vmatmul.msk.bf16.vlgmr.msra.gmra.mxu0 %vm482_vm0, %v10031_v50  ;;  %v4384_v17 = vadd.f32 %v10136_v47, %v4333_v19 }
 0x2e3   : > { %7336 = vmatmul.msk.bf16.gmra.mxu1 %vm482_vm0, %v10168_v27  ;;  %7346 = vmatmul.msk.bf16.gmra.mxu2 %vm482_vm0, %v5233_v12 }
 0x2e4   : > { %v4435_v47 = vadd.f32 %v10154_v63, %v4384_v17 }
 0x2e5   : > { %v10182_v9 = vpop.f32.mrf.mxu3 }
 0x2e6   : > { %v10176_v52 = vpop.f32.mrf.mxu2  ;;  %v4486_v22 = vadd.f32 %v10156_v44, %v4435_v47 }
 0x2e7   : > { %v10178_v33 = vpop.f32.mrf.mxu0 }
 0x2e8   : > { %v10180_v61 = vpop.f32.mrf.mxu1  ;;  %v4334_v42 = vadd.f32 %v10178_v33, %v4283_v59 }
 0x2ea   : > { %v4385_v62 = vadd.f32 %v10160_v45, %v4334_v42  ;;  %v10241_v45 = vld [vmem:[#allocation11] ss:$0 sm:$0xff] }
 0x2ed   : > { %v10194_v21 = vpop.f32.mrf.mxu3 }
 0x2ee   : > { %v10186_v50 = vpop.f32.mrf.mxu2 }
 0x2ef   : > { %v4328_v14 = vpop.f32.mrf.mxu0 }
 0x2f0   : > { %v4608_v1 = vpop.f32.mrf.mxu1  ;;  %v4335_v4 = vadd.f32 %v4328_v14, %v4284_v13  ;;  %v4436_v14 = vadd.f32 %v10162_v30, %v4385_v62  ;;  %v5505_v13 = vld [vmem:[#allocation3] sm:$0xff] }
 0x2f2   : > { %7403 = vmatmul.msk.bf16.vlgmr.msrb.gmra.mxu3 %vm516_vm4, %v5533_v43  ;;  %7326 = vmatmul.msk.bf16.gmra.mxu0 %vm482_vm0, %v10100_v28  ;;  %v7742_v28 = vld [vmem:[#allocation14 + $0x18] sm:$0xff]  ;;  %v4386_v29 = vadd.f32 %v10164_v60, %v4335_v4  ;;  %v5333_v60 = vld [vmem:[#allocation2 + $0xf8] sm:$0xff] }
 0x2f3   : > { %7375 = vmatmul.msk.bf16.vlgmr.msra.gmra.mxu1 %vm482_vm0, %v5233_v12  ;;  %7385 = vmatmul.msk.bf16.vlgmr.msrb.gmra.mxu2 %vm482_vm0, %v5284_v18  ;;  %v7740_v18 = vld [vmem:[#allocation14 + $0x8] sm:$0xff]  ;;  %v5335_v8 = vpack.c.bf16 %v5333_v60, %v5332_v35  ;;  %v10279_v4 = vld [vmem:[#allocation3 + $0x1a] sm:$0xff] }
 0x2f4   : > { %5650 = vmatpush.bf16.msra.mxu0 %v7742_v28  ;;  %v4437_v49 = vadd.f32 %v10176_v52, %v4386_v29  ;;  %v4487_v52 = vadd.f32 %v10166_v5, %v4436_v14 }
 0x2f5   : > { %v10209_v56 = vpop.f32.mrf.mxu3 }
 0x2f6   : > { %v4645_v39 = vpop.f32.mrf.mxu2  ;;  %v4488_v43 = vadd.f32 %v10182_v9, %v4437_v49 }
 0x2f7   : > { %v10196_v6 = vadd.f32 %v4645_v39, %v4608_v1  ;;  %v4330_v37 = vpop.f32.mrf.mxu0  ;;  %v10247_v39 = vld [vmem:[#allocation3 + $0xa] sm:$0xff] }
 0x2f8   : > { %v10200_v2 = vpop.f32.mrf.mxu1  ;;  %5651 = vmatpush.bf16.msra.mxu0 %v7741_v38  ;;  %v5683_v30 = vpack.c.bf16 %v10247_v39, %v5675_v54 }
 0x2fc   : > { %5652 = vmatpush.bf16.msra.mxu0 %v7740_v18 }
 0x2fd   : > { %v10236_v58 = vpop.f32.mrf.mxu3 }
 0x2fe   : > { %v10207_v53 = vpop.f32.mrf.mxu2 }
 0x2ff   : > { %v4527_v0 = vpop.f32.mrf.mxu0 }
 0x300   : > { %v10215_v23 = vpop.f32.mrf.mxu1  ;;  %5653 = vmatpush.bf16.msra.mxu0 %v7739_v15  ;;  %v4537_v63 = vadd.f32 %v4527_v0, %v4486_v22 }
 0x302   : > { %7404 = vmatmul.msk.bf16.gmra.mxu3 %vm516_vm4, %v5534_v10  ;;  %7365 = vmatmul.msk.bf16.vlgmr.msrb.gmra.mxu0 %vm482_vm0, %v10168_v27  ;;  %v4285_v27 = vadd.f32 %v10130_v7, %v4234_v36  ;;  %v4541_v7 = vmul.f32 %v10241_v45, %v4537_v63  ;;  %v5506_v10 = vld [vmem:[#allocation3 + $0x8] sm:$0xff] }
 0x303   : > { %7376 = vmatmul.msk.bf16.gmra.mxu1 %vm482_vm0, %v5386_v16  ;;  %7386 = vmatmul.msk.bf16.gmra.mxu2 %vm482_vm0, %v5437_v55  ;;  %v5771_v36 = vld [vmem:[#allocation3 + $0x21] sm:$0xff]  ;;  %v5513_v29 = vpack.c.bf16 %v5506_v10, %v5505_v13 }
 0x304   : > { %v4336_v33 = vadd.f32 %v4330_v37, %v4285_v27  ;;  %v4545_v28 = vadd.f32 %v10254_v48, %v4541_v7  ;;  %v5777_v27 = vpack.c.bf16 %v5771_v36, %v10205_v41 }
 0x305   : > { %v10260_v31 = vpop.f32.mrf.mxu3 }
 0x306   : > { %v10229_v24 = vpop.f32.mrf.mxu2  ;;  %v4387_v1 = vadd.f32 %v10180_v61, %v4336_v33  ;;  %v5776_v61 = vpack.c.bf16 %v5527_v11, %v10184_v51  ;;  %v4549_v51 = vmax.f32 %v4545_v28, 0.0 }
 0x307   : > { %v4529_v12 = vpop.f32.mrf.mxu0 }
 0x308   : > { %v10234_v40 = vpop.f32.mrf.mxu1  ;;  %v4538_v34 = vadd.f32 %v4529_v12, %v4487_v52  ;;  %v4438_v32 = vadd.f32 %v10186_v50, %v4387_v1  ;;  %v10281_v12 = vld [vmem:[#allocation3 + $0x12] sm:$0xff] }
 0x309   : > { %v10285_v62 = vpack.c.bf16 %v10279_v4, %v10281_v12  ;;  %v5508_v1 = vld [vmem:[#allocation3 + $0x18] sm:$0xff] }
 0x30a   : > { %v4542_v19 = vmul.f32 %v10241_v45, %v4538_v34  ;;  %v4489_v26 = vadd.f32 %v10194_v21, %v4438_v32  ;;  %v4702_v32 = vadd.f32 %v10209_v56, %v10196_v6 }
 0x30c   : > { %v4546_v55 = vadd.f32 %v10254_v48, %v4542_v19 }
 0x30d   : > { %v10275_v17 = vpop.f32.mrf.mxu3 }
 0x30e   : > { %v10244_v44 = vpop.f32.mrf.mxu2  ;;  %v4550_v18 = vmax.f32 %v4546_v55, 0.0 }
 0x30f   : > { %v4532_v37 = vpop.f32.mrf.mxu0 }
 0x310   : > { %v4539_v3 = vadd.f32 %v4532_v37, %v4488_v43  ;;  %v10250_v25 = vpop.f32.mrf.mxu1  ;;  %v5507_v43 = vld [vmem:[#allocation3 + $0x10] sm:$0xff] }
 0x311   : > { %v5514_v54 = vpack.c.bf16 %v5508_v1, %v5507_v43 }
 0x312   : > { %v4543_v9 = vmul.f32 %v10241_v45, %v4539_v3  ;;  %7366 = vmatmul.msk.bf16.gmra.mxu0 %vm482_vm0, %v5335_v8  ;;  %v10297_v3 = vld [vmem:[#allocation3 + $0x22] sm:$0xff] }
 0x313   : > { %7443 = vmatmul.msk.bf16.vlgmr.msrb.gmra.mxu1 %vm516_vm4, %v5683_v30  ;;  %7463 = vmatmul.msk.bf16.vlgmr.msra.gmra.mxu2 %vm516_vm4, %v5776_v61 }
 0x314   : > { %v4547_v5 = vadd.f32 %v10254_v48, %v4543_v9 }
 0x315   : > { %v4896_v33 = vpop.f32.mrf.mxu3 }
 0x316   : > { %v4551_v20 = vmax.f32 %v4547_v5, 0.0  ;;  %v10266_v46 = vpop.f32.mrf.mxu2 }
 0x317   : > { %v4534_v0 = vpop.f32.mrf.mxu0 }
 0x318   : > { %v4553_v11 = vmax.f32 %v4549_v51, %v4551_v20  ;;  %v4540_v16 = vadd.f32 %v4534_v0, %v4489_v26  ;;  %v10269_v50 = vpop.f32.mrf.mxu1  ;;  %v4648_v20 = vadd.f32 %v10207_v53, %v10200_v2  ;;  %v4651_v26 = vadd.f32 %v10229_v24, %v10215_v23 }
 0x319   : > { %v4653_v53 = vadd.f32 %v10244_v44, %v10234_v40 }
 0x31a   : > { %v4544_v38 = vmul.f32 %v10241_v45, %v4540_v16  ;;  %4555 = vst.msk [vmem:[#allocation5] sm:$0xff] %vm516_vm4, %v4553_v11  ;;  %v4704_v6 = vadd.f32 %v10260_v31, %v4651_v26 }
 0x31b   : > { %v4705_v31 = vadd.f32 %v10275_v17, %v4653_v53 }
 0x31c   : > { %v4548_v57 = vadd.f32 %v10254_v48, %v4544_v38  ;;  %v5509_v38 = vld [vmem:[#allocation3 + $0x20] sm:$0xff] }
 0x31d   : > { %v4898_v37 = vpop.f32.mrf.mxu3 }
 0x31e   : > { %v4552_v59 = vmax.f32 %v4548_v57, 0.0  ;;  %v10277_v21 = vpop.f32.mrf.mxu2  ;;  %v4703_v57 = vadd.f32 %v10236_v58, %v4648_v20 }
 0x31f   : > { %v4743_v42 = vpop.f32.mrf.mxu0 }
 0x320   : > { %v4554_v47 = vmax.f32 %v4550_v18, %v4552_v59  ;;  %v4799_v15 = vpop.f32.mrf.mxu1  ;;  %v4753_v51 = vadd.f32 %v4743_v42, %v4702_v32 }
 0x322   : > { %7423 = vmatmul.msk.bf16.vlgmr.msra.gmra.mxu0 %vm516_vm4, %v5513_v29  ;;  %4556 = vst.msk [vmem:[#allocation5 + $0x8] sm:$0xff] %vm516_vm4, %v4554_v47  ;;  %v4804_v11 = vadd.f32 %v10250_v25, %v4753_v51 }
 0x323   : > { %7444 = vmatmul.msk.bf16.gmra.mxu1 %vm516_vm4, %v10285_v62  ;;  %7464 = vmatmul.msk.bf16.gmra.mxu2 %vm516_vm4, %v5777_v27 }
 0x324   : > { %v4855_v2 = vadd.f32 %v10266_v46, %v4804_v11 }
 0x325   : > { %v4901_v19 = vpop.f32.mrf.mxu3 }
 0x326   : > { %v4850_v22 = vpop.f32.mrf.mxu2  ;;  %v4906_v59 = vadd.f32 %v4896_v33, %v4855_v2 }
 0x327   : > { %v4745_v63 = vpop.f32.mrf.mxu0 }
 0x328   : > { %v4801_v49 = vpop.f32.mrf.mxu1  ;;  %v4754_v10 = vadd.f32 %v4745_v63, %v4703_v57  ;;  %v7761_v57 = vld [vmem:[#allocation14 + $0xb0] sm:$0xff] }
 0x329   : > { %v4557_v35 = vld [vmem:[#allocation5] ss:$2 sm:$0x7f]  ;;  %v4558_v60 = vld [vmem:[#allocation5 + $0x1] ss:$2 sm:$0x7f] }
 0x32a   : > { %v4559_v14 = vmax.f32 %v4557_v35, %v4558_v60  ;;  %v4805_v24 = vadd.f32 %v10269_v50, %v4754_v10 }
 0x32c   : > { %4560 = vst.msk [vmem:[#allocation3 + $0x2e] sm:$0x7f] %vm2675_vm5, %v4559_v14  ;;  %v4856_v46 = vadd.f32 %v10277_v21, %v4805_v24 }
 0x32d   : > { %v4903_v23 = vpop.f32.mrf.mxu3 }
 0x32e   : > { %v4852_v41 = vpop.f32.mrf.mxu2  ;;  %v4907_v60 = vadd.f32 %v4898_v37, %v4856_v46 }
 0x32f   : > { %v4748_v7 = vpop.f32.mrf.mxu0 }
 0x330   : > { %v4998_v8 = vpop.f32.mrf.mxu1  ;;  %v4755_v18 = vadd.f32 %v4748_v7, %v4704_v6 }
 0x332   : > { %7424 = vmatmul.msk.bf16.gmra.mxu0 %vm516_vm4, %v5514_v54  ;;  %v4806_v25 = vadd.f32 %v4799_v15, %v4755_v18 }
 0x333   : > { %v10295_v52 = vld [vmem:[#allocation3 + $0x29] sm:$0xff] }
 0x334   : > { %v10299_v30 = vld [vmem:[#allocation3 + $0x2a] sm:$0xff]  ;;  %v5535_v61 = vpack.c.bf16 %v10295_v52, %v5771_v36  ;;  %v4857_v27 = vadd.f32 %v4850_v22, %v4806_v25 }
 0x335   : > { %v10304_v28 = vpack.c.bf16 %v10299_v30, %v10297_v3  ;;  %v5510_v0 = vld [vmem:[#allocation3 + $0x28] sm:$0xff]  ;;  %v5116_v50 = vpop.f32.mrf.mxu3 }
 0x336   : > { %v10306_v34 = vpop.f32.mrf.mxu2  ;;  %7405 = vmatmul.msk.bf16.gmra.mxu3 %vm516_vm4, %v5535_v61  ;;  %v5515_v13 = vpack.c.bf16 %v5510_v0, %v5509_v38  ;;  %v4908_v44 = vadd.f32 %v4901_v19, %v4857_v27  ;;  %v7760_v25 = vld [vmem:[#allocation14 + $0xa8] sm:$0xff]  ;;  %v7758_v27 = vld [vmem:[#allocation14 + $0x98] sm:$0xff] }
 0x337   : > { %7445 = vmatmul.msk.bf16.gmra.mxu1 %vm516_vm4, %v10304_v28  ;;  %v4750_v9 = vpop.f32.mrf.mxu0  ;;  %5921 = vmatpush.bf16.msra.mxu3 %v7758_v27  ;;  %v10361_v27 = vld [vmem:[#allocation3 + $0x1b] sm:$0xff] }
 0x338   : > { %v5000_v5 = vpop.f32.mrf.mxu1  ;;  %v4756_v29 = vadd.f32 %v4750_v9, %v4705_v31 }
 0x33a   : > { %v4807_v35 = vadd.f32 %v4801_v49, %v4756_v29 }
 0x33c   : > { %v4858_v17 = vadd.f32 %v4852_v41, %v4807_v35  ;;  %v7762_v41 = vld [vmem:[#allocation14 + $0xb8] sm:$0xff] }
 0x33d   : > { %v5118_v20 = vpop.f32.mrf.mxu3  ;;  %6014 = vmatpush.bf16.msrb.mxu0 %v7762_v41 }
 0x33e   : > { %v10318_v16 = vpop.f32.mrf.mxu2 }
 0x33f   : > { %v4947_v55 = vpop.f32.mrf.mxu0 }
 0x340   : > { %v5003_v56 = vpop.f32.mrf.mxu1  ;;  %v4957_v42 = vadd.f32 %v4947_v55, %v4906_v59  ;;  %v7759_v59 = vld [vmem:[#allocation14 + $0xa0] sm:$0xff] }
 0x341   : > { %6015 = vmatpush.bf16.msrb.mxu0 %v7761_v57 }
 0x342   : > { %7425 = vmatmul.msk.bf16.gmra.mxu0 %vm516_vm4, %v5515_v13  ;;  %v5008_v63 = vadd.f32 %v4998_v8, %v4957_v42  ;;  %v4909_v8 = vadd.f32 %v4903_v23, %v4858_v17 }
 0x344   : > { %v5012_v33 = vmul.f32 %v10241_v45, %v5008_v63 }
 0x345   : > { %v5121_v2 = vpop.f32.mrf.mxu3  ;;  %6016 = vmatpush.bf16.msrb.mxu0 %v7760_v25 }
 0x346   : > { %v10327_v36 = vpop.f32.mrf.mxu2  ;;  %v5016_v54 = vadd.f32 %v10254_v48, %v5012_v33 }
 0x347   : > { %v4949_v58 = vpop.f32.mrf.mxu0 }
 0x348   : > { %v5005_v47 = vpop.f32.mrf.mxu1  ;;  %v4958_v14 = vadd.f32 %v4949_v58, %v4907_v60  ;;  %v5020_v9 = vmax.f32 %v5016_v54, 0.0 }
 0x349   : > { %6017 = vmatpush.bf16.msrb.mxu0 %v7759_v59 }
 0x34a   : > { %v5009_v61 = vadd.f32 %v5000_v5, %v4958_v14 }
 0x34c   : > { %v5013_v32 = vmul.f32 %v10241_v45, %v5009_v61 }
 0x34e   : > { %v10331_v40 = vpop.f32.mrf.mxu2  ;;  %v5017_v11 = vadd.f32 %v10254_v48, %v5013_v32 }
 0x34f   : > { %v4952_v15 = vpop.f32.mrf.mxu0 }
 0x350   : > { %v4959_v1 = vadd.f32 %v4952_v15, %v4908_v44  ;;  %v5214_v43 = vpop.f32.mrf.mxu1  ;;  %v5021_v13 = vmax.f32 %v5017_v11, 0.0  ;;  %v5117_v15 = vadd.f32 %v5116_v50, %v10306_v34 }
 0x352   : > { %v5010_v7 = vadd.f32 %v5003_v56, %v4959_v1 }
 0x354   : > { %v5014_v21 = vmul.f32 %v10241_v45, %v5010_v7 }
 0x356   : > { %v5018_v22 = vadd.f32 %v10254_v48, %v5014_v21  ;;  %v5265_v49 = vpop.f32.mrf.mxu2 }
 0x357   : > { %v4954_v37 = vpop.f32.mrf.mxu0 }
 0x358   : > { %v5022_v51 = vmax.f32 %v5018_v22, 0.0  ;;  %v4960_v19 = vadd.f32 %v4954_v37, %v4909_v8  ;;  %v5216_v55 = vpop.f32.mrf.mxu1  ;;  %v5119_v22 = vadd.f32 %v5118_v20, %v10318_v16  ;;  %v5122_v37 = vadd.f32 %v5121_v2, %v10327_v36 }
 0x35a   : > { %v5024_v26 = vmax.f32 %v5020_v9, %v5022_v51  ;;  %v5011_v0 = vadd.f32 %v5005_v47, %v4960_v19  ;;  %v5123_v47 = vpop.f32.mrf.mxu3 }
 0x35b   : > { %v5124_v20 = vadd.f32 %v5123_v47, %v10331_v40 }
 0x35c   : > { %5026 = vst.msk [vmem:[#allocation5] sm:$0xff] %vm516_vm4, %v5024_v26  ;;  %v5015_v5 = vmul.f32 %v10241_v45, %v5011_v0  ;;  %v5954_v0 = vld [vmem:[#allocation3 + $0xb] sm:$0xff] }
 0x35e   : > { %v5019_v38 = vadd.f32 %v10254_v48, %v5015_v5  ;;  %v5267_v6 = vpop.f32.mrf.mxu2  ;;  %v7757_v5 = vld [vmem:[#allocation14 + $0x90] sm:$0xff] }
 0x35f   : > { %v5163_v56 = vpop.f32.mrf.mxu0  ;;  %5922 = vmatpush.bf16.msra.mxu3 %v7757_v5  ;;  %v7764_v5 = vld [vmem:[#allocation14 + $0xc8] sm:$0xff] }
 0x360   : > { %v5023_v10 = vmax.f32 %v5019_v38, 0.0  ;;  %v5219_v53 = vpop.f32.mrf.mxu1  ;;  %v5173_v17 = vadd.f32 %v5163_v56, %v5117_v15 }
 0x362   : > { %v5025_v18 = vmax.f32 %v5021_v13, %v5023_v10  ;;  %v5316_v1 = vpop.f32.mrf.mxu3  ;;  %v5224_v61 = vadd.f32 %v5214_v43, %v5173_v17 }
 0x364   : > { %5027 = vst.msk [vmem:[#allocation5 + $0x8] sm:$0xff] %vm516_vm4, %v5025_v18  ;;  %v5275_v50 = vadd.f32 %v5265_v49, %v5224_v61 }
 0x366   : > { %v5270_v24 = vpop.f32.mrf.mxu2  ;;  %v5326_v19 = vadd.f32 %v5316_v1, %v5275_v50  ;;  %v7770_v50 = vld [vmem:[#allocation14 + $0xf8] sm:$0xff] }
 0x367   : > { %v5165_v23 = vpop.f32.mrf.mxu0  ;;  %6200 = vmatpush.bf16.msrb.mxu2 %v7770_v50 }
 0x368   : > { %v5221_v46 = vpop.f32.mrf.mxu1  ;;  %v5174_v34 = vadd.f32 %v5165_v23, %v5119_v22 }
 0x36a   : > { %v5318_v9 = vpop.f32.mrf.mxu3  ;;  %v5225_v51 = vadd.f32 %v5216_v55, %v5174_v34  ;;  %v7756_v55 = vld [vmem:[#allocation14 + $0x88] sm:$0xff]  ;;  %v7766_v34 = vld [vmem:[#allocation14 + $0xd8] sm:$0xff] }
 0x36b   : > { %v5028_v58 = vld [vmem:[#allocation5] ss:$2 sm:$0x7f]  ;;  %v5029_v31 = vld [vmem:[#allocation5 + $0x1] ss:$2 sm:$0x7f]  ;;  %5923 = vmatpush.bf16.msra.mxu3 %v7756_v55  ;;  %6107 = vmatpush.bf16.msra.mxu1 %v7766_v34 }
 0x36c   : > { %v5030_v42 = vmax.f32 %v5028_v58, %v5029_v31  ;;  %v5276_v36 = vadd.f32 %v5267_v6, %v5225_v51 }
 0x36e   : > { %5031 = vst.msk [vmem:[#allocation3 + $0x37] sm:$0x7f] %vm2675_vm5, %v5030_v42  ;;  %v5272_v63 = vpop.f32.mrf.mxu2  ;;  %v5327_v10 = vadd.f32 %v5318_v9, %v5276_v36  ;;  %v5958_v36 = vld [vmem:[#allocation3 + $0x2b] sm:$0xff] }
 0x36f   : > { %v5168_v29 = vpop.f32.mrf.mxu0 }
 0x370   : > { %v5418_v54 = vpop.f32.mrf.mxu1  ;;  %v5175_v32 = vadd.f32 %v5168_v29, %v5122_v37  ;;  %v10359_v29 = vld [vmem:[#allocation3 + $0x23] sm:$0xff] }
 0x371   : > { %v7755_v37 = vld [vmem:[#allocation14 + $0x80] sm:$0xff] }
 0x372   : > { %v5226_v41 = vadd.f32 %v5219_v53, %v5175_v32  ;;  %v5321_v13 = vpop.f32.mrf.mxu3  ;;  %5924 = vmatpush.bf16.msra.mxu3 %v7755_v37 }
 0x374   : > { %v5277_v56 = vadd.f32 %v5270_v24, %v5226_v41  ;;  %v7769_v41 = vld [vmem:[#allocation14 + $0xf0] sm:$0xff] }
 0x375   : > { %v5511_v35 = vld [vmem:[#allocation3 + $0x30] sm:$0xff]  ;;  %v5512_v60 = vld [vmem:[#allocation3 + $0x38] sm:$0xff]  ;;  %6201 = vmatpush.bf16.msrb.mxu2 %v7769_v41 }
 0x376   : > { %v10344_v44 = vld [vmem:[#allocation3 + $0x31] sm:$0xff]  ;;  %v5516_v33 = vpack.c.bf16 %v5512_v60, %v5511_v35  ;;  %v5469_v21 = vpop.f32.mrf.mxu2  ;;  %v5328_v23 = vadd.f32 %v5321_v13, %v5277_v56 }
 0x377   : > { %v5778_v14 = vpack.c.bf16 %v10344_v44, %v10295_v52  ;;  %v5170_v7 = vpop.f32.mrf.mxu0  ;;  %v10353_v52 = vld [vmem:[#allocation3 + $0x13] sm:$0xff] }
 0x378   : > { %7426 = vmatmul.msk.bf16.gmra.mxu0 %vm516_vm4, %v5516_v33  ;;  %v5420_v26 = vpop.f32.mrf.mxu1  ;;  %v5962_v43 = vpack.c.bf16 %v10353_v52, %v5954_v0  ;;  %v5176_v49 = vadd.f32 %v5170_v7, %v5124_v20  ;;  %v7765_v0 = vld [vmem:[#allocation14 + $0xd0] sm:$0xff] }
 0x379   : > { %7465 = vmatmul.msk.bf16.gmra.mxu2 %vm516_vm4, %v5778_v14  ;;  %6108 = vmatpush.bf16.msra.mxu1 %v7765_v0 }
 0x37a   : > { %v5227_v18 = vadd.f32 %v5221_v46, %v5176_v49  ;;  %v5323_v35 = vpop.f32.mrf.mxu3  ;;  %v5963_v46 = vpack.c.bf16 %v10359_v29, %v10361_v27 }
 0x37c   : > { %v5278_v47 = vadd.f32 %v5272_v63, %v5227_v18 }
 0x37d   : > { %6109 = vmatpush.bf16.msra.mxu1 %v7764_v5 }
 0x37e   : > { %v5471_v38 = vpop.f32.mrf.mxu2  ;;  %v5329_v14 = vadd.f32 %v5323_v35, %v5278_v47  ;;  %v7772_v47 = vld [vmem:[#allocation14 + $0x108] sm:$0xff]  ;;  %v6149_v35 = vpack.c.bf16 %v5958_v36, %v10359_v29 }
 0x37f   : > { %v5367_v8 = vpop.f32.mrf.mxu0 }
 0x380   : > { %v5377_v11 = vadd.f32 %v5367_v8, %v5326_v19  ;;  %v5423_v25 = vpop.f32.mrf.mxu1 }
 0x382   : > { %v5428_v57 = vadd.f32 %v5418_v54, %v5377_v11 }
 0x384   : > { %v5479_v2 = vadd.f32 %v5469_v21, %v5428_v57  ;;  %v7774_v57 = vld [vmem:[#allocation14 + $0x118] sm:$0xff] }
 0x385   : > { %6293 = vmatpush.bf16.msrb.mxu3 %v7774_v57 }
 0x386   : > { %v5474_v31 = vpop.f32.mrf.mxu2  ;;  %v5483_v40 = vmul.f32 %v10241_v45, %v5479_v2 }
 0x387   : > { %v5369_v16 = vpop.f32.mrf.mxu0 }
 0x388   : > { %7503 = vmatmul.msk.bf16.vlgmr.msrb.gmra.mxu0 %vm516_vm4, %v5962_v43  ;;  %v5378_v53 = vadd.f32 %v5369_v16, %v5327_v10  ;;  %v5487_v60 = vadd.f32 %v10254_v48, %v5483_v40  ;;  %v5425_v63 = vpop.f32.mrf.mxu1  ;;  %v5959_v16 = vld [vmem:[#allocation3 + $0x33] sm:$0xff] }
 0x389   : > { %v5964_v49 = vpack.c.bf16 %v5959_v16, %v5958_v36  ;;  %v5681_v10 = vld [vmem:[#allocation3 + $0x32] sm:$0xff] }
 0x38a   : > { %v5429_v6 = vadd.f32 %v5420_v26, %v5378_v53  ;;  %v5491_v54 = vmax.f32 %v5487_v60, 0.0  ;;  %v6233_v60 = vld [vmem:[#allocation3 + $0x14] sm:$0xff] }
 0x38c   : > { %v5480_v15 = vadd.f32 %v5471_v38, %v5429_v6  ;;  %v7768_v38 = vld [vmem:[#allocation14 + $0xe8] sm:$0xff]  ;;  %v7773_v6 = vld [vmem:[#allocation14 + $0x110] sm:$0xff] }
 0x38d   : > { %6202 = vmatpush.bf16.msrb.mxu2 %v7768_v38  ;;  %6294 = vmatpush.bf16.msrb.mxu3 %v7773_v6 }
 0x38e   : > { %v5484_v61 = vmul.f32 %v10241_v45, %v5480_v15  ;;  %v5476_v8 = vpop.f32.mrf.mxu2 }
 0x38f   : > { %v5372_v59 = vpop.f32.mrf.mxu0 }
 0x390   : > { %v5379_v58 = vadd.f32 %v5372_v59, %v5328_v23  ;;  %v5488_v51 = vadd.f32 %v10254_v48, %v5484_v61  ;;  %v6237_v61 = vld [vmem:[#allocation3 + $0x34] sm:$0xff]  ;;  %v5740_v37 = vpop.f32.mrf.mxu1 }
 0x391   : > { %6295 = vmatpush.bf16.msrb.mxu3 %v7772_v47 }
 0x392   : > { %v5430_v42 = vadd.f32 %v5423_v25, %v5379_v58  ;;  %v5492_v11 = vmax.f32 %v5488_v51, 0.0  ;;  %v6240_v51 = vld [vmem:[#allocation3 + $0x4c] sm:$0xff] }
 0x394   : > { %v5481_v24 = vadd.f32 %v5474_v31, %v5430_v42  ;;  %v5869_v42 = vpack.c.bf16 %v10281_v12, %v10247_v39  ;;  %v7771_v39 = vld [vmem:[#allocation14 + $0x100] sm:$0xff]  ;;  %v5871_v12 = vpack.c.bf16 %v5681_v10, %v10299_v30  ;;  %v5590_v30 = vpop.f32.mrf.mxu3 }
 0x395   : > { %6296 = vmatpush.bf16.msrb.mxu3 %v7771_v39 }
 0x396   : > { %v5485_v33 = vmul.f32 %v10241_v45, %v5481_v24  ;;  %v5870_v24 = vpack.c.bf16 %v10297_v3, %v10279_v4  ;;  %v6054_v3 = vld [vmem:[#allocation3 + $0x4a] sm:$0xff]  ;;  %v5833_v34 = vpop.f32.mrf.mxu2 }
 0x397   : > { %v5374_v1 = vpop.f32.mrf.mxu0 }
 0x398   : > { %v5489_v7 = vadd.f32 %v10254_v48, %v5485_v33  ;;  %v5380_v17 = vadd.f32 %v5374_v1, %v5329_v14  ;;  %7504 = vmatmul.msk.bf16.gmra.mxu0 %vm516_vm4, %v5963_v46  ;;  %v6236_v14 = vld [vmem:[#allocation3 + $0x2c] sm:$0xff]  ;;  %v6235_v1 = vld [vmem:[#allocation3 + $0x24] sm:$0xff] }
 0x39a   : > { %v5493_v21 = vmax.f32 %v5489_v7, 0.0  ;;  %v5431_v22 = vadd.f32 %v5425_v63, %v5380_v17  ;;  %v6242_v7 = vpack.c.bf16 %v6236_v14, %v6235_v1 }
 0x39c   : > { %v5495_v9 = vmax.f32 %v5491_v54, %v5493_v21  ;;  %v5482_v32 = vadd.f32 %v5476_v8, %v5431_v22  ;;  %v5592_v33 = vpop.f32.mrf.mxu3 }
 0x39e   : > { %5497 = vst.msk [vmem:[#allocation5] sm:$0xff] %vm516_vm4, %v5495_v9  ;;  %v5486_v19 = vmul.f32 %v10241_v45, %v5482_v32  ;;  %v7763_v45 = vld [vmem:[#allocation14 + $0xc0] sm:$0xff]  ;;  %v5835_v0 = vpop.f32.mrf.mxu2 }
 0x39f   : > { %6110 = vmatpush.bf16.msra.mxu1 %v7763_v45  ;;  %v5655_v22 = vpop.f32.mrf.mxu0 }
 0x3a0   : > { %v5490_v26 = vadd.f32 %v10254_v48, %v5486_v19  ;;  %v7767_v48 = vld [vmem:[#allocation14 + $0xe0] sm:$0xff]  ;;  %v5742_v19 = vpop.f32.mrf.mxu1 }
 0x3a1   : > { %6203 = vmatpush.bf16.msrb.mxu2 %v7767_v48 }
 0x3a2   : > { %v5494_v43 = vmax.f32 %v5490_v26, 0.0 }
 0x3a4   : > { %v5496_v20 = vmax.f32 %v5492_v11, %v5494_v43  ;;  %v5595_v17 = vpop.f32.mrf.mxu3 }
 0x3a6   : > { %5498 = vst.msk [vmem:[#allocation5 + $0x8] sm:$0xff] %vm516_vm4, %v5496_v20  ;;  %v5838_v5 = vpop.f32.mrf.mxu2 }
 0x3a7   : > { %v5657_v50 = vpop.f32.mrf.mxu0 }
 0x3a8   : > { %7505 = vmatmul.msk.bf16.gmra.mxu0 %vm516_vm4, %v5964_v49  ;;  %v5745_v43 = vpop.f32.mrf.mxu1 }
 0x3ac   : > { %v10406_v63 = vpop.f32.mrf.mxu3 }
 0x3ad   : > { %v5499_v56 = vld [vmem:[#allocation5] ss:$2 sm:$0x7f]  ;;  %v5500_v55 = vld [vmem:[#allocation5 + $0x1] ss:$2 sm:$0x7f] }
 0x3ae   : > { %v5501_v13 = vmax.f32 %v5499_v56, %v5500_v55  ;;  %v5840_v49 = vpop.f32.mrf.mxu2 }
 0x3af   : > { %v5660_v41 = vpop.f32.mrf.mxu0 }
 0x3b0   : > { %5502 = vst.msk [vmem:[#allocation3 + $0x40] sm:$0x7f] %vm2675_vm5, %v5501_v13  ;;  %v5747_v20 = vpop.f32.mrf.mxu1 }
 0x3b7   : > { %v5532_v18 = vld [vmem:[#allocation3 + $0x39] sm:$0xff]  ;;  %v5775_v53 = vld [vmem:[#allocation3 + $0x41] sm:$0xff] }
 0x3b8   : > { %v5682_v2 = vld [vmem:[#allocation3 + $0x3a] sm:$0xff]  ;;  %v5536_v23 = vpack.c.bf16 %v5532_v18, %v10344_v44  ;;  %v5779_v59 = vpack.c.bf16 %v5775_v53, %v5532_v18  ;;  %v5961_v31 = vld [vmem:[#allocation3 + $0x43] sm:$0xff]  ;;  %v6148_v44 = vpack.c.bf16 %v10361_v27, %v10353_v52  ;;  %v6147_v52 = vld [vmem:[#allocation3 + $0x4b] sm:$0xff]  ;;  %v10420_v48 = vpop.f32.mrf.mxu1 }
 0x3b9   : > { %v5686_v25 = vpack.c.bf16 %v5682_v2, %v5681_v10  ;;  %v5960_v58 = vld [vmem:[#allocation3 + $0x3b] sm:$0xff]  ;;  %v6151_v46 = vpack.c.bf16 %v6147_v52, %v5961_v31  ;;  %v10409_v8 = vpop.f32.mrf.mxu3  ;;  %v6239_v32 = vld [vmem:[#allocation3 + $0x44] sm:$0xff] }
 0x3ba   : > { %v5965_v40 = vpack.c.bf16 %v5961_v31, %v5960_v58  ;;  %7406 = vmatmul.msk.bf16.gmra.mxu3 %vm516_vm4, %v5536_v23  ;;  %7466 = vmatmul.msk.bf16.gmra.mxu2 %vm516_vm4, %v5779_v59  ;;  %v5868_v4 = vld [vmem:[#allocation3 + $0x42] sm:$0xff]  ;;  %v6244_v26 = vpack.c.bf16 %v6240_v51, %v6239_v32 }
 0x3bb   : > { %7446 = vmatmul.msk.bf16.gmra.mxu1 %vm516_vm4, %v5686_v25  ;;  %v5872_v29 = vpack.c.bf16 %v5868_v4, %v5682_v2  ;;  %v6058_v27 = vpack.c.bf16 %v6054_v3, %v5868_v4  ;;  %v6238_v54 = vld [vmem:[#allocation3 + $0x3c] sm:$0xff] }
 0x3bc   : > { %7506 = vmatmul.msk.bf16.gmra.mxu0 %vm516_vm4, %v5965_v40  ;;  %v6243_v21 = vpack.c.bf16 %v6238_v54, %v6237_v61  ;;  %v10453_v32 = vld [vmem:[#allocation17] ss:$0 sm:$0xff] }
 0x3c0   : > { %v10426_v13 = vpop.f32.mrf.mxu1 }
 0x3c1   : > { %v10411_v9 = vpop.f32.mrf.mxu3 }
 0x3ca   : > { %7483 = vmatmul.msk.bf16.vlgmr.msra.gmra.mxu3 %vm516_vm4, %v5869_v42  ;;  %7543 = vmatmul.msk.bf16.vlgmr.msrb.gmra.mxu2 %vm516_vm4, %v6148_v44  ;;  %v5656_v42 = vadd.f32 %v5655_v22, %v5590_v30 }
 0x3cb   : > { %7523 = vmatmul.msk.bf16.vlgmr.msra.gmra.mxu1 %vm516_vm4, %v10285_v62  ;;  %v6150_v62 = vpack.c.bf16 %v5960_v58, %v5959_v16  ;;  %v5662_v16 = vpop.f32.mrf.mxu0 }
 0x3d3   : > { %v10418_v45 = vpop.f32.mrf.mxu0 }
 0x3da   : > { %7484 = vmatmul.msk.bf16.gmra.mxu3 %vm516_vm4, %v5870_v24  ;;  %7544 = vmatmul.msk.bf16.gmra.mxu2 %vm516_vm4, %v6149_v35  ;;  %v5760_v24 = vadd.f32 %v5740_v37, %v5656_v42  ;;  %v5663_v37 = vadd.f32 %v5662_v16, %v10406_v63 }
 0x3db   : > { %7524 = vmatmul.msk.bf16.gmra.mxu1 %vm516_vm4, %v10304_v28  ;;  %v6234_v28 = vld [vmem:[#allocation3 + $0x1c] sm:$0xff]  ;;  %v10424_v55 = vpop.f32.mrf.mxu0 }
 0x3dc   : > { %v6241_v15 = vpack.c.bf16 %v6234_v28, %v6233_v60  ;;  %v5661_v28 = vadd.f32 %v5660_v41, %v5595_v17 }
 0x3de   : > { %v5762_v1 = vadd.f32 %v5745_v43, %v5661_v28 }
 0x3ea   : > { %7485 = vmatmul.msk.bf16.gmra.mxu3 %vm516_vm4, %v5871_v12  ;;  %7545 = vmatmul.msk.bf16.gmra.mxu2 %vm516_vm4, %v6150_v62  ;;  %v5658_v12 = vadd.f32 %v5657_v50, %v5592_v33  ;;  %v5853_v62 = vadd.f32 %v5833_v34, %v5760_v24  ;;  %v5855_v34 = vadd.f32 %v5838_v5, %v5762_v1 }
 0x3eb   : > { %7525 = vmatmul.msk.bf16.gmra.mxu1 %vm516_vm4, %v5686_v25 }
 0x3ec   : > { %v5761_v52 = vadd.f32 %v5742_v19, %v5658_v12 }
 0x3ee   : > { %v5854_v60 = vadd.f32 %v5835_v0, %v5761_v52  ;;  %v5763_v0 = vadd.f32 %v5747_v20, %v5663_v37  ;;  %v5666_v20 = vadd.f32 %v10418_v45, %v10409_v8  ;;  %v5668_v8 = vadd.f32 %v10424_v55, %v10411_v9 }
 0x3f5   : > { %v10430_v2 = vpop.f32.mrf.mxu0 }
 0x3fa   : > { %7486 = vmatmul.msk.bf16.gmra.mxu3 %vm516_vm4, %v5872_v29  ;;  %7546 = vmatmul.msk.bf16.gmra.mxu2 %vm516_vm4, %v6151_v46 }
 0x3fb   : > { %7526 = vmatmul.msk.bf16.gmra.mxu1 %vm516_vm4, %v6058_v27 }
 0x3fc   : > { %v10422_v56 = vpop.f32.mrf.mxu2 }
 0x3fd   : > { %v10436_v59 = vpop.f32.mrf.mxu0 }
 0x404   : > { %v10428_v18 = vpop.f32.mrf.mxu2 }
 0x405   : > { %v6019_v44 = vpop.f32.mrf.mxu0 }
 0x40a   : > { %7563 = vmatmul.msk.bf16.vlgmr.msrb.gmra.mxu3 %vm516_vm4, %v6241_v15 }
 0x40d   : > { %v6021_v3 = vpop.f32.mrf.mxu0 }
 0x41a   : > { %7564 = vmatmul.msk.bf16.gmra.mxu3 %vm516_vm4, %v6242_v7  ;;  %v6024_v7 = vpop.f32.mrf.mxu0 }
 0x422   : > { %v6026_v16 = vpop.f32.mrf.mxu0 }
 0x42a   : > { %7565 = vmatmul.msk.bf16.gmra.mxu3 %vm516_vm4, %v6243_v21  ;;  %v10450_v21 = vld [vmem:[#allocation16] ss:$0 sm:$0xff]  ;;  %v6029_v28 = vpop.f32.mrf.mxu0 }
 0x438   : > { %v10432_v53 = vpop.f32.mrf.mxu1 }
 0x43a   : > { %7566 = vmatmul.msk.bf16.gmra.mxu3 %vm516_vm4, %v6244_v26 }
 0x43d   : > { %v10414_v11 = vpop.f32.mrf.mxu3  ;;  %v10434_v25 = vpop.f32.mrf.mxu2 }
 0x43e   : > { %v5671_v9 = vadd.f32 %v10430_v2, %v10414_v11 }
 0x440   : > { %v10440_v31 = vpop.f32.mrf.mxu1  ;;  %v5766_v37 = vadd.f32 %v10432_v53, %v5671_v9 }
 0x442   : > { %v5859_v11 = vadd.f32 %v10434_v25, %v5766_v37 }
 0x445   : > { %v10416_v38 = vpop.f32.mrf.mxu3  ;;  %v10442_v40 = vpop.f32.mrf.mxu2 }
 0x446   : > { %v5673_v2 = vadd.f32 %v10436_v59, %v10416_v38 }
 0x448   : > { %v6112_v47 = vpop.f32.mrf.mxu1 }
 0x44d   : > { %v5926_v36 = vpop.f32.mrf.mxu3  ;;  %v6205_v35 = vpop.f32.mrf.mxu2 }
 0x44e   : > { %v5946_v4 = vadd.f32 %v5926_v36, %v5853_v62  ;;  %v5764_v62 = vadd.f32 %v10420_v48, %v5666_v20 }
 0x450   : > { %v6114_v29 = vpop.f32.mrf.mxu1  ;;  %v6039_v27 = vadd.f32 %v6019_v44, %v5946_v4 }
 0x452   : > { %v6132_v30 = vadd.f32 %v6112_v47, %v6039_v27 }
 0x454   : > { %v6225_v54 = vadd.f32 %v6205_v35, %v6132_v30  ;;  %v5765_v30 = vadd.f32 %v10426_v13, %v5668_v8  ;;  %v6031_v13 = vpop.f32.mrf.mxu0 }
 0x455   : > { %v5928_v57 = vpop.f32.mrf.mxu3  ;;  %v6207_v15 = vpop.f32.mrf.mxu2 }
 0x456   : > { %v5947_v14 = vadd.f32 %v5928_v57, %v5854_v60  ;;  %v5856_v57 = vadd.f32 %v5840_v49, %v5763_v0 }
 0x458   : > { %v6040_v61 = vadd.f32 %v6021_v3, %v5947_v14  ;;  %v6117_v33 = vpop.f32.mrf.mxu1 }
 0x45a   : > { %v6133_v17 = vadd.f32 %v6114_v29, %v6040_v61  ;;  %v5857_v29 = vadd.f32 %v10422_v56, %v5764_v62  ;;  %v5858_v61 = vadd.f32 %v10428_v18, %v5765_v30 }
 0x45c   : > { %v6226_v63 = vadd.f32 %v6207_v15, %v6133_v17 }
 0x45d   : > { %v5931_v10 = vpop.f32.mrf.mxu3  ;;  %v6210_v26 = vpop.f32.mrf.mxu2 }
 0x45e   : > { %v5948_v51 = vadd.f32 %v5931_v10, %v5855_v34 }
 0x460   : > { %v6041_v43 = vadd.f32 %v6024_v7, %v5948_v51  ;;  %v6119_v42 = vpop.f32.mrf.mxu1 }
 0x462   : > { %v6134_v44 = vadd.f32 %v6117_v33, %v6041_v43  ;;  %v5767_v43 = vadd.f32 %v10440_v31, %v5673_v2 }
 0x464   : > { %v6227_v4 = vadd.f32 %v6210_v26, %v6134_v44 }
 0x465   : > { %v5933_v23 = vpop.f32.mrf.mxu3  ;;  %v6212_v12 = vpop.f32.mrf.mxu2 }
 0x466   : > { %v5949_v47 = vadd.f32 %v5933_v23, %v5856_v57  ;;  %v5860_v57 = vadd.f32 %v10442_v40, %v5767_v43 }
 0x468   : > { %v6042_v3 = vadd.f32 %v6026_v16, %v5949_v47  ;;  %v6122_v15 = vpop.f32.mrf.mxu1 }
 0x46a   : > { %v6135_v45 = vadd.f32 %v6119_v42, %v6042_v3 }
 0x46c   : > { %v6228_v14 = vadd.f32 %v6212_v12, %v6135_v45 }
 0x46d   : > { %v10438_v58 = vpop.f32.mrf.mxu3  ;;  %v6215_v7 = vpop.f32.mrf.mxu2 }
 0x46e   : > { %v5950_v23 = vadd.f32 %v10438_v58, %v5857_v29 }
 0x470   : > { %v6043_v1 = vadd.f32 %v6029_v28, %v5950_v23 }
 0x472   : > { %v6136_v58 = vadd.f32 %v6122_v15, %v6043_v1 }
 0x474   : > { %v6229_v17 = vadd.f32 %v6215_v7, %v6136_v58 }
 0x475   : > { %v10444_v6 = vpop.f32.mrf.mxu3  ;;  %v6217_v26 = vpop.f32.mrf.mxu2 }
 0x476   : > { %v5951_v33 = vadd.f32 %v10444_v6, %v5858_v61 }
 0x478   : > { %v6044_v18 = vadd.f32 %v6031_v13, %v5951_v33 }
 0x47d   : > { %v10446_v39 = vpop.f32.mrf.mxu3  ;;  %v6220_v31 = vpop.f32.mrf.mxu2 }
 0x47e   : > { %v5952_v53 = vadd.f32 %v10446_v39, %v5859_v11 }
 0x485   : > { %v10448_v46 = vpop.f32.mrf.mxu3 }
 0x486   : > { %v5953_v42 = vadd.f32 %v10448_v46, %v5860_v57 }
 0x48d   : > { %v6298_v22 = vpop.f32.mrf.mxu3 }
 0x48e   : > { %v6318_v50 = vadd.f32 %v6298_v22, %v6225_v54 }
 0x490   : > { %v6329_v19 = vmul.f32 %v10450_v21, %v6318_v50  ;;  %v6124_v50 = vpop.f32.mrf.mxu1 }
 0x491   : > { %v6137_v0 = vadd.f32 %v6124_v50, %v6044_v18 }
 0x492   : > { %v6340_v41 = vadd.f32 %v10453_v32, %v6329_v19 }
 0x493   : > { %v6230_v25 = vadd.f32 %v6217_v26, %v6137_v0 }
 0x494   : > { %v6348_v5 = vmax.f32 %v6340_v41, 0.0 }
 0x495   : > { %v6300_v36 = vpop.f32.mrf.mxu3 }
 0x496   : > { %6356 = vst [vmem:[%s10461_s14] sm:$0x7f] %v6348_v5  ;;  %v6319_v10 = vadd.f32 %v6300_v36, %v6226_v63  ;;  %v6034_v63 = vpop.f32.mrf.mxu0 }
 0x497   : > { %v6045_v16 = vadd.f32 %v6034_v63, %v5952_v53 }
 0x498   : > { %v6330_v24 = vmul.f32 %v10450_v21, %v6319_v10  ;;  %v6127_v38 = vpop.f32.mrf.mxu1 }
 0x499   : > { %v6138_v39 = vadd.f32 %v6127_v38, %v6045_v16 }
 0x49a   : > { %v6341_v35 = vadd.f32 %v10453_v32, %v6330_v24 }
 0x49b   : > { %v6231_v24 = vadd.f32 %v6220_v31, %v6138_v39 }
 0x49c   : > { %v6349_v52 = vmax.f32 %v6341_v35, 0.0 }
 0x49d   : > { %v6303_v49 = vpop.f32.mrf.mxu3 }
 0x49e   : > { %6357 = vst [vmem:[%s10461_s14 + $0x6] sm:$0xfe] %v6349_v52  ;;  %v6320_v27 = vadd.f32 %v6303_v49, %v6227_v4  ;;  %v6036_v47 = vpop.f32.mrf.mxu0  ;;  %v6222_v49 = vpop.f32.mrf.mxu2 }
 0x49f   : > { %v6046_v35 = vadd.f32 %v6036_v47, %v5953_v42 }
 0x4a0   : > { %v6331_v60 = vmul.f32 %v10450_v21, %v6320_v27  ;;  %v6129_v4 = vpop.f32.mrf.mxu1 }
 0x4a1   : > { %v6139_v3 = vadd.f32 %v6129_v4, %v6046_v35 }
 0x4a2   : > { %v6342_v48 = vadd.f32 %v10453_v32, %v6331_v60 }
 0x4a3   : > { %v6232_v29 = vadd.f32 %v6222_v49, %v6139_v3 }
 0x4a4   : > { %v6350_v56 = vmax.f32 %v6342_v48, 0.0 }
 0x4a5   : > { %v6305_v54 = vpop.f32.mrf.mxu3 }
 0x4a6   : > { %6358 = vst [vmem:[%s10461_s14 + $0xc] sm:$0xfc] %v6350_v56  ;;  %v6321_v55 = vadd.f32 %v6305_v54, %v6228_v14 }
 0x4a8   : > { %v6332_v22 = vmul.f32 %v10450_v21, %v6321_v55 }
 0x4aa   : > { %v6343_v34 = vadd.f32 %v10453_v32, %v6332_v22 }
 0x4ac   : > { %v6351_v51 = vmax.f32 %v6343_v34, 0.0 }
 0x4ad   : > { %v6308_v19 = vpop.f32.mrf.mxu3 }
 0x4ae   : > { %6359 = vst [vmem:[%s10461_s14 + $0x14] sm:$0x1] %v6351_v51  ;;  %v6322_v6 = vadd.f32 %v6308_v19, %v6229_v17 }
 0x4af   : > { %6360 = vst [vmem:[%s10461_s14 + $0x12] sm:$0xf8] %v6351_v51 }
 0x4b0   : > { %v6333_v41 = vmul.f32 %v10450_v21, %v6322_v6 }
 0x4b2   : > { %v6344_v5 = vadd.f32 %v10453_v32, %v6333_v41 }
 0x4b4   : > { %v6352_v36 = vmax.f32 %v6344_v5, 0.0 }
 0x4b5   : > { %v6310_v59 = vpop.f32.mrf.mxu3 }
 0x4b6   : > { %6361 = vst [vmem:[%s10461_s14 + $0x1a] sm:$0x3] %v6352_v36  ;;  %v6323_v10 = vadd.f32 %v6310_v59, %v6230_v25 }
 0x4b7   : > { %6362 = vst [vmem:[%s10461_s14 + $0x18] sm:$0xf0] %v6352_v36 }
 0x4b8   : > { %v6334_v20 = vmul.f32 %v10450_v21, %v6323_v10 }
 0x4ba   : > { %v6345_v44 = vadd.f32 %v10453_v32, %v6334_v20 }
 0x4bc   : > { %v6353_v12 = vmax.f32 %v6345_v44, 0.0 }
 0x4bd   : > { %v6313_v62 = vpop.f32.mrf.mxu3 }
 0x4be   : > { %6363 = vst [vmem:[%s10461_s14 + $0x20] sm:$0x7] %v6353_v12  ;;  %v6324_v40 = vadd.f32 %v6313_v62, %v6231_v24 }
 0x4bf   : > { %6364 = vst [vmem:[%s10461_s14 + $0x1e] sm:$0xe0] %v6353_v12 }
 0x4c0   : > { %v6335_v46 = vmul.f32 %v10450_v21, %v6324_v40 }
 0x4c2   : > { %v6346_v52 = vadd.f32 %v10453_v32, %v6335_v46 }
 0x4c4   : > { %v6354_v27 = vmax.f32 %v6346_v52, 0.0 }
 0x4c5   : > { %v6315_v28 = vpop.f32.mrf.mxu3 }
 0x4c6   : > { %6365 = vst [vmem:[%s10461_s14 + $0x26] sm:$0xf] %v6354_v27  ;;  %v6325_v8 = vadd.f32 %v6315_v28, %v6232_v29 }
 0x4c7   : > { %6366 = vst [vmem:[%s10461_s14 + $0x24] sm:$0xc0] %v6354_v27 }
 0x4c8   : > { %v6336_v45 = vmul.f32 %v10450_v21, %v6325_v8 }
 0x4ca   : > { %v6347_v23 = vadd.f32 %v10453_v32, %v6336_v45 }
 0x4cc   : > { %v6355_v60 = vmax.f32 %v6347_v23, 0.0 }
 0x4ce   : > { %6367 = vst [vmem:[%s10461_s14 + $0x2c] sm:$0x1f] %v6355_v60 }
 0x4cf PF: > { %s25_s13 = sadd.s32 1, %s8147_s13  }
 0x4d0   : > { %p22_p7 = scmp.ge.s32.totalorder %s25_s13, 4  }
 0x4d2   :  { %24 = sbr.rel (!%p22_p7) target bundleno = 5 (0x5), region = 127 }
 0x4d7   :  { %6389 = vsyncpa [#allocation7], 1 }
 0x4d8   :  { %6391 = vsyncpa [#allocation7 + $0x1], 1 }
 0x4d9   :  { %6392 = vsyncpa [#allocation9], 1 }
 0x4da   :  { %6393 = vsyncpa [#allocation12], 1 }
 0x4db   :  { %6394 = vsyncpa [#allocation15], 1 }
 0x4dc   :  { %6395 = vsyncpa [#allocation18], 1 }

</bundles_post_ra>
